<compile_context>
chip_gen: v7x
topology: tpu7x:2x2x1
jax: 0.10.0
libtpu: 0.0.40
codegen_flags: <defaults>
</compile_context>

<pallas_src>
import numpy as np
import jax
import jax.numpy as jnp
from jax import lax
from jax.experimental import pallas as pl
from jax.experimental.pallas import tpu as pltpu

KSIZE = 7              # "depthwise_conv" kernel size (it is actually a full conv)
KTAPS = KSIZE + 1      # kb taps padded to 8 so each ka weight/patch slab is 8*C wide
PAD = 3                # conv spatial padding
LN_EPS = 1e-6


def _erf(x):
    # Abramowitz & Stegun 7.1.26 polynomial.  With the approximate (EUP)
    # reciprocal below the effective max abs error is ~1e-4 (vs ~1.5e-7 with an
    # exact reciprocal); the kernel's overall error budget is dominated by the
    # bf16 matmuls (~1e-2), so the cheap EUP path is kept.
    a1, a2, a3, a4, a5 = (0.254829592, -0.284496736, 1.421413741,
                          -1.453152027, 1.061405429)
    p = 0.3275911
    s = jnp.where(x >= 0.0, 1.0, -1.0)
    ax = jnp.abs(x)
    t = pl.reciprocal(1.0 + p * ax, approx=True)      # EUP slot (off the VALU)
    poly = ((((a5 * t + a4) * t + a3) * t + a2) * t + a1) * t
    return s * (1.0 - poly * jnp.exp(-ax * ax))


def _gelu_exact(x):
    # nn.GELU() default = exact (erf) formulation.
    return 0.5 * x * (1.0 + _erf(x * (1.0 / np.sqrt(2.0))))


def convnext_block_kernel(x1_ref, x2_ref, wim_ref, bdw_ref, lnw_ref, lnb_ref,
                          w1_ref, b1_ref, w2t_ref, b2g_ref,
                          out_ref, xpad_ref, acc_ref):
    """One batch image per grid step.

    x1_ref : (1, H, W, C)        spatially-transposed NHWC input (conv input)
    x2_ref : (1, C, H*W)         original NCHW input, flattened (residual)
    wim_ref: (7, 8C, C) bf16     per-ka conv weight slabs (kb padded to 8, 0s)
    w1_ref : (C, 4C) bf16        pointwise expand
    w2t_ref: (C, 4C) bf16        transposed pointwise contract, gama pre-folded
    b2g_ref: (C, 1)  f32         gama * conv2 bias
    out_ref: (1, C, H*W)         final module output, NCHW flattened (lane dense)
    xpad_ref: (H+6, W+6, C) bf16 VMEM scratch (zero-padded conv input)
    acc_ref : (H*W, C) f32       VMEM scratch (conv accumulator)
    """
    _, H, W, C = x1_ref.shape
    HW = H * W
    Hp = H + 2 * PAD
    Wp = W + 2 * PAD

    # ---- pad the conv input in VMEM: zero only the 3-wide halo, cast once ---
    xpad_ref[:PAD, :, :] = jnp.zeros((PAD, Wp, C), jnp.bfloat16)
    xpad_ref[PAD + H:, :, :] = jnp.zeros((Hp - PAD - H, Wp, C), jnp.bfloat16)
    xpad_ref[PAD:PAD + H, :PAD, :] = jnp.zeros((H, PAD, C), jnp.bfloat16)
    xpad_ref[PAD:PAD + H, PAD + W:, :] = jnp.zeros((H, Wp - PAD - W, C),
                                                   jnp.bfloat16)
    xpad_ref[PAD:PAD + H, PAD:PAD + W, :] = x1_ref[0].astype(jnp.bfloat16)

    # ---- 7x7 conv as 7 accumulating (HW, 8C) x (8C, C) MXU matmuls ----------
    # Conv bias folded into the accumulator init.
    acc_ref[...] = jnp.broadcast_to(bdw_ref[...], (HW, C))
    zero_tap = jnp.zeros((HW, C), jnp.bfloat16)

    def conv_row(ka, carry):
        # 7 kb-shifted slabs of the padded input (static lane-trivial reshape),
        # concatenated with one zero tap into a 128-lane-aligned K slab.
        pieces = []
        for kb in range(KSIZE):                       # static inner unroll
            pieces.append(
                xpad_ref[pl.ds(ka, H), kb:kb + W, :].reshape(HW, C))
        pieces.append(zero_tap)                       # pad tap (zero weights)
        grp = jnp.concatenate(pieces, axis=1)         # (HW, 8C) bf16, lane dense
        acc_ref[...] += jnp.dot(grp, wim_ref[ka],
                                preferred_element_type=jnp.float32)
        return carry

    lax.fori_loop(0, KSIZE, conv_row, None)

    # ---- LayerNorm over C ('last channel', eps=1e-6) ------------------------
    acc = acc_ref[...]                                # (HW, C) f32
    mean = jnp.mean(acc, axis=-1, keepdims=True)
    xc = acc - mean
    var = jnp.mean(xc * xc, axis=-1, keepdims=True)
    y = xc * lax.rsqrt(var + LN_EPS)
    y = y * lnw_ref[...] + lnb_ref[...]

    # ---- pointwise MLP: C -> 4C -> GELU -> C (gama folded into w2t/b2g) -----
    h = jnp.dot(y.astype(jnp.bfloat16), w1_ref[...],
                preferred_element_type=jnp.float32) + b1_ref[...]   # (HW, 4C)
    h = _gelu_exact(h)

    # branch directly in (C, HW) orientation: zT[c,p] = sum_k w2t[c,k] * h[p,k]
    zT = lax.dot_general(w2t_ref[...], h.astype(jnp.bfloat16),
                         dimension_numbers=(((1,), (1,)), ((), ())),
                         preferred_element_type=jnp.float32)        # (C, HW)
    zT = zT + b2g_ref[...]

    # ---- fused literal epilogue: out = shortcut + (shortcut + branch_perm) --
    out_ref[0] = 2.0 * x2_ref[0] + zT


def convnext_block(x_nchw, params):
    """Full ConvNeXt_block forward.  x_nchw: (N, C, H, W) float32."""
    N, C, H, W = x_nchw.shape
    assert H == W, "literal permute(0,3,2,1) + residual add requires H == W"
    hidden = 4 * C
    HW = H * W
    Hp, Wp = H + 2 * PAD, W + 2 * PAD

    # Single HBM-side copy: spatially transposed NHWC view of the input.
    # x_conv[n, a, b, c] = x_nchw[n, c, b, a]
    x_conv = jnp.transpose(x_nchw, (0, 3, 2, 1))
    x_res = x_nchw.reshape(N, C, HW)                     # free reshape

    # Tiny weight prep (runs once under jit):
    wdw_t = jnp.transpose(params["wdw"], (1, 0, 2, 3))   # swap kh <-> kw
    wim = jnp.pad(wdw_t, ((0, 0), (0, KTAPS - KSIZE), (0, 0), (0, 0)))
    wim = wim.reshape(KSIZE, KTAPS * C, C).astype(jnp.bfloat16)   # (7, 8C, C)
    gama = params["gama"][0]                              # (C,)
    w1 = params["w1"].astype(jnp.bfloat16)                # (C, 4C)
    w2t = (params["w2"].T * gama[:, None]).astype(jnp.bfloat16)   # (C, 4C)
    b2g = (params["b2"][0] * gama).reshape(C, 1)          # (C, 1)

    out_flat = pl.pallas_call(
        convnext_block_kernel,
        out_shape=jax.ShapeDtypeStruct((N, C, HW), jnp.float32),
        grid=(N,),
        in_specs=[
            pl.BlockSpec((1, H, W, C), lambda n: (n, 0, 0, 0)),          # x_conv
            pl.BlockSpec((1, C, HW), lambda n: (n, 0, 0)),               # x_res
            pl.BlockSpec((KSIZE, KTAPS * C, C), lambda n: (0, 0, 0)),    # wim
            pl.BlockSpec((1, C), lambda n: (0, 0)),                      # bdw
            pl.BlockSpec((1, C), lambda n: (0, 0)),                      # lnw
            pl.BlockSpec((1, C), lambda n: (0, 0)),                      # lnb
            pl.BlockSpec((C, hidden), lambda n: (0, 0)),                 # w1
            pl.BlockSpec((1, hidden), lambda n: (0, 0)),                 # b1
            pl.BlockSpec((C, hidden), lambda n: (0, 0)),                 # w2t
            pl.BlockSpec((C, 1), lambda n: (0, 0)),                      # b2g
        ],
        out_specs=pl.BlockSpec((1, C, HW), lambda n: (n, 0, 0)),
        scratch_shapes=[
            pltpu.VMEM((Hp, Wp, C), jnp.bfloat16),       # padded input (bf16)
            pltpu.VMEM((HW, C), jnp.float32),            # conv accumulator
        ],
        compiler_params=pltpu.CompilerParams(
            dimension_semantics=("parallel",)),
    )(x_conv, x_res, wim, params["bdw"], params["lnw"], params["lnb"],
      w1, params["b1"], w2t, b2g)

    return out_flat.reshape(N, C, H, W)                  # free reshape


def make_params(key, dim, scale_value=1.0):
    """Deterministic synthetic parameters with the module's shapes."""
    ks = jax.random.split(key, 6)
    hidden = 4 * dim
    return dict(
        wdw=jax.random.normal(ks[0], (KSIZE, KSIZE, dim, dim), jnp.float32) * 0.05,
        bdw=jax.random.normal(ks[1], (1, dim), jnp.float32) * 0.05,
        lnw=jnp.ones((1, dim), jnp.float32),         # LayerNorm.w init = ones
        lnb=jnp.zeros((1, dim), jnp.float32),        # LayerNorm.b init = zeros
        w1=jax.random.normal(ks[2], (dim, hidden), jnp.float32) * 0.05,
        b1=jax.random.normal(ks[3], (1, hidden), jnp.float32) * 0.05,
        w2=jax.random.normal(ks[4], (hidden, dim), jnp.float32) * 0.05,
        b2=jax.random.normal(ks[5], (1, dim), jnp.float32) * 0.05,
        gama=jnp.full((1, dim), scale_value, jnp.float32),   # ones * scale_value
    )


def convnext_block_reference(x_nchw, params):
    """Pure-JAX reference with identical semantics (sanity check)."""
    x_nhwc = jnp.transpose(x_nchw, (0, 2, 3, 1))
    y = jax.lax.conv_general_dilated(
        x_nhwc, params["wdw"], window_strides=(1, 1),
        padding=((PAD, PAD), (PAD, PAD)),
        dimension_numbers=("NHWC", "HWIO", "NHWC"),
        precision=jax.lax.Precision.HIGHEST) + params["bdw"][0]
    mean = jnp.mean(y, -1, keepdims=True)
    var = jnp.mean((y - mean) ** 2, -1, keepdims=True)
    y = (y - mean) / jnp.sqrt(var + LN_EPS) * params["lnw"][0] + params["lnb"][0]
    h = jnp.einsum("nhwc,cd->nhwd", y, params["w1"],
                   precision=jax.lax.Precision.HIGHEST) + params["b1"][0]
    h = jax.nn.gelu(h, approximate=False)
    z = jnp.einsum("nhwd,dc->nhwc", h, params["w2"],
                   precision=jax.lax.Precision.HIGHEST) + params["b2"][0]
    z = z * params["gama"][0]
    branch = jnp.transpose(z, (0, 3, 2, 1))
    return x_nchw + (x_nchw + branch)


if __name__ == "__main__":
    key = jax.random.PRNGKey(0)
    kx, kp = jax.random.split(key)

    N, dim, H, W = 2, 32, 16, 16          # small shapes consistent with the module
    x = jax.random.normal(kx, (N, dim, H, W), jnp.float32)
    params = make_params(kp, dim, scale_value=1.0)   # scale_value > 0 so gama exists

    out = jax.jit(convnext_block)(x, params)
    jax.block_until_ready(out)

    ref = convnext_block_reference(x, params)
    err = float(jnp.max(jnp.abs(out - ref)))
    assert np.isfinite(err) and err < 5e-2, f"max abs error too large: {err}"

    print("KERNEL_OK")
</pallas_src>

<mosaic_0001>
module attributes {stable_mosaic.version = 11 : i64} {
  func.func @convnext_block_kernel(%arg0: i32, %arg1: memref<1x16x16x32xf32, #tpu.memory_space<vmem>>, %arg2: memref<1x32x256xf32, #tpu.memory_space<vmem>>, %arg3: memref<7x256x32xbf16, #tpu.memory_space<vmem>>, %arg4: memref<1x32xf32, #tpu.memory_space<vmem>>, %arg5: memref<1x32xf32, #tpu.memory_space<vmem>>, %arg6: memref<1x32xf32, #tpu.memory_space<vmem>>, %arg7: memref<32x128xbf16, #tpu.memory_space<vmem>>, %arg8: memref<1x128xf32, #tpu.memory_space<vmem>>, %arg9: memref<32x128xbf16, #tpu.memory_space<vmem>>, %arg10: memref<32x1xf32, #tpu.memory_space<vmem>>, %arg11: memref<1x32x256xf32, #tpu.memory_space<vmem>>, %arg12: memref<22x22x32xbf16, #tpu.memory_space<vmem>>, %arg13: memref<256x32xf32, #tpu.memory_space<vmem>>) attributes {dimension_semantics = [#tpu.dimension_semantics<parallel>], iteration_bounds = array<i64: 2>, scalar_prefetch = 0 : i64, scratch_operands = 2 : i64, tpu.core_type = #tpu.core_type<tc>, window_params = [{transform_indices = @transform_0, window_bounds = array<i64: 1, 16, 16, 32>}, {transform_indices = @transform_1, window_bounds = array<i64: 1, 32, 256>}, {pipeline_mode = #tpu.pipeline_mode<synchronous>, transform_indices = @transform_2, window_bounds = array<i64: 7, 256, 32>}, {pipeline_mode = #tpu.pipeline_mode<synchronous>, transform_indices = @transform_3, window_bounds = array<i64: 1, 32>}, {pipeline_mode = #tpu.pipeline_mode<synchronous>, transform_indices = @transform_4, window_bounds = array<i64: 1, 32>}, {pipeline_mode = #tpu.pipeline_mode<synchronous>, transform_indices = @transform_5, window_bounds = array<i64: 1, 32>}, {pipeline_mode = #tpu.pipeline_mode<synchronous>, transform_indices = @transform_6, window_bounds = array<i64: 32, 128>}, {pipeline_mode = #tpu.pipeline_mode<synchronous>, transform_indices = @transform_7, window_bounds = array<i64: 1, 128>}, {pipeline_mode = #tpu.pipeline_mode<synchronous>, transform_indices = @transform_8, window_bounds = array<i64: 32, 128>}, {pipeline_mode = #tpu.pipeline_mode<synchronous>, transform_indices = @transform_9, window_bounds = array<i64: 32, 1>}, {transform_indices = @transform_10, window_bounds = array<i64: 1, 32, 256>}]} {
    %cst = arith.constant 0.000000e+00 : bf16
    %0 = vector.broadcast %cst : bf16 to vector<3x22x32xbf16>
    %c0 = arith.constant 0 : index
    %c0_0 = arith.constant 0 : index
    %c0_1 = arith.constant 0 : index
    %1 = vector.load %arg12[%c0, %c0_0, %c0_1] : memref<22x22x32xbf16, #tpu.memory_space<vmem>>, vector<3x22x32xbf16>
    tpu.vector_store %arg12[%c0, %c0_0, %c0_1], %0 {strides = array<i32>} : memref<22x22x32xbf16, #tpu.memory_space<vmem>>, vector<3x22x32xbf16>,
    %cst_2 = arith.constant 0.000000e+00 : bf16
    %2 = vector.broadcast %cst_2 : bf16 to vector<3x22x32xbf16>
    %c19 = arith.constant 19 : index
    %c0_3 = arith.constant 0 : index
    %c0_4 = arith.constant 0 : index
    %3 = vector.load %arg12[%c19, %c0_3, %c0_4] : memref<22x22x32xbf16, #tpu.memory_space<vmem>>, vector<3x22x32xbf16>
    tpu.vector_store %arg12[%c19, %c0_3, %c0_4], %2 {strides = array<i32>} : memref<22x22x32xbf16, #tpu.memory_space<vmem>>, vector<3x22x32xbf16>,
    %cst_5 = arith.constant 0.000000e+00 : bf16
    %4 = vector.broadcast %cst_5 : bf16 to vector<16x3x32xbf16>
    %c3 = arith.constant 3 : index
    %c0_6 = arith.constant 0 : index
    %c0_7 = arith.constant 0 : index
    %5 = vector.load %arg12[%c3, %c0_6, %c0_7] : memref<22x22x32xbf16, #tpu.memory_space<vmem>>, vector<16x3x32xbf16>
    tpu.vector_store %arg12[%c3, %c0_6, %c0_7], %4 {strides = array<i32>} : memref<22x22x32xbf16, #tpu.memory_space<vmem>>, vector<16x3x32xbf16>,
    %cst_8 = arith.constant 0.000000e+00 : bf16
    %6 = vector.broadcast %cst_8 : bf16 to vector<16x3x32xbf16>
    %c3_9 = arith.constant 3 : index
    %c19_10 = arith.constant 19 : index
    %c0_11 = arith.constant 0 : index
    %7 = vector.load %arg12[%c3_9, %c19_10, %c0_11] : memref<22x22x32xbf16, #tpu.memory_space<vmem>>, vector<16x3x32xbf16>
    tpu.vector_store %arg12[%c3_9, %c19_10, %c0_11], %6 {strides = array<i32>} : memref<22x22x32xbf16, #tpu.memory_space<vmem>>, vector<16x3x32xbf16>,
    %c0_12 = arith.constant 0 : index
    %c0_13 = arith.constant 0 : index
    %c0_14 = arith.constant 0 : index
    %c0_15 = arith.constant 0 : index
    %8 = vector.load %arg1[%c0_12, %c0_13, %c0_14, %c0_15] : memref<1x16x16x32xf32, #tpu.memory_space<vmem>>, vector<1x16x16x32xf32>
    %9 = vector.shape_cast %8 : vector<1x16x16x32xf32> to vector<16x16x32xf32>
    %10 = arith.truncf %9 : vector<16x16x32xf32> to vector<16x16x32xbf16>
    %c3_16 = arith.constant 3 : index
    %c3_17 = arith.constant 3 : index
    %c0_18 = arith.constant 0 : index
    %11 = vector.load %arg12[%c3_16, %c3_17, %c0_18] : memref<22x22x32xbf16, #tpu.memory_space<vmem>>, vector<16x16x32xbf16>
    tpu.vector_store %arg12[%c3_16, %c3_17, %c0_18], %10 {strides = array<i32>} : memref<22x22x32xbf16, #tpu.memory_space<vmem>>, vector<16x16x32xbf16>,
    %c0_19 = arith.constant 0 : index
    %c0_20 = arith.constant 0 : index
    %12 = vector.load %arg4[%c0_19, %c0_20] : memref<1x32xf32, #tpu.memory_space<vmem>>, vector<1x32xf32>
    %13 = vector.shape_cast %12 : vector<1x32xf32> to vector<1x32xf32>
    %14 = vector.broadcast %13 : vector<1x32xf32> to vector<256x32xf32>
    %c0_21 = arith.constant 0 : index
    %c0_22 = arith.constant 0 : index
    %15 = vector.load %arg13[%c0_21, %c0_22] : memref<256x32xf32, #tpu.memory_space<vmem>>, vector<256x32xf32>
    tpu.vector_store %arg13[%c0_21, %c0_22], %14 {strides = array<i32>} : memref<256x32xf32, #tpu.memory_space<vmem>>, vector<256x32xf32>,
    %cst_23 = arith.constant 0.000000e+00 : bf16
    %16 = vector.broadcast %cst_23 : bf16 to vector<256x32xbf16>
    %c0_i32 = arith.constant 0 : i32
    %c7_i32 = arith.constant 7 : i32
    %17 = arith.addi %c0_i32, %c7_i32 : i32
    %c1_i32 = arith.constant 1 : i32
    scf.for %arg14 = %c0_i32 to %17 step %c1_i32  : i32 {
      %101 = arith.index_cast %arg14 : i32 to index
      %c0_68 = arith.constant 0 : index
      %c0_69 = arith.constant 0 : index
      %102 = vector.load %arg12[%101, %c0_68, %c0_69] : memref<22x22x32xbf16, #tpu.memory_space<vmem>>, vector<16x16x32xbf16>
      %103 = vector.shape_cast %102 : vector<16x16x32xbf16> to vector<256x32xbf16>
      %104 = arith.index_cast %arg14 : i32 to index
      %c1 = arith.constant 1 : index
      %c0_70 = arith.constant 0 : index
      %105 = vector.load %arg12[%104, %c1, %c0_70] : memref<22x22x32xbf16, #tpu.memory_space<vmem>>, vector<16x16x32xbf16>
      %106 = vector.shape_cast %105 : vector<16x16x32xbf16> to vector<256x32xbf16>
      %107 = arith.index_cast %arg14 : i32 to index
      %c2 = arith.constant 2 : index
      %c0_71 = arith.constant 0 : index
      %108 = vector.load %arg12[%107, %c2, %c0_71] : memref<22x22x32xbf16, #tpu.memory_space<vmem>>, vector<16x16x32xbf16>
      %109 = vector.shape_cast %108 : vector<16x16x32xbf16> to vector<256x32xbf16>
      %110 = arith.index_cast %arg14 : i32 to index
      %c3_72 = arith.constant 3 : index
      %c0_73 = arith.constant 0 : index
      %111 = vector.load %arg12[%110, %c3_72, %c0_73] : memref<22x22x32xbf16, #tpu.memory_space<vmem>>, vector<16x16x32xbf16>
      %112 = vector.shape_cast %111 : vector<16x16x32xbf16> to vector<256x32xbf16>
      %113 = arith.index_cast %arg14 : i32 to index
      %c4 = arith.constant 4 : index
      %c0_74 = arith.constant 0 : index
      %114 = vector.load %arg12[%113, %c4, %c0_74] : memref<22x22x32xbf16, #tpu.memory_space<vmem>>, vector<16x16x32xbf16>
      %115 = vector.shape_cast %114 : vector<16x16x32xbf16> to vector<256x32xbf16>
      %116 = arith.index_cast %arg14 : i32 to index
      %c5 = arith.constant 5 : index
      %c0_75 = arith.constant 0 : index
      %117 = vector.load %arg12[%116, %c5, %c0_75] : memref<22x22x32xbf16, #tpu.memory_space<vmem>>, vector<16x16x32xbf16>
      %118 = vector.shape_cast %117 : vector<16x16x32xbf16> to vector<256x32xbf16>
      %119 = arith.index_cast %arg14 : i32 to index
      %c6 = arith.constant 6 : index
      %c0_76 = arith.constant 0 : index
      %120 = vector.load %arg12[%119, %c6, %c0_76] : memref<22x22x32xbf16, #tpu.memory_space<vmem>>, vector<16x16x32xbf16>
      %121 = vector.shape_cast %120 : vector<16x16x32xbf16> to vector<256x32xbf16>
      %122 = tpu.concatenate %103, %106, %109, %112, %115, %118, %121, %16 in 1 : vector<256x32xbf16>, vector<256x32xbf16>, vector<256x32xbf16>, vector<256x32xbf16>, vector<256x32xbf16>, vector<256x32xbf16>, vector<256x32xbf16>, vector<256x32xbf16> -> vector<256x256xbf16>
      %c0_77 = arith.constant 0 : index
      %c0_78 = arith.constant 0 : index
      %123 = vector.load %arg13[%c0_77, %c0_78] : memref<256x32xf32, #tpu.memory_space<vmem>>, vector<256x32xf32>
      %124 = arith.index_cast %arg14 : i32 to index
      %c0_79 = arith.constant 0 : index
      %c0_80 = arith.constant 0 : index
      %125 = vector.load %arg3[%124, %c0_79, %c0_80] : memref<7x256x32xbf16, #tpu.memory_space<vmem>>, vector<1x256x32xbf16>
      %126 = vector.shape_cast %125 : vector<1x256x32xbf16> to vector<256x32xbf16>
      %cst_81 = arith.constant dense<0.000000e+00> : vector<256x32xf32>
      %127 = tpu.matmul %122, %126, %cst_81 {dimension_numbers = #tpu.dot_dimension_numbers<[1], [0], [0], [1], [0, 0, 1, 1], [], []>} : vector<256x256xbf16>, vector<256x32xbf16>, vector<256x32xf32> -> vector<256x32xf32>
      %128 = arith.addf %123, %127 : vector<256x32xf32>
      %c0_82 = arith.constant 0 : index
      %c0_83 = arith.constant 0 : index
      %129 = vector.load %arg13[%c0_82, %c0_83] : memref<256x32xf32, #tpu.memory_space<vmem>>, vector<256x32xf32>
      tpu.vector_store %arg13[%c0_82, %c0_83], %128 {strides = array<i32>} : memref<256x32xf32, #tpu.memory_space<vmem>>, vector<256x32xf32>,
    }
    %c7_i32_24 = arith.constant 7 : i32
    %c0_25 = arith.constant 0 : index
    %c0_26 = arith.constant 0 : index
    %18 = vector.load %arg13[%c0_25, %c0_26] : memref<256x32xf32, #tpu.memory_space<vmem>>, vector<256x32xf32>
    %cst_27 = arith.constant dense<0.000000e+00> : vector<256xf32>
    %19 = vector.multi_reduction <add>, %18, %cst_27 [1] : vector<256x32xf32> to vector<256xf32>
    %20 = vector.shape_cast %19 : vector<256xf32> to vector<256x1xf32>
    %cst_28 = arith.constant 3.200000e+01 : f32
    %21 = vector.broadcast %cst_28 : f32 to vector<256x1xf32>
    %22 = arith.divf %20, %21 : vector<256x1xf32>
    %23 = vector.broadcast %22 : vector<256x1xf32> to vector<256x32xf32>
    %24 = arith.subf %18, %23 : vector<256x32xf32>
    %25 = arith.mulf %24, %24 : vector<256x32xf32>
    %cst_29 = arith.constant dense<0.000000e+00> : vector<256xf32>
    %26 = vector.multi_reduction <add>, %25, %cst_29 [1] : vector<256x32xf32> to vector<256xf32>
    %27 = vector.shape_cast %26 : vector<256xf32> to vector<256x1xf32>
    %cst_30 = arith.constant 3.200000e+01 : f32
    %28 = vector.broadcast %cst_30 : f32 to vector<256x1xf32>
    %29 = arith.divf %27, %28 : vector<256x1xf32>
    %cst_31 = arith.constant 9.99999997E-7 : f32
    %30 = vector.broadcast %cst_31 : f32 to vector<256x1xf32>
    %31 = arith.addf %29, %30 : vector<256x1xf32>
    %32 = math.rsqrt %31 : vector<256x1xf32>
    %33 = vector.broadcast %32 : vector<256x1xf32> to vector<256x32xf32>
    %34 = arith.mulf %24, %33 : vector<256x32xf32>
    %c0_32 = arith.constant 0 : index
    %c0_33 = arith.constant 0 : index
    %35 = vector.load %arg5[%c0_32, %c0_33] : memref<1x32xf32, #tpu.memory_space<vmem>>, vector<1x32xf32>
    %36 = vector.broadcast %35 : vector<1x32xf32> to vector<256x32xf32>
    %37 = arith.mulf %34, %36 : vector<256x32xf32>
    %c0_34 = arith.constant 0 : index
    %c0_35 = arith.constant 0 : index
    %38 = vector.load %arg6[%c0_34, %c0_35] : memref<1x32xf32, #tpu.memory_space<vmem>>, vector<1x32xf32>
    %39 = vector.broadcast %38 : vector<1x32xf32> to vector<256x32xf32>
    %40 = arith.addf %37, %39 : vector<256x32xf32>
    %41 = arith.truncf %40 : vector<256x32xf32> to vector<256x32xbf16>
    %c0_36 = arith.constant 0 : index
    %c0_37 = arith.constant 0 : index
    %42 = vector.load %arg7[%c0_36, %c0_37] : memref<32x128xbf16, #tpu.memory_space<vmem>>, vector<32x128xbf16>
    %cst_38 = arith.constant dense<0.000000e+00> : vector<256x128xf32>
    %43 = tpu.matmul %41, %42, %cst_38 {dimension_numbers = #tpu.dot_dimension_numbers<[1], [0], [0], [1], [0, 0, 1, 1], [], []>} : vector<256x32xbf16>, vector<32x128xbf16>, vector<256x128xf32> -> vector<256x128xf32>
    %c0_39 = arith.constant 0 : index
    %c0_40 = arith.constant 0 : index
    %44 = vector.load %arg8[%c0_39, %c0_40] : memref<1x128xf32, #tpu.memory_space<vmem>>, vector<1x128xf32>
    %45 = vector.broadcast %44 : vector<1x128xf32> to vector<256x128xf32>
    %46 = arith.addf %43, %45 : vector<256x128xf32>
    %cst_41 = arith.constant 5.000000e-01 : f32
    %47 = vector.broadcast %cst_41 : f32 to vector<256x128xf32>
    %48 = arith.mulf %47, %46 : vector<256x128xf32>
    %cst_42 = arith.constant 0.707106769 : f32
    %49 = vector.broadcast %cst_42 : f32 to vector<256x128xf32>
    %50 = arith.mulf %46, %49 : vector<256x128xf32>
    %cst_43 = arith.constant 0.000000e+00 : f32
    %51 = vector.broadcast %cst_43 : f32 to vector<256x128xf32>
    %52 = arith.cmpf oge, %50, %51 : vector<256x128xf32>
    %cst_44 = arith.constant 1.000000e+00 : f32
    %cst_45 = arith.constant -1.000000e+00 : f32
    %53 = vector.broadcast %cst_44 : f32 to vector<256x128xf32>
    %54 = vector.broadcast %cst_45 : f32 to vector<256x128xf32>
    %55 = arith.select %52, %53, %54 : vector<256x128xi1>, vector<256x128xf32>
    %56 = math.absf %50 : vector<256x128xf32>
    %cst_46 = arith.constant 0.327591091 : f32
    %57 = vector.broadcast %cst_46 : f32 to vector<256x128xf32>
    %58 = arith.mulf %57, %56 : vector<256x128xf32>
    %cst_47 = arith.constant 1.000000e+00 : f32
    %59 = vector.broadcast %cst_47 : f32 to vector<256x128xf32>
    %60 = arith.addf %59, %58 : vector<256x128xf32>
    %61 = tpu.reciprocal %60 {approx = true} : vector<256x128xf32> -> vector<256x128xf32>
    %cst_48 = arith.constant 1.06140542 : f32
    %62 = vector.broadcast %cst_48 : f32 to vector<256x128xf32>
    %63 = arith.mulf %62, %61 : vector<256x128xf32>
    %cst_49 = arith.constant -1.45315206 : f32
    %64 = vector.broadcast %cst_49 : f32 to vector<256x128xf32>
    %65 = arith.addf %63, %64 : vector<256x128xf32>
    %66 = arith.mulf %65, %61 : vector<256x128xf32>
    %cst_50 = arith.constant 1.42141378 : f32
    %67 = vector.broadcast %cst_50 : f32 to vector<256x128xf32>
    %68 = arith.addf %66, %67 : vector<256x128xf32>
    %69 = arith.mulf %68, %61 : vector<256x128xf32>
    %cst_51 = arith.constant -0.284496725 : f32
    %70 = vector.broadcast %cst_51 : f32 to vector<256x128xf32>
    %71 = arith.addf %69, %70 : vector<256x128xf32>
    %72 = arith.mulf %71, %61 : vector<256x128xf32>
    %cst_52 = arith.constant 0.254829586 : f32
    %73 = vector.broadcast %cst_52 : f32 to vector<256x128xf32>
    %74 = arith.addf %72, %73 : vector<256x128xf32>
    %75 = arith.mulf %74, %61 : vector<256x128xf32>
    %cst_53 = arith.constant 0.000000e+00 : f32
    %76 = vector.broadcast %cst_53 : f32 to vector<256x128xf32>
    %77 = arith.subf %76, %56 : vector<256x128xf32>
    %78 = arith.mulf %77, %56 : vector<256x128xf32>
    %79 = math.exp %78 : vector<256x128xf32>
    %80 = arith.mulf %75, %79 : vector<256x128xf32>
    %cst_54 = arith.constant 1.000000e+00 : f32
    %81 = vector.broadcast %cst_54 : f32 to vector<256x128xf32>
    %82 = arith.subf %81, %80 : vector<256x128xf32>
    %83 = arith.mulf %55, %82 : vector<256x128xf32>
    %cst_55 = arith.constant 1.000000e+00 : f32
    %84 = vector.broadcast %cst_55 : f32 to vector<256x128xf32>
    %85 = arith.addf %84, %83 : vector<256x128xf32>
    %86 = arith.mulf %48, %85 : vector<256x128xf32>
    %c0_56 = arith.constant 0 : index
    %c0_57 = arith.constant 0 : index
    %87 = vector.load %arg9[%c0_56, %c0_57] : memref<32x128xbf16, #tpu.memory_space<vmem>>, vector<32x128xbf16>
    %88 = arith.truncf %86 : vector<256x128xf32> to vector<256x128xbf16>
    %cst_58 = arith.constant dense<0.000000e+00> : vector<32x256xf32>
    %89 = tpu.matmul %87, %88, %cst_58 {dimension_numbers = #tpu.dot_dimension_numbers<[1], [1], [0], [0], [0, 0, 1, 0], [], []>} : vector<32x128xbf16>, vector<256x128xbf16>, vector<32x256xf32> -> vector<32x256xf32>
    %c0_59 = arith.constant 0 : index
    %c0_60 = arith.constant 0 : index
    %90 = vector.load %arg10[%c0_59, %c0_60] : memref<32x1xf32, #tpu.memory_space<vmem>>, vector<32x1xf32>
    %91 = vector.broadcast %90 : vector<32x1xf32> to vector<32x256xf32>
    %92 = arith.addf %89, %91 : vector<32x256xf32>
    %c0_61 = arith.constant 0 : index
    %c0_62 = arith.constant 0 : index
    %c0_63 = arith.constant 0 : index
    %93 = vector.load %arg2[%c0_61, %c0_62, %c0_63] : memref<1x32x256xf32, #tpu.memory_space<vmem>>, vector<1x32x256xf32>
    %94 = vector.shape_cast %93 : vector<1x32x256xf32> to vector<32x256xf32>
    %cst_64 = arith.constant 2.000000e+00 : f32
    %95 = vector.broadcast %cst_64 : f32 to vector<32x256xf32>
    %96 = arith.mulf %95, %94 : vector<32x256xf32>
    %97 = arith.addf %96, %92 : vector<32x256xf32>
    %c0_65 = arith.constant 0 : index
    %c0_66 = arith.constant 0 : index
    %c0_67 = arith.constant 0 : index
    %98 = vector.load %arg11[%c0_65, %c0_66, %c0_67] : memref<1x32x256xf32, #tpu.memory_space<vmem>>, vector<1x32x256xf32>
    %99 = vector.shape_cast %98 : vector<1x32x256xf32> to vector<32x256xf32>
    %100 = vector.shape_cast %97 : vector<32x256xf32> to vector<1x32x256xf32>
    tpu.vector_store %arg11[%c0_65, %c0_66, %c0_67], %100 {strides = array<i32>} : memref<1x32x256xf32, #tpu.memory_space<vmem>>, vector<1x32x256xf32>,
    return
  }
  func.func @transform_0(%arg0: i32) -> (i32, i32, i32, i32) {
    %c0_i32 = arith.constant 0 : i32
    %c0_i32_0 = arith.constant 0 : i32
    %c0_i32_1 = arith.constant 0 : i32
    %c0_i32_2 = arith.constant 0 : i32
    return %arg0, %c0_i32, %c0_i32_0, %c0_i32_1 : i32, i32, i32, i32
  }
  func.func @transform_1(%arg0: i32) -> (i32, i32, i32) {
    %c0_i32 = arith.constant 0 : i32
    %c0_i32_0 = arith.constant 0 : i32
    %c0_i32_1 = arith.constant 0 : i32
    return %arg0, %c0_i32, %c0_i32_0 : i32, i32, i32
  }
  func.func @transform_2(%arg0: i32) -> (i32, i32, i32) {
    %c0_i32 = arith.constant 0 : i32
    %c0_i32_0 = arith.constant 0 : i32
    %c0_i32_1 = arith.constant 0 : i32
    %c0_i32_2 = arith.constant 0 : i32
    return %c0_i32, %c0_i32_0, %c0_i32_1 : i32, i32, i32
  }
  func.func @transform_3(%arg0: i32) -> (i32, i32) {
    %c0_i32 = arith.constant 0 : i32
    %c0_i32_0 = arith.constant 0 : i32
    %c0_i32_1 = arith.constant 0 : i32
    return %c0_i32, %c0_i32_0 : i32, i32
  }
  func.func @transform_4(%arg0: i32) -> (i32, i32) {
    %c0_i32 = arith.constant 0 : i32
    %c0_i32_0 = arith.constant 0 : i32
    %c0_i32_1 = arith.constant 0 : i32
    return %c0_i32, %c0_i32_0 : i32, i32
  }
  func.func @transform_5(%arg0: i32) -> (i32, i32) {
    %c0_i32 = arith.constant 0 : i32
    %c0_i32_0 = arith.constant 0 : i32
    %c0_i32_1 = arith.constant 0 : i32
    return %c0_i32, %c0_i32_0 : i32, i32
  }
  func.func @transform_6(%arg0: i32) -> (i32, i32) {
    %c0_i32 = arith.constant 0 : i32
    %c0_i32_0 = arith.constant 0 : i32
    %c0_i32_1 = arith.constant 0 : i32
    return %c0_i32, %c0_i32_0 : i32, i32
  }
  func.func @transform_7(%arg0: i32) -> (i32, i32) {
    %c0_i32 = arith.constant 0 : i32
    %c0_i32_0 = arith.constant 0 : i32
    %c0_i32_1 = arith.constant 0 : i32
    return %c0_i32, %c0_i32_0 : i32, i32
  }
  func.func @transform_8(%arg0: i32) -> (i32, i32) {
    %c0_i32 = arith.constant 0 : i32
    %c0_i32_0 = arith.constant 0 : i32
    %c0_i32_1 = arith.constant 0 : i32
    return %c0_i32, %c0_i32_0 : i32, i32
  }
  func.func @transform_9(%arg0: i32) -> (i32, i32) {
    %c0_i32 = arith.constant 0 : i32
    %c0_i32_0 = arith.constant 0 : i32
    %c0_i32_1 = arith.constant 0 : i32
    return %c0_i32, %c0_i32_0 : i32, i32
  }
  func.func @transform_10(%arg0: i32) -> (i32, i32, i32) {
    %c0_i32 = arith.constant 0 : i32
    %c0_i32_0 = arith.constant 0 : i32
    %c0_i32_1 = arith.constant 0 : i32
    return %arg0, %c0_i32, %c0_i32_0 : i32, i32, i32
  }
}

</mosaic_0001>

<bundles_post_ra>
// kernel: convnext_block.1
= control target key start
LH: loop header
LB: loop body
LE: loop exit
PB: predicated region body
PF: predicated region fallthrough
CT: control target
= control target key end

     0   :  { %s6712_s13 = smov 0   ;;  %s9827_s0 = inlined_call_operand.vmem [shape: f32[2,16,16,32], index: 0, kind: input, shape index: {}]   ;;  %s9828_s1 = inlined_call_operand.vmem [shape: f32[2,32,256], index: 1, kind: input, shape index: {}]   ;;  %s9829_s2 = inlined_call_operand.vmem [shape: bf16[7,256,32], index: 2, kind: input, shape index: {}]   ;;  %s9830_s3 = inlined_call_operand.vmem [shape: f32[1,32], index: 3, kind: input, shape index: {}]   ;;  %s9831_s4 = inlined_call_operand.vmem [shape: f32[1,32], index: 4, kind: input, shape index: {}]   ;;  %s9832_s5 = inlined_call_operand.vmem [shape: f32[1,32], index: 5, kind: input, shape index: {}]   ;;  %s9833_s6 = inlined_call_operand.vmem [shape: bf16[32,128], index: 6, kind: input, shape index: {}]   ;;  %s9834_s7 = inlined_call_operand.vmem [shape: f32[1,128], index: 7, kind: input, shape index: {}]   ;;  %s9835_s8 = inlined_call_operand.vmem [shape: bf16[32,128], index: 8, kind: input, shape index: {}]   ;;  %s9836_s9 = inlined_call_operand.vmem [shape: f32[32,1], index: 9, kind: input, shape index: {}]   ;;  %s9837_s10 = inlined_call_operand.vmem [shape: f32[2,32,256], index: 10, kind: output, shape index: {}]  }
   0x1 LB: > { %s5828_s14 = sadd.s32 4294967295, %s6646_s13   ;;  %p5832_p0 = scmp.ge.s32.totalorder %s6646_s13, 1  ;;  %s6646_s13 = sphi %s6712_s13, %s20_s13  }
   0x2   : > { %p322_p1 = scmp.lt.s32.totalorder %s6646_s13, 3 }
   0x4   : > { %p323_p2 = pnand %p5832_p0, %p322_p1 }
   0x6   : > { %326 = sbr.rel (%p323_p2) target bundleno = 1766 (0x6e6), region = 60 }
   0xd   : > { %vm403_vm0 = vcmask 254976   ;;  %vm404_vm1 = vsmask.f32 1280  ;;  %v406_v0 = vld [vmem:[#allocation2 + $0x24] sm:$0x3]  ;;  %vm454_vm4 = vcmask 256001  }
   0xe   : > { %vm6721_vm2 = vmand %vm403_vm0, %vm404_vm1  ;;  %v409_v2 = vld [vmem:[#allocation2 + $0x30] sm:$0x3]  ;;  %v412_v3 = vld [vmem:[#allocation2 + $0x3c] sm:$0x3]  ;;  %vm455_vm3 = vsmask.f32 7942 }
   0xf   : > { %v407_v4 = vsel %vm6721_vm2, 0, %v406_v0  ;;  %v410_v5 = vsel %vm6721_vm2, 0, %v409_v2  ;;  %v413_v6 = vsel %vm6721_vm2, 0, %v412_v3  ;;  %v415_v7 = vld [vmem:[#allocation2 + $0x48] sm:$0x3]  ;;  %vm6751_vm5 = vmand %vm454_vm4, %vm455_vm3  ;;  %vm381_vm6 = vcmask 257024  }
  0x10   : > { %408 = vst [vmem:[#allocation2 + $0x24] sm:$0x3] %v407_v4  ;;  %411 = vst [vmem:[#allocation2 + $0x30] sm:$0x3] %v410_v5  ;;  %v416_v8 = vsel %vm6721_vm2, 0, %v415_v7  ;;  %vm384_vm7 = vcmask 256000  }
  0x11   : > { %414 = vst [vmem:[#allocation2 + $0x3c] sm:$0x3] %v413_v6  ;;  %v418_v9 = vld [vmem:[#allocation2 + $0x54] sm:$0x3]  ;;  %v421_v10 = vld [vmem:[#allocation2 + $0x60] sm:$0x3] }
  0x12   : > { %417 = vst [vmem:[#allocation2 + $0x48] sm:$0x3] %v416_v8  ;;  %v419_v11 = vsel %vm6721_vm2, 0, %v418_v9  ;;  %v422_v12 = vsel %vm6721_vm2, 0, %v421_v10  ;;  %v424_v13 = vld [vmem:[#allocation2 + $0x6c] sm:$0x3] }
  0x13   : > { %v427_v14 = vld [vmem:[#allocation2 + $0x78] sm:$0x3]  ;;  %420 = vst [vmem:[#allocation2 + $0x54] sm:$0x3] %v419_v11  ;;  %423 = vst [vmem:[#allocation2 + $0x60] sm:$0x3] %v422_v12 }
  0x14   : > { %v425_v15 = vsel %vm6721_vm2, 0, %v424_v13  ;;  %v428_v16 = vsel %vm6721_vm2, 0, %v427_v14  ;;  %v430_v17 = vld [vmem:[#allocation2 + $0x84] sm:$0x3]  ;;  %v433_v18 = vld [vmem:[#allocation2 + $0x90] sm:$0x3] }
  0x15   : > { %426 = vst [vmem:[#allocation2 + $0x6c] sm:$0x3] %v425_v15  ;;  %429 = vst [vmem:[#allocation2 + $0x78] sm:$0x3] %v428_v16  ;;  %v431_v19 = vsel %vm6721_vm2, 0, %v430_v17  ;;  %v434_v20 = vsel %vm6721_vm2, 0, %v433_v18 }
  0x16   : > { %v436_v21 = vld [vmem:[#allocation2 + $0x9c] sm:$0x3]  ;;  %v439_v22 = vld [vmem:[#allocation2 + $0xa8] sm:$0x3]  ;;  %432 = vst [vmem:[#allocation2 + $0x84] sm:$0x3] %v431_v19 }
  0x17   : > { %435 = vst [vmem:[#allocation2 + $0x90] sm:$0x3] %v434_v20  ;;  %v437_v23 = vsel %vm6721_vm2, 0, %v436_v21  ;;  %v440_v24 = vsel %vm6721_vm2, 0, %v439_v22  ;;  %v442_v25 = vld [vmem:[#allocation2 + $0xb4] sm:$0x3] }
  0x18   : > { %v445_v26 = vld [vmem:[#allocation2 + $0xc0] sm:$0x3]  ;;  %438 = vst [vmem:[#allocation2 + $0x9c] sm:$0x3] %v437_v23  ;;  %441 = vst [vmem:[#allocation2 + $0xa8] sm:$0x3] %v440_v24 }
  0x19   : > { %v443_v28 = vsel %vm6721_vm2, 0, %v442_v25  ;;  %v446_v29 = vsel %vm6721_vm2, 0, %v445_v26  ;;  %v448_v30 = vld [vmem:[#allocation2 + $0xcc] sm:$0x3]  ;;  %v451_v31 = vld [vmem:[#allocation2 + $0xd8] sm:$0x3] }
  0x1a   : > { %444 = vst [vmem:[#allocation2 + $0xb4] sm:$0x3] %v443_v28  ;;  %447 = vst [vmem:[#allocation2 + $0xc0] sm:$0x3] %v446_v29  ;;  %v449_v32 = vsel %vm6721_vm2, 0, %v448_v30  ;;  %v452_v33 = vsel %vm6721_vm2, 0, %v451_v31 }
  0x1b   : > { %v457_v34 = vld [vmem:[#allocation2 + $0x2c] sm:$0x6]  ;;  %v460_v35 = vld [vmem:[#allocation2 + $0x38] sm:$0x6]  ;;  %450 = vst [vmem:[#allocation2 + $0xcc] sm:$0x3] %v449_v32 }
  0x1c   : > { %453 = vst [vmem:[#allocation2 + $0xd8] sm:$0x3] %v452_v33  ;;  %v458_v36 = vsel %vm6751_vm5, 0, %v457_v34  ;;  %v461_v37 = vsel %vm6751_vm5, 0, %v460_v35  ;;  %v463_v38 = vld [vmem:[#allocation2 + $0x44] sm:$0x6] }
  0x1d   : > { %v466_v39 = vld [vmem:[#allocation2 + $0x50] sm:$0x6]  ;;  %459 = vst [vmem:[#allocation2 + $0x2c] sm:$0x6] %v458_v36  ;;  %462 = vst [vmem:[#allocation2 + $0x38] sm:$0x6] %v461_v37 }
  0x1e   : > { %v464_v40 = vsel %vm6751_vm5, 0, %v463_v38  ;;  %v467_v41 = vsel %vm6751_vm5, 0, %v466_v39  ;;  %v469_v42 = vld [vmem:[#allocation2 + $0x5c] sm:$0x6]  ;;  %v472_v43 = vld [vmem:[#allocation2 + $0x68] sm:$0x6] }
  0x1f   : > { %465 = vst [vmem:[#allocation2 + $0x44] sm:$0x6] %v464_v40  ;;  %468 = vst [vmem:[#allocation2 + $0x50] sm:$0x6] %v467_v41  ;;  %v470_v44 = vsel %vm6751_vm5, 0, %v469_v42  ;;  %v473_v45 = vsel %vm6751_vm5, 0, %v472_v43 }
  0x20   : > { %v475_v46 = vld [vmem:[#allocation2 + $0x74] sm:$0x6]  ;;  %v478_v47 = vld [vmem:[#allocation2 + $0x80] sm:$0x6]  ;;  %471 = vst [vmem:[#allocation2 + $0x5c] sm:$0x6] %v470_v44 }
  0x21   : > { %474 = vst [vmem:[#allocation2 + $0x68] sm:$0x6] %v473_v45  ;;  %v476_v48 = vsel %vm6751_vm5, 0, %v475_v46  ;;  %v479_v49 = vsel %vm6751_vm5, 0, %v478_v47  ;;  %v481_v50 = vld [vmem:[#allocation2 + $0x8c] sm:$0x6] }
  0x22   : > { %v484_v51 = vld [vmem:[#allocation2 + $0x98] sm:$0x6]  ;;  %477 = vst [vmem:[#allocation2 + $0x74] sm:$0x6] %v476_v48  ;;  %480 = vst [vmem:[#allocation2 + $0x80] sm:$0x6] %v479_v49 }
  0x23   : > { %v482_v52 = vsel %vm6751_vm5, 0, %v481_v50  ;;  %v485_v53 = vsel %vm6751_vm5, 0, %v484_v51  ;;  %v487_v54 = vld [vmem:[#allocation2 + $0xa4] sm:$0x6]  ;;  %v490_v55 = vld [vmem:[#allocation2 + $0xb0] sm:$0x6] }
  0x24   : > { %483 = vst [vmem:[#allocation2 + $0x8c] sm:$0x6] %v482_v52  ;;  %486 = vst [vmem:[#allocation2 + $0x98] sm:$0x6] %v485_v53  ;;  %v488_v56 = vsel %vm6751_vm5, 0, %v487_v54  ;;  %v491_v57 = vsel %vm6751_vm5, 0, %v490_v55 }
  0x25   : > { %v493_v58 = vld [vmem:[#allocation2 + $0xbc] sm:$0x6]  ;;  %v496_v59 = vld [vmem:[#allocation2 + $0xc8] sm:$0x6]  ;;  %489 = vst [vmem:[#allocation2 + $0xa4] sm:$0x6] %v488_v56 }
  0x26   : > { %492 = vst [vmem:[#allocation2 + $0xb0] sm:$0x6] %v491_v57  ;;  %v494_v60 = vsel %vm6751_vm5, 0, %v493_v58  ;;  %v497_v61 = vsel %vm6751_vm5, 0, %v496_v59  ;;  %v499_v62 = vld [vmem:[#allocation2 + $0xd4] sm:$0x6] }
  0x27   : > { %v502_v63 = vld [vmem:[#allocation2 + $0xe0] sm:$0x6]  ;;  %495 = vst [vmem:[#allocation2 + $0xbc] sm:$0x6] %v494_v60  ;;  %498 = vst [vmem:[#allocation2 + $0xc8] sm:$0x6] %v497_v61 }
  0x28   : > { %v500_v0 = vsel %vm6751_vm5, 0, %v499_v62  ;;  %v503_v2 = vsel %vm6751_vm5, 0, %v502_v63  ;;  %p6797_p3 = scmp.lt.s32.totalorder %s5828_s14, 1  ;;  %v9838_v3 = vmov 0   ;;  %vm987_vm8 = vcmask 257025   ;;  %s7055_s29 = smov 0  }
  0x29   : > { %501 = vst [vmem:[#allocation2 + $0xd4] sm:$0x6] %v500_v0  ;;  %504 = vst [vmem:[#allocation2 + $0xe0] sm:$0x6] %v503_v2  ;;  %vm633_vm9 = vsmask.f32 5392 }
  0x2a   : > { %382 = vst.msk [vmem:[#allocation2] sm:$0xf] %vm381_vm6, %v9838_v3  ;;  %383 = vst.msk [vmem:[#allocation2 + $0x4] sm:$0xf] %vm381_vm6, %v9838_v3  ;;  %s9940_s14 = smov (!%p6797_p3, %s5828_s14), 1  ;;  %vm1108_vm12 = vcmask 261120  }
  0x2b   : > { %386 = vst.msk [vmem:[#allocation2 + $0xc] sm:$0xf] %vm381_vm6, %v9838_v3  ;;  %387 = vst.msk [vmem:[#allocation2 + $0x10] sm:$0xf] %vm381_vm6, %v9838_v3  ;;  %s6092_s16 = sshll.u32 %s9940_s14, 8  ;;  %s6093_s17 = sshll.u32 %s9940_s14, 6 }
  0x2c   : > { %389 = vst.msk [vmem:[#allocation2 + $0x18] sm:$0xf] %vm381_vm6, %v9838_v3  ;;  %390 = vst.msk [vmem:[#allocation2 + $0x1c] sm:$0xf] %vm381_vm6, %v9838_v3  ;;  %s6844_s20 = scalar_lea.vmem %s9827_s0, %s6092_s16  ;;  %s6849_s23 = scalar_lea.vmem %s9828_s1, %s6093_s17  ;;  %v989_v29 = vld [vmem:[#allocation2 + $0x24] sm:$0xe] }
  0x2d   : > { %393 = vst.msk [vmem:[#allocation2 + $0xe4] sm:$0xf] %vm381_vm6, %v9838_v3  ;;  %394 = vst.msk [vmem:[#allocation2 + $0xe8] sm:$0xf] %vm381_vm6, %v9838_v3  ;;  %s6854_s26 = scalar_lea.vmem %s9837_s10, %s6093_s17  ;;  %v505_v4 = vld [vmem:[%s6844_s20] sm:$0xff]  ;;  %v506_v5 = vld [vmem:[%s6844_s20 + $0x8] sm:$0xff] }
  0x2e   : > { %396 = vst.msk [vmem:[#allocation2 + $0xf0] sm:$0xf] %vm381_vm6, %v9838_v3  ;;  %397 = vst.msk [vmem:[#allocation2 + $0xf4] sm:$0xf] %vm381_vm6, %v9838_v3  ;;  %v507_v6 = vld [vmem:[%s6844_s20 + $0x10] sm:$0xff]  ;;  %v6095_v7 = vpack.c.bf16 %v505_v4, %v505_v4  ;;  %v6096_v8 = vpack.c.bf16 %v506_v5, %v506_v5  ;;  %v508_v10 = vld [vmem:[%s6844_s20 + $0x18] sm:$0xff] }
  0x2f   : > { %399 = vst.msk [vmem:[#allocation2 + $0xfc] sm:$0xf] %vm381_vm6, %v9838_v3  ;;  %400 = vst.msk [vmem:[#allocation2 + $0x100] sm:$0xf] %vm381_vm6, %v9838_v3  ;;  %v6097_v9 = vpack.c.bf16 %v507_v6, %v507_v6  ;;  %v509_v11 = vld [vmem:[%s6844_s20 + $0x20] sm:$0xff]  ;;  %v510_v12 = vld [vmem:[%s6844_s20 + $0x28] sm:$0xff]  ;;  %v6098_v13 = vpack.c.bf16 %v508_v10, %v508_v10 }
  0x30   : > { %385 = vst.msk [vmem:[#allocation2 + $0x8] sm:$0x7] %vm384_vm7, %v9838_v3  ;;  %388 = vst.msk [vmem:[#allocation2 + $0x14] sm:$0x7] %vm384_vm7, %v9838_v3  ;;  %v6099_v14 = vpack.c.bf16 %v509_v11, %v509_v11  ;;  %v6100_v15 = vpack.c.bf16 %v510_v12, %v510_v12  ;;  %v636_v16 = vshrl.u32 %v6095_v7, 16  ;;  %v639_v17 = vshll.u32 %v6095_v7, 16 }
  0x31   : > { %391 = vst.msk [vmem:[#allocation2 + $0x20] sm:$0x7] %vm384_vm7, %v9838_v3  ;;  %395 = vst.msk [vmem:[#allocation2 + $0xec] sm:$0x7] %vm384_vm7, %v9838_v3  ;;  %v645_v18 = vshrl.u32 %v6096_v8, 16  ;;  %v648_v19 = vshll.u32 %v6096_v8, 16 }
  0x32   : > { %398 = vst.msk [vmem:[#allocation2 + $0xf8] sm:$0x7] %vm384_vm7, %v9838_v3  ;;  %401 = vst.msk [vmem:[#allocation2 + $0x104] sm:$0x7] %vm384_vm7, %v9838_v3  ;;  %v655_v20 = vshrl.u32 %v6097_v9, 16  ;;  %v658_v21 = vshll.u32 %v6097_v9, 16 }
  0x33   : > { %v664_v22 = vshrl.u32 %v6098_v13, 16  ;;  %v667_v23 = vshll.u32 %v6098_v13, 16  ;;  %v638_v24 = vrot.slane %v636_v16, 6  ;;  %v641_v25 = vrot.slane %v639_v17, 7  ;;  %vm6864_vm10 = vmand %vm987_vm8, %vm455_vm3  ;;  %v996_v36 = vld [vmem:[#allocation2 + $0x30] sm:$0xe] }
  0x34   : > { %v647_v26 = vrot.slane %v645_v18, 6  ;;  %v650_v27 = vrot.slane %v648_v19, 7  ;;  %v657_v30 = vrot.slane %v655_v20, 6  ;;  %v660_v31 = vrot.slane %v658_v21, 7  ;;  %vm6870_vm11 = vmor %vm404_vm1, %vm633_vm9  ;;  %v993_v40 = vld [vmem:[#allocation2 + $0x2c] sm:$0x3] }
  0x35   : > { %v666_v32 = vrot.slane %v664_v22, 6  ;;  %v669_v33 = vrot.slane %v667_v23, 7  ;;  %v642_v34 = vor.u32 %v641_v25, %v638_v24  ;;  %v674_v37 = vshrl.u32 %v6099_v14, 16  ;;  %v1000_v48 = vld [vmem:[#allocation2 + $0x38] sm:$0x3]  ;;  %v511_v50 = vld [vmem:[%s6844_s20 + $0x30] sm:$0xff] }
  0x36   : > { %v651_v35 = vor.u32 %v650_v27, %v647_v26  ;;  %v677_v38 = vshll.u32 %v6099_v14, 16  ;;  %v661_v41 = vor.u32 %v660_v31, %v657_v30  ;;  %v683_v43 = vshrl.u32 %v6100_v15, 16  ;;  %v512_v55 = vld [vmem:[%s6844_s20 + $0x38] sm:$0xff]  ;;  %v513_v56 = vld [vmem:[%s6844_s20 + $0x40] sm:$0xff]  ;;  %v514_v57 = vld [vmem:[%s6844_s20 + $0x48] sm:$0xff] }
  0x37   : > { %v670_v42 = vor.u32 %v669_v33, %v666_v32  ;;  %v686_v44 = vshll.u32 %v6100_v15, 16  ;;  %v990_v45 = vsel %vm6864_vm10, %v642_v34, %v989_v29  ;;  %v643_v46 = vrot.slane %v642_v34, 4  ;;  %v1003_v60 = vld [vmem:[#allocation2 + $0x3c] sm:$0xe]  ;;  %v1007_v11 = vld [vmem:[#allocation2 + $0x44] sm:$0x3] }
  0x38   : > { %v653_v47 = vrot.slane %v651_v35, 4  ;;  %v676_v49 = vrot.slane %v674_v37, 6  ;;  %991 = vst [vmem:[#allocation2 + $0x24] sm:$0xe] %v990_v45  ;;  %v997_v51 = vsel %vm6864_vm10, %v661_v41, %v996_v36  ;;  %v662_v52 = vrot.slane %v661_v41, 4  ;;  %v515_v22 = vld [vmem:[%s6844_s20 + $0x50] sm:$0xff] }
  0x39   : > { %v672_v53 = vrot.slane %v670_v42, 4  ;;  %v679_v54 = vrot.slane %v677_v38, 7  ;;  %v652_v58 = vsel %vm6870_vm11, %v643_v46, %v651_v35  ;;  %998 = vst [vmem:[#allocation2 + $0x30] sm:$0xe] %v997_v51  ;;  %v685_v61 = vrot.slane %v683_v43, 6  ;;  %v516_v23 = vld [vmem:[%s6844_s20 + $0x58] sm:$0xff] }
  0x3a   : > { %v994_v59 = vsel %vm6721_vm2, %v653_v47, %v993_v40  ;;  %v688_v62 = vrot.slane %v686_v44, 7  ;;  %992 = vst.msk [vmem:[#allocation2 + $0x28] sm:$0xf] %vm381_vm6, %v652_v58  ;;  %v671_v63 = vsel %vm6870_vm11, %v662_v52, %v670_v42  ;;  %v6101_v4 = vpack.c.bf16 %v511_v50, %v511_v50  ;;  %v517_v24 = vld [vmem:[%s6844_s20 + $0x60] sm:$0xff]  ;;  %v1010_v26 = vld [vmem:[#allocation2 + $0x48] sm:$0xe] }
  0x3b   : > { %995 = vst [vmem:[#allocation2 + $0x2c] sm:$0x3] %v994_v59  ;;  %v1001_v0 = vsel %vm6721_vm2, %v672_v53, %v1000_v48  ;;  %v680_v2 = vor.u32 %v679_v54, %v676_v49  ;;  %999 = vst.msk [vmem:[#allocation2 + $0x34] sm:$0xf] %vm381_vm6, %v671_v63  ;;  %v6102_v6 = vpack.c.bf16 %v512_v55, %v512_v55  ;;  %v1017_v36 = vld [vmem:[#allocation2 + $0x54] sm:$0xe] }
  0x3c   : > { %1002 = vst [vmem:[#allocation2 + $0x38] sm:$0x3] %v1001_v0  ;;  %v689_v5 = vor.u32 %v688_v62, %v685_v61  ;;  %v6103_v7 = vpack.c.bf16 %v513_v56, %v513_v56  ;;  %v6104_v8 = vpack.c.bf16 %v514_v57, %v514_v57  ;;  %v693_v12 = vshrl.u32 %v6101_v4, 16  ;;  %v1014_v43 = vld [vmem:[#allocation2 + $0x50] sm:$0x3]  ;;  %v518_v54 = vld [vmem:[%s6844_s20 + $0x68] sm:$0xff] }
  0x3d   : > { %v1004_v9 = vsel %vm6864_vm10, %v680_v2, %v1003_v60  ;;  %v681_v10 = vrot.slane %v680_v2, 4  ;;  %v696_v13 = vshll.u32 %v6101_v4, 16  ;;  %v702_v15 = vshrl.u32 %v6102_v6, 16  ;;  %v5871_v55 = vld [vmem:[%s9830_s3] ss:$0 sm:$0xff]  ;;  %v519_v61 = vld [vmem:[%s6844_s20 + $0x70] sm:$0xff] }
  0x3e   : > { %1005 = vst [vmem:[#allocation2 + $0x3c] sm:$0xe] %v1004_v9  ;;  %v691_v14 = vrot.slane %v689_v5, 4  ;;  %v705_v16 = vshll.u32 %v6102_v6, 16  ;;  %v712_v17 = vshrl.u32 %v6103_v7, 16  ;;  %v695_v19 = vrot.slane %v693_v12, 6 }
  0x3f   : > { %v690_v18 = vsel %vm6870_vm11, %v681_v10, %v689_v5  ;;  %v698_v20 = vrot.slane %v696_v13, 7  ;;  %v715_v21 = vshll.u32 %v6103_v7, 16  ;;  %v704_v27 = vrot.slane %v702_v15, 6  ;;  %v1021_v58 = vld [vmem:[#allocation2 + $0x5c] sm:$0x3]  ;;  %1109 = vst.msk [vmem:[#allocation3] sm:$0xff] %vm1108_vm12, %v5871_v55 }
  0x40   : > { %1006 = vst.msk [vmem:[#allocation2 + $0x40] sm:$0xf] %vm381_vm6, %v690_v18  ;;  %v1008_v25 = vsel %vm6721_vm2, %v691_v14, %v1007_v11  ;;  %v707_v29 = vrot.slane %v705_v16, 7  ;;  %v714_v30 = vrot.slane %v712_v17, 6  ;;  %v721_v33 = vshrl.u32 %v6104_v8, 16  ;;  %v520_v13 = vld [vmem:[%s6844_s20 + $0x78] sm:$0xff] }
  0x41   : > { %1009 = vst [vmem:[#allocation2 + $0x44] sm:$0x3] %v1008_v25  ;;  %v699_v31 = vor.u32 %v698_v20, %v695_v19  ;;  %v717_v32 = vrot.slane %v715_v21, 7  ;;  %v724_v34 = vshll.u32 %v6104_v8, 16  ;;  %v6105_v37 = vpack.c.bf16 %v515_v22, %v515_v22  ;;  %1110 = vst.msk [vmem:[#allocation3 + $0x8] sm:$0xff] %vm1108_vm12, %v5871_v55  ;;  %v521_v14 = vld [vmem:[%s6844_s20 + $0x80] sm:$0xff] }
  0x42   : > { %v708_v35 = vor.u32 %v707_v29, %v704_v27  ;;  %v6902_v38 = vpack.c.bf16 %v516_v23, %v516_v23  ;;  %v6904_v40 = vpack.c.bf16 %v517_v24, %v517_v24  ;;  %v723_v45 = vrot.slane %v721_v33, 6  ;;  %1111 = vst.msk [vmem:[#allocation3 + $0x10] sm:$0xff] %vm1108_vm12, %v5871_v55  ;;  %1112 = vst.msk [vmem:[#allocation3 + $0x18] sm:$0xff] %vm1108_vm12, %v5871_v55  ;;  %v1024_v62 = vld [vmem:[#allocation2 + $0x60] sm:$0xe] }
  0x43   : > { %v1011_v41 = vsel %vm6864_vm10, %v699_v31, %v1010_v26  ;;  %v700_v42 = vrot.slane %v699_v31, 4  ;;  %v718_v44 = vor.u32 %v717_v32, %v714_v30  ;;  %v726_v47 = vrot.slane %v724_v34, 7  ;;  %1113 = vst.msk [vmem:[#allocation3 + $0x20] sm:$0xff] %vm1108_vm12, %v5871_v55  ;;  %1114 = vst.msk [vmem:[#allocation3 + $0x28] sm:$0xff] %vm1108_vm12, %v5871_v55  ;;  %v1031_v18 = vld [vmem:[#allocation2 + $0x6c] sm:$0xe] }
  0x44   : > { %1012 = vst [vmem:[#allocation2 + $0x48] sm:$0xe] %v1011_v41  ;;  %v710_v46 = vrot.slane %v708_v35, 4  ;;  %v731_v48 = vshrl.u32 %v6105_v37, 16  ;;  %v734_v49 = vshll.u32 %v6105_v37, 16  ;;  %v740_v53 = vshrl.u32 %v6902_v38, 16 }
  0x45   : > { %v709_v50 = vsel %vm6870_vm11, %v700_v42, %v708_v35  ;;  %v1018_v51 = vsel %vm6864_vm10, %v718_v44, %v1017_v36  ;;  %v719_v52 = vrot.slane %v718_v44, 4  ;;  %v727_v57 = vor.u32 %v726_v47, %v723_v45  ;;  %1115 = vst.msk [vmem:[#allocation3 + $0x30] sm:$0xff] %vm1108_vm12, %v5871_v55  ;;  %1116 = vst.msk [vmem:[#allocation3 + $0x38] sm:$0xff] %vm1108_vm12, %v5871_v55  ;;  %v1028_v24 = vld [vmem:[#allocation2 + $0x68] sm:$0x3] }
  0x46   : > { %1013 = vst.msk [vmem:[#allocation2 + $0x4c] sm:$0xf] %vm381_vm6, %v709_v50  ;;  %v1015_v56 = vsel %vm6721_vm2, %v710_v46, %v1014_v43  ;;  %1019 = vst [vmem:[#allocation2 + $0x54] sm:$0xe] %v1018_v51  ;;  %v733_v59 = vrot.slane %v731_v48, 6  ;;  %v736_v60 = vrot.slane %v734_v49, 7  ;;  %v6108_v8 = vpack.c.bf16 %v518_v54, %v518_v54 }
  0x47   : > { %1117 = vst.msk [vmem:[#allocation3 + $0x40] sm:$0xff] %vm1108_vm12, %v5871_v55  ;;  %1118 = vst.msk [vmem:[#allocation3 + $0x48] sm:$0xff] %vm1108_vm12, %v5871_v55  ;;  %v742_v63 = vrot.slane %v740_v53, 6  ;;  %v743_v0 = vshll.u32 %v6902_v38, 16  ;;  %v750_v2 = vshrl.u32 %v6904_v40, 16  ;;  %v753_v4 = vshll.u32 %v6904_v40, 16 }
  0x48   : > { %1119 = vst.msk [vmem:[#allocation3 + $0x50] sm:$0xff] %vm1108_vm12, %v5871_v55  ;;  %1120 = vst.msk [vmem:[#allocation3 + $0x58] sm:$0xff] %vm1108_vm12, %v5871_v55  ;;  %v728_v5 = vsel %vm6870_vm11, %v719_v52, %v727_v57  ;;  %v729_v6 = vrot.slane %v727_v57, 4  ;;  %v737_v7 = vor.u32 %v736_v60, %v733_v59  ;;  %v6109_v12 = vpack.c.bf16 %v519_v61, %v519_v61  ;;  %v522_v34 = vld [vmem:[%s6844_s20 + $0x88] sm:$0xff]  ;;  %v523_v40 = vld [vmem:[%s6844_s20 + $0x90] sm:$0xff] }
  0x49   : > { %1121 = vst.msk [vmem:[#allocation3 + $0x60] sm:$0xff] %vm1108_vm12, %v5871_v55  ;;  %1122 = vst.msk [vmem:[#allocation3 + $0x68] sm:$0xff] %vm1108_vm12, %v5871_v55  ;;  %v745_v9 = vrot.slane %v743_v0, 7  ;;  %v752_v10 = vrot.slane %v750_v2, 6  ;;  %v755_v11 = vrot.slane %v753_v4, 7  ;;  %v759_v19 = vshrl.u32 %v6108_v8, 16 }
  0x4a   : > { %1123 = vst.msk [vmem:[#allocation3 + $0x70] sm:$0xff] %vm1108_vm12, %v5871_v55  ;;  %1124 = vst.msk [vmem:[#allocation3 + $0x78] sm:$0xff] %vm1108_vm12, %v5871_v55  ;;  %v1022_v15 = vsel %vm6721_vm2, %v729_v6, %v1021_v58  ;;  %v1025_v16 = vsel %vm6864_vm10, %v737_v7, %v1024_v62  ;;  %v738_v17 = vrot.slane %v737_v7, 4  ;;  %v762_v22 = vshll.u32 %v6108_v8, 16  ;;  %v1038_v42 = vld [vmem:[#allocation2 + $0x78] sm:$0xe] }
  0x4b   : > { %1125 = vst.msk [vmem:[#allocation3 + $0x80] sm:$0xff] %vm1108_vm12, %v5871_v55  ;;  %1126 = vst.msk [vmem:[#allocation3 + $0x88] sm:$0xff] %vm1108_vm12, %v5871_v55  ;;  %v746_v20 = vor.u32 %v745_v9, %v742_v63  ;;  %v756_v21 = vor.u32 %v755_v11, %v752_v10  ;;  %v769_v23 = vshrl.u32 %v6109_v12, 16  ;;  %v761_v25 = vrot.slane %v759_v19, 6  ;;  %v1035_v50 = vld [vmem:[#allocation2 + $0x74] sm:$0x3] }
  0x4c   : > { %1127 = vst.msk [vmem:[#allocation3 + $0x90] sm:$0xff] %vm1108_vm12, %v5871_v55  ;;  %1128 = vst.msk [vmem:[#allocation3 + $0x98] sm:$0xff] %vm1108_vm12, %v5871_v55  ;;  %v772_v26 = vshll.u32 %v6109_v12, 16  ;;  %v6110_v27 = vpack.c.bf16 %v520_v13, %v520_v13  ;;  %v6111_v29 = vpack.c.bf16 %v521_v14, %v521_v14  ;;  %v764_v35 = vrot.slane %v762_v22, 7  ;;  %v1045_v60 = vld [vmem:[#allocation2 + $0x84] sm:$0xe] }
  0x4d   : > { %1129 = vst.msk [vmem:[#allocation3 + $0xa0] sm:$0xff] %vm1108_vm12, %v5871_v55  ;;  %1130 = vst.msk [vmem:[#allocation3 + $0xa8] sm:$0xff] %vm1108_vm12, %v5871_v55  ;;  %v747_v30 = vsel %vm6870_vm11, %v738_v17, %v746_v20  ;;  %v748_v31 = vrot.slane %v746_v20, 4  ;;  %v1032_v32 = vsel %vm6864_vm10, %v756_v21, %v1031_v18  ;;  %v757_v33 = vrot.slane %v756_v21, 4  ;;  %v1042_v4 = vld [vmem:[#allocation2 + $0x80] sm:$0x3] }
  0x4e   : > { %1131 = vst.msk [vmem:[#allocation3 + $0xb0] sm:$0xff] %vm1108_vm12, %v5871_v55  ;;  %1132 = vst.msk [vmem:[#allocation3 + $0xb8] sm:$0xff] %vm1108_vm12, %v5871_v55  ;;  %v771_v36 = vrot.slane %v769_v23, 6  ;;  %v774_v37 = vrot.slane %v772_v26, 7  ;;  %v778_v38 = vshrl.u32 %v6110_v27, 16  ;;  %v781_v43 = vshll.u32 %v6110_v27, 16 }
  0x4f   : > { %1133 = vst.msk [vmem:[#allocation3 + $0xc0] sm:$0xff] %vm1108_vm12, %v5871_v55  ;;  %1134 = vst.msk [vmem:[#allocation3 + $0xc8] sm:$0xff] %vm1108_vm12, %v5871_v55  ;;  %v1029_v41 = vsel %vm6721_vm2, %v748_v31, %v1028_v24  ;;  %v788_v44 = vshrl.u32 %v6111_v29, 16  ;;  %v791_v45 = vshll.u32 %v6111_v29, 16  ;;  %v765_v46 = vor.u32 %v764_v35, %v761_v25  ;;  %v525_v8 = vld [vmem:[%s6844_s20 + $0xa0] sm:$0xff]  ;;  %v526_v13 = vld [vmem:[%s6844_s20 + $0xa8] sm:$0xff] }
  0x50   : > { %1135 = vst.msk [vmem:[#allocation3 + $0xd0] sm:$0xff] %vm1108_vm12, %v5871_v55  ;;  %1136 = vst.msk [vmem:[#allocation3 + $0xd8] sm:$0xff] %vm1108_vm12, %v5871_v55  ;;  %v775_v47 = vor.u32 %v774_v37, %v771_v36  ;;  %v780_v48 = vrot.slane %v778_v38, 6  ;;  %v6112_v49 = vpack.c.bf16 %v522_v34, %v522_v34  ;;  %v783_v51 = vrot.slane %v781_v43, 7  ;;  %v527_v14 = vld [vmem:[%s6844_s20 + $0xb0] sm:$0xff] }
  0x51   : > { %1137 = vst.msk [vmem:[#allocation3 + $0xe0] sm:$0xff] %vm1108_vm12, %v5871_v55  ;;  %1138 = vst.msk [vmem:[#allocation3 + $0xe8] sm:$0xff] %vm1108_vm12, %v5871_v55  ;;  %v790_v52 = vrot.slane %v788_v44, 6  ;;  %v793_v53 = vrot.slane %v791_v45, 7  ;;  %v6113_v54 = vpack.c.bf16 %v523_v40, %v523_v40  ;;  %v767_v57 = vrot.slane %v765_v46, 4  ;;  %v528_v44 = vld [vmem:[%s6844_s20 + $0xb8] sm:$0xff] }
  0x52   : > { %1139 = vst.msk [vmem:[#allocation3 + $0xf0] sm:$0xff] %vm1108_vm12, %v5871_v55  ;;  %1140 = vst.msk [vmem:[#allocation3 + $0xf8] sm:$0xff] %vm1108_vm12, %v5871_v55  ;;  %v524_v55 = vld [vmem:[%s6844_s20 + $0x98] sm:$0xff]  ;;  %v1039_v58 = vsel %vm6864_vm10, %v775_v47, %v1038_v42  ;;  %v776_v59 = vrot.slane %v775_v47, 4  ;;  %v784_v61 = vor.u32 %v783_v51, %v780_v48  ;;  %v797_v63 = vshrl.u32 %v6112_v49, 16 }
  0x53   : > { %1016 = vst [vmem:[#allocation2 + $0x50] sm:$0x3] %v1015_v56  ;;  %1020 = vst.msk [vmem:[#allocation2 + $0x58] sm:$0xf] %vm381_vm6, %v728_v5  ;;  %v766_v56 = vsel %vm6870_vm11, %v757_v33, %v765_v46  ;;  %v794_v62 = vor.u32 %v793_v53, %v790_v52  ;;  %v800_v0 = vshll.u32 %v6112_v49, 16  ;;  %v1036_v2 = vsel %vm6721_vm2, %v767_v57, %v1035_v50  ;;  %v529_v50 = vld [vmem:[%s6844_s20 + $0xc0] sm:$0xff] }
  0x54   : > { %1023 = vst [vmem:[#allocation2 + $0x5c] sm:$0x3] %v1022_v15  ;;  %1026 = vst [vmem:[#allocation2 + $0x60] sm:$0xe] %v1025_v16  ;;  %v807_v5 = vshrl.u32 %v6113_v54, 16  ;;  %v810_v6 = vshll.u32 %v6113_v54, 16  ;;  %v6114_v7 = vpack.c.bf16 %v524_v55, %v524_v55  ;;  %v785_v9 = vsel %vm6870_vm11, %v776_v59, %v784_v61 }
  0x55   : > { %1027 = vst.msk [vmem:[#allocation2 + $0x64] sm:$0xf] %vm381_vm6, %v747_v30  ;;  %1033 = vst [vmem:[#allocation2 + $0x6c] sm:$0xe] %v1032_v32  ;;  %v786_v10 = vrot.slane %v784_v61, 4  ;;  %v1046_v11 = vsel %vm6864_vm10, %v794_v62, %v1045_v60  ;;  %v795_v12 = vrot.slane %v794_v62, 4  ;;  %v6115_v23 = vpack.c.bf16 %v525_v8, %v525_v8 }
  0x56   : > { %1030 = vst [vmem:[#allocation2 + $0x68] sm:$0x3] %v1029_v41  ;;  %1034 = vst.msk [vmem:[#allocation2 + $0x70] sm:$0xf] %vm381_vm6, %v766_v56  ;;  %v799_v15 = vrot.slane %v797_v63, 6  ;;  %v802_v16 = vrot.slane %v800_v0, 7  ;;  %v6116_v26 = vpack.c.bf16 %v526_v13, %v526_v13  ;;  %v6117_v27 = vpack.c.bf16 %v527_v14, %v527_v14 }
  0x57   : > { %1040 = vst [vmem:[#allocation2 + $0x78] sm:$0xe] %v1039_v58  ;;  %1037 = vst [vmem:[#allocation2 + $0x74] sm:$0x3] %v1036_v2  ;;  %v809_v17 = vrot.slane %v807_v5, 6  ;;  %v812_v18 = vrot.slane %v810_v6, 7  ;;  %v1043_v19 = vsel %vm6721_vm2, %v786_v10, %v1042_v4  ;;  %v6118_v58 = vpack.c.bf16 %v528_v44, %v528_v44 }
  0x58   : > { %1041 = vst.msk [vmem:[#allocation2 + $0x7c] sm:$0xf] %vm381_vm6, %v785_v9  ;;  %1047 = vst [vmem:[#allocation2 + $0x84] sm:$0xe] %v1046_v11  ;;  %v1052_v20 = vld [vmem:[#allocation2 + $0x90] sm:$0xe]  ;;  %v803_v24 = vor.u32 %v802_v16, %v799_v15  ;;  %v6119_v2 = vpack.c.bf16 %v529_v50, %v529_v50 }
  0x59   : > { %v816_v21 = vshrl.u32 %v6114_v7, 16  ;;  %v819_v22 = vshll.u32 %v6114_v7, 16  ;;  %1044 = vst [vmem:[#allocation2 + $0x80] sm:$0x3] %v1043_v19  ;;  %v813_v25 = vor.u32 %v812_v18, %v809_v17  ;;  %v1049_v29 = vld [vmem:[#allocation2 + $0x8c] sm:$0x3] }
  0x5a   : > { %v826_v32 = vshrl.u32 %v6115_v23, 16  ;;  %v829_v33 = vshll.u32 %v6115_v23, 16  ;;  %v804_v34 = vsel %vm6870_vm11, %v795_v12, %v803_v24  ;;  %v805_v35 = vrot.slane %v803_v24, 4  ;;  %v1056_v40 = vld [vmem:[#allocation2 + $0x98] sm:$0x3]  ;;  %v530_v59 = vld [vmem:[%s6844_s20 + $0xc8] sm:$0xff] }
  0x5b   : > { %v818_v30 = vrot.slane %v816_v21, 6  ;;  %v821_v31 = vrot.slane %v819_v22, 7  ;;  %v1053_v36 = vsel %vm6864_vm10, %v813_v25, %v1052_v20  ;;  %v814_v37 = vrot.slane %v813_v25, 4  ;;  %1048 = vst.msk [vmem:[#allocation2 + $0x88] sm:$0xf] %vm381_vm6, %v804_v34  ;;  %v531_v60 = vld [vmem:[%s6844_s20 + $0xd0] sm:$0xff] }
  0x5c   : > { %1054 = vst [vmem:[#allocation2 + $0x90] sm:$0xe] %v1053_v36  ;;  %v828_v41 = vrot.slane %v826_v32, 6  ;;  %v831_v42 = vrot.slane %v829_v33, 7  ;;  %v835_v43 = vshrl.u32 %v6116_v26, 16  ;;  %v1050_v45 = vsel %vm6721_vm2, %v805_v35, %v1049_v29  ;;  %v532_v17 = vld [vmem:[%s6844_s20 + $0xd8] sm:$0xff] }
  0x5d   : > { %v822_v38 = vor.u32 %v821_v31, %v818_v30  ;;  %v1059_v46 = vld [vmem:[#allocation2 + $0x9c] sm:$0xe]  ;;  %v838_v47 = vshll.u32 %v6116_v26, 16  ;;  %v845_v48 = vshrl.u32 %v6117_v27, 16  ;;  %v848_v49 = vshll.u32 %v6117_v27, 16  ;;  %v533_v22 = vld [vmem:[%s6844_s20 + $0xe0] sm:$0xff] }
  0x5e   : > { %1051 = vst [vmem:[#allocation2 + $0x8c] sm:$0x3] %v1050_v45  ;;  %v832_v53 = vor.u32 %v831_v42, %v828_v41  ;;  %v837_v54 = vrot.slane %v835_v43, 6  ;;  %v1066_v0 = vld [vmem:[#allocation2 + $0xa8] sm:$0xe]  ;;  %v854_v6 = vshrl.u32 %v6118_v58, 16  ;;  %v6120_v11 = vpack.c.bf16 %v530_v59, %v530_v59 }
  0x5f   : > { %v823_v51 = vsel %vm6870_vm11, %v814_v37, %v822_v38  ;;  %v824_v52 = vrot.slane %v822_v38, 4  ;;  %v840_v55 = vrot.slane %v838_v47, 7  ;;  %v847_v56 = vrot.slane %v845_v48, 6  ;;  %v1063_v8 = vld [vmem:[#allocation2 + $0xa4] sm:$0x3]  ;;  %v534_v38 = vld [vmem:[%s6844_s20 + $0xe8] sm:$0xff] }
  0x60   : > { %1055 = vst.msk [vmem:[#allocation2 + $0x94] sm:$0xf] %vm381_vm6, %v823_v51  ;;  %v850_v57 = vrot.slane %v848_v49, 7  ;;  %v1060_v62 = vsel %vm6864_vm10, %v832_v53, %v1059_v46  ;;  %v833_v63 = vrot.slane %v832_v53, 4  ;;  %v857_v7 = vshll.u32 %v6118_v58, 16  ;;  %v535_v58 = vld [vmem:[%s6844_s20 + $0xf0] sm:$0xff] }
  0x61   : > { %v1057_v61 = vsel %vm6721_vm2, %v824_v52, %v1056_v40  ;;  %1061 = vst [vmem:[#allocation2 + $0x9c] sm:$0xe] %v1060_v62  ;;  %v841_v4 = vor.u32 %v840_v55, %v837_v54  ;;  %v864_v9 = vshrl.u32 %v6119_v2, 16  ;;  %v867_v10 = vshll.u32 %v6119_v2, 16  ;;  %v1073_v24 = vld [vmem:[#allocation2 + $0xb4] sm:$0xe] }
  0x62   : > { %1058 = vst [vmem:[#allocation2 + $0x98] sm:$0x3] %v1057_v61  ;;  %v851_v5 = vor.u32 %v850_v57, %v847_v56  ;;  %v6121_v12 = vpack.c.bf16 %v531_v60, %v531_v60  ;;  %v856_v18 = vrot.slane %v854_v6, 6  ;;  %v859_v19 = vrot.slane %v857_v7, 7  ;;  %v1070_v33 = vld [vmem:[#allocation2 + $0xb0] sm:$0x3] }
  0x63   : > { %v842_v13 = vsel %vm6870_vm11, %v833_v63, %v841_v4  ;;  %v843_v14 = vrot.slane %v841_v4, 4  ;;  %v866_v20 = vrot.slane %v864_v9, 6  ;;  %v869_v21 = vrot.slane %v867_v10, 7  ;;  %v1077_v49 = vld [vmem:[#allocation2 + $0xbc] sm:$0x3] }
  0x64   : > { %v1067_v15 = vsel %vm6864_vm10, %v851_v5, %v1066_v0  ;;  %v852_v16 = vrot.slane %v851_v5, 4  ;;  %1062 = vst.msk [vmem:[#allocation2 + $0xa0] sm:$0xf] %vm381_vm6, %v842_v13  ;;  %v873_v25 = vshrl.u32 %v6120_v11, 16  ;;  %v876_v26 = vshll.u32 %v6120_v11, 16  ;;  %v536_v63 = vld [vmem:[%s6844_s20 + $0xf8] sm:$0xff] }
  0x65   : > { %1068 = vst [vmem:[#allocation2 + $0xa8] sm:$0xe] %v1067_v15  ;;  %v1064_v23 = vsel %vm6721_vm2, %v843_v14, %v1063_v8  ;;  %v883_v27 = vshrl.u32 %v6121_v12, 16  ;;  %v860_v29 = vor.u32 %v859_v19, %v856_v18  ;;  %v870_v30 = vor.u32 %v869_v21, %v866_v20  ;;  %v1080_v50 = vld [vmem:[#allocation2 + $0xc0] sm:$0xe] }
  0x66   : > { %1065 = vst [vmem:[#allocation2 + $0xa4] sm:$0x3] %v1064_v23  ;;  %v886_v31 = vshll.u32 %v6121_v12, 16  ;;  %v6122_v32 = vpack.c.bf16 %v532_v17, %v532_v17  ;;  %v875_v34 = vrot.slane %v873_v25, 6  ;;  %v878_v35 = vrot.slane %v876_v26, 7 }
  0x67   : > { %v885_v36 = vrot.slane %v883_v27, 6  ;;  %v6123_v37 = vpack.c.bf16 %v533_v22, %v533_v22  ;;  %v861_v40 = vsel %vm6870_vm11, %v852_v16, %v860_v29  ;;  %v862_v41 = vrot.slane %v860_v29, 4  ;;  %v1087_v5 = vld [vmem:[#allocation2 + $0xcc] sm:$0xe]  ;;  %v1084_v11 = vld [vmem:[#allocation2 + $0xc8] sm:$0x3] }
  0x68   : > { %v1074_v42 = vsel %vm6864_vm10, %v870_v30, %v1073_v24  ;;  %v871_v43 = vrot.slane %v870_v30, 4  ;;  %1069 = vst.msk [vmem:[#allocation2 + $0xac] sm:$0xf] %vm381_vm6, %v861_v40  ;;  %v879_v44 = vor.u32 %v878_v35, %v875_v34  ;;  %v888_v45 = vrot.slane %v886_v31, 7  ;;  %v1091_v23 = vld [vmem:[#allocation2 + $0xd4] sm:$0x3] }
  0x69   : > { %1075 = vst [vmem:[#allocation2 + $0xb4] sm:$0xe] %v1074_v42  ;;  %v892_v46 = vshrl.u32 %v6122_v32, 16  ;;  %v895_v47 = vshll.u32 %v6122_v32, 16  ;;  %v1071_v48 = vsel %vm6721_vm2, %v862_v41, %v1070_v33  ;;  %v902_v51 = vshrl.u32 %v6123_v37, 16 }
  0x6a   : > { %v905_v52 = vshll.u32 %v6123_v37, 16  ;;  %v6124_v53 = vpack.c.bf16 %v534_v38, %v534_v38  ;;  %1072 = vst [vmem:[#allocation2 + $0xb0] sm:$0x3] %v1071_v48  ;;  %v880_v54 = vsel %vm6870_vm11, %v871_v43, %v879_v44  ;;  %v881_v55 = vrot.slane %v879_v44, 4  ;;  %v1094_v30 = vld [vmem:[#allocation2 + $0xd8] sm:$0xe] }
  0x6b   : > { %v889_v56 = vor.u32 %v888_v45, %v885_v36  ;;  %v894_v57 = vrot.slane %v892_v46, 6  ;;  %1076 = vst.msk [vmem:[#allocation2 + $0xb8] sm:$0xf] %vm381_vm6, %v880_v54  ;;  %v897_v59 = vrot.slane %v895_v47, 7  ;;  %v904_v60 = vrot.slane %v902_v51, 6 }
  0x6c   : > { %v907_v61 = vrot.slane %v905_v52, 7  ;;  %v911_v62 = vshrl.u32 %v6124_v53, 16  ;;  %v1078_v0 = vsel %vm6721_vm2, %v881_v55, %v1077_v49  ;;  %v914_v6 = vshll.u32 %v6124_v53, 16  ;;  %v1098_v38 = vld [vmem:[#allocation2 + $0xe0] sm:$0x3] }
  0x6d   : > { %v1081_v2 = vsel %vm6864_vm10, %v889_v56, %v1080_v50  ;;  %v890_v4 = vrot.slane %v889_v56, 4  ;;  %1079 = vst [vmem:[#allocation2 + $0xbc] sm:$0x3] %v1078_v0  ;;  %v898_v7 = vor.u32 %v897_v59, %v894_v57  ;;  %v6125_v10 = vpack.c.bf16 %v535_v58, %v535_v58 }
  0x6e   : > { %1082 = vst [vmem:[#allocation2 + $0xc0] sm:$0xe] %v1081_v2  ;;  %v908_v8 = vor.u32 %v907_v61, %v904_v60  ;;  %v913_v9 = vrot.slane %v911_v62, 6  ;;  %v916_v12 = vrot.slane %v914_v6, 7  ;;  %v6126_v13 = vpack.c.bf16 %v536_v63, %v536_v63 }
  0x6f   : > { %v899_v14 = vsel %vm6870_vm11, %v890_v4, %v898_v7  ;;  %v900_v15 = vrot.slane %v898_v7, 4  ;;  %v921_v19 = vshrl.u32 %v6125_v10, 16  ;;  %v924_v20 = vshll.u32 %v6125_v10, 16 }
  0x70   : > { %v1088_v16 = vsel %vm6864_vm10, %v908_v8, %v1087_v5  ;;  %v909_v17 = vrot.slane %v908_v8, 4  ;;  %1083 = vst.msk [vmem:[#allocation2 + $0xc4] sm:$0xf] %vm381_vm6, %v899_v14  ;;  %v917_v18 = vor.u32 %v916_v12, %v913_v9  ;;  %v930_v21 = vshrl.u32 %v6126_v13, 16 }
  0x71   : > { %1089 = vst [vmem:[#allocation2 + $0xcc] sm:$0xe] %v1088_v16  ;;  %v1085_v22 = vsel %vm6721_vm2, %v900_v15, %v1084_v11  ;;  %v933_v24 = vshll.u32 %v6126_v13, 16  ;;  %v923_v27 = vrot.slane %v921_v19, 6  ;;  %v926_v29 = vrot.slane %v924_v20, 7 }
  0x72   : > { %1086 = vst [vmem:[#allocation2 + $0xc8] sm:$0x3] %v1085_v22  ;;  %v918_v25 = vsel %vm6870_vm11, %v909_v17, %v917_v18  ;;  %v919_v26 = vrot.slane %v917_v18, 4  ;;  %v932_v31 = vrot.slane %v930_v21, 6 }
  0x73   : > { %1090 = vst.msk [vmem:[#allocation2 + $0xd0] sm:$0xf] %vm381_vm6, %v918_v25  ;;  %v935_v32 = vrot.slane %v933_v24, 7  ;;  %v927_v34 = vor.u32 %v926_v29, %v923_v27 }
  0x74   : > { %v1092_v33 = vsel %vm6721_vm2, %v919_v26, %v1091_v23 }
  0x75   : > { %1093 = vst [vmem:[#allocation2 + $0xd4] sm:$0x3] %v1092_v33  ;;  %v936_v35 = vor.u32 %v935_v32, %v932_v31  ;;  %v1095_v36 = vsel %vm6864_vm10, %v927_v34, %v1094_v30  ;;  %v928_v37 = vrot.slane %v927_v34, 4 }
  0x76   : > { %1096 = vst [vmem:[#allocation2 + $0xd8] sm:$0xe] %v1095_v36 }
  0x77   : > { %v938_v40 = vrot.slane %v936_v35, 4  ;;  %v937_v41 = vsel %vm6870_vm11, %v928_v37, %v936_v35 }
  0x78   : > { %1097 = vst.msk [vmem:[#allocation2 + $0xdc] sm:$0xf] %vm381_vm6, %v937_v41 }
  0x79   : > { %v1099_v42 = vsel %vm6721_vm2, %v938_v40, %v1098_v38 }
  0x7a   : > { %1100 = vst [vmem:[#allocation2 + $0xe0] sm:$0x3] %v1099_v42 }
  0x7b LB: >> { %vm1649_vm13 = vcmask 1042432   ;;  %vm1650_vm14 = vcmask 1046532   ;;  %s6127_s30 = smul.u32 12, %s6650_s29  ;;  %vm2746_vm0 = vcmask 1040384   ;;  %vm2747_vm1 = vcmask 1044484   ;;  %s6653_s12 = smov 64   ;;  %s6650_s29 = sphi %s7055_s29, %s1146_s29  }
  0x7c   : >> { %vm7061_vm15 = vmor %vm1649_vm13, %vm1650_vm14  ;;  %vm1198_vm3 = vsmask.f32 3328  ;;  %vm1199_vm4 = vsmask.f32 7440  ;;  %vm1780_vm6 = vsmask.f32 2304 }
  0x7d   : >> { %s7065_s11 = scalar_lea.vmem [#allocation2], %s6127_s30  ;;  %vm7102_vm2 = vmor %vm2746_vm0, %vm2747_vm1  ;;  %vm1781_vm7 = vsmask.f32 6416  ;;  %s6654_s14 = smov 32   ;;  %vm2199_vm9 = vcmask 1041408   ;;  %vm2200_vm10 = vcmask 1045508  }
  0x7e   : >> { %vm7146_vm5 = vmor %vm1198_vm3, %vm1199_vm4  ;;  %s6655_s15 = smov 96   ;;  %s6128_s16 = sshll.u32 %s6650_s29, 7  ;;  %vm3421_vm14 = vcmask 523264   ;;  %vm3454_vm0 = vcmask 785408  }
  0x7f   : >> { %vm7180_vm8 = vmor %vm1780_vm6, %vm1781_vm7  ;;  %s7268_s19 = scalar_lea.vmem %s9829_s2, %s6128_s16  ;;  %s1146_s29 = sadd.s32 1, %s6650_s29  }
  0x80   : >> { %vm7930_vm13 = vmor %vm2199_vm9, %vm2200_vm10  ;;  %p1143_p4 = scmp.ge.s32.totalorder %s1146_s29, 7  }
  0x81   : >> { %v7068_v1 = vld [vmem:[%s7065_s11 + $0x64] sm:$0xf]  ;;  %v7071_v43 = vld [vmem:[%s7065_s11 + $0x68] sm:$0x1]  ;;  %v7074_v44 = vld [vmem:[%s7065_s11 + $0x60] sm:$0xe] }
  0x82   : >> { %v1413_v45 = vshll.u32 %v7071_v43, 16  ;;  %v5881_v46 = vrot.slane %v7074_v44, 9  ;;  %v1710_v47 = vrot.slane %v7068_v1, 5  ;;  %v1713_v48 = vrot.slane %v7071_v43, 5  ;;  %v1151_v49 = vld [vmem:[%s7065_s11 + $0x4] sm:$0xf] }
  0x83   : >> { %v1968_v50 = vshrl.u32 %v7074_v44, 16  ;;  %v1971_v51 = vshll.u32 %v7074_v44, 16  ;;  %v7084_v52 = vld [vmem:[%s7065_s11 + $0x8] sm:$0x1]  ;;  %v7087_v53 = vld [vmem:[%s7065_s11] sm:$0xe] }
  0x84   : >> { %v1711_v54 = vsel %vm7061_vm15, %v5881_v46, %v1710_v47  ;;  %v1712_v55 = vrot.slane %v1710_v47, 4  ;;  %v1221_v56 = vshll.u32 %v7084_v52, 16  ;;  %v5873_v57 = vrot.slane %v7087_v53, 9  ;;  %v7094_v58 = vld [vmem:[%s7065_s11 + $0x68] sm:$0x7] }
  0x85   : >> { %v1654_v59 = vrot.slane %v1151_v49, 5  ;;  %v1657_v60 = vrot.slane %v7084_v52, 5  ;;  %v1784_v61 = vshrl.u32 %v7087_v53, 16  ;;  %v1787_v62 = vshll.u32 %v7087_v53, 16  ;;  %v2706_v63 = vld [vmem:[%s7065_s11 + $0x60] sm:$0x8] }
  0x86   : >> { %v1714_v2 = vsel %vm7061_vm15, %v1712_v55, %v1713_v48  ;;  %v5913_v4 = vrot.slane %v2706_v63, 11  ;;  %v2807_v5 = vrot.slane %v7068_v1, 7  ;;  %v2810_v6 = vrot.slane %v7094_v58, 7  ;;  %v2314_v7 = vld [vmem:[%s7065_s11 + $0x8] sm:$0x7] }
  0x87   : >> { %v5961_v8 = vcombine.low %v1711_v54, %v1714_v2  ;;  %v1655_v9 = vsel %vm7061_vm15, %v5873_v57, %v1654_v59  ;;  %v1656_v10 = vrot.slane %v1654_v59, 4  ;;  %v2698_v11 = vld [vmem:[%s7065_s11] sm:$0x8]  ;;  %v2751_v12 = vrot.slane %v1151_v49, 7 }
  0x88   : >> { %v2151_v13 = vld [vmem:[%s7065_s11] sm:$0xc]  ;;  %v2808_v14 = vsel %vm7102_vm2, %v5913_v4, %v2807_v5  ;;  %v2809_v15 = vrot.slane %v2807_v5, 4  ;;  %v5905_v16 = vrot.slane %v2698_v11, 11  ;;  %v2754_v17 = vrot.slane %v2314_v7, 7 }
  0x89   : >> { %3069 = vrot.lane.b32.xlu1 %v5961_v8, %s6653_s12  ;;  %v1658_v18 = vsel %vm7061_vm15, %v1656_v10, %v1657_v60  ;;  %v2753_v19 = vrot.slane %v2751_v12, 4  ;;  %v7120_v20 = vshll.u32 %v1151_v49, 16  ;;  %v7122_v21 = vshrl.u32 %v1151_v49, 16  ;;  %v1150_v26 = vld [vmem:[%s7065_s11] sm:$0xf] }
  0x8a   : >> { %v5953_v22 = vcombine.low %v1655_v9, %v1658_v18  ;;  %v2811_v23 = vsel %vm7102_vm2, %v2809_v15, %v2810_v6  ;;  %v2752_v24 = vsel %vm7102_vm2, %v5905_v16, %v2751_v12  ;;  %v2331_v25 = vshrl.u32 %v2151_v13, 16  ;;  %v2159_v57 = vld [vmem:[%s7065_s11 + $0x60] sm:$0xc] }
  0x8b   : >> { %v6025_v27 = vcombine.low %v2808_v14, %v2811_v23  ;;  %v2755_v29 = vsel %vm7102_vm2, %v2753_v19, %v2754_v17  ;;  %v2334_v30 = vshll.u32 %v2151_v13, 16  ;;  %v2339_v31 = vrot.slane %v7122_v21, 6  ;;  %v1166_v15 = vld [vmem:[%s7065_s11 + $0x60] sm:$0xf] }
  0x8c   : >> { %3053 = vrot.lane.b32.xlu0 %v5953_v22, %s6653_s12  ;;  %v6017_v32 = vcombine.low %v2752_v24, %v2755_v29  ;;  %v2333_v33 = vrot.slane %v2331_v25, 6  ;;  %v2340_v34 = vrot.slane %v7120_v20, 7  ;;  %v2345_v35 = vshrl.u32 %v2314_v7, 16 }
  0x8d   : >> { %3357 = vrot.lane.b32.xlu1 %v6025_v27, %s6653_s12  ;;  %v2336_v36 = vrot.slane %v2334_v30, 7  ;;  %v2348_v37 = vshll.u32 %v2314_v7, 16  ;;  %v1202_v38 = vshrl.u32 %v1150_v26, 16  ;;  %v1205_v40 = vshll.u32 %v1150_v26, 16 }
  0x8e   : >> { %v2341_v41 = vor.u32 %v2340_v34, %v2339_v31  ;;  %v2347_v42 = vrot.slane %v2345_v35, 6  ;;  %v1213_v46 = vrot.slane %v7120_v20, 5  ;;  %v1217_v47 = vrot.slane %v7122_v21, 4 }
  0x8f   : >> { %v2337_v48 = vor.u32 %v2336_v36, %v2333_v33  ;;  %v2350_v49 = vrot.slane %v2348_v37, 7  ;;  %v1204_v54 = vrot.slane %v1202_v38, 4  ;;  %v1207_v55 = vrot.slane %v1205_v40, 5 }
  0x90   : >> { %3341 = vrot.lane.b32.xlu0 %v6017_v32, %s6653_s12  ;;  %v2343_v59 = vrot.slane %v2341_v41, 4  ;;  %v1218_v60 = vor.u32 %v1217_v47, %v1213_v46  ;;  %v1223_v63 = vrot.slane %v1221_v56, 5  ;;  %v7142_v2 = vshll.u32 %v7068_v1, 16 }
  0x91   : >> { %v2338_v4 = vrot.slane %v2337_v48, 4  ;;  %v2351_v5 = vor.u32 %v2350_v49, %v2347_v42  ;;  %v1208_v7 = vor.u32 %v1207_v55, %v1204_v54  ;;  %v1407_v8 = vshrl.u32 %v7068_v1, 16 }
  0x92   : >> { %v1219_v9 = vrot.slane %v1218_v60, 4  ;;  %v2515_v52 = vshrl.u32 %v2159_v57, 16  ;;  %v2518_v56 = vshll.u32 %v2159_v57, 16  ;;  %v2524_v10 = vrot.slane %v7142_v2, 7 }
  0x93   : >> { %v2342_v11 = vsel %vm6870_vm11, %v2338_v4, %v2341_v41  ;;  %v2352_v12 = vsel %vm6870_vm11, %v2343_v59, %v2351_v5  ;;  %v1209_v13 = vrot.slane %v1208_v7, 4  ;;  %v2523_v14 = vrot.slane %v1407_v8, 6  ;;  %v1764_v5 = vld [vmem:[%s7065_s11 + $0x8] sm:$0x3] }
  0x94   : >> { %v6001_v16 = vcombine.low %v2342_v11, %v2352_v12  ;;  %v1224_v1 = vsel %vm7146_vm5, %v1219_v9, %v1223_v63  ;;  %v2517_v17 = vrot.slane %v2515_v52, 6  ;;  %v2520_v18 = vrot.slane %v2518_v56, 7  ;;  %v1168_v56 = vld [vmem:[%s7065_s11 + $0x6c] sm:$0xf] }
  0x95   : >> { %v1214_v19 = vsel %vm7146_vm5, %v1209_v13, %v1213_v46  ;;  %v2525_v22 = vor.u32 %v2524_v10, %v2523_v14  ;;  %v2529_v23 = vshrl.u32 %v7094_v58, 16  ;;  %v2532_v24 = vshll.u32 %v7094_v58, 16  ;;  %v1772_v58 = vld [vmem:[%s7065_s11 + $0x68] sm:$0x3]  ;;  %v7196_v10 = vld [vmem:[%s7065_s11 + $0x70] sm:$0xf] }
  0x96   : >> { %3261 = vrot.lane.b32.xlu1 %v6001_v16, %s6654_s14  ;;  %v5937_v25 = vcombine.low %v1214_v19, %v1224_v1  ;;  %v2521_v26 = vor.u32 %v2520_v18, %v2517_v17  ;;  %v1394_v27 = vshrl.u32 %v1166_v15, 16  ;;  %v1397_v29 = vshll.u32 %v1166_v15, 16 }
  0x97   : >> { %v2527_v30 = vrot.slane %v2525_v22, 4  ;;  %v2531_v31 = vrot.slane %v2529_v23, 6  ;;  %v2534_v32 = vrot.slane %v2532_v24, 7  ;;  %v1405_v33 = vrot.slane %v7142_v2, 5  ;;  %v7209_v24 = vld [vmem:[%s7065_s11 + $0x74] sm:$0x1] }
  0x98   : >> { %2973 = vrot.lane.b32.xlu0 %v5937_v25, %s6654_s14  ;;  %v2522_v34 = vrot.slane %v2521_v26, 4  ;;  %v1396_v35 = vrot.slane %v1394_v27, 4  ;;  %v1399_v36 = vrot.slane %v1397_v29, 5  ;;  %v1409_v37 = vrot.slane %v1407_v8, 4 }
  0x99   : >> { %v2535_v38 = vor.u32 %v2534_v32, %v2531_v31  ;;  %v1415_v40 = vrot.slane %v1413_v45, 5  ;;  %v1970_v41 = vrot.slane %v1968_v50, 5  ;;  %v1973_v42 = vrot.slane %v1971_v51, 6 }
  0x9a   : >> { %v2526_v46 = vsel %vm6870_vm11, %v2522_v34, %v2525_v22  ;;  %v1400_v47 = vor.u32 %v1399_v36, %v1396_v35  ;;  %v1410_v48 = vor.u32 %v1409_v37, %v1405_v33  ;;  %v1976_v49 = vrot.slane %v1407_v8, 5 }
  0x9b   : >> { %v2536_v54 = vsel %vm6870_vm11, %v2527_v30, %v2535_v38  ;;  %v1974_v55 = vor.u32 %v1973_v42, %v1970_v41  ;;  %v1977_v43 = vrot.slane %v7142_v2, 6  ;;  %v1982_v45 = vshrl.u32 %v1772_v58, 16  ;;  %v7213_v30 = vld [vmem:[%s7065_s11 + $0x10] sm:$0xf] }
  0x9c   : >> { %v6009_v57 = vcombine.low %v2526_v46, %v2536_v54  ;;  %v1401_v50 = vrot.slane %v1400_v47, 4  ;;  %v1411_v44 = vrot.slane %v1410_v48, 4  ;;  %v1985_v59 = vshll.u32 %v1772_v58, 16  ;;  %v7224_v58 = vld [vmem:[%s7065_s11 + $0x14] sm:$0x1] }
  0x9d   : >> { %v1975_v60 = vrot.slane %v1974_v55, 4  ;;  %v1978_v63 = vor.u32 %v1977_v43, %v1976_v49  ;;  %v1984_v4 = vrot.slane %v1982_v45, 5  ;;  %v1786_v2 = vrot.slane %v1784_v61, 5  ;;  %v2160_v47 = vld [vmem:[%s7065_s11 + $0x6c] sm:$0xc] }
  0x9e   : >> { %3277 = vrot.lane.b32.xlu1 %v6009_v57, %s6654_s14  ;;  %v1406_v7 = vsel %vm7146_vm5, %v1401_v50, %v1405_v33  ;;  %v1416_v8 = vsel %vm7146_vm5, %v1411_v44, %v1415_v40  ;;  %v1987_v9 = vrot.slane %v1985_v59, 6  ;;  %v1789_v52 = vrot.slane %v1787_v62, 6 }
  0x9f   : >> { %v5945_v11 = vcombine.low %v1406_v7, %v1416_v8  ;;  %v1979_v12 = vsel %vm7180_vm8, %v1975_v60, %v1978_v63  ;;  %v1980_v61 = vrot.slane %v1978_v63, 4  ;;  %v1792_v13 = vrot.slane %v7122_v21, 5  ;;  %v7242_v63 = vld [vmem:[%s7065_s11 + $0x74] sm:$0x7] }
  0xa0   : >> { %v1988_v14 = vor.u32 %v1987_v9, %v1984_v4  ;;  %v1790_v15 = vor.u32 %v1789_v52, %v1786_v2  ;;  %v1793_v16 = vrot.slane %v7120_v20, 6  ;;  %v1798_v1 = vshrl.u32 %v1764_v5, 16  ;;  %v1152_v20 = vld [vmem:[%s7065_s11 + $0xc] sm:$0xf] }
  0xa1   : >> { %2989 = vrot.lane.b32.xlu0 %v5945_v11, %s6654_s14  ;;  %v1801_v53 = vshll.u32 %v1764_v5, 16  ;;  %v1418_v62 = vshrl.u32 %v1168_v56, 16  ;;  %v1421_v17 = vshll.u32 %v1168_v56, 16  ;;  %v7204_v18 = vshll.u32 %v7196_v10, 16 }
  0xa2   : >> { %v1989_v19 = vsel %vm7180_vm8, %v1980_v61, %v1988_v14  ;;  %v1791_v22 = vrot.slane %v1790_v15, 4  ;;  %v1794_v23 = vor.u32 %v1793_v16, %v1792_v13  ;;  %v1800_v21 = vrot.slane %v1798_v1, 5 }
  0xa3   : >> { %v5977_v25 = vcombine.low %v1979_v12, %v1989_v19  ;;  %v1803_v26 = vrot.slane %v1801_v53, 6  ;;  %v1420_v27 = vrot.slane %v1418_v62, 4  ;;  %v1423_v29 = vrot.slane %v1421_v17, 5  ;;  %v2152_v12 = vld [vmem:[%s7065_s11 + $0xc] sm:$0xc] }
  0xa4   : >> { %v1795_v31 = vsel %vm7180_vm8, %v1791_v22, %v1794_v23  ;;  %v1796_v32 = vrot.slane %v1794_v23, 4  ;;  %v1429_v33 = vrot.slane %v7204_v18, 5  ;;  %v7219_v34 = vshrl.u32 %v7196_v10, 16  ;;  %v7255_v23 = vld [vmem:[%s7065_s11 + $0x14] sm:$0x7] }
  0xa5   : >> { %3149 = vrot.lane.b32.xlu1 %v5977_v25, %s6655_s15  ;;  %v1804_v35 = vor.u32 %v1803_v26, %v1800_v21  ;;  %v1424_v36 = vor.u32 %v1423_v29, %v1420_v27  ;;  %v1437_v37 = vshll.u32 %v7209_v24, 16  ;;  %v1226_v38 = vshrl.u32 %v1152_v20, 16  ;;  %v7261_v29 = vld [vmem:[%s7065_s11 + $0x6c] sm:$0xe] }
  0xa6   : >> { %v1433_v40 = vrot.slane %v7219_v34, 4  ;;  %v1229_v41 = vshll.u32 %v1152_v20, 16  ;;  %v7228_v42 = vshll.u32 %v7213_v30, 16  ;;  %v7231_v46 = vshrl.u32 %v7213_v30, 16 }
  0xa7   : >> { %v1805_v48 = vsel %vm7180_vm8, %v1796_v32, %v1804_v35  ;;  %v1425_v49 = vrot.slane %v1424_v36, 4  ;;  %v1439_v54 = vrot.slane %v1437_v37, 5  ;;  %v1228_v55 = vrot.slane %v1226_v38, 4 }
  0xa8   : >> { %v5969_v43 = vcombine.low %v1795_v31, %v1805_v48  ;;  %v1434_v45 = vor.u32 %v1433_v40, %v1429_v33  ;;  %v1231_v57 = vrot.slane %v1229_v41, 5  ;;  %v1237_v50 = vrot.slane %v7228_v42, 5  ;;  %v6352_v41 = vld [vmem:[%s7268_s19 + $0x40] sm:$0xff]  }
  0xa9   : >> { %v1430_v44 = vsel %vm7146_vm5, %v1425_v49, %v1429_v33  ;;  %v1241_v59 = vrot.slane %v7231_v46, 4  ;;  %v1245_v60 = vshll.u32 %v7224_v58, 16  ;;  %v2538_v4 = vshrl.u32 %v2160_v47, 16  ;;  %6129 = vmatprep.subr.bf16.mxu0 %v6352_v41  ;;  %6315 = vmatprep.subr.bf16.mxu1 %v6352_v41 }
  0xaa   : >> { %3133 = vrot.lane.b32.xlu0 %v5969_v43, %s6655_s15  ;;  %v1435_v5 = vrot.slane %v1434_v45, 4  ;;  %v1232_v2 = vor.u32 %v1231_v57, %v1228_v55  ;;  %v2541_v7 = vshll.u32 %v2160_v47, 16  ;;  %v2546_v8 = vrot.slane %v7219_v34, 6  ;;  %v7280_v55 = vld [vmem:[%s7065_s11 + $0xc] sm:$0xe] }
  0xab   : >> { %v1242_v9 = vor.u32 %v1241_v59, %v1237_v50  ;;  %v1247_v52 = vrot.slane %v1245_v60, 5  ;;  %v2540_v56 = vrot.slane %v2538_v4, 6  ;;  %v2547_v11 = vrot.slane %v7204_v18, 7 }
  0xac   : >> { %v1440_v61 = vsel %vm7146_vm5, %v1435_v5, %v1439_v54  ;;  %v1233_v13 = vrot.slane %v1232_v2, 4  ;;  %v2543_v14 = vrot.slane %v2541_v7, 7  ;;  %v2552_v15 = vshrl.u32 %v7242_v63, 16 }
  0xad   : >> { %v5946_v16 = vcombine.low %v1430_v44, %v1440_v61  ;;  %v1243_v1 = vrot.slane %v1242_v9, 4  ;;  %v2548_v53 = vor.u32 %v2547_v11, %v2546_v8  ;;  %v2555_v62 = vshll.u32 %v7242_v63, 16  ;;  %v2707_v44 = vld [vmem:[%s7065_s11 + $0x6c] sm:$0x8] }
  0xae   : >> { %v1238_v17 = vsel %vm7146_vm5, %v1233_v13, %v1237_v50  ;;  %v2544_v19 = vor.u32 %v2543_v14, %v2540_v56  ;;  %v2554_v22 = vrot.slane %v2552_v15, 6  ;;  %v2354_v21 = vshrl.u32 %v2152_v12, 16  ;;  %v2699_v61 = vld [vmem:[%s7065_s11 + $0xc] sm:$0x8] }
  0xaf   : >> { %2991 = vrot.lane.b32.xlu1 %v5946_v16, %s6654_s14  ;;  %v1248_v20 = vsel %vm7146_vm5, %v1243_v1, %v1247_v52  ;;  %v2550_v25 = vrot.slane %v2548_v53, 4  ;;  %v2557_v26 = vrot.slane %v2555_v62, 7  ;;  %v2357_v27 = vshll.u32 %v2152_v12, 16  ;;  %v6353_v62 = vld [vmem:[%s7268_s19] sm:$0xff]  }
  0xb0   : >> { %v5938_v31 = vcombine.low %v1238_v17, %v1248_v20  ;;  %v2545_v32 = vrot.slane %v2544_v19, 4  ;;  %v2356_v33 = vrot.slane %v2354_v21, 6  ;;  %v2362_v35 = vrot.slane %v7231_v46, 6  ;;  %6130 = vmatpush3.bf16.msra.mxu0 %v6353_v62  ;;  %6323 = vmatpush3.bf16.msra.mxu1 %v6353_v62  ;;  %v7347_v62 = vld [vmem:[%s7065_s11 + $0x1c] sm:$0xf] }
  0xb1   : >> { %v2558_v36 = vor.u32 %v2557_v26, %v2554_v22  ;;  %v2359_v37 = vrot.slane %v2357_v27, 7  ;;  %v2363_v38 = vrot.slane %v7228_v42, 7  ;;  %v2368_v40 = vshrl.u32 %v7255_v23, 16  ;;  %v6354_v27 = vld [vmem:[%s7268_s19 + $0x48] sm:$0xff]  }
  0xb2   : >> { %2975 = vrot.lane.b32.xlu0 %v5938_v31, %s6654_s14  ;;  %v2549_v47 = vsel %vm6870_vm11, %v2545_v32, %v2548_v53  ;;  %v2371_v48 = vshll.u32 %v7255_v23, 16  ;;  %v5882_v49 = vrot.slane %v7261_v29, 9  ;;  %v1717_v54 = vrot.slane %v7196_v10, 5  ;;  %6131 = vmatprep.subr.bf16.mxu0 %v6354_v27 }
  0xb3   : >> { %v2559_v43 = vsel %vm6870_vm11, %v2550_v25, %v2558_v36  ;;  %v2360_v45 = vor.u32 %v2359_v37, %v2356_v33  ;;  %v2364_v57 = vor.u32 %v2363_v38, %v2362_v35  ;;  %v2370_v50 = vrot.slane %v2368_v40, 6  ;;  %v1773_v25 = vld [vmem:[%s7065_s11 + $0x74] sm:$0x3]  ;;  %6316 = vmatprep.subr.bf16.mxu1 %v6354_v27 }
  0xb4   : >> { %v6010_v59 = vcombine.low %v2549_v47, %v2559_v43  ;;  %v2373_v60 = vrot.slane %v2371_v48, 7  ;;  %v1718_v4 = vsel %vm7061_vm15, %v5882_v49, %v1717_v54  ;;  %v1719_v5 = vrot.slane %v1717_v54, 4  ;;  %v1765_v38 = vld [vmem:[%s7065_s11 + $0x14] sm:$0x3]  ;;  %v1170_v49 = vld [vmem:[%s7065_s11 + $0x78] sm:$0xf] }
  0xb5   : >> { %v2361_v2 = vrot.slane %v2360_v45, 4  ;;  %v2366_v7 = vrot.slane %v2364_v57, 4  ;;  %v1720_v8 = vrot.slane %v7209_v24, 5  ;;  %v5874_v9 = vrot.slane %v7280_v55, 9 }
  0xb6   : >> { %3279 = vrot.lane.b32.xlu1 %v6010_v59, %s6654_s14  ;;  %v2374_v52 = vor.u32 %v2373_v60, %v2370_v50  ;;  %v1661_v56 = vrot.slane %v7213_v30, 5  ;;  %v1664_v11 = vrot.slane %v7224_v58, 5  ;;  %v5914_v12 = vrot.slane %v2707_v44, 11 }
  0xb7   : >> { %v2365_v13 = vsel %vm6870_vm11, %v2361_v2, %v2364_v57  ;;  %v1721_v14 = vsel %vm7061_vm15, %v1719_v5, %v1720_v8  ;;  %v2814_v24 = vrot.slane %v7196_v10, 7  ;;  %v2817_v15 = vrot.slane %v7242_v63, 7 }
  0xb8   : >> { %v2375_v16 = vsel %vm6870_vm11, %v2366_v7, %v2374_v52  ;;  %v5962_v1 = vcombine.low %v1718_v4, %v1721_v14  ;;  %v1662_v58 = vsel %vm7061_vm15, %v5874_v9, %v1661_v56  ;;  %v1663_v53 = vrot.slane %v1661_v56, 4  ;;  %v7336_v56 = vld [vmem:[%s7065_s11 + $0x80] sm:$0x1] }
  0xb9   : >> { %v6002_v17 = vcombine.low %v2365_v13, %v2375_v16  ;;  %v2815_v19 = vsel %vm7102_vm2, %v5914_v12, %v2814_v24  ;;  %v2816_v22 = vrot.slane %v2814_v24, 4  ;;  %v5906_v21 = vrot.slane %v2699_v61, 11  ;;  %v1154_v12 = vld [vmem:[%s7065_s11 + $0x18] sm:$0xf]  ;;  %v6355_v61 = vld [vmem:[%s7268_s19 + $0x8] sm:$0xff]  }
  0xba   : >> { %3071 = vrot.lane.b32.xlu1 %v5962_v1, %s6653_s12  ;;  %v1665_v10 = vsel %vm7061_vm15, %v1663_v53, %v1664_v11  ;;  %v2758_v63 = vrot.slane %v7213_v30, 7  ;;  %v2761_v20 = vrot.slane %v7255_v23, 7  ;;  %v1991_v26 = vshrl.u32 %v7261_v29, 16  ;;  %6132 = vmatpush3.bf16.msra.mxu0 %v6355_v61 }
  0xbb   : >> { %3263 = vrot.lane.b32.xlu0 %v6002_v17, %s6654_s14  ;;  %v5954_v31 = vcombine.low %v1662_v58, %v1665_v10  ;;  %v2818_v32 = vsel %vm7102_vm2, %v2816_v22, %v2817_v15  ;;  %v1994_v33 = vshll.u32 %v7261_v29, 16  ;;  %v1999_v35 = vrot.slane %v7219_v34, 5  ;;  %v6356_v15 = vld [vmem:[%s7268_s19 + $0x50] sm:$0xff]   ;;  %6324 = vmatpush3.bf16.msra.mxu1 %v6355_v61 }
  0xbc   : >> { %v6026_v30 = vcombine.low %v2815_v19, %v2818_v32  ;;  %v2759_v23 = vsel %vm7102_vm2, %v5906_v21, %v2758_v63  ;;  %v2760_v36 = vrot.slane %v2758_v63, 4  ;;  %v1993_v37 = vrot.slane %v1991_v26, 5  ;;  %v6357_v17 = vld [vmem:[%s7268_s19 + $0x10] sm:$0xff]   ;;  %6133 = vmatprep.subr.bf16.mxu0 %v6356_v15  ;;  %6317 = vmatprep.subr.bf16.mxu1 %v6356_v15  ;;  %v7360_v26 = vld [vmem:[%s7065_s11 + $0x20] sm:$0x1] }
  0xbd   : >> { %v1996_v40 = vrot.slane %v1994_v33, 6  ;;  %v2000_v41 = vrot.slane %v7204_v18, 6  ;;  %v2005_v47 = vshrl.u32 %v1773_v25, 16  ;;  %v2008_v48 = vshll.u32 %v1773_v25, 16 }
  0xbe   : >> { %3359 = vrot.lane.b32.xlu1 %v6026_v30, %s6653_s12  ;;  %v2762_v34 = vsel %vm7102_vm2, %v2760_v36, %v2761_v20  ;;  %v1807_v29 = vshrl.u32 %v7280_v55, 16  ;;  %v1810_v54 = vshll.u32 %v7280_v55, 16  ;;  %v1815_v43 = vrot.slane %v7231_v46, 5  ;;  %v7333_v46 = vld [vmem:[%s7065_s11 + $0x7c] sm:$0xf]  ;;  %6134 = vmatpush3.bf16.msra.mxu0 %v6357_v17 }
  0xbf   : >> { %3055 = vrot.lane.b32.xlu0 %v5954_v31, %s6653_s12  ;;  %v6018_v45 = vcombine.low %v2759_v23, %v2762_v34  ;;  %v1997_v18 = vor.u32 %v1996_v40, %v1993_v37  ;;  %v2001_v57 = vor.u32 %v2000_v41, %v1999_v35  ;;  %v2007_v50 = vrot.slane %v2005_v47, 5  ;;  %v6358_v31 = vld [vmem:[%s7268_s19 + $0x58] sm:$0xff]   ;;  %6325 = vmatpush3.bf16.msra.mxu1 %v6357_v17 }
  0xc0   : >> { %v2010_v44 = vrot.slane %v2008_v48, 6  ;;  %v1809_v59 = vrot.slane %v1807_v29, 5  ;;  %v1812_v60 = vrot.slane %v1810_v54, 6  ;;  %v1816_v4 = vrot.slane %v7228_v42, 6  ;;  %v2161_v23 = vld [vmem:[%s7065_s11 + $0x78] sm:$0xc]  ;;  %6135 = vmatprep.subr.bf16.mxu0 %v6358_v31  ;;  %6318 = vmatprep.subr.bf16.mxu1 %v6358_v31 }
  0xc1   : >> { %v1998_v5 = vrot.slane %v1997_v18, 4  ;;  %v2003_v2 = vrot.slane %v2001_v57, 4  ;;  %v1821_v55 = vshrl.u32 %v1765_v38, 16  ;;  %v1824_v7 = vshll.u32 %v1765_v38, 16  ;;  %v6359_v41 = vld [vmem:[%s7268_s19 + $0x18] sm:$0xff]   ;;  %v6360_v18 = vld [vmem:[%s7268_s19 + $0x60] sm:$0xff]  }
  0xc2   : >> { %v2011_v8 = vor.u32 %v2010_v44, %v2007_v50  ;;  %v1813_v9 = vor.u32 %v1812_v60, %v1809_v59  ;;  %v1817_v52 = vor.u32 %v1816_v4, %v1815_v43  ;;  %v1442_v11 = vshrl.u32 %v1170_v49, 16  ;;  %v7384_v60 = vld [vmem:[%s7065_s11 + $0x80] sm:$0x7]  ;;  %v2153_v4 = vld [vmem:[%s7065_s11 + $0x18] sm:$0xc]  ;;  %6136 = vmatpush3.bf16.msra.mxu0 %v6359_v41 }
  0xc3   : >> { %3343 = vrot.lane.b32.xlu0 %v6018_v45, %s6653_s12  ;;  %v2002_v42 = vsel %vm7180_vm8, %v1998_v5, %v2001_v57  ;;  %v1823_v13 = vrot.slane %v1821_v55, 5  ;;  %v1826_v14 = vrot.slane %v1824_v7, 6  ;;  %v1445_v24 = vshll.u32 %v1170_v49, 16  ;;  %6326 = vmatpush3.bf16.msra.mxu1 %v6359_v41  ;;  %v7413_v41 = vld [vmem:[%s7065_s11 + $0x18] sm:$0xe] }
  0xc4   : >> { %v2012_v16 = vsel %vm7180_vm8, %v2003_v2, %v2011_v8  ;;  %v1814_v1 = vrot.slane %v1813_v9, 4  ;;  %v1819_v58 = vrot.slane %v1817_v52, 4  ;;  %v1444_v53 = vrot.slane %v1442_v11, 4  ;;  %6137 = vmatprep.subr.bf16.mxu0 %v6360_v18  ;;  %6319 = vmatprep.subr.bf16.mxu1 %v6360_v18 }
  0xc5   : >> { %v5978_v19 = vcombine.low %v2002_v42, %v2012_v16  ;;  %v1827_v22 = vor.u32 %v1826_v14, %v1823_v13  ;;  %v1447_v21 = vrot.slane %v1445_v24, 5  ;;  %v7351_v10 = vshll.u32 %v7333_v46, 16 }
  0xc6   : >> { %v1818_v63 = vsel %vm7180_vm8, %v1814_v1, %v1817_v52  ;;  %v7356_v20 = vshrl.u32 %v7333_v46, 16  ;;  %v1461_v25 = vshll.u32 %v7336_v56, 16  ;;  %v1250_v27 = vshrl.u32 %v1154_v12, 16  ;;  %v7396_v1 = vld [vmem:[%s7065_s11 + $0x20] sm:$0x7] }
  0xc7   : >> { %3151 = vrot.lane.b32.xlu1 %v5978_v19, %s6655_s15  ;;  %v1828_v32 = vsel %vm7180_vm8, %v1819_v58, %v1827_v22  ;;  %v1448_v33 = vor.u32 %v1447_v21, %v1444_v53  ;;  %v1453_v35 = vrot.slane %v7351_v10, 5  ;;  %v1253_v30 = vshll.u32 %v1154_v12, 16  ;;  %v7399_v58 = vld [vmem:[%s7065_s11 + $0x78] sm:$0xe]  ;;  %v6361_v53 = vld [vmem:[%s7268_s19 + $0x20] sm:$0xff]  }
  0xc8   : >> { %v5970_v36 = vcombine.low %v1818_v63, %v1828_v32  ;;  %v1457_v37 = vrot.slane %v7356_v20, 4  ;;  %v1463_v38 = vrot.slane %v1461_v25, 5  ;;  %v1252_v40 = vrot.slane %v1250_v27, 4  ;;  %6138 = vmatpush3.bf16.msra.mxu0 %v6361_v53  ;;  %v6362_v32 = vld [vmem:[%s7268_s19 + $0x68] sm:$0xff]   ;;  %6327 = vmatpush3.bf16.msra.mxu1 %v6361_v53 }
  0xc9   : >> { %v1449_v47 = vrot.slane %v1448_v33, 4  ;;  %v1255_v48 = vrot.slane %v1253_v30, 5  ;;  %v7371_v49 = vshll.u32 %v7347_v62, 16  ;;  %v7374_v34 = vshrl.u32 %v7347_v62, 16  ;;  %6139 = vmatprep.subr.bf16.mxu0 %v6362_v32  ;;  %6320 = vmatprep.subr.bf16.mxu1 %v6362_v32 }
  0xca   : >> { %3135 = vrot.lane.b32.xlu0 %v5970_v36, %s6655_s15  ;;  %v1458_v29 = vor.u32 %v1457_v37, %v1453_v35  ;;  %v1269_v54 = vshll.u32 %v7360_v26, 16  ;;  %v2561_v43 = vshrl.u32 %v2161_v23, 16  ;;  %v2564_v45 = vshll.u32 %v2161_v23, 16 }
  0xcb   : >> { %v1454_v57 = vsel %vm7146_vm5, %v1449_v47, %v1453_v35  ;;  %v1256_v50 = vor.u32 %v1255_v48, %v1252_v40  ;;  %v1261_v44 = vrot.slane %v7371_v49, 5  ;;  %v1265_v59 = vrot.slane %v7374_v34, 4 }
  0xcc   : >> { %v1459_v5 = vrot.slane %v1458_v29, 4  ;;  %v1271_v2 = vrot.slane %v1269_v54, 5  ;;  %v2563_v55 = vrot.slane %v2561_v43, 6  ;;  %v2566_v7 = vrot.slane %v2564_v45, 7 }
  0xcd   : >> { %v1257_v8 = vrot.slane %v1256_v50, 4  ;;  %v1266_v9 = vor.u32 %v1265_v59, %v1261_v44  ;;  %v2569_v52 = vrot.slane %v7356_v20, 6  ;;  %v2570_v11 = vrot.slane %v7351_v10, 7  ;;  %v2708_v50 = vld [vmem:[%s7065_s11 + $0x78] sm:$0x8] }
  0xce   : >> { %v1464_v12 = vsel %vm7146_vm5, %v1459_v5, %v1463_v38  ;;  %v2567_v61 = vor.u32 %v2566_v7, %v2563_v55  ;;  %v2575_v42 = vshrl.u32 %v7384_v60, 16  ;;  %v2578_v13 = vshll.u32 %v7384_v60, 16 }
  0xcf   : >> { %v5947_v14 = vcombine.low %v1454_v57, %v1464_v12  ;;  %v1262_v24 = vsel %vm7146_vm5, %v1257_v8, %v1261_v44  ;;  %v1267_v15 = vrot.slane %v1266_v9, 4  ;;  %v2571_v16 = vor.u32 %v2570_v11, %v2569_v52  ;;  %v2700_v8 = vld [vmem:[%s7065_s11 + $0x18] sm:$0x8] }
  0xd0   : >> { %v2568_v17 = vrot.slane %v2567_v61, 4  ;;  %v2577_v19 = vrot.slane %v2575_v42, 6  ;;  %v2580_v22 = vrot.slane %v2578_v13, 7  ;;  %v2377_v21 = vshrl.u32 %v2153_v4, 16 }
  0xd1   : >> { %2993 = vrot.lane.b32.xlu1 %v5947_v14, %s6654_s14  ;;  %v1272_v63 = vsel %vm7146_vm5, %v1267_v15, %v1271_v2  ;;  %v2573_v25 = vrot.slane %v2571_v16, 4  ;;  %v2380_v27 = vshll.u32 %v2153_v4, 16  ;;  %v2385_v31 = vrot.slane %v7374_v34, 6 }
  0xd2   : >> { %v5939_v33 = vcombine.low %v1262_v24, %v1272_v63  ;;  %v2572_v35 = vsel %vm6870_vm11, %v2568_v17, %v2571_v16  ;;  %v2581_v30 = vor.u32 %v2580_v22, %v2577_v19  ;;  %v2379_v23 = vrot.slane %v2377_v21, 6  ;;  %v6363_v24 = vld [vmem:[%s7268_s19 + $0x28] sm:$0xff]   ;;  %v1774_v63 = vld [vmem:[%s7065_s11 + $0x80] sm:$0x3] }
  0xd3   : >> { %v2382_v36 = vrot.slane %v2380_v27, 7  ;;  %v2386_v37 = vrot.slane %v7371_v49, 7  ;;  %v2391_v38 = vshrl.u32 %v7396_v1, 16  ;;  %v2394_v40 = vshll.u32 %v7396_v1, 16  ;;  %6140 = vmatpush3.bf16.msra.mxu0 %v6363_v24  ;;  %6328 = vmatpush3.bf16.msra.mxu1 %v6363_v24 }
  0xd4   : >> { %2977 = vrot.lane.b32.xlu0 %v5939_v33, %s6654_s14  ;;  %v2582_v47 = vsel %vm6870_vm11, %v2573_v25, %v2581_v30  ;;  %v5883_v48 = vrot.slane %v7399_v58, 9  ;;  %v1724_v29 = vrot.slane %v7333_v46, 5  ;;  %v1727_v54 = vrot.slane %v7336_v56, 5  ;;  %v1766_v30 = vld [vmem:[%s7065_s11 + $0x20] sm:$0x3] }
  0xd5   : >> { %v6011_v43 = vcombine.low %v2572_v35, %v2582_v47  ;;  %v2383_v45 = vor.u32 %v2382_v36, %v2379_v23  ;;  %v2387_v18 = vor.u32 %v2386_v37, %v2385_v31  ;;  %v2393_v57 = vrot.slane %v2391_v38, 6 }
  0xd6   : >> { %v2396_v44 = vrot.slane %v2394_v40, 7  ;;  %v1725_v59 = vsel %vm7061_vm15, %v5883_v48, %v1724_v29  ;;  %v1726_v4 = vrot.slane %v1724_v29, 4  ;;  %v5875_v5 = vrot.slane %v7413_v41, 9 }
  0xd7   : >> { %3281 = vrot.lane.b32.xlu1 %v6011_v43, %s6654_s14  ;;  %v2384_v2 = vrot.slane %v2383_v45, 4  ;;  %v2389_v55 = vrot.slane %v2387_v18, 4  ;;  %v1668_v7 = vrot.slane %v7347_v62, 5  ;;  %v1671_v56 = vrot.slane %v7360_v26, 5  ;;  %v1172_v45 = vld [vmem:[%s7065_s11 + $0x84] sm:$0xf] }
  0xd8   : >> { %v2397_v9 = vor.u32 %v2396_v44, %v2393_v57  ;;  %v1728_v52 = vsel %vm7061_vm15, %v1726_v4, %v1727_v54  ;;  %v5915_v11 = vrot.slane %v2708_v50, 11  ;;  %v2821_v12 = vrot.slane %v7333_v46, 7  ;;  %v6365_v46 = vld [vmem:[%s7268_s19 + $0x70] sm:$0xff]  }
  0xd9   : >> { %v2388_v61 = vsel %vm6870_vm11, %v2384_v2, %v2387_v18  ;;  %v5963_v42 = vcombine.low %v1725_v59, %v1728_v52  ;;  %v1669_v13 = vsel %vm7061_vm15, %v5875_v5, %v1668_v7  ;;  %v1670_v14 = vrot.slane %v1668_v7, 4  ;;  %6141 = vmatprep.subr.bf16.mxu0 %v6365_v46  ;;  %6321 = vmatprep.subr.bf16.mxu1 %v6365_v46  ;;  %v7472_v52 = vld [vmem:[%s7065_s11 + $0x8c] sm:$0x1] }
  0xda   : >> { %v2398_v26 = vsel %vm6870_vm11, %v2389_v55, %v2397_v9  ;;  %v2822_v15 = vsel %vm7102_vm2, %v5915_v11, %v2821_v12  ;;  %v2823_v16 = vrot.slane %v2821_v12, 4  ;;  %v2824_v53 = vrot.slane %v7384_v60, 7 }
  0xdb   : >> { %v6003_v17 = vcombine.low %v2388_v61, %v2398_v26  ;;  %3073 = vrot.lane.b32.xlu1 %v5963_v42, %s6653_s12  ;;  %v1672_v19 = vsel %vm7061_vm15, %v1670_v14, %v1671_v56  ;;  %v5907_v22 = vrot.slane %v2700_v8, 11  ;;  %v2765_v21 = vrot.slane %v7347_v62, 7 }
  0xdc   : >> { %v5955_v25 = vcombine.low %v1669_v13, %v1672_v19  ;;  %v2825_v27 = vsel %vm7102_vm2, %v2823_v16, %v2824_v53  ;;  %v2768_v31 = vrot.slane %v7396_v1, 7  ;;  %v2014_v60 = vshrl.u32 %v7399_v58, 16  ;;  %v1156_v13 = vld [vmem:[%s7065_s11 + $0x24] sm:$0xf]  ;;  %v6368_v16 = vld [vmem:[%s7268_s19 + $0x78] sm:$0xff]  }
  0xdd   : >> { %3265 = vrot.lane.b32.xlu0 %v6003_v17, %s6654_s14  ;;  %v6027_v32 = vcombine.low %v2822_v15, %v2825_v27  ;;  %v2766_v33 = vsel %vm7102_vm2, %v5907_v22, %v2765_v21  ;;  %v2767_v35 = vrot.slane %v2765_v21, 4  ;;  %v2017_v62 = vshll.u32 %v7399_v58, 16 }
  0xde   : >> { %v2016_v23 = vrot.slane %v2014_v60, 5  ;;  %v2022_v36 = vrot.slane %v7356_v20, 5  ;;  %v2023_v1 = vrot.slane %v7351_v10, 6  ;;  %v2028_v37 = vshrl.u32 %v1774_v63, 16 }
  0xdf   : >> { %3361 = vrot.lane.b32.xlu1 %v6027_v32, %s6653_s12  ;;  %v2769_v38 = vsel %vm7102_vm2, %v2767_v35, %v2768_v31  ;;  %v2019_v40 = vrot.slane %v2017_v62, 6  ;;  %v2031_v47 = vshll.u32 %v1774_v63, 16  ;;  %v1830_v48 = vshrl.u32 %v7413_v41, 16  ;;  %v7493_v63 = vld [vmem:[%s7065_s11 + $0x28] sm:$0xf] }
  0xe0   : >> { %v6019_v29 = vcombine.low %v2766_v33, %v2769_v38  ;;  %v2024_v58 = vor.u32 %v2023_v1, %v2022_v36  ;;  %v2030_v54 = vrot.slane %v2028_v37, 5  ;;  %v1833_v43 = vshll.u32 %v7413_v41, 16  ;;  %v7469_v41 = vld [vmem:[%s7065_s11 + $0x88] sm:$0xf]  ;;  %v2162_v62 = vld [vmem:[%s7065_s11 + $0x84] sm:$0xc] }
  0xe1   : >> { %3057 = vrot.lane.b32.xlu0 %v5955_v25, %s6653_s12  ;;  %v2020_v10 = vor.u32 %v2019_v40, %v2016_v23  ;;  %v2033_v20 = vrot.slane %v2031_v47, 6  ;;  %v1832_v18 = vrot.slane %v1830_v48, 5  ;;  %v1838_v57 = vrot.slane %v7374_v34, 5  ;;  %v6366_v34 = vld [vmem:[%s7268_s19 + $0x30] sm:$0xff]   ;;  %v7496_v25 = vld [vmem:[%s7065_s11 + $0x2c] sm:$0x1] }
  0xe2   : >> { %v2026_v50 = vrot.slane %v2024_v58, 4  ;;  %v1835_v44 = vrot.slane %v1833_v43, 6  ;;  %v1839_v59 = vrot.slane %v7371_v49, 6  ;;  %v1844_v4 = vshrl.u32 %v1766_v30, 16  ;;  %6142 = vmatpush3.bf16.msra.mxu0 %v6366_v34  ;;  %6329 = vmatpush3.bf16.msra.mxu1 %v6366_v34  ;;  %v6369_v48 = vld [vmem:[%s7268_s19 + $0x38] sm:$0xff]  }
  0xe3   : >> { %v2021_v5 = vrot.slane %v2020_v10, 4  ;;  %v2034_v2 = vor.u32 %v2033_v20, %v2030_v54  ;;  %v1847_v55 = vshll.u32 %v1766_v30, 16  ;;  %v1466_v7 = vshrl.u32 %v1172_v45, 16  ;;  %6143 = vmatprep.subr.bf16.mxu0 %v6368_v16  ;;  %6322 = vmatprep.subr.bf16.mxu1 %v6368_v16  ;;  %v7515_v54 = vld [vmem:[%s7065_s11 + $0x8c] sm:$0x7] }
  0xe4   : >> { %v1836_v56 = vor.u32 %v1835_v44, %v1832_v18  ;;  %v1840_v8 = vor.u32 %v1839_v59, %v1838_v57  ;;  %v1846_v9 = vrot.slane %v1844_v4, 5  ;;  %v1469_v11 = vshll.u32 %v1172_v45, 16  ;;  %v1596_v16 = vld [vmem:[%s7065_s11 + $0x84] sm:$0xe] }
  0xe5   : >> { %3345 = vrot.lane.b32.xlu0 %v6019_v29, %s6653_s12  ;;  %v2025_v49 = vsel %vm7180_vm8, %v2021_v5, %v2024_v58  ;;  %v2035_v12 = vsel %vm7180_vm8, %v2026_v50, %v2034_v2  ;;  %v1849_v61 = vrot.slane %v1847_v55, 6  ;;  %v1468_v42 = vrot.slane %v1466_v7, 4  ;;  %v2154_v5 = vld [vmem:[%s7065_s11 + $0x24] sm:$0xc] }
  0xe6   : >> { %v5979_v14 = vcombine.low %v2025_v49, %v2035_v12  ;;  %v1837_v24 = vrot.slane %v1836_v56, 4  ;;  %v1842_v26 = vrot.slane %v1840_v8, 4  ;;  %v1471_v15 = vrot.slane %v1469_v11, 5  ;;  %6144 = vmatpush3.bf16.msra.mxu0 %v6369_v48  ;;  %6330 = vmatpush3.bf16.msra.mxu1 %v6369_v48  ;;  %v2709_v48 = vld [vmem:[%s7065_s11 + $0x84] sm:$0x8] }
  0xe7   : >> { %v1850_v53 = vor.u32 %v1849_v61, %v1846_v9  ;;  %v7483_v46 = vshll.u32 %v7469_v41, 16  ;;  %v7486_v17 = vshrl.u32 %v7469_v41, 16  ;;  %v1485_v19 = vshll.u32 %v7472_v52, 16 }
  0xe8   : >> { %3153 = vrot.lane.b32.xlu1 %v5979_v14, %s6655_s15  ;;  %v1841_v22 = vsel %vm7180_vm8, %v1837_v24, %v1840_v8  ;;  %v1472_v21 = vor.u32 %v1471_v15, %v1468_v42  ;;  %v1274_v27 = vshrl.u32 %v1156_v13, 16  ;;  %v1277_v31 = vshll.u32 %v1156_v13, 16  ;;  %v7529_v42 = vld [vmem:[%s7065_s11 + $0x2c] sm:$0x7] }
  0xe9   : >> { %v1851_v60 = vsel %vm7180_vm8, %v1842_v26, %v1850_v53  ;;  %v1477_v32 = vrot.slane %v7483_v46, 5  ;;  %v1481_v33 = vrot.slane %v7486_v17, 4  ;;  %v1487_v35 = vrot.slane %v1485_v19, 5 }
  0xea   : >> { %v5971_v30 = vcombine.low %v1841_v22, %v1851_v60  ;;  %v1473_v23 = vrot.slane %v1472_v21, 4  ;;  %v1276_v36 = vrot.slane %v1274_v27, 4  ;;  %v1279_v1 = vrot.slane %v1277_v31, 5 }
  0xeb   : >> { %v1482_v37 = vor.u32 %v1481_v33, %v1477_v32  ;;  %v7504_v38 = vshll.u32 %v7493_v63, 16  ;;  %v7507_v40 = vshrl.u32 %v7493_v63, 16  ;;  %v1293_v47 = vshll.u32 %v7496_v25, 16 }
  0xec   : >> { %3137 = vrot.lane.b32.xlu0 %v5971_v30, %s6655_s15  ;;  %v1478_v29 = vsel %vm7146_vm5, %v1473_v23, %v1477_v32  ;;  %v1280_v58 = vor.u32 %v1279_v1, %v1276_v36  ;;  %v2584_v43 = vshrl.u32 %v2162_v62, 16  ;;  %v2587_v45 = vshll.u32 %v2162_v62, 16  ;;  %v7542_v23 = vld [vmem:[%s7065_s11 + $0x24] sm:$0xe] }
  0xed   : >> { %v1483_v10 = vrot.slane %v1482_v37, 4  ;;  %v1285_v20 = vrot.slane %v7504_v38, 5  ;;  %v1289_v18 = vrot.slane %v7507_v40, 4  ;;  %v1295_v57 = vrot.slane %v1293_v47, 5 }
  0xee   : >> { %v1281_v50 = vrot.slane %v1280_v58, 4  ;;  %v2586_v44 = vrot.slane %v2584_v43, 6  ;;  %v2589_v59 = vrot.slane %v2587_v45, 7  ;;  %v2592_v4 = vrot.slane %v7486_v17, 6 }
  0xef   : >> { %v1488_v2 = vsel %vm7146_vm5, %v1483_v10, %v1487_v35  ;;  %v1290_v55 = vor.u32 %v1289_v18, %v1285_v20  ;;  %v2593_v7 = vrot.slane %v7483_v46, 7  ;;  %v2598_v56 = vshrl.u32 %v7515_v54, 16 }
  0xf0   : >> { %v5948_v8 = vcombine.low %v1478_v29, %v1488_v2  ;;  %v1286_v9 = vsel %vm7146_vm5, %v1281_v50, %v1285_v20  ;;  %v2590_v11 = vor.u32 %v2589_v59, %v2586_v44  ;;  %v2601_v34 = vshll.u32 %v7515_v54, 16 }
  0xf1   : >> { %v1291_v49 = vrot.slane %v1290_v55, 4  ;;  %v2594_v12 = vor.u32 %v2593_v7, %v2592_v4  ;;  %v2600_v61 = vrot.slane %v2598_v56, 6  ;;  %v2400_v13 = vshrl.u32 %v2154_v5, 16  ;;  %v2701_v4 = vld [vmem:[%s7065_s11 + $0x24] sm:$0x8] }
  0xf2   : >> { %2995 = vrot.lane.b32.xlu1 %v5948_v8, %s6654_s14  ;;  %v2591_v14 = vrot.slane %v2590_v11, 4  ;;  %v2603_v24 = vrot.slane %v2601_v34, 7  ;;  %v2403_v26 = vshll.u32 %v2154_v5, 16  ;;  %v2408_v15 = vrot.slane %v7507_v40, 6 }
  0xf3   : >> { %v1296_v53 = vsel %vm7146_vm5, %v1291_v49, %v1295_v57  ;;  %v2596_v19 = vrot.slane %v2594_v12, 4  ;;  %v2402_v22 = vrot.slane %v2400_v13, 6  ;;  %v2409_v21 = vrot.slane %v7504_v38, 7  ;;  %v1775_v13 = vld [vmem:[%s7065_s11 + $0x8c] sm:$0x3] }
  0xf4   : >> { %v5940_v27 = vcombine.low %v1286_v9, %v1296_v53  ;;  %v2595_v31 = vsel %vm6870_vm11, %v2591_v14, %v2594_v12  ;;  %v2604_v60 = vor.u32 %v2603_v24, %v2600_v61  ;;  %v2405_v32 = vrot.slane %v2403_v26, 7 }
  0xf5   : >> { %v2410_v33 = vor.u32 %v2409_v21, %v2408_v15  ;;  %v2414_v35 = vshrl.u32 %v7529_v42, 16  ;;  %v2417_v62 = vshll.u32 %v7529_v42, 16  ;;  %v5884_v30 = vrot.slane %v1596_v16, 9 }
  0xf6   : >> { %2979 = vrot.lane.b32.xlu0 %v5940_v27, %s6654_s14  ;;  %v2605_v36 = vsel %vm6870_vm11, %v2596_v19, %v2604_v60  ;;  %v2406_v1 = vor.u32 %v2405_v32, %v2402_v22  ;;  %v1731_v37 = vrot.slane %v7469_v41, 5  ;;  %v1734_v47 = vrot.slane %v7472_v52, 5 }
  0xf7   : >> { %v6012_v29 = vcombine.low %v2595_v31, %v2605_v36  ;;  %v2412_v58 = vrot.slane %v2410_v33, 4  ;;  %v2416_v43 = vrot.slane %v2414_v35, 6  ;;  %v2419_v45 = vrot.slane %v2417_v62, 7 }
  0xf8   : >> { %v2407_v10 = vrot.slane %v2406_v1, 4  ;;  %v1732_v20 = vsel %vm7061_vm15, %v5884_v30, %v1731_v37  ;;  %v1733_v18 = vrot.slane %v1731_v37, 4  ;;  %v5876_v57 = vrot.slane %v7542_v23, 9  ;;  %v1174_v1 = vld [vmem:[%s7065_s11 + $0x90] sm:$0xf] }
  0xf9   : >> { %3283 = vrot.lane.b32.xlu1 %v6012_v29, %s6654_s14  ;;  %v2420_v50 = vor.u32 %v2419_v45, %v2416_v43  ;;  %v1675_v44 = vrot.slane %v7493_v63, 5  ;;  %v1678_v59 = vrot.slane %v7496_v25, 5  ;;  %v5916_v52 = vrot.slane %v2709_v48, 11 }
  0xfa   : >> { %v2411_v5 = vsel %vm6870_vm11, %v2407_v10, %v2410_v33  ;;  %v1735_v2 = vsel %vm7061_vm15, %v1733_v18, %v1734_v47  ;;  %v2828_v55 = vrot.slane %v7469_v41, 7  ;;  %v2831_v7 = vrot.slane %v7515_v54, 7  ;;  %v7593_v18 = vld [vmem:[%s7065_s11 + $0x94] sm:$0xf] }
  0xfb   : >> { %v2421_v56 = vsel %vm6870_vm11, %v2412_v58, %v2420_v50  ;;  %v5964_v8 = vcombine.low %v1732_v20, %v1735_v2  ;;  %v1676_v25 = vsel %vm7061_vm15, %v5876_v57, %v1675_v44  ;;  %v1677_v9 = vrot.slane %v1675_v44, 4  ;;  %v7596_v57 = vld [vmem:[%s7065_s11 + $0x98] sm:$0x1] }
  0xfc   : >> { %v6004_v11 = vcombine.low %v2411_v5, %v2421_v56  ;;  %v2829_v34 = vsel %vm7102_vm2, %v5916_v52, %v2828_v55  ;;  %v2830_v49 = vrot.slane %v2828_v55, 4  ;;  %v5908_v12 = vrot.slane %v2701_v4, 11  ;;  %v1158_v4 = vld [vmem:[%s7065_s11 + $0x30] sm:$0xf] }
  0xfd   : >> { %3075 = vrot.lane.b32.xlu1 %v5964_v8, %s6653_s12  ;;  %v1679_v41 = vsel %vm7061_vm15, %v1677_v9, %v1678_v59  ;;  %v2772_v54 = vrot.slane %v7493_v63, 7  ;;  %v2775_v61 = vrot.slane %v7529_v42, 7  ;;  %v2037_v14 = vshrl.u32 %v1596_v16, 16 }
  0xfe   : >> { %3267 = vrot.lane.b32.xlu0 %v6004_v11, %s6654_s14  ;;  %v5956_v24 = vcombine.low %v1676_v25, %v1679_v41  ;;  %v2832_v26 = vsel %vm7102_vm2, %v2830_v49, %v2831_v7  ;;  %v2040_v15 = vshll.u32 %v1596_v16, 16  ;;  %v2045_v53 = vrot.slane %v7486_v17, 5  ;;  %v1767_v16 = vld [vmem:[%s7065_s11 + $0x2c] sm:$0x3] }
  0xff   : >> { %v6028_v19 = vcombine.low %v2829_v34, %v2832_v26  ;;  %v2773_v22 = vsel %vm7102_vm2, %v5908_v12, %v2772_v54  ;;  %v2774_v21 = vrot.slane %v2772_v54, 4  ;;  %v2039_v63 = vrot.slane %v2037_v14, 5  ;;  %v7614_v12 = vld [vmem:[%s7065_s11 + $0x34] sm:$0xf]  ;;  %v7621_v14 = vld [vmem:[%s7065_s11 + $0x38] sm:$0x1] }
 0x100   : >> { %v2042_v42 = vrot.slane %v2040_v15, 6  ;;  %v2046_v27 = vrot.slane %v7483_v46, 6  ;;  %v2051_v31 = vshrl.u32 %v1775_v13, 16  ;;  %v2054_v60 = vshll.u32 %v1775_v13, 16  ;;  %v2163_v26 = vld [vmem:[%s7065_s11 + $0x90] sm:$0xc] }
 0x101   : >> { %3363 = vrot.lane.b32.xlu1 %v6028_v19, %s6653_s12  ;;  %v2776_v32 = vsel %vm7102_vm2, %v2774_v21, %v2775_v61  ;;  %v1853_v17 = vshrl.u32 %v7542_v23, 16  ;;  %v1856_v33 = vshll.u32 %v7542_v23, 16  ;;  %v1861_v35 = vrot.slane %v7507_v40, 5 }
 0x102   : >> { %3059 = vrot.lane.b32.xlu0 %v5956_v24, %s6653_s12  ;;  %v6020_v62 = vcombine.low %v2773_v22, %v2776_v32  ;;  %v2043_v30 = vor.u32 %v2042_v42, %v2039_v63  ;;  %v2047_v46 = vor.u32 %v2046_v27, %v2045_v53  ;;  %v2053_v36 = vrot.slane %v2051_v31, 5 }
 0x103   : >> { %v2056_v37 = vrot.slane %v2054_v60, 6  ;;  %v1855_v47 = vrot.slane %v1853_v17, 5  ;;  %v1858_v48 = vrot.slane %v1856_v33, 6  ;;  %v1862_v29 = vrot.slane %v7504_v38, 6 }
 0x104   : >> { %v2044_v58 = vrot.slane %v2043_v30, 4  ;;  %v2049_v43 = vrot.slane %v2047_v46, 4  ;;  %v1867_v23 = vshrl.u32 %v1767_v16, 16  ;;  %v1870_v45 = vshll.u32 %v1767_v16, 16  ;;  %v7638_v30 = vld [vmem:[%s7065_s11 + $0x98] sm:$0x7] }
 0x105   : >> { %v2057_v40 = vor.u32 %v2056_v37, %v2053_v36  ;;  %v1859_v10 = vor.u32 %v1858_v48, %v1855_v47  ;;  %v1863_v20 = vor.u32 %v1862_v29, %v1861_v35  ;;  %v1490_v50 = vshrl.u32 %v1174_v1, 16 }
 0x106   : >> { %3347 = vrot.lane.b32.xlu0 %v6020_v62, %s6653_s12  ;;  %v2048_v44 = vsel %vm7180_vm8, %v2044_v58, %v2047_v46  ;;  %v1869_v38 = vrot.slane %v1867_v23, 5  ;;  %v1872_v59 = vrot.slane %v1870_v45, 6  ;;  %v1493_v52 = vshll.u32 %v1174_v1, 16 }
 0x107   : >> { %v2058_v5 = vsel %vm7180_vm8, %v2049_v43, %v2057_v40  ;;  %v1860_v2 = vrot.slane %v1859_v10, 4  ;;  %v1865_v55 = vrot.slane %v1863_v20, 4  ;;  %v1492_v7 = vrot.slane %v1490_v50, 4  ;;  %v2155_v43 = vld [vmem:[%s7065_s11 + $0x30] sm:$0xc] }
 0x108   : >> { %v5980_v56 = vcombine.low %v2048_v44, %v2058_v5  ;;  %v1873_v8 = vor.u32 %v1872_v59, %v1869_v38  ;;  %v1495_v25 = vrot.slane %v1493_v52, 5  ;;  %v7605_v9 = vshll.u32 %v7593_v18, 16  ;;  %v7649_v59 = vpop.permute.xlu1 %3069 }
 0x109   : >> { %v1864_v11 = vsel %vm7180_vm8, %v1860_v2, %v1863_v20  ;;  %v7610_v34 = vshrl.u32 %v7593_v18, 16  ;;  %v1509_v49 = vshll.u32 %v7596_v57, 16  ;;  %v1298_v41 = vshrl.u32 %v1158_v4, 16  ;;  %v7652_v2 = vld [vmem:[%s7065_s11 + $0x38] sm:$0x7] }
 0x10a   : >> { %3155 = vrot.lane.b32.xlu1 %v5980_v56, %s6655_s15  ;;  %v1874_v54 = vsel %vm7180_vm8, %v1865_v55, %v1873_v8  ;;  %v1496_v61 = vor.u32 %v1495_v25, %v1492_v7  ;;  %v1501_v13 = vrot.slane %v7605_v9, 5  ;;  %v1301_v24 = vshll.u32 %v1158_v4, 16 }
 0x10b   : >> { %v5972_v15 = vcombine.low %v1864_v11, %v1874_v54  ;;  %v1505_v53 = vrot.slane %v7610_v34, 4  ;;  %v1511_v19 = vrot.slane %v1509_v49, 5  ;;  %v1300_v22 = vrot.slane %v1298_v41, 4  ;;  %v7659_v11 = vld [vmem:[%s7065_s11 + $0x90] sm:$0xe] }
 0x10c   : >> { %v1497_v21 = vrot.slane %v1496_v61, 4  ;;  %v1303_v63 = vrot.slane %v1301_v24, 5  ;;  %v7626_v42 = vshll.u32 %v7614_v12, 16  ;;  %v7629_v27 = vshrl.u32 %v7614_v12, 16 }
 0x10d   : >> { %3139 = vrot.lane.b32.xlu0 %v5972_v15, %s6655_s15  ;;  %v1506_v31 = vor.u32 %v1505_v53, %v1501_v13  ;;  %v1317_v60 = vshll.u32 %v7621_v14, 16  ;;  %v2607_v32 = vshrl.u32 %v2163_v26, 16  ;;  %v2610_v16 = vshll.u32 %v2163_v26, 16  ;;  %v7667_v53 = vld [vmem:[%s7065_s11 + $0x30] sm:$0xe] }
 0x10e   : >> { %v1502_v17 = vsel %vm7146_vm5, %v1497_v21, %v1501_v13  ;;  %v1304_v33 = vor.u32 %v1303_v63, %v1300_v22  ;;  %v1309_v35 = vrot.slane %v7626_v42, 5  ;;  %v1313_v62 = vrot.slane %v7629_v27, 4 }
 0x10f   : >> { %v1507_v46 = vrot.slane %v1506_v31, 4  ;;  %v1319_v36 = vrot.slane %v1317_v60, 5  ;;  %v2609_v1 = vrot.slane %v2607_v32, 6  ;;  %v2612_v37 = vrot.slane %v2610_v16, 7  ;;  %v7675_v31 = vpop.permute.xlu0 %3053 }
 0x110   : >> { %v1305_v47 = vrot.slane %v1304_v33, 4  ;;  %v1314_v48 = vor.u32 %v1313_v62, %v1309_v35  ;;  %v2615_v29 = vrot.slane %v7610_v34, 6  ;;  %v2616_v58 = vrot.slane %v7605_v9, 7  ;;  %v2710_v33 = vld [vmem:[%s7065_s11 + $0x90] sm:$0x8] }
 0x111   : >> { %v1512_v23 = vsel %vm7146_vm5, %v1507_v46, %v1511_v19  ;;  %v2613_v45 = vor.u32 %v2612_v37, %v2609_v1  ;;  %v2621_v40 = vshrl.u32 %v7638_v30, 16  ;;  %v2624_v10 = vshll.u32 %v7638_v30, 16 }
 0x112   : >> { %v5949_v20 = vcombine.low %v1502_v17, %v1512_v23  ;;  %v1310_v50 = vsel %vm7146_vm5, %v1305_v47, %v1309_v35  ;;  %v1315_v44 = vrot.slane %v1314_v48, 4  ;;  %v2617_v38 = vor.u32 %v2616_v58, %v2615_v29  ;;  %v7678_v35 = vpop.permute.xlu1 %3357 }
 0x113   : >> { %v2614_v52 = vrot.slane %v2613_v45, 4  ;;  %v2623_v4 = vrot.slane %v2621_v40, 6  ;;  %v2626_v5 = vrot.slane %v2624_v10, 7  ;;  %v2423_v55 = vshrl.u32 %v2155_v43, 16  ;;  %v2702_v45 = vld [vmem:[%s7065_s11 + $0x30] sm:$0x8] }
 0x114   : >> { %2997 = vrot.lane.b32.xlu1 %v5949_v20, %s6654_s14  ;;  %v1320_v7 = vsel %vm7146_vm5, %v1315_v44, %v1319_v36  ;;  %v2619_v56 = vrot.slane %v2617_v38, 4  ;;  %v2426_v8 = vshll.u32 %v2155_v43, 16  ;;  %v2431_v25 = vrot.slane %v7629_v27, 6 }
 0x115   : >> { %v5941_v49 = vcombine.low %v1310_v50, %v1320_v7  ;;  %v2618_v41 = vsel %vm6870_vm11, %v2614_v52, %v2617_v38  ;;  %v2627_v54 = vor.u32 %v2626_v5, %v2623_v4  ;;  %v2425_v61 = vrot.slane %v2423_v55, 6 }
 0x116   : >> { %v2428_v13 = vrot.slane %v2426_v8, 7  ;;  %v2432_v24 = vrot.slane %v7626_v42, 7  ;;  %v2437_v26 = vshrl.u32 %v7652_v2, 16  ;;  %v2440_v15 = vshll.u32 %v7652_v2, 16  ;;  %v7706_v8 = vpop.permute.xlu1 %3261 }
 0x117   : >> { %2981 = vrot.lane.b32.xlu0 %v5941_v49, %s6654_s14  ;;  %v2628_v19 = vsel %vm6870_vm11, %v2619_v56, %v2627_v54  ;;  %v5885_v22 = vrot.slane %v7659_v11, 9  ;;  %v1738_v21 = vrot.slane %v7593_v18, 5  ;;  %v1741_v63 = vrot.slane %v7596_v57, 5  ;;  %v1776_v56 = vld [vmem:[%s7065_s11 + $0x98] sm:$0x3] }
 0x118   : >> { %v6013_v60 = vcombine.low %v2618_v41, %v2628_v19  ;;  %v2429_v32 = vor.u32 %v2428_v13, %v2425_v61  ;;  %v2433_v16 = vor.u32 %v2432_v24, %v2431_v25  ;;  %v2439_v17 = vrot.slane %v2437_v26, 6 }
 0x119   : >> { %v2442_v62 = vrot.slane %v2440_v15, 7  ;;  %v1739_v46 = vsel %vm7061_vm15, %v5885_v22, %v1738_v21  ;;  %v1740_v36 = vrot.slane %v1738_v21, 4  ;;  %v5877_v1 = vrot.slane %v7667_v53, 9 }
 0x11a   : >> { %3285 = vrot.lane.b32.xlu1 %v6013_v60, %s6654_s14  ;;  %v2430_v57 = vrot.slane %v2429_v32, 4  ;;  %v2435_v37 = vrot.slane %v2433_v16, 4  ;;  %v1682_v47 = vrot.slane %v7614_v12, 5  ;;  %v1685_v48 = vrot.slane %v7621_v14, 5 }
 0x11b   : >> { %v2443_v29 = vor.u32 %v2442_v62, %v2439_v17  ;;  %v1742_v58 = vsel %vm7061_vm15, %v1740_v36, %v1741_v63  ;;  %v5917_v43 = vrot.slane %v2710_v33, 11  ;;  %v2835_v23 = vrot.slane %v7593_v18, 7  ;;  %v7699_v18 = vpop.permute.xlu0 %3341  ;;  %v1768_v63 = vld [vmem:[%s7065_s11 + $0x38] sm:$0x3]  ;;  %v1176_v33 = vld [vmem:[%s7065_s11 + $0x9c] sm:$0xf] }
 0x11c   : >> { %v2434_v40 = vsel %vm6870_vm11, %v2430_v57, %v2433_v16  ;;  %v5965_v10 = vcombine.low %v1739_v46, %v1742_v58  ;;  %v1683_v20 = vsel %vm7061_vm15, %v5877_v1, %v1682_v47  ;;  %v1684_v50 = vrot.slane %v1682_v47, 4  ;;  %v7729_v1 = vpop.permute.xlu1 %3277 }
 0x11d   : >> { %v2444_v14 = vsel %vm6870_vm11, %v2435_v37, %v2443_v29  ;;  %v2836_v44 = vsel %vm7102_vm2, %v5917_v43, %v2835_v23  ;;  %v2837_v38 = vrot.slane %v2835_v23, 4  ;;  %v2838_v52 = vrot.slane %v7638_v30, 7 }
 0x11e   : >> { %v6005_v4 = vcombine.low %v2434_v40, %v2444_v14  ;;  %3077 = vrot.lane.b32.xlu1 %v5965_v10, %s6653_s12  ;;  %v1686_v5 = vsel %vm7061_vm15, %v1684_v50, %v1685_v48  ;;  %v5909_v55 = vrot.slane %v2702_v45, 11  ;;  %v2779_v7 = vrot.slane %v7614_v12, 7  ;;  %v7733_v10 = vld [vmem:[%s7065_s11 + $0xa0] sm:$0xf] }
 0x11f   : >> { %v5957_v25 = vcombine.low %v1683_v20, %v1686_v5  ;;  %v2839_v49 = vsel %vm7102_vm2, %v2837_v38, %v2838_v52  ;;  %v2782_v30 = vrot.slane %v7652_v2, 7  ;;  %v2060_v41 = vshrl.u32 %v7659_v11, 16  ;;  %v7736_v20 = vld [vmem:[%s7065_s11 + $0xa4] sm:$0x1]  ;;  %v1160_v38 = vld [vmem:[%s7065_s11 + $0x3c] sm:$0xf] }
 0x120   : >> { %3269 = vrot.lane.b32.xlu0 %v6005_v4, %s6654_s14  ;;  %v6029_v54 = vcombine.low %v2836_v44, %v2839_v49  ;;  %v2780_v61 = vsel %vm7102_vm2, %v5909_v55, %v2779_v7  ;;  %v2781_v13 = vrot.slane %v2779_v7, 4  ;;  %v2063_v12 = vshll.u32 %v7659_v11, 16 }
 0x121   : >> { %v2062_v24 = vrot.slane %v2060_v41, 5  ;;  %v2068_v26 = vrot.slane %v7610_v34, 5  ;;  %v2069_v15 = vrot.slane %v7605_v9, 6  ;;  %v2074_v19 = vshrl.u32 %v1776_v56, 16  ;;  %v7725_v34 = vpop.permute.xlu0 %2973  ;;  %v7753_v41 = vpop.permute.xlu1 %3149 }
 0x122   : >> { %3365 = vrot.lane.b32.xlu1 %v6029_v54, %s6653_s12  ;;  %v2783_v2 = vsel %vm7102_vm2, %v2781_v13, %v2782_v30  ;;  %v2065_v22 = vrot.slane %v2063_v12, 6  ;;  %v2077_v21 = vshll.u32 %v1776_v56, 16  ;;  %v1876_v60 = vshrl.u32 %v7667_v53, 16  ;;  %v7759_v13 = vld [vmem:[%s7065_s11 + $0x40] sm:$0xf] }
 0x123   : >> { %v6021_v32 = vcombine.low %v2780_v61, %v2783_v2  ;;  %v2070_v16 = vor.u32 %v2069_v15, %v2068_v26  ;;  %v2076_v17 = vrot.slane %v2074_v19, 5  ;;  %v1879_v11 = vshll.u32 %v7667_v53, 16  ;;  %v7762_v12 = vld [vmem:[%s7065_s11 + $0x44] sm:$0x1] }
 0x124   : >> { %3061 = vrot.lane.b32.xlu0 %v5957_v25, %s6653_s12  ;;  %v2066_v9 = vor.u32 %v2065_v22, %v2062_v24  ;;  %v2079_v62 = vrot.slane %v2077_v21, 6  ;;  %v1878_v46 = vrot.slane %v1876_v60, 5  ;;  %v1884_v36 = vrot.slane %v7629_v27, 5  ;;  %v2164_v21 = vld [vmem:[%s7065_s11 + $0x9c] sm:$0xc] }
 0x125   : >> { %v2072_v57 = vrot.slane %v2070_v16, 4  ;;  %v1881_v37 = vrot.slane %v1879_v11, 6  ;;  %v1885_v47 = vrot.slane %v7626_v42, 6  ;;  %v1890_v48 = vshrl.u32 %v1768_v63, 16  ;;  %v7744_v7 = vpop.permute.xlu0 %2989 }
 0x126   : >> { %v2067_v53 = vrot.slane %v2066_v9, 4  ;;  %v2080_v29 = vor.u32 %v2079_v62, %v2076_v17  ;;  %v1893_v58 = vshll.u32 %v1768_v63, 16  ;;  %v1514_v43 = vshrl.u32 %v1176_v33, 16 }
 0x127   : >> { %v1882_v23 = vor.u32 %v1881_v37, %v1878_v46  ;;  %v1886_v45 = vor.u32 %v1885_v47, %v1884_v36  ;;  %v1892_v40 = vrot.slane %v1890_v48, 5  ;;  %v1517_v27 = vshll.u32 %v1176_v33, 16  ;;  %v7780_v36 = vld [vmem:[%s7065_s11 + $0xa4] sm:$0x7] }
 0x128   : >> { %3349 = vrot.lane.b32.xlu0 %v6021_v32, %s6653_s12  ;;  %v2071_v50 = vsel %vm7180_vm8, %v2067_v53, %v2070_v16  ;;  %v2081_v42 = vsel %vm7180_vm8, %v2072_v57, %v2080_v29  ;;  %v1895_v14 = vrot.slane %v1893_v58, 6  ;;  %v1516_v44 = vrot.slane %v1514_v43, 4  ;;  %v7786_v43 = vpop.permute.xlu1 %2991 }
 0x129   : >> { %v5981_v52 = vcombine.low %v2071_v50, %v2081_v42  ;;  %v1883_v4 = vrot.slane %v1882_v23, 4  ;;  %v1888_v5 = vrot.slane %v1886_v45, 4  ;;  %v1519_v55 = vrot.slane %v1517_v27, 5  ;;  %v7782_v47 = vpop.permute.xlu0 %3133  ;;  %v2156_v50 = vld [vmem:[%s7065_s11 + $0x3c] sm:$0xc] }
 0x12a   : >> { %v1896_v56 = vor.u32 %v1895_v14, %v1892_v40  ;;  %v7747_v25 = vshll.u32 %v7733_v10, 16  ;;  %v7750_v49 = vshrl.u32 %v7733_v10, 16  ;;  %v1533_v30 = vshll.u32 %v7736_v20, 16 }
 0x12b   : >> { %3157 = vrot.lane.b32.xlu1 %v5981_v52, %s6655_s15  ;;  %v1887_v54 = vsel %vm7180_vm8, %v1883_v4, %v1886_v45  ;;  %v1520_v61 = vor.u32 %v1519_v55, %v1516_v44  ;;  %v1322_v24 = vshrl.u32 %v1160_v38, 16  ;;  %v1325_v26 = vshll.u32 %v1160_v38, 16 }
 0x12c   : >> { %v1897_v15 = vsel %vm7180_vm8, %v1888_v5, %v1896_v56  ;;  %v1525_v19 = vrot.slane %v7747_v25, 5  ;;  %v1529_v2 = vrot.slane %v7750_v49, 4  ;;  %v1535_v22 = vrot.slane %v1533_v30, 5 }
 0x12d   : >> { %v5973_v63 = vcombine.low %v1887_v54, %v1897_v15  ;;  %v1521_v60 = vrot.slane %v1520_v61, 4  ;;  %v1324_v32 = vrot.slane %v1322_v24, 4  ;;  %v1327_v16 = vrot.slane %v1325_v26, 5  ;;  %v7798_v61 = vld [vmem:[%s7065_s11 + $0x44] sm:$0x7] }
 0x12e   : >> { %v1530_v17 = vor.u32 %v1529_v2, %v1525_v19  ;;  %v7770_v11 = vshll.u32 %v7759_v13, 16  ;;  %v7773_v33 = vshrl.u32 %v7759_v13, 16  ;;  %v1341_v9 = vshll.u32 %v7762_v12, 16 }
 0x12f   : >> { %3141 = vrot.lane.b32.xlu0 %v5973_v63, %s6655_s15  ;;  %v1526_v62 = vsel %vm7146_vm5, %v1521_v60, %v1525_v19  ;;  %v1328_v46 = vor.u32 %v1327_v16, %v1324_v32  ;;  %v2630_v57 = vshrl.u32 %v2164_v21, 16  ;;  %v2633_v37 = vshll.u32 %v2164_v21, 16  ;;  %v7805_v21 = vpop.permute.xlu0 %2975 }
 0x130   : >> { %v1531_v48 = vrot.slane %v1530_v17, 4  ;;  %v1333_v53 = vrot.slane %v7770_v11, 5  ;;  %v1337_v29 = vrot.slane %v7773_v33, 4  ;;  %v1343_v58 = vrot.slane %v1341_v9, 5  ;;  %v7810_v17 = vpop.permute.xlu1 %3279 }
 0x131   : >> { %v1329_v23 = vrot.slane %v1328_v46, 4  ;;  %v2632_v45 = vrot.slane %v2630_v57, 6  ;;  %v2635_v40 = vrot.slane %v2633_v37, 7  ;;  %v2638_v27 = vrot.slane %v7750_v49, 6 }
 0x132   : >> { %v1536_v42 = vsel %vm7146_vm5, %v1531_v48, %v1535_v22  ;;  %v1338_v14 = vor.u32 %v1337_v29, %v1333_v53  ;;  %v2639_v44 = vrot.slane %v7747_v25, 7  ;;  %v2644_v38 = vshrl.u32 %v7780_v36, 16  ;;  %v7803_v22 = vld [vmem:[%s7065_s11 + $0x9c] sm:$0xe] }
 0x133   : >> { %v5950_v52 = vcombine.low %v1526_v62, %v1536_v42  ;;  %v1334_v4 = vsel %vm7146_vm5, %v1329_v23, %v1333_v53  ;;  %v2636_v5 = vor.u32 %v2635_v40, %v2632_v45  ;;  %v2647_v55 = vshll.u32 %v7780_v36, 16 }
 0x134   : >> { %v1339_v56 = vrot.slane %v1338_v14, 4  ;;  %v2640_v30 = vor.u32 %v2639_v44, %v2638_v27  ;;  %v2646_v54 = vrot.slane %v2644_v38, 6  ;;  %v2446_v24 = vshrl.u32 %v2156_v50, 16 }
 0x135   : >> { %2999 = vrot.lane.b32.xlu1 %v5950_v52, %s6654_s14  ;;  %v2637_v26 = vrot.slane %v2636_v5, 4  ;;  %v2649_v15 = vrot.slane %v2647_v55, 7  ;;  %v2449_v19 = vshll.u32 %v2156_v50, 16  ;;  %v2454_v2 = vrot.slane %v7773_v33, 6  ;;  %v2711_v50 = vld [vmem:[%s7065_s11 + $0x9c] sm:$0x8] }
 0x136   : >> { %v1344_v63 = vsel %vm7146_vm5, %v1339_v56, %v1343_v58  ;;  %v2642_v60 = vrot.slane %v2640_v30, 4  ;;  %v2448_v32 = vrot.slane %v2446_v24, 6  ;;  %v2455_v16 = vrot.slane %v7770_v11, 7  ;;  %v7818_v58 = vld [vmem:[%s7065_s11 + $0x3c] sm:$0xe]  ;;  %v7829_v56 = vpop.permute.xlu0 %3263 }
 0x137   : >> { %v5942_v9 = vcombine.low %v1334_v4, %v1344_v63  ;;  %v2641_v62 = vsel %vm6870_vm11, %v2637_v26, %v2640_v30  ;;  %v2650_v46 = vor.u32 %v2649_v15, %v2646_v54  ;;  %v2451_v57 = vrot.slane %v2449_v19, 7  ;;  %v2703_v26 = vld [vmem:[%s7065_s11 + $0x3c] sm:$0x8]  ;;  %v7835_v15 = vpop.permute.xlu1 %3071 }
 0x138   : >> { %v2456_v37 = vor.u32 %v2455_v16, %v2454_v2  ;;  %v2460_v48 = vshrl.u32 %v7798_v61, 16  ;;  %v2463_v53 = vshll.u32 %v7798_v61, 16  ;;  %v5886_v29 = vrot.slane %v7803_v22, 9 }
 0x139   : >> { %2983 = vrot.lane.b32.xlu0 %v5942_v9, %s6654_s14  ;;  %v2651_v23 = vsel %vm6870_vm11, %v2642_v60, %v2650_v46  ;;  %v2452_v45 = vor.u32 %v2451_v57, %v2448_v32  ;;  %v1745_v40 = vrot.slane %v7733_v10, 5  ;;  %v1748_v27 = vrot.slane %v7736_v20, 5 }
 0x13a   : >> { %v6014_v42 = vcombine.low %v2641_v62, %v2651_v23  ;;  %v2458_v14 = vrot.slane %v2456_v37, 4  ;;  %v2462_v44 = vrot.slane %v2460_v48, 6  ;;  %v2465_v38 = vrot.slane %v2463_v53, 7  ;;  %v1777_v53 = vld [vmem:[%s7065_s11 + $0xa4] sm:$0x3] }
 0x13b   : >> { %v2453_v52 = vrot.slane %v2452_v45, 4  ;;  %v1746_v4 = vsel %vm7061_vm15, %v5886_v29, %v1745_v40  ;;  %v1747_v5 = vrot.slane %v1745_v40, 4  ;;  %v5878_v55 = vrot.slane %v7818_v58, 9 }
 0x13c   : >> { %3287 = vrot.lane.b32.xlu1 %v6014_v42, %s6654_s14  ;;  %v2466_v30 = vor.u32 %v2465_v38, %v2462_v44  ;;  %v1689_v20 = vrot.slane %v7759_v13, 5  ;;  %v1692_v54 = vrot.slane %v7762_v12, 5  ;;  %v5918_v24 = vrot.slane %v2711_v50, 11  ;;  %v7861_v50 = vpop.permute.xlu0 %3055  ;;  %v7865_v44 = vpop.permute.xlu1 %3359 }
 0x13d   : >> { %v2457_v19 = vsel %vm6870_vm11, %v2453_v52, %v2456_v37  ;;  %v1749_v2 = vsel %vm7061_vm15, %v1747_v5, %v1748_v27  ;;  %v2842_v63 = vrot.slane %v7733_v10, 7  ;;  %v2845_v60 = vrot.slane %v7780_v36, 7 }
 0x13e   : >> { %v2467_v32 = vsel %vm6870_vm11, %v2458_v14, %v2466_v30  ;;  %v5966_v16 = vcombine.low %v1746_v4, %v1749_v2  ;;  %v1690_v12 = vsel %vm7061_vm15, %v5878_v55, %v1689_v20  ;;  %v1691_v9 = vrot.slane %v1689_v20, 4 }
 0x13f   : >> { %v6006_v62 = vcombine.low %v2457_v19, %v2467_v32  ;;  %v2843_v46 = vsel %vm7102_vm2, %v5918_v24, %v2842_v63  ;;  %v2844_v57 = vrot.slane %v2842_v63, 4  ;;  %v5910_v37 = vrot.slane %v2703_v26, 11  ;;  %v1178_v19 = vld [vmem:[%s7065_s11 + $0xa8] sm:$0xf] }
 0x140   : >> { %3079 = vrot.lane.b32.xlu1 %v5966_v16, %s6653_s12  ;;  %v1693_v10 = vsel %vm7061_vm15, %v1691_v9, %v1692_v54  ;;  %v2786_v36 = vrot.slane %v7759_v13, 7  ;;  %v2789_v48 = vrot.slane %v7798_v61, 7  ;;  %v2083_v29 = vshrl.u32 %v7803_v22, 16 }
 0x141   : >> { %3271 = vrot.lane.b32.xlu0 %v6006_v62, %s6654_s14  ;;  %v5958_v23 = vcombine.low %v1690_v12, %v1693_v10  ;;  %v2846_v45 = vsel %vm7102_vm2, %v2844_v57, %v2845_v60  ;;  %v2086_v40 = vshll.u32 %v7803_v22, 16  ;;  %v2091_v27 = vrot.slane %v7750_v49, 5  ;;  %v1769_v22 = vld [vmem:[%s7065_s11 + $0x44] sm:$0x3]  ;;  %v7884_v10 = vld [vmem:[%s7065_s11 + $0xb0] sm:$0x1] }
 0x142   : >> { %v6030_v42 = vcombine.low %v2843_v46, %v2846_v45  ;;  %v2787_v13 = vsel %vm7102_vm2, %v5910_v37, %v2786_v36  ;;  %v2788_v61 = vrot.slane %v2786_v36, 4  ;;  %v2085_v14 = vrot.slane %v2083_v29, 5  ;;  %v7881_v37 = vld [vmem:[%s7065_s11 + $0xac] sm:$0xf]  ;;  %v1162_v45 = vld [vmem:[%s7065_s11 + $0x48] sm:$0xf] }
 0x143   : >> { %v2088_v38 = vrot.slane %v2086_v40, 6  ;;  %v2092_v52 = vrot.slane %v7747_v25, 6  ;;  %v2097_v4 = vshrl.u32 %v1777_v53, 16  ;;  %v2100_v5 = vshll.u32 %v1777_v53, 16 }
 0x144   : >> { %3367 = vrot.lane.b32.xlu1 %v6030_v42, %s6653_s12  ;;  %v2790_v49 = vsel %vm7102_vm2, %v2788_v61, %v2789_v48  ;;  %v1899_v55 = vshrl.u32 %v7818_v58, 16  ;;  %v1902_v30 = vshll.u32 %v7818_v58, 16  ;;  %v1907_v20 = vrot.slane %v7773_v33, 5  ;;  %v7878_v33 = vpop.permute.xlu0 %3343  ;;  %v7886_v48 = vpop.permute.xlu1 %3151 }
 0x145   : >> { %3063 = vrot.lane.b32.xlu0 %v5958_v23, %s6653_s12  ;;  %v6022_v54 = vcombine.low %v2787_v13, %v2790_v49  ;;  %v2089_v24 = vor.u32 %v2088_v38, %v2085_v14  ;;  %v2093_v25 = vor.u32 %v2092_v52, %v2091_v27  ;;  %v2099_v26 = vrot.slane %v2097_v4, 5 }
 0x146   : >> { %v2102_v2 = vrot.slane %v2100_v5, 6  ;;  %v1901_v63 = vrot.slane %v1899_v55, 5  ;;  %v1904_v60 = vrot.slane %v1902_v30, 6  ;;  %v1908_v32 = vrot.slane %v7770_v11, 6 }
 0x147   : >> { %v2090_v16 = vrot.slane %v2089_v24, 4  ;;  %v2095_v12 = vrot.slane %v2093_v25, 4  ;;  %v1913_v58 = vshrl.u32 %v1769_v22, 16  ;;  %v1916_v9 = vshll.u32 %v1769_v22, 16  ;;  %v7904_v22 = vld [vmem:[%s7065_s11 + $0x4c] sm:$0xf] }
 0x148   : >> { %v2103_v62 = vor.u32 %v2102_v2, %v2099_v26  ;;  %v1905_v46 = vor.u32 %v1904_v60, %v1901_v63  ;;  %v1909_v57 = vor.u32 %v1908_v32, %v1907_v20  ;;  %v1538_v36 = vshrl.u32 %v1178_v19, 16  ;;  %v7911_v24 = vld [vmem:[%s7065_s11 + $0x50] sm:$0x1]  ;;  %v7913_v26 = vpop.permute.xlu0 %3135  ;;  %v7916_v32 = vpop.permute.xlu1 %2993 }
 0x149   : >> { %3351 = vrot.lane.b32.xlu0 %v6022_v54, %s6653_s12  ;;  %v2094_v11 = vsel %vm7180_vm8, %v2090_v16, %v2093_v25  ;;  %v1915_v53 = vrot.slane %v1913_v58, 5  ;;  %v1918_v29 = vrot.slane %v1916_v9, 6  ;;  %v1541_v23 = vshll.u32 %v1178_v19, 16 }
 0x14a   : >> { %v2104_v40 = vsel %vm7180_vm8, %v2095_v12, %v2103_v62  ;;  %v1906_v27 = vrot.slane %v1905_v46, 4  ;;  %v1911_v42 = vrot.slane %v1909_v57, 4  ;;  %v1540_v13 = vrot.slane %v1538_v36, 4 }
 0x14b   : >> { %v5982_v61 = vcombine.low %v2094_v11, %v2104_v40  ;;  %v1919_v14 = vor.u32 %v1918_v29, %v1915_v53  ;;  %v1543_v38 = vrot.slane %v1541_v23, 5  ;;  %v7895_v52 = vshll.u32 %v7881_v37, 16  ;;  %v6384_v40 = vld [vmem:[%s7065_s11] sm:$0xc]  ;;  %v6436_v29 = vld [vmem:[%s7065_s11 + $0x48] sm:$0xf] }
 0x14c   : >> { %v1910_v4 = vsel %vm7180_vm8, %v1906_v27, %v1909_v57  ;;  %v7900_v5 = vshrl.u32 %v7881_v37, 16  ;;  %v1557_v49 = vshll.u32 %v7884_v10, 16  ;;  %v1346_v55 = vshrl.u32 %v1162_v45, 16 }
 0x14d   : >> { %3159 = vrot.lane.b32.xlu1 %v5982_v61, %s6655_s15  ;;  %v1920_v30 = vsel %vm7180_vm8, %v1911_v42, %v1919_v14  ;;  %v1544_v20 = vor.u32 %v1543_v38, %v1540_v13  ;;  %v1549_v54 = vrot.slane %v7895_v52, 5  ;;  %v1349_v25 = vshll.u32 %v1162_v45, 16  ;;  %v6385_v42 = vld [vmem:[%s7065_s11 + $0x4] sm:$0xf]  ;;  %v6386_v38 = vld [vmem:[%s7065_s11 + $0x8] sm:$0x3] }
 0x14e   : >> { %v5974_v19 = vcombine.low %v1910_v4, %v1920_v30  ;;  %v1553_v2 = vrot.slane %v7900_v5, 4  ;;  %v1559_v63 = vrot.slane %v1557_v49, 5  ;;  %v1348_v60 = vrot.slane %v1346_v55, 4  ;;  %v6387_v49 = vld [vmem:[%s7065_s11] sm:$0xf] }
 0x14f   : >> { %v1545_v16 = vrot.slane %v1544_v20, 4  ;;  %v1351_v12 = vrot.slane %v1349_v25, 5  ;;  %v7919_v58 = vshll.u32 %v7904_v22, 16  ;;  %v7922_v9 = vshrl.u32 %v7904_v22, 16  ;;  %v2165_v30 = vld [vmem:[%s7065_s11 + $0xa8] sm:$0xc]  ;;  %v7939_v20 = vpop.permute.xlu0 %2977 }
 0x150   : >> { %3143 = vrot.lane.b32.xlu0 %v5974_v19, %s6655_s15  ;;  %v1554_v62 = vor.u32 %v1553_v2, %v1549_v54  ;;  %v1365_v46 = vshll.u32 %v7911_v24, 16  ;;  %v5889_v27 = vrot.slane %v6384_v40, 10  ;;  %v2204_v13 = vrot.slane %v6385_v42, 6  ;;  %v7945_v2 = vpop.permute.xlu1 %3281 }
 0x151   : >> { %v1550_v57 = vsel %vm7146_vm5, %v1545_v16, %v1549_v54  ;;  %v1352_v36 = vor.u32 %v1351_v12, %v1348_v60  ;;  %v1357_v11 = vrot.slane %v7919_v58, 5  ;;  %v1361_v53 = vrot.slane %v7922_v9, 4 }
 0x152   : >> { %v1555_v23 = vrot.slane %v1554_v62, 4  ;;  %v1367_v45 = vrot.slane %v1365_v46, 5  ;;  %v2207_v4 = vrot.slane %v6386_v38, 6  ;;  %v5921_v55 = vcombine.low %v6387_v49, %v6385_v42  ;;  %v7952_v46 = vld [vmem:[%s7065_s11 + $0xb0] sm:$0x7] }
 0x153   : >> { %v1353_v61 = vrot.slane %v1352_v36, 4  ;;  %v1362_v14 = vor.u32 %v1361_v53, %v1357_v11  ;;  %v2205_v25 = vsel %vm7930_vm13, %v5889_v27, %v2204_v13  ;;  %v2206_v19 = vrot.slane %v2204_v13, 4  ;;  %v7973_v49 = vld [vmem:[%s7065_s11 + $0x50] sm:$0x7] }
 0x154   : >> { %v1560_v54 = vsel %vm7146_vm5, %v1555_v23, %v1559_v63  ;;  %v3375_v62 = vsel %vm1108_vm12, %v5921_v55, %v7725_v34  ;;  %v2653_v53 = vshrl.u32 %v2165_v30, 16  ;;  %v2656_v23 = vshll.u32 %v2165_v30, 16  ;;  %v7976_v55 = vpop.permute.xlu0 %3265 }
 0x155   : >> { %v5951_v60 = vcombine.low %v1550_v57, %v1560_v54  ;;  %v1358_v16 = vsel %vm7146_vm5, %v1353_v61, %v1357_v11  ;;  %v1363_v12 = vrot.slane %v1362_v14, 4  ;;  %v2208_v63 = vsel %vm7930_vm13, %v2206_v19, %v2207_v4  ;;  %v7961_v57 = vld [vmem:[%s7065_s11 + $0x48] sm:$0xc] }
 0x156   : >> { %v7958_v36 = vsel %vm3421_vm14, %v3375_v62, %v7675_v31  ;;  %9873 = vst [vmem:[#allocation4_spill] sm:$0xff] %v7961_v57  ;;  %v5985_v34 = vcombine.low %v2205_v25, %v2208_v63  ;;  %v2661_v40 = vrot.slane %v7900_v5, 6  ;;  %v2662_v27 = vrot.slane %v7895_v52, 7 }
 0x157   : >> { %3001 = vrot.lane.b32.xlu1 %v5951_v60, %s6654_s14  ;;  %v1368_v11 = vsel %vm7146_vm5, %v1363_v12, %v1367_v45  ;;  %v2655_v13 = vrot.slane %v2653_v53, 6  ;;  %v2658_v61 = vrot.slane %v2656_v23, 7  ;;  %v2667_v31 = vshrl.u32 %v7952_v46, 16  ;;  %v7981_v60 = vpop.permute.xlu1 %3073 }
 0x158   : >> { %v5943_v42 = vcombine.low %v1358_v16, %v1368_v11  ;;  %v3505_v14 = vsel %vm1108_vm12, %v5985_v34, %v7706_v8  ;;  %v2663_v38 = vor.u32 %v2662_v27, %v2661_v40  ;;  %v2670_v4 = vshll.u32 %v7952_v46, 16 }
 0x159   : >> { %v2469_v45 = vshrl.u32 %v7961_v57, 16  ;;  %v2659_v30 = vor.u32 %v2658_v61, %v2655_v13  ;;  %v2669_v54 = vrot.slane %v2667_v31, 6  ;;  %v2472_v25 = vshll.u32 %v7961_v57, 16 }
 0x15a   : >> { %2985 = vrot.lane.b32.xlu0 %v5943_v42, %s6654_s14  ;;  %v2477_v19 = vrot.slane %v7922_v9, 6  ;;  %v2665_v8 = vrot.slane %v2663_v38, 4  ;;  %v2672_v16 = vrot.slane %v2670_v4, 7  ;;  %v2478_v62 = vrot.slane %v7919_v58, 7  ;;  %v7992_v4 = vld [vmem:[%s7065_s11 + $0xa8] sm:$0xe] }
 0x15b   : >> { %v2471_v12 = vrot.slane %v2469_v45, 6  ;;  %v2660_v63 = vrot.slane %v2659_v30, 4  ;;  %v2474_v53 = vrot.slane %v2472_v25, 7  ;;  %v2483_v23 = vshrl.u32 %v7973_v49, 16 }
 0x15c   : >> { %v2486_v11 = vshll.u32 %v7973_v49, 16  ;;  %v2673_v34 = vor.u32 %v2672_v16, %v2669_v54  ;;  %v2479_v40 = vor.u32 %v2478_v62, %v2477_v19  ;;  %v3552_v27 = vsel %vm3421_vm14, %v3505_v14, %v7699_v18  ;;  %v6388_v54 = vld [vmem:[%s7065_s11 + $0x60] sm:$0xc]  ;;  %v6389_v18 = vld [vmem:[%s7065_s11 + $0x64] sm:$0xf]  ;;  %v7998_v19 = vpop.permute.xlu0 %3057 }
 0x15d   : >> { %v2664_v42 = vsel %vm6870_vm11, %v2660_v63, %v2663_v38  ;;  %v2475_v13 = vor.u32 %v2474_v53, %v2471_v12  ;;  %v2485_v61 = vrot.slane %v2483_v23, 6  ;;  %6051 = vmatprep.mubr.msk.bf16.mxu0 %vm3454_vm0, %v3552_v27  ;;  %v5897_v25 = vrot.slane %v6388_v54, 10  ;;  %v6390_v62 = vld [vmem:[%s7065_s11 + $0x68] sm:$0x3]  ;;  %v8004_v23 = vpop.permute.xlu1 %3361 }
 0x15e   : >> { %v2488_v31 = vrot.slane %v2486_v11, 7  ;;  %v2674_v45 = vsel %vm6870_vm11, %v2665_v8, %v2673_v34  ;;  %v2481_v30 = vrot.slane %v2479_v40, 4  ;;  %v2260_v14 = vrot.slane %v6389_v18, 6  ;;  %v8002_v53 = vld [vmem:[%s7065_s11 + $0x48] sm:$0xe] }
 0x15f   : >> { %v6015_v38 = vcombine.low %v2664_v42, %v2674_v45  ;;  %v2476_v16 = vrot.slane %v2475_v13, 4  ;;  %v2263_v63 = vrot.slane %v6390_v62, 6  ;;  %v6391_v34 = vld [vmem:[%s7065_s11 + $0x60] sm:$0xf]  ;;  %v5887_v54 = vrot.slane %v7992_v4, 9 }
 0x160   : >> { %v2489_v12 = vor.u32 %v2488_v31, %v2485_v61  ;;  %v2261_v8 = vsel %vm7930_vm13, %v5897_v25, %v2260_v14  ;;  %v2262_v11 = vrot.slane %v2260_v14, 4  ;;  %v5929_v27 = vcombine.low %v6391_v34, %v6389_v18  ;;  %v2712_v45 = vld [vmem:[%s7065_s11 + $0xa8] sm:$0x8] }
 0x161   : >> { %3289 = vrot.lane.b32.xlu1 %v6015_v38, %s6654_s14  ;;  %v2480_v42 = vsel %vm6870_vm11, %v2476_v16, %v2479_v40  ;;  %v1752_v61 = vrot.slane %v7881_v37, 5  ;;  %v1755_v31 = vrot.slane %v7884_v10, 5  ;;  %v5879_v14 = vrot.slane %v8002_v53, 9  ;;  %v2704_v38 = vld [vmem:[%s7065_s11 + $0x48] sm:$0x8] }
 0x162   : >> { %v2490_v13 = vsel %vm6870_vm11, %v2481_v30, %v2489_v12  ;;  %v2264_v25 = vsel %vm7930_vm13, %v2262_v11, %v2263_v63  ;;  %v3399_v18 = vsel %vm1108_vm12, %v5929_v27, %v7744_v7  ;;  %v1696_v10 = vrot.slane %v7904_v22, 5  ;;  %v8032_v11 = vpop.permute.xlu0 %3345 }
 0x163   : >> { %v6007_v62 = vcombine.low %v2480_v42, %v2490_v13  ;;  %v5993_v34 = vcombine.low %v2261_v8, %v2264_v25  ;;  %v3439_v40 = vsel %vm3421_vm14, %v3399_v18, %v7649_v59  ;;  %v1753_v30 = vsel %vm7061_vm15, %v5887_v54, %v1752_v61  ;;  %v8039_v42 = vpop.permute.xlu1 %3153  ;;  %v6392_v18 = vld [vmem:[%s7065_s11 + $0x6c] sm:$0xf] }
 0x164   : >> { %v1754_v16 = vrot.slane %v1752_v61, 4  ;;  %v1699_v12 = vrot.slane %v7911_v24, 5  ;;  %v5919_v63 = vrot.slane %v2712_v45, 11  ;;  %v2849_v7 = vrot.slane %v7881_v37, 7 }
 0x165   : >> { %3273 = vrot.lane.b32.xlu0 %v6007_v62, %s6654_s14  ;;  %v3529_v8 = vsel %vm1108_vm12, %v5993_v34, %v7729_v1  ;;  %v2852_v27 = vrot.slane %v7952_v46, 7  ;;  %v5911_v54 = vrot.slane %v2704_v38, 11  ;;  %v1697_v24 = vsel %vm7061_vm15, %v5879_v14, %v1696_v10  ;;  %v6393_v14 = vld [vmem:[%s7065_s11 + $0x70] sm:$0xf] }
 0x166   : >> { %v1756_v59 = vsel %vm7061_vm15, %v1754_v16, %v1755_v31  ;;  %v1698_v37 = vrot.slane %v1696_v10, 4  ;;  %v3568_v61 = vsel %vm3421_vm14, %v3529_v8, %v7678_v35  ;;  %v2850_v1 = vsel %vm7102_vm2, %v5919_v63, %v2849_v7  ;;  %v8065_v16 = vld [vmem:[%s7065_s11 + $0xb0] sm:$0x3]  ;;  %v8077_v63 = vpop.permute.xlu0 %3137 }
 0x167   : >> { %v5967_v13 = vcombine.low %v1753_v30, %v1756_v59  ;;  %6059 = vmatprep.mubr.msk.bf16.mxu1 %vm3454_vm0, %v3568_v61  ;;  %v2851_v31 = vrot.slane %v2849_v7, 4  ;;  %v2793_v46 = vrot.slane %v7904_v22, 7  ;;  %v2796_v45 = vrot.slane %v7973_v49, 7  ;;  %9874 = vst [vmem:[#allocation5_spill] sm:$0xff] %v8065_v16 }
 0x168   : >> { %v1700_v62 = vsel %vm7061_vm15, %v1698_v37, %v1699_v12  ;;  %v3456_v35 = vsel %vm3454_vm0, %v7958_v36, %v7782_v47  ;;  %v3480_v25 = vsel %vm3454_vm0, %v3439_v40, %v7753_v41  ;;  %v5930_v38 = vcombine.low %v6392_v18, %v6393_v14  ;;  %v6394_v41 = vld [vmem:[%s7065_s11 + $0xc] sm:$0xf]  ;;  %v8073_v36 = vld [vmem:[%s7065_s11 + $0x10] sm:$0xf] }
 0x169   : >> { %3081 = vrot.lane.b32.xlu1 %v5967_v13, %s6653_s12  ;;  %v5959_v22 = vcombine.low %v1697_v24, %v1700_v62  ;;  %v2853_v49 = vsel %vm7102_vm2, %v2851_v31, %v2852_v27  ;;  %v2794_v34 = vsel %vm7102_vm2, %v5911_v54, %v2793_v46  ;;  %v2795_v30 = vrot.slane %v2793_v46, 4  ;;  %3812 = vmatmul.mubr.bf16.vlgmr.msra.gmra.mrb[0].mxu0 %v3456_v35  ;;  %v8085_v27 = vpop.permute.xlu1 %2995  ;;  %v8095_v31 = vld [vmem:[%s7065_s11 + $0x50] sm:$0x3] }
 0x16a   : >> { %3876 = vmatmul.mubr.bf16.vlgmr.msra.gmra.mrb[0].mxu1 %v3480_v25  ;;  %v6031_v10 = vcombine.low %v2850_v1, %v2853_v49  ;;  %v8069_v47 = vsel %vm1108_vm12, %v5930_v38, %v7786_v43  ;;  %v5922_v40 = vcombine.low %v6394_v41, %v8073_v36  ;;  %v2106_v12 = vshrl.u32 %v7992_v4, 16  ;;  %9875 = vst [vmem:[#allocation6_spill] sm:$0xff] %v8095_v31 }
 0x16b   : >> { %3065 = vrot.lane.b32.xlu0 %v5959_v22, %s6653_s12  ;;  %v2797_v7 = vsel %vm7102_vm2, %v2795_v30, %v2796_v45  ;;  %v2109_v8 = vshll.u32 %v7992_v4, 16  ;;  %v2114_v43 = vrot.slane %v7900_v5, 5  ;;  %v2115_v59 = vrot.slane %v7895_v52, 6  ;;  %v8104_v30 = vpop.permute.xlu0 %2979 }
 0x16c   : >> { %v6023_v54 = vcombine.low %v2794_v34, %v2797_v7  ;;  %v8090_v13 = vsel %vm1108_vm12, %v5922_v40, %v7805_v21  ;;  %v2108_v24 = vrot.slane %v2106_v12, 5  ;;  %v2120_v37 = vshrl.u32 %v8065_v16, 16 }
 0x16d   : >> { %3369 = vrot.lane.b32.xlu1 %v6031_v10, %s6653_s12  ;;  %v2111_v61 = vrot.slane %v2109_v8, 6  ;;  %v2116_v1 = vor.u32 %v2115_v59, %v2114_v43  ;;  %v2123_v4 = vshll.u32 %v8065_v16, 16  ;;  %v1922_v52 = vshrl.u32 %v8002_v53, 16  ;;  %v8107_v40 = vpop.permute.xlu1 %3283  ;;  %v8110_v59 = vld [vmem:[%s7065_s11 + $0xb4] sm:$0xf] }
 0x16e   : >> { %v2122_v5 = vrot.slane %v2120_v37, 5  ;;  %v1925_v46 = vshll.u32 %v8002_v53, 16  ;;  %v1930_v45 = vrot.slane %v7922_v9, 5  ;;  %v1931_v21 = vrot.slane %v7919_v58, 6  ;;  %v6396_v9 = vld [vmem:[%s7065_s11 + $0x6c] sm:$0xc] }
 0x16f   : >> { %3353 = vrot.lane.b32.xlu0 %v6023_v54, %s6653_s12  ;;  %v2112_v62 = vor.u32 %v2111_v61, %v2108_v24  ;;  %v2118_v35 = vrot.slane %v2116_v1, 4  ;;  %v2125_v25 = vrot.slane %v2123_v4, 6  ;;  %v1924_v18 = vrot.slane %v1922_v52, 5  ;;  %9876 = vst [vmem:[#allocation7_spill] sm:$0xff] %v8110_v59 }
 0x170   : >> { %v1927_v38 = vrot.slane %v1925_v46, 6  ;;  %v1932_v22 = vor.u32 %v1931_v21, %v1930_v45  ;;  %v1936_v49 = vshrl.u32 %v8095_v31, 16  ;;  %v1939_v34 = vshll.u32 %v8095_v31, 16  ;;  %v6398_v45 = vld [vmem:[%s7065_s11 + $0xc] sm:$0xc] }
 0x171   : >> { %v2113_v53 = vrot.slane %v2112_v62, 4  ;;  %v2126_v10 = vor.u32 %v2125_v25, %v2122_v5  ;;  %v5898_v58 = vrot.slane %v6396_v9, 10  ;;  %v2267_v41 = vrot.slane %v6393_v14, 6  ;;  %v6397_v5 = vld [vmem:[%s7065_s11 + $0x74] sm:$0x3]  ;;  %v8140_v9 = vpop.permute.xlu0 %3267 }
 0x172   : >> { %v1928_v12 = vor.u32 %v1927_v38, %v1924_v18  ;;  %v1934_v7 = vrot.slane %v1932_v22, 4  ;;  %v1938_v8 = vrot.slane %v1936_v49, 5  ;;  %v1941_v43 = vrot.slane %v1939_v34, 6  ;;  %v6399_v25 = vld [vmem:[%s7065_s11 + $0x14] sm:$0x3] }
 0x173   : >> { %v2117_v54 = vsel %vm7180_vm8, %v2113_v53, %v2116_v1  ;;  %v2127_v24 = vsel %vm7180_vm8, %v2118_v35, %v2126_v10  ;;  %v2268_v14 = vsel %vm7930_vm13, %v5898_v58, %v2267_v41  ;;  %v2269_v37 = vrot.slane %v2267_v41, 4  ;;  %v8123_v18 = vld [vmem:[%s7065_s11 + $0xb8] sm:$0xf]  ;;  %v8134_v53 = vld [vmem:[%s7065_s11 + $0xbc] sm:$0x1] }
 0x174   : >> { %v5983_v61 = vcombine.low %v2117_v54, %v2127_v24  ;;  %v1929_v4 = vrot.slane %v1928_v12, 4  ;;  %v1942_v52 = vor.u32 %v1941_v43, %v1938_v8  ;;  %v2270_v46 = vrot.slane %v6397_v5, 6  ;;  %v8138_v10 = vld [vmem:[%s7065_s11 + $0x54] sm:$0xf]  ;;  %v8144_v8 = vpop.permute.xlu1 %3075 }
 0x175   : >> { %v5890_v21 = vrot.slane %v6398_v45, 10  ;;  %v2211_v62 = vrot.slane %v8073_v36, 6  ;;  %v2214_v1 = vrot.slane %v6399_v25, 6  ;;  %v1562_v35 = vshrl.u32 %v8110_v59, 16  ;;  %9877 = vst [vmem:[#allocation8_spill] sm:$0xff] %v8138_v10 }
 0x176   : >> { %3161 = vrot.lane.b32.xlu1 %v5983_v61, %s6655_s15  ;;  %v1933_v38 = vsel %vm7180_vm8, %v1929_v4, %v1932_v22  ;;  %v1943_v49 = vsel %vm7180_vm8, %v1934_v7, %v1942_v52  ;;  %v2271_v34 = vsel %vm7930_vm13, %v2269_v37, %v2270_v46  ;;  %v1565_v36 = vshll.u32 %v8110_v59, 16  ;;  %v8153_v37 = vld [vmem:[%s7065_s11 + $0x58] sm:$0xf]  ;;  %v8212_v31 = vld [vmem:[%s7065_s11 + $0x54] sm:$0xc] }
 0x177   : >> { %v5975_v58 = vcombine.low %v1933_v38, %v1943_v49  ;;  %v5994_v41 = vcombine.low %v2268_v14, %v2271_v34  ;;  %v2212_v22 = vsel %vm7930_vm13, %v5890_v21, %v2211_v62  ;;  %v2213_v12 = vrot.slane %v2211_v62, 4  ;;  %v8167_v62 = vld [vmem:[%s7065_s11 + $0x5c] sm:$0x1]  ;;  %9879 = vst [vmem:[#allocation10_spill] sm:$0xff] %v8212_v31 }
 0x178   : >> { %v1564_v7 = vrot.slane %v1562_v35, 4  ;;  %v1567_v43 = vrot.slane %v1565_v36, 5  ;;  %v8147_v54 = vshll.u32 %v8123_v18, 16  ;;  %v8150_v24 = vshrl.u32 %v8123_v18, 16 }
 0x179   : >> { %3145 = vrot.lane.b32.xlu0 %v5975_v58, %s6655_s15  ;;  %v8158_v14 = vsel %vm1108_vm12, %v5994_v41, %v7810_v17  ;;  %v2215_v61 = vsel %vm7930_vm13, %v2213_v12, %v2214_v1  ;;  %v1581_v4 = vshll.u32 %v8134_v53, 16  ;;  %v1370_v52 = vshrl.u32 %v8138_v10, 16  ;;  %v8181_v58 = vld [vmem:[%s7065_s11 + $0xb4] sm:$0xc]  ;;  %v8183_v41 = vpop.permute.xlu0 %3059 }
 0x17a   : >> { %v5986_v5 = vcombine.low %v2212_v22, %v2215_v61  ;;  %v1568_v46 = vor.u32 %v1567_v43, %v1564_v7  ;;  %v1573_v45 = vrot.slane %v8147_v54, 5  ;;  %v1577_v21 = vrot.slane %v8150_v24, 4  ;;  %9878 = vst [vmem:[#allocation9_spill] sm:$0xff] %v8181_v58  ;;  %v8192_v43 = vpop.permute.xlu1 %3363 }
 0x17b   : >> { %v1583_v25 = vrot.slane %v1581_v4, 5  ;;  %v1372_v35 = vrot.slane %v1370_v52, 4  ;;  %v1373_v17 = vshll.u32 %v8138_v10, 16  ;;  %v8171_v38 = vshll.u32 %v8153_v37, 16 }
 0x17c   : >> { %v8175_v1 = vsel %vm1108_vm12, %v5986_v5, %v7829_v56  ;;  %v1569_v49 = vrot.slane %v1568_v46, 4  ;;  %v1578_v34 = vor.u32 %v1577_v21, %v1573_v45  ;;  %v8178_v36 = vshrl.u32 %v8153_v37, 16 }
 0x17d   : >> { %v1375_v22 = vrot.slane %v1373_v17, 5  ;;  %v1381_v12 = vrot.slane %v8171_v38, 5  ;;  %v1389_v7 = vshll.u32 %v8167_v62, 16  ;;  %v8190_v56 = vsel %vm3421_vm14, %v8069_v47, %v7835_v15  ;;  %v8203_v17 = vld [vmem:[%s7065_s11 + $0xbc] sm:$0x7]  ;;  %v8216_v10 = vpop.permute.xlu0 %3347 }
 0x17e   : >> { %v1574_v61 = vsel %vm7146_vm5, %v1569_v49, %v1573_v45  ;;  %v1579_v4 = vrot.slane %v1578_v34, 4  ;;  %v1385_v52 = vrot.slane %v8178_v36, 4  ;;  %v8200_v5 = vsel %vm3421_vm14, %v8090_v13, %v7861_v50  ;;  %9880 = vst [vmem:[#allocation11_spill] sm:$0xff] %v8216_v10  ;;  %v8234_v10 = vld [vmem:[%s7065_s11 + $0xb4] sm:$0xe] }
 0x17f   : >> { %v1376_v46 = vor.u32 %v1375_v22, %v1372_v35  ;;  %v1391_v21 = vrot.slane %v1389_v7, 5  ;;  %v2676_v15 = vshrl.u32 %v8181_v58, 16  ;;  %v2679_v47 = vshll.u32 %v8181_v58, 16 }
 0x180   : >> { %v1584_v3 = vsel %vm7146_vm5, %v1579_v4, %v1583_v25  ;;  %v1386_v45 = vor.u32 %v1385_v52, %v1381_v12  ;;  %v2684_v49 = vrot.slane %v8150_v24, 6  ;;  %v2685_v34 = vrot.slane %v8147_v54, 7  ;;  %v8222_v52 = vld [vmem:[%s7065_s11 + $0x5c] sm:$0x7] }
 0x181   : >> { %v5952_v50 = vcombine.low %v1574_v61, %v1584_v3  ;;  %v1377_v13 = vrot.slane %v1376_v46, 4  ;;  %v2678_v35 = vrot.slane %v2676_v15, 6  ;;  %v2681_v22 = vrot.slane %v2679_v47, 7  ;;  %v8226_v46 = vpop.permute.xlu1 %3155 }
 0x182   : >> { %v1387_v7 = vrot.slane %v1386_v45, 4  ;;  %v2686_v57 = vor.u32 %v2685_v34, %v2684_v49  ;;  %v2690_v16 = vshrl.u32 %v8203_v17, 16  ;;  %v2693_v58 = vshll.u32 %v8203_v17, 16 }
 0x183   : >> { %3003 = vrot.lane.b32.xlu1 %v5952_v50, %s6654_s14  ;;  %v1382_v25 = vsel %vm7146_vm5, %v1377_v13, %v1381_v12  ;;  %v2682_v4 = vor.u32 %v2681_v22, %v2678_v35  ;;  %v2492_v3 = vshrl.u32 %v8212_v31, 16  ;;  %v2495_v61 = vshll.u32 %v8212_v31, 16 }
 0x184   : >> { %v1392_v15 = vsel %vm7146_vm5, %v1387_v7, %v1391_v21  ;;  %v2688_v47 = vrot.slane %v2686_v57, 4  ;;  %v2692_v45 = vrot.slane %v2690_v16, 6  ;;  %v2695_v49 = vrot.slane %v2693_v58, 7  ;;  %v8244_v7 = vld [vmem:[%s7065_s11 + $0x54] sm:$0xe] }
 0x185   : >> { %v5944_v34 = vcombine.low %v1382_v25, %v1392_v15  ;;  %v2683_v50 = vrot.slane %v2682_v4, 4  ;;  %v2494_v12 = vrot.slane %v2492_v3, 6  ;;  %v2497_v13 = vrot.slane %v2495_v61, 7 }
 0x186   : >> { %v2696_v35 = vor.u32 %v2695_v49, %v2692_v45  ;;  %v2500_v22 = vrot.slane %v8178_v36, 6  ;;  %v2501_v59 = vrot.slane %v8171_v38, 7  ;;  %v2506_v31 = vshrl.u32 %v8222_v52, 16 }
 0x187   : >> { %2987 = vrot.lane.b32.xlu0 %v5944_v34, %s6654_s14  ;;  %v2687_v6 = vsel %vm6870_vm11, %v2683_v50, %v2686_v57  ;;  %v2498_v16 = vor.u32 %v2497_v13, %v2494_v12  ;;  %v2509_v58 = vshll.u32 %v8222_v52, 16  ;;  %v3570_v21 = vsel %vm3421_vm14, %v8158_v14, %v7865_v44  ;;  %v8252_v57 = vpop.permute.xlu0 %3139  ;;  %v2713_v14 = vld [vmem:[%s7065_s11 + $0xb4] sm:$0x8] }
 0x188   : >> { %v2697_v25 = vsel %vm6870_vm11, %v2688_v47, %v2696_v35  ;;  %v2502_v4 = vor.u32 %v2501_v59, %v2500_v22  ;;  %v2508_v3 = vrot.slane %v2506_v31, 6  ;;  %v3554_v61 = vsel %vm3421_vm14, %v8175_v1, %v7878_v33  ;;  %6060 = vmatprep.mubr.msk.bf16.mxu1 %vm3454_vm0, %v3570_v21  ;;  %v8257_v47 = vpop.permute.xlu1 %2997 }
 0x189   : >> { %v6016_v15 = vcombine.low %v2687_v6, %v2697_v25  ;;  %v2499_v45 = vrot.slane %v2498_v16, 4  ;;  %v2511_v49 = vrot.slane %v2509_v58, 7  ;;  %v5888_v44 = vrot.slane %v8234_v10, 9  ;;  %6052 = vmatprep.mubr.msk.bf16.mxu0 %vm3454_vm0, %v3554_v61 }
 0x18a   : >> { %v2504_v31 = vrot.slane %v2502_v4, 4  ;;  %v1759_v59 = vrot.slane %v8123_v18, 5  ;;  %v1762_v33 = vrot.slane %v8134_v53, 5  ;;  %v5880_v1 = vrot.slane %v8244_v7, 9  ;;  %v2705_v53 = vld [vmem:[%s7065_s11 + $0x54] sm:$0x8] }
 0x18b   : >> { %3291 = vrot.lane.b32.xlu1 %v6016_v15, %s6654_s14  ;;  %v2503_v34 = vsel %vm6870_vm11, %v2499_v45, %v2502_v4  ;;  %v2512_v50 = vor.u32 %v2511_v49, %v2508_v3  ;;  %v1703_v12 = vrot.slane %v8153_v37, 5  ;;  %v1706_v13 = vrot.slane %v8167_v62, 5  ;;  %v8280_v45 = vpop.permute.xlu0 %2981 }
 0x18c   : >> { %v1760_v35 = vsel %vm7061_vm15, %v5888_v44, %v1759_v59  ;;  %v1761_v22 = vrot.slane %v1759_v59, 4  ;;  %v5920_v6 = vrot.slane %v2713_v14, 11  ;;  %v2856_v16 = vrot.slane %v8123_v18, 7  ;;  %v8285_v59 = vpop.permute.xlu1 %3285 }
 0x18d   : >> { %v2513_v58 = vsel %vm6870_vm11, %v2504_v31, %v2512_v50  ;;  %v1704_v21 = vsel %vm7061_vm15, %v5880_v1, %v1703_v12  ;;  %v1705_v25 = vrot.slane %v1703_v12, 4  ;;  %v2859_v4 = vrot.slane %v8203_v17, 7  ;;  %v8295_v50 = vld [vmem:[%s7065_s11 + $0xbc] sm:$0x3] }
 0x18e   : >> { %v6008_v3 = vcombine.low %v2503_v34, %v2513_v58  ;;  %v1763_v62 = vsel %vm7061_vm15, %v1761_v22, %v1762_v33  ;;  %v2857_v61 = vsel %vm7102_vm2, %v5920_v6, %v2856_v16  ;;  %v2858_v15 = vrot.slane %v2856_v16, 4  ;;  %v6400_v58 = vld [vmem:[%s7065_s11 + $0x78] sm:$0xf] }
 0x18f   : >> { %v5968_v49 = vcombine.low %v1760_v35, %v1763_v62  ;;  %v1707_v44 = vsel %vm7061_vm15, %v1705_v25, %v1706_v13  ;;  %v5912_v14 = vrot.slane %v2705_v53, 11  ;;  %v2800_v31 = vrot.slane %v8153_v37, 7  ;;  %v6403_v25 = vld [vmem:[%s7065_s11 + $0x1c] sm:$0xf] }
 0x190   : >> { %3275 = vrot.lane.b32.xlu0 %v6008_v3, %s6654_s14  ;;  %v5960_v17 = vcombine.low %v1704_v21, %v1707_v44  ;;  %v2860_v33 = vsel %vm7102_vm2, %v2858_v15, %v2859_v4  ;;  %v2803_v1 = vrot.slane %v8222_v52, 7  ;;  %v3459_v34 = vsel %vm3454_vm0, %v8200_v5, %v7913_v26  ;;  %v6402_v21 = vld [vmem:[%s7065_s11 + $0x18] sm:$0xf]  ;;  %v8322_v15 = vpop.permute.xlu1 %3077 }
 0x191   : >> { %3083 = vrot.lane.b32.xlu1 %v5968_v49, %s6653_s12  ;;  %v6032_v28 = vcombine.low %v2857_v61, %v2860_v33  ;;  %v2801_v12 = vsel %vm7102_vm2, %v5912_v14, %v2800_v31  ;;  %v2802_v13 = vrot.slane %v2800_v31, 4  ;;  %3820 = vmatmul.mubr.bf16.gmra.mrb[4].mxu0 %v3459_v34  ;;  %v3483_v52 = vsel %vm3454_vm0, %v8190_v56, %v7886_v48  ;;  %v6401_v48 = vld [vmem:[%s7065_s11 + $0x7c] sm:$0xf] }
 0x192   : >> { %3884 = vmatmul.mubr.bf16.gmra.mrb[4].mxu1 %v3483_v52  ;;  %v2129_v26 = vshrl.u32 %v8234_v10, 16  ;;  %v2132_v5 = vshll.u32 %v8234_v10, 16  ;;  %v2137_v22 = vrot.slane %v8150_v24, 5  ;;  %v2138_v6 = vrot.slane %v8147_v54, 6  ;;  %v8316_v10 = vld [vmem:[%s7065_s11 + $0x5c] sm:$0x3]  ;;  %v8318_v0 = vpop.permute.xlu0 %3269 }
 0x193   : >> { %v2804_v35 = vsel %vm7102_vm2, %v2802_v13, %v2803_v1  ;;  %v2143_v16 = vshrl.u32 %v8295_v50, 16  ;;  %v5931_v56 = vcombine.low %v6400_v58, %v6401_v48  ;;  %v5923_v4 = vcombine.low %v6402_v21, %v6403_v25 }
 0x194   : >> { %3067 = vrot.lane.b32.xlu0 %v5960_v17, %s6653_s12  ;;  %v6024_v53 = vcombine.low %v2801_v12, %v2804_v35  ;;  %v2131_v3 = vrot.slane %v2129_v26, 5  ;;  %v2134_v24 = vrot.slane %v2132_v5, 6  ;;  %v2139_v54 = vor.u32 %v2138_v6, %v2137_v22 }
 0x195   : >> { %3371 = vrot.lane.b32.xlu1 %v6032_v28, %s6653_s12  ;;  %v2145_v62 = vrot.slane %v2143_v16, 5  ;;  %v2146_v61 = vshll.u32 %v8295_v50, 16  ;;  %v1945_v49 = vshrl.u32 %v8244_v7, 16  ;;  %v1948_v44 = vshll.u32 %v8244_v7, 16 }
 0x196   : >> { %v1953_v14 = vrot.slane %v8178_v36, 5  ;;  %v1954_v31 = vrot.slane %v8171_v38, 6  ;;  %v2135_v17 = vor.u32 %v2134_v24, %v2131_v3  ;;  %v2141_v33 = vrot.slane %v2139_v54, 4  ;;  %v6404_v36 = vld [vmem:[%s7065_s11 + $0x78] sm:$0xc]  ;;  %v8332_v58 = vpop.permute.xlu0 %3061 }
 0x197   : >> { %v2148_v1 = vrot.slane %v2146_v61, 6  ;;  %v1959_v34 = vshrl.u32 %v8316_v10, 16  ;;  %v1947_v28 = vrot.slane %v1945_v49, 5  ;;  %v1950_v12 = vrot.slane %v1948_v44, 6  ;;  %v6405_v3 = vld [vmem:[%s7065_s11 + $0x80] sm:$0x3]  ;;  %v8340_v49 = vpop.permute.xlu1 %3365 }
 0x198   : >> { %3355 = vrot.lane.b32.xlu0 %v6024_v53, %s6653_s12  ;;  %v1955_v13 = vor.u32 %v1954_v31, %v1953_v14  ;;  %v1962_v52 = vshll.u32 %v8316_v10, 16  ;;  %v2136_v26 = vrot.slane %v2135_v17, 4  ;;  %v5899_v35 = vrot.slane %v6404_v36, 10  ;;  %v6406_v61 = vld [vmem:[%s7065_s11 + $0x18] sm:$0xc] }
 0x199   : >> { %v2149_v7 = vor.u32 %v2148_v1, %v2145_v62  ;;  %v1961_v5 = vrot.slane %v1959_v34, 5  ;;  %v1951_v38 = vor.u32 %v1950_v12, %v1947_v28  ;;  %v2274_v16 = vrot.slane %v6401_v48, 6  ;;  %v6407_v34 = vld [vmem:[%s7065_s11 + $0x20] sm:$0x3] }
 0x19a   : >> { %v1957_v22 = vrot.slane %v1955_v13, 4  ;;  %v1964_v6 = vrot.slane %v1962_v52, 6  ;;  %v2140_v53 = vsel %vm7180_vm8, %v2136_v26, %v2139_v54  ;;  %v2277_v24 = vrot.slane %v6405_v3, 6  ;;  %v6412_v3 = vld [vmem:[%s7065_s11 + $0x24] sm:$0xf] }
 0x19b   : >> { %v2150_v21 = vsel %vm7180_vm8, %v2141_v33, %v2149_v7  ;;  %v5891_v62 = vrot.slane %v6406_v61, 10  ;;  %v3405_v44 = vsel %vm1108_vm12, %v5931_v56, %v7916_v32  ;;  %v1952_v48 = vrot.slane %v1951_v38, 4  ;;  %v8364_v7 = vpop.permute.xlu0 %3349 }
 0x19c   : >> { %v5984_v14 = vcombine.low %v2140_v53, %v2150_v21  ;;  %v1965_v31 = vor.u32 %v1964_v6, %v1961_v5  ;;  %v2275_v17 = vsel %vm7930_vm13, %v5899_v35, %v2274_v16  ;;  %v2276_v1 = vrot.slane %v2274_v16, 4  ;;  %v6408_v5 = vld [vmem:[%s7065_s11 + $0x84] sm:$0xc]  ;;  %v6409_v35 = vld [vmem:[%s7065_s11 + $0x88] sm:$0xf] }
 0x19d   : >> { %v2218_v54 = vrot.slane %v6403_v25, 6  ;;  %v2221_v28 = vrot.slane %v6407_v34, 6  ;;  %v3381_v33 = vsel %vm1108_vm12, %v5923_v4, %v7939_v20  ;;  %v1956_v32 = vsel %vm7180_vm8, %v1952_v48, %v1955_v13  ;;  %v6411_v53 = vld [vmem:[%s7065_s11 + $0x84] sm:$0xf] }
 0x19e   : >> { %3163 = vrot.lane.b32.xlu1 %v5984_v14, %s6655_s15  ;;  %v1966_v56 = vsel %vm7180_vm8, %v1957_v22, %v1965_v31  ;;  %v3443_v12 = vsel %vm3421_vm14, %v3405_v44, %v7981_v60  ;;  %v2278_v52 = vsel %vm7930_vm13, %v2276_v1, %v2277_v24  ;;  %v3427_v13 = vsel %vm3421_vm14, %v3381_v33, %v7998_v19  ;;  %v6410_v22 = vld [vmem:[%s7065_s11 + $0x8c] sm:$0x3]  ;;  %v8372_v19 = vpop.permute.xlu1 %3157  ;;  %v6413_v24 = vld [vmem:[%s7065_s11 + $0x28] sm:$0xf]  ;;  %v6414_v48 = vld [vmem:[%s7065_s11 + $0x24] sm:$0xc] }
 0x19f   : >> { %v5976_v25 = vcombine.low %v1956_v32, %v1966_v56  ;;  %v2219_v20 = vsel %vm7930_vm13, %v5891_v62, %v2218_v54  ;;  %v2220_v4 = vrot.slane %v2218_v54, 4  ;;  %v5995_v26 = vcombine.low %v2275_v17, %v2278_v52  ;;  %v6415_v54 = vld [vmem:[%s7065_s11 + $0x2c] sm:$0x3] }
 0x1a0   : >> { %v3486_v51 = vsel %vm3454_vm0, %v3443_v12, %v8039_v42  ;;  %v5900_v36 = vrot.slane %v6408_v5, 10  ;;  %v2281_v38 = vrot.slane %v6409_v35, 6  ;;  %v2284_v6 = vrot.slane %v6410_v22, 6 }
 0x1a1   : >> { %3147 = vrot.lane.b32.xlu0 %v5976_v25, %s6655_s15  ;;  %v2222_v60 = vsel %vm7930_vm13, %v2220_v4, %v2221_v28  ;;  %v3535_v42 = vsel %vm1108_vm12, %v5995_v26, %v7945_v2  ;;  %v5932_v21 = vcombine.low %v6411_v53, %v6409_v35  ;;  %v5924_v61 = vcombine.low %v6412_v3, %v6413_v24  ;;  %v8399_v56 = vpop.permute.xlu0 %3141  ;;  %v6416_v25 = vld [vmem:[%s7065_s11 + $0x90] sm:$0xc] }
 0x1a2   : >> { %v5987_v16 = vcombine.low %v2219_v20, %v2222_v60  ;;  %v3572_v62 = vsel %vm3421_vm14, %v3535_v42, %v8004_v23  ;;  %v2282_v44 = vsel %vm7930_vm13, %v5900_v36, %v2281_v38  ;;  %v2283_v14 = vrot.slane %v2281_v38, 4  ;;  %v6417_v20 = vld [vmem:[%s7065_s11 + $0x94] sm:$0xf] }
 0x1a3   : >> { %v5892_v31 = vrot.slane %v6414_v48, 10  ;;  %6061 = vmatprep.mubr.msk.bf16.mxu1 %vm3454_vm0, %v3572_v62  ;;  %v3462_v2 = vsel %vm3454_vm0, %v3427_v13, %v8077_v63  ;;  %v2225_v1 = vrot.slane %v6413_v24, 6  ;;  %v2228_v34 = vrot.slane %v6415_v54, 6  ;;  %v9881_v3 = vld [vmem:[#allocation11_spill] sm:$0xff]  ;;  %v8445_v54 = vld [vmem:[%s7065_s11 + $0xa0] sm:$0xf] }
 0x1a4   : >> { %v3511_v17 = vsel %vm1108_vm12, %v5987_v16, %v7976_v55  ;;  %3892 = vmatmul.mubr.bf16.gmra.mrb[8].mxu1 %v3486_v51  ;;  %v2285_v28 = vsel %vm7930_vm13, %v2283_v14, %v2284_v6  ;;  %v3408_v55 = vsel %vm1108_vm12, %v5932_v21, %v8085_v27  ;;  %v5901_v52 = vrot.slane %v6416_v25, 10  ;;  %v6418_v51 = vld [vmem:[%s7065_s11 + $0x98] sm:$0x3]  ;;  %v6420_v6 = vld [vmem:[%s7065_s11 + $0x34] sm:$0xf] }
 0x1a5   : >> { %v3556_v23 = vsel %vm3421_vm14, %v3511_v17, %v8032_v11  ;;  %v5996_v33 = vcombine.low %v2282_v44, %v2285_v28  ;;  %v2226_v63 = vsel %vm7930_vm13, %v5892_v31, %v2225_v1  ;;  %v2227_v32 = vrot.slane %v2225_v1, 4  ;;  %v6421_v16 = vld [vmem:[%s7065_s11 + $0x38] sm:$0x3]  ;;  %v6422_v21 = vld [vmem:[%s7065_s11 + $0x90] sm:$0xf] }
 0x1a6   : >> { %6053 = vmatprep.mubr.msk.bf16.mxu0 %vm3454_vm0, %v3556_v23  ;;  %v3384_v11 = vsel %vm1108_vm12, %v5924_v61, %v8104_v30  ;;  %v3445_v12 = vsel %vm3421_vm14, %v3408_v55, %v8144_v8  ;;  %v2288_v27 = vrot.slane %v6417_v20, 6  ;;  %v2291_v60 = vrot.slane %v6418_v51, 6  ;;  %v6419_v30 = vld [vmem:[%s7065_s11 + $0x30] sm:$0xc]  ;;  %v6426_v55 = vld [vmem:[%s7065_s11 + $0xa4] sm:$0x3] }
 0x1a7   : >> { %3828 = vmatmul.mubr.bf16.gmra.mrb[8].mxu0 %v3462_v2  ;;  %v8407_v4 = vpop.permute.xlu1 %2999  ;;  %v3538_v26 = vsel %vm1108_vm12, %v5996_v33, %v8107_v40  ;;  %v2229_v13 = vsel %vm7930_vm13, %v2227_v32, %v2228_v34  ;;  %v5893_v5 = vrot.slane %v6419_v30, 10  ;;  %v3429_v36 = vsel %vm3421_vm14, %v3384_v11, %v8183_v41  ;;  %v6424_v17 = vld [vmem:[%s7065_s11 + $0x30] sm:$0xf] }
 0x1a8   : >> { %v5988_v8 = vcombine.low %v2226_v63, %v2229_v13  ;;  %v3574_v35 = vsel %vm3421_vm14, %v3538_v26, %v8192_v43  ;;  %v3489_v38 = vsel %vm3454_vm0, %v3445_v12, %v8226_v46  ;;  %v2289_v40 = vsel %vm7930_vm13, %v5901_v52, %v2288_v27  ;;  %v6427_v63 = vld [vmem:[%s7065_s11 + $0x3c] sm:$0xc]  ;;  %v6429_v13 = vld [vmem:[%s7065_s11 + $0x44] sm:$0x3] }
 0x1a9   : >> { %6062 = vmatprep.mubr.msk.bf16.mxu1 %vm3454_vm0, %v3574_v35  ;;  %v2290_v22 = vrot.slane %v2288_v27, 4  ;;  %v2232_v42 = vrot.slane %v6420_v6, 6  ;;  %v2235_v53 = vrot.slane %v6421_v16, 6  ;;  %v3465_v43 = vsel %vm3454_vm0, %v3429_v36, %v8252_v57  ;;  %v6423_v57 = vld [vmem:[%s7065_s11 + $0x9c] sm:$0xc] }
 0x1aa   : >> { %v3514_v41 = vsel %vm1108_vm12, %v5988_v8, %v8140_v9  ;;  %v5933_v46 = vcombine.low %v6422_v21, %v6417_v20  ;;  %v5902_v48 = vrot.slane %v6423_v57, 10  ;;  %v5925_v2 = vcombine.low %v6424_v17, %v6420_v6  ;;  %v6428_v27 = vld [vmem:[%s7065_s11 + $0x40] sm:$0xf]  ;;  %v6430_v21 = vld [vmem:[%s7065_s11 + $0x9c] sm:$0xf] }
 0x1ab   : >> { %v3558_v24 = vsel %vm3421_vm14, %v3514_v41, %v9881_v3  ;;  %v2292_v61 = vsel %vm7930_vm13, %v2290_v22, %v2291_v60  ;;  %v2233_v62 = vsel %vm7930_vm13, %v5893_v5, %v2232_v42  ;;  %v2234_v44 = vrot.slane %v2232_v42, 4  ;;  %v8437_v14 = vpop.permute.xlu0 %2983 }
 0x1ac   : >> { %6054 = vmatprep.mubr.msk.bf16.mxu0 %vm3454_vm0, %v3558_v24  ;;  %3900 = vmatmul.mubr.bf16.gmra.mrb[12].mxu1 %v3489_v38  ;;  %v5997_v9 = vcombine.low %v2289_v40, %v2292_v61  ;;  %v2295_v34 = vrot.slane %v8445_v54, 6  ;;  %v2298_v33 = vrot.slane %v6426_v55, 6  ;;  %v5894_v32 = vrot.slane %v6427_v63, 10  ;;  %v9885_v24 = vld [vmem:[#allocation10_spill] sm:$0xff] }
 0x1ad   : >> { %v2236_v1 = vsel %vm7930_vm13, %v2234_v44, %v2235_v53  ;;  %v3411_v11 = vsel %vm1108_vm12, %v5933_v46, %v8257_v47  ;;  %v2239_v26 = vrot.slane %v6428_v27, 6  ;;  %v2242_v51 = vrot.slane %v6429_v13, 6  ;;  %v9884_v53 = vld [vmem:[#allocation9_spill] sm:$0xff] }
 0x1ae   : >> { %v3288_v31 = vpop.permute.xlu1 %3287  ;;  %v3541_v23 = vsel %vm1108_vm12, %v5997_v9, %v8285_v59  ;;  %v5989_v28 = vcombine.low %v2233_v62, %v2236_v1  ;;  %v2296_v25 = vsel %vm7930_vm13, %v5902_v48, %v2295_v34  ;;  %v2297_v52 = vrot.slane %v2295_v34, 4 }
 0x1af   : >> { %3836 = vmatmul.mubr.bf16.gmra.mrb[12].mxu0 %v3465_v43  ;;  %v3576_v12 = vsel %vm3421_vm14, %v3541_v23, %v8340_v49  ;;  %v3447_v59 = vsel %vm3421_vm14, %v3411_v11, %v8322_v15  ;;  %v3387_v49 = vsel %vm1108_vm12, %v5925_v2, %v8280_v45  ;;  %v2240_v36 = vsel %vm7930_vm13, %v5894_v32, %v2239_v26  ;;  %v6431_v2 = vld [vmem:[%s7065_s11 + $0x3c] sm:$0xf] }
 0x1b0   : >> { %v3517_v20 = vsel %vm1108_vm12, %v5989_v28, %v8318_v0  ;;  %6063 = vmatprep.mubr.msk.bf16.mxu1 %vm3454_vm0, %v3576_v12  ;;  %v3492_v30 = vsel %vm3454_vm0, %v3447_v59, %v8372_v19  ;;  %v2299_v0 = vsel %vm7930_vm13, %v2297_v52, %v2298_v33  ;;  %v3431_v5 = vsel %vm3421_vm14, %v3387_v49, %v8332_v58  ;;  %v9882_v58 = vld [vmem:[#allocation7_spill] sm:$0xff] }
 0x1b1   : >> { %v3560_v60 = vsel %vm3421_vm14, %v3517_v20, %v8364_v7  ;;  %v5998_v8 = vcombine.low %v2296_v25, %v2299_v0  ;;  %v2241_v45 = vrot.slane %v2239_v26, 4  ;;  %v3468_v7 = vsel %vm3454_vm0, %v3431_v5, %v8399_v56  ;;  %v9883_v56 = vld [vmem:[#allocation8_spill] sm:$0xff]  ;;  %v6432_v20 = vld [vmem:[%s7065_s11 + $0xac] sm:$0xf] }
 0x1b2   : >> { %v3080_v47 = vpop.permute.xlu1 %3079  ;;  %6055 = vmatprep.mubr.msk.bf16.mxu0 %vm3454_vm0, %v3560_v60  ;;  %v5936_v40 = vcombine.low %v9882_v58, %v8123_v18  ;;  %v5928_v16 = vcombine.low %v9883_v56, %v8153_v37  ;;  %v5904_v41 = vrot.slane %v9884_v53, 10  ;;  %v2309_v43 = vrot.slane %v8123_v18, 6  ;;  %v6433_v26 = vld [vmem:[%s7065_s11 + $0x4c] sm:$0xf]  ;;  %v9886_v60 = vld [vmem:[#allocation5_spill] sm:$0xff] }
 0x1b3   : >> { %v3272_v15 = vpop.permute.xlu0 %3271  ;;  %v3544_v19 = vsel %vm1108_vm12, %v5998_v8, %v3288_v31  ;;  %v2243_v35 = vsel %vm7930_vm13, %v2241_v45, %v2242_v51  ;;  %v5934_v46 = vcombine.low %v6430_v21, %v8445_v54  ;;  %v2312_v3 = vrot.slane %v8295_v50, 6  ;;  %v6434_v51 = vld [vmem:[%s7065_s11 + $0xa8] sm:$0xc] }
 0x1b4   : >> { %3908 = vmatmul.mubr.bf16.gmra.mrb[16].mxu1 %v3492_v30  ;;  %v5990_v22 = vcombine.low %v2240_v36, %v2243_v35  ;;  %v5896_v61 = vrot.slane %v9885_v24, 10  ;;  %v8498_v9 = vsel %vm7930_vm13, %v5904_v41, %v2309_v43  ;;  %v2311_v57 = vrot.slane %v2309_v43, 4  ;;  %v9888_v8 = vld [vmem:[#allocation6_spill] sm:$0xff] }
 0x1b5   : >> { %v2253_v48 = vrot.slane %v8153_v37, 6  ;;  %v2256_v17 = vrot.slane %v8316_v10, 6  ;;  %v5926_v1 = vcombine.low %v6431_v2, %v6428_v27  ;;  %v3414_v23 = vsel %vm1108_vm12, %v5934_v46, %v8407_v4  ;;  %v3617_v37 = vld [vmem:[#allocation3 + $0x8] sm:$0xff] }
 0x1b6   : >> { %v3368_v38 = vpop.permute.xlu1 %3367  ;;  %v3520_v62 = vsel %vm1108_vm12, %v5990_v22, %v3272_v15  ;;  %v8507_v50 = vsel %vm7930_vm13, %v2311_v57, %v2312_v3  ;;  %v3449_v28 = vsel %vm3421_vm14, %v3414_v23, %v3080_v47  ;;  %v2302_v59 = vrot.slane %v6432_v20, 6 }
 0x1b7   : >> { %v3064_v6 = vpop.permute.xlu0 %3063  ;;  %v3578_v42 = vsel %vm3421_vm14, %v3544_v19, %v3368_v38  ;;  %3844 = vmatmul.mubr.bf16.gmra.mrb[16].mxu0 %v3468_v7  ;;  %v8511_v54 = vsel %vm7930_vm13, %v5896_v61, %v2253_v48  ;;  %v2255_v34 = vrot.slane %v2253_v48, 4  ;;  %v6000_v10 = vcombine.low %v8498_v9, %v8507_v50  ;;  %v6435_v61 = vld [vmem:[%s7065_s11 + $0xa8] sm:$0xf] }
 0x1b8   : >> { %6064 = vmatprep.mubr.msk.bf16.mxu1 %vm3454_vm0, %v3578_v42  ;;  %v3390_v4 = vsel %vm1108_vm12, %v5926_v1, %v8437_v14  ;;  %v2246_v13 = vrot.slane %v6433_v26, 6  ;;  %v5903_v47 = vrot.slane %v6434_v51, 10  ;;  %v2304_v49 = vrot.slane %v2302_v59, 4  ;;  %v9887_v14 = vld [vmem:[#allocation4_spill] sm:$0xff] }
 0x1b9   : >> { %v8520_v33 = vsel %vm7930_vm13, %v2255_v34, %v2256_v17  ;;  %v3433_v11 = vsel %vm3421_vm14, %v3390_v4, %v3064_v6  ;;  %v2305_v30 = vrot.slane %v9886_v60, 6  ;;  %v5895_v15 = vrot.slane %v9887_v14, 10 }
 0x1ba   : >> { %v5992_v32 = vcombine.low %v8511_v54, %v8520_v33  ;;  %v2248_v5 = vrot.slane %v2246_v13, 4  ;;  %v2249_v36 = vrot.slane %v9888_v8, 6  ;;  %v2303_v45 = vsel %vm7930_vm13, %v5903_v47, %v2302_v59 }
 0x1bb   : >> { %v3352_v44 = vpop.permute.xlu0 %3351  ;;  %v2306_v7 = vsel %vm7930_vm13, %v2304_v49, %v2305_v30  ;;  %v2247_v38 = vsel %vm7930_vm13, %v5895_v15, %v2246_v13  ;;  %v3632_v49 = vld [vmem:[#allocation3 + $0x80] sm:$0xff] }
 0x1bc   : >> { %v3562_v31 = vsel %vm3421_vm14, %v3520_v62, %v3352_v44  ;;  %v5999_v35 = vcombine.low %v2303_v45, %v2306_v7  ;;  %v2250_v22 = vsel %vm7930_vm13, %v2248_v5, %v2249_v36  ;;  %v5935_v62 = vcombine.low %v6435_v61, %v6432_v20 }
 0x1bd   : >> { %6056 = vmatprep.mubr.msk.bf16.mxu0 %vm3454_vm0, %v3562_v31  ;;  %v5991_v42 = vcombine.low %v2247_v38, %v2250_v22  ;;  %v5927_v44 = vcombine.low %v6436_v29, %v6433_v26 }
 0x1bf   : >> { %v3160_v55 = vpop.permute.xlu1 %3159 }
 0x1c0   : >> { %v3495_v63 = vsel %vm3454_vm0, %v3449_v28, %v3160_v55 }
 0x1c1   : >> { %3916 = vmatmul.mubr.bf16.gmra.mrb[20].mxu1 %v3495_v63 }
 0x1c2   : >> { %v3144_v12 = vpop.permute.xlu0 %3143 }
 0x1c3   : >> { %v3471_v25 = vsel %vm3454_vm0, %v3433_v11, %v3144_v12 }
 0x1c4   : >> { %3852 = vmatmul.mubr.bf16.gmra.mrb[20].mxu0 %v3471_v25 }
 0x1c9   : >> { %v3002_v52 = vpop.permute.xlu1 %3001 }
 0x1ca   : >> { %v3417_v57 = vsel %vm1108_vm12, %v5935_v62, %v3002_v52 }
 0x1cc   : >> { %v2986_v27 = vpop.permute.xlu0 %2985 }
 0x1cd   : >> { %v3393_v2 = vsel %vm1108_vm12, %v5927_v44, %v2986_v27  ;;  %v3635_v44 = vld [vmem:[#allocation3 + $0x98] sm:$0xff] }
 0x1d3   : >> { %v3290_v0 = vpop.permute.xlu1 %3289 }
 0x1d4   : >> { %v3547_v41 = vsel %vm1108_vm12, %v5999_v35, %v3290_v0 }
 0x1d7   : >> { %v3274_v19 = vpop.permute.xlu0 %3273 }
 0x1d8   : >> { %v3523_v46 = vsel %vm1108_vm12, %v5991_v42, %v3274_v19 }
 0x1db   : >> { %v3082_v6 = vpop.permute.xlu1 %3081 }
 0x1dc   : >> { %v3451_v48 = vsel %vm3421_vm14, %v3417_v57, %v3082_v6  ;;  %v3618_v6 = vld [vmem:[#allocation3 + $0x10] sm:$0xff] }
 0x1dd   : >> { %v3066_v53 = vpop.permute.xlu0 %3065 }
 0x1de   : >> { %v3435_v1 = vsel %vm3421_vm14, %v3393_v2, %v3066_v53 }
 0x1df   : >> { %v3370_v43 = vpop.permute.xlu1 %3369 }
 0x1e0   : >> { %v3580_v21 = vsel %vm3421_vm14, %v3547_v41, %v3370_v43  ;;  %v3634_v41 = vld [vmem:[#allocation3 + $0x90] sm:$0xff] }
 0x1e1   : >> { %6065 = vmatprep.mubr.msk.bf16.mxu1 %vm3454_vm0, %v3580_v21  ;;  %v3354_v3 = vpop.permute.xlu0 %3353 }
 0x1e2   : >> { %v3564_v24 = vsel %vm3421_vm14, %v3523_v46, %v3354_v3 }
 0x1e3   : >> { %6057 = vmatprep.mubr.msk.bf16.mxu0 %vm3454_vm0, %v3564_v24  ;;  %v3619_v24 = vld [vmem:[#allocation3 + $0x18] sm:$0xff] }
 0x1e8   : >> { %v3162_v31 = vpop.permute.xlu1 %3161 }
 0x1e9   : >> { %v3498_v17 = vsel %vm3454_vm0, %v3451_v48, %v3162_v31 }
 0x1ea   : >> { %3924 = vmatmul.mubr.bf16.gmra.mrb[24].mxu1 %v3498_v17 }
 0x1eb   : >> { %v3146_v34 = vpop.permute.xlu0 %3145 }
 0x1ec   : >> { %v3474_v23 = vsel %vm3454_vm0, %v3435_v1, %v3146_v34  ;;  %v3636_v34 = vld [vmem:[#allocation3 + $0xa0] sm:$0xff] }
 0x1ed   : >> { %3860 = vmatmul.mubr.bf16.gmra.mrb[24].mxu0 %v3474_v23 }
 0x1f5   : >> { %v3004_v28 = vpop.permute.xlu1 %3003 }
 0x1f6   : >> { %v3420_v9 = vsel %vm1108_vm12, %v5936_v40, %v3004_v28  ;;  %v3616_v40 = vld [vmem:[#allocation3] sm:$0xff] }
 0x1f9   : >> { %v2988_v55 = vpop.permute.xlu0 %2987 }
 0x1fa   : >> { %v3396_v54 = vsel %vm1108_vm12, %v5928_v16, %v2988_v55  ;;  %v3633_v16 = vld [vmem:[#allocation3 + $0x88] sm:$0xff] }
 0x1fd   : >> { %v3292_v63 = vpop.permute.xlu1 %3291 }
 0x1fe   : >> { %v3550_v25 = vsel %vm1108_vm12, %v6000_v10, %v3292_v63 }
 0x202   : >> { %v3276_v4 = vpop.permute.xlu0 %3275 }
 0x203   : >> { %v3084_v11 = vpop.permute.xlu1 %3083  ;;  %v3526_v59 = vsel %vm1108_vm12, %v5992_v32, %v3276_v4  ;;  %v3620_v4 = vld [vmem:[#allocation3 + $0x20] sm:$0xff] }
 0x204   : >> { %v3453_v50 = vsel %vm3421_vm14, %v3420_v9, %v3084_v11 }
 0x206   : >> { %v3068_v12 = vpop.permute.xlu0 %3067 }
 0x207   : >> { %v3372_v52 = vpop.permute.xlu1 %3371  ;;  %v3437_v33 = vsel %vm3421_vm14, %v3396_v54, %v3068_v12  ;;  %v3637_v12 = vld [vmem:[#allocation3 + $0xa8] sm:$0xff] }
 0x208   : >> { %v3582_v20 = vsel %vm3421_vm14, %v3550_v25, %v3372_v52 }
 0x209   : >> { %6066 = vmatprep.mubr.msk.bf16.mxu1 %vm3454_vm0, %v3582_v20 }
 0x20a   : >> { %v3356_v27 = vpop.permute.xlu0 %3355 }
 0x20b   : >> { %v3566_v26 = vsel %vm3421_vm14, %v3526_v59, %v3356_v27 }
 0x20c   : >> { %6058 = vmatprep.mubr.msk.bf16.mxu0 %vm3454_vm0, %v3566_v26  ;;  %v3621_v26 = vld [vmem:[#allocation3 + $0x28] sm:$0xff] }
 0x210   : >> { %v3164_v10 = vpop.permute.xlu1 %3163 }
 0x211   : >> { %v3501_v13 = vsel %vm3454_vm0, %v3453_v50, %v3164_v10 }
 0x212   : >> { %3932 = vmatmul.mubr.bf16.gmra.mrb[28].mxu1 %v3501_v13 }
 0x213   : >> { %v3148_v32 = vpop.permute.xlu0 %3147 }
 0x214   : >> { %v3477_v51 = vsel %vm3454_vm0, %v3437_v33, %v3148_v32  ;;  %v3638_v32 = vld [vmem:[#allocation3 + $0xb0] sm:$0xff] }
 0x215   : >> { %3868 = vmatmul.mubr.bf16.gmra.mrb[28].mxu0 %v3477_v51 }
 0x23c   : >> { %v6145_v18 = vpop.f32.mrb[0].mxu0 }
 0x23d   : >> { %v6193_v58 = vpop.f32.mrb[0].mxu1  ;;  %v6146_v47 = vpop.f32.mrb[1].mxu0 }
 0x23e   : >> { %v6194_v60 = vpop.f32.mrb[1].mxu1  ;;  %v6147_v30 = vadd.f32 %v6146_v47, %v6145_v18  ;;  %v6148_v14 = vpop.f32.mrb[2].mxu0  ;;  %v3622_v47 = vld [vmem:[#allocation3 + $0x30] sm:$0xff] }
 0x23f   : >> { %v6195_v0 = vadd.f32 %v6194_v60, %v6193_v58  ;;  %v6196_v15 = vpop.f32.mrb[2].mxu1  ;;  %v6149_v56 = vpop.f32.mrb[3].mxu0  ;;  %v3639_v60 = vld [vmem:[#allocation3 + $0xb8] sm:$0xff] }
 0x240   : >> { %v6197_v5 = vpop.f32.mrb[3].mxu1  ;;  %v3940_v8 = vadd.f32 %v6147_v30, %v3616_v40  ;;  %v6150_v45 = vadd.f32 %v6149_v56, %v6148_v14  ;;  %v3623_v56 = vld [vmem:[#allocation3 + $0x38] sm:$0xff] }
 0x241   : >> { %v3956_v36 = vadd.f32 %v6195_v0, %v3632_v49  ;;  %v6198_v7 = vadd.f32 %v6197_v5, %v6196_v15 }
 0x242   : >> { %3972 = vst.msk [vmem:[#allocation3] sm:$0xff] %vm1108_vm12, %v3940_v8  ;;  %v3941_v19 = vadd.f32 %v6150_v45, %v3617_v37 }
 0x243   : >> { %3988 = vst.msk [vmem:[#allocation3 + $0x80] sm:$0xff] %vm1108_vm12, %v3956_v36  ;;  %v3957_v35 = vadd.f32 %v6198_v7, %v3633_v16 }
 0x244   : >> { %3973 = vst.msk [vmem:[#allocation3 + $0x8] sm:$0xff] %vm1108_vm12, %v3941_v19  ;;  %v3640_v19 = vld [vmem:[#allocation3 + $0xc0] sm:$0xff] }
 0x245   : >> { %3989 = vst.msk [vmem:[#allocation3 + $0x88] sm:$0xff] %vm1108_vm12, %v3957_v35 }
 0x264   : >> { %v6151_v38 = vpop.f32.mrb[4].mxu0 }
 0x265   : >> { %v6199_v22 = vpop.f32.mrb[4].mxu1  ;;  %v6152_v42 = vpop.f32.mrb[5].mxu0 }
 0x266   : >> { %v6153_v53 = vadd.f32 %v6152_v42, %v6151_v38  ;;  %v6200_v43 = vpop.f32.mrb[5].mxu1  ;;  %v6154_v21 = vpop.f32.mrb[6].mxu0  ;;  %v3624_v42 = vld [vmem:[#allocation3 + $0x40] sm:$0xff] }
 0x267   : >> { %v6201_v46 = vadd.f32 %v6200_v43, %v6199_v22  ;;  %v6202_v3 = vpop.f32.mrb[6].mxu1  ;;  %v6155_v61 = vpop.f32.mrb[7].mxu0 }
 0x268   : >> { %v3942_v62 = vadd.f32 %v6153_v53, %v3618_v6  ;;  %v6156_v29 = vadd.f32 %v6155_v61, %v6154_v21  ;;  %v6203_v57 = vpop.f32.mrb[7].mxu1  ;;  %v3625_v61 = vld [vmem:[#allocation3 + $0x48] sm:$0xff] }
 0x269   : >> { %v3958_v48 = vadd.f32 %v6201_v46, %v3634_v41  ;;  %v6204_v31 = vadd.f32 %v6203_v57, %v6202_v3  ;;  %v3641_v41 = vld [vmem:[#allocation3 + $0xc8] sm:$0xff] }
 0x26a   : >> { %3974 = vst.msk [vmem:[#allocation3 + $0x10] sm:$0xff] %vm1108_vm12, %v3942_v62  ;;  %v3943_v17 = vadd.f32 %v6156_v29, %v3619_v24 }
 0x26b   : >> { %3990 = vst.msk [vmem:[#allocation3 + $0x90] sm:$0xff] %vm1108_vm12, %v3958_v48  ;;  %v3959_v2 = vadd.f32 %v6204_v31, %v3635_v44 }
 0x26c   : >> { %3975 = vst.msk [vmem:[#allocation3 + $0x18] sm:$0xff] %vm1108_vm12, %v3943_v17  ;;  %v3642_v17 = vld [vmem:[#allocation3 + $0xd0] sm:$0xff] }
 0x26d   : >> { %3991 = vst.msk [vmem:[#allocation3 + $0x98] sm:$0xff] %vm1108_vm12, %v3959_v2 }
 0x277   : >> { %v6205_v1 = vpop.f32.mrb[8].mxu1 }
 0x278   : >> { %v6206_v23 = vpop.f32.mrb[9].mxu1 }
 0x279   : >> { %v6207_v55 = vadd.f32 %v6206_v23, %v6205_v1  ;;  %v6208_v63 = vpop.f32.mrb[10].mxu1 }
 0x27a   : >> { %v6157_v28 = vpop.f32.mrb[8].mxu0  ;;  %v6209_v25 = vpop.f32.mrb[11].mxu1 }
 0x27b   : >> { %v6158_v11 = vpop.f32.mrb[9].mxu0  ;;  %v3960_v20 = vadd.f32 %v6207_v55, %v3636_v34  ;;  %v6210_v27 = vadd.f32 %v6209_v25, %v6208_v63  ;;  %v3626_v63 = vld [vmem:[#allocation3 + $0x50] sm:$0xff] }
 0x27c   : >> { %v6159_v52 = vadd.f32 %v6158_v11, %v6157_v28  ;;  %v6160_v59 = vpop.f32.mrb[10].mxu0  ;;  %v3643_v28 = vld [vmem:[#allocation3 + $0xd8] sm:$0xff] }
 0x27d   : >> { %v6161_v9 = vpop.f32.mrb[11].mxu0  ;;  %3992 = vst.msk [vmem:[#allocation3 + $0xa0] sm:$0xff] %vm1108_vm12, %v3960_v20  ;;  %v3961_v13 = vadd.f32 %v6210_v27, %v3637_v12  ;;  %v3627_v20 = vld [vmem:[#allocation3 + $0x58] sm:$0xff] }
 0x27e   : >> { %v3944_v50 = vadd.f32 %v6159_v52, %v3620_v4  ;;  %v6162_v10 = vadd.f32 %v6161_v9, %v6160_v59 }
 0x27f   : >> { %3993 = vst.msk [vmem:[#allocation3 + $0xa8] sm:$0xff] %vm1108_vm12, %v3961_v13  ;;  %v6211_v33 = vpop.f32.mrb[12].mxu1  ;;  %v3644_v13 = vld [vmem:[#allocation3 + $0xe0] sm:$0xff] }
 0x280   : >> { %3976 = vst.msk [vmem:[#allocation3 + $0x20] sm:$0xff] %vm1108_vm12, %v3944_v50  ;;  %v3945_v54 = vadd.f32 %v6162_v10, %v3621_v26  ;;  %v6212_v51 = vpop.f32.mrb[13].mxu1 }
 0x281   : >> { %v6213_v58 = vadd.f32 %v6212_v51, %v6211_v33  ;;  %v6214_v40 = vpop.f32.mrb[14].mxu1 }
 0x282   : >> { %3977 = vst.msk [vmem:[#allocation3 + $0x28] sm:$0xff] %vm1108_vm12, %v3945_v54  ;;  %v6163_v18 = vpop.f32.mrb[12].mxu0  ;;  %v6215_v30 = vpop.f32.mrb[15].mxu1 }
 0x283   : >> { %v6164_v49 = vpop.f32.mrb[13].mxu0  ;;  %v3962_v14 = vadd.f32 %v6213_v58, %v3638_v32  ;;  %v6216_v37 = vadd.f32 %v6215_v30, %v6214_v40  ;;  %v3628_v40 = vld [vmem:[#allocation3 + $0x60] sm:$0xff] }
 0x284   : >> { %v6165_v0 = vadd.f32 %v6164_v49, %v6163_v18  ;;  %v6166_v15 = vpop.f32.mrb[14].mxu0  ;;  %v3645_v18 = vld [vmem:[#allocation3 + $0xe8] sm:$0xff] }
 0x285   : >> { %v6167_v16 = vpop.f32.mrb[15].mxu0  ;;  %3994 = vst.msk [vmem:[#allocation3 + $0xb0] sm:$0xff] %vm1108_vm12, %v3962_v14  ;;  %v3963_v36 = vadd.f32 %v6216_v37, %v3639_v60  ;;  %v3629_v14 = vld [vmem:[#allocation3 + $0x68] sm:$0xff] }
 0x286   : >> { %v3946_v5 = vadd.f32 %v6165_v0, %v3622_v47  ;;  %v6168_v8 = vadd.f32 %v6167_v16, %v6166_v15 }
 0x287   : >> { %3995 = vst.msk [vmem:[#allocation3 + $0xb8] sm:$0xff] %vm1108_vm12, %v3963_v36  ;;  %v6217_v7 = vpop.f32.mrb[16].mxu1  ;;  %v3646_v36 = vld [vmem:[#allocation3 + $0xf0] sm:$0xff] }
 0x288   : >> { %3978 = vst.msk [vmem:[#allocation3 + $0x30] sm:$0xff] %vm1108_vm12, %v3946_v5  ;;  %v3947_v45 = vadd.f32 %v6168_v8, %v3623_v56  ;;  %v6218_v35 = vpop.f32.mrb[17].mxu1 }
 0x289   : >> { %v6219_v22 = vadd.f32 %v6218_v35, %v6217_v7  ;;  %v6220_v6 = vpop.f32.mrb[18].mxu1 }
 0x28a   : >> { %3979 = vst.msk [vmem:[#allocation3 + $0x38] sm:$0xff] %vm1108_vm12, %v3947_v45  ;;  %v6169_v38 = vpop.f32.mrb[16].mxu0  ;;  %v6221_v43 = vpop.f32.mrb[19].mxu1 }
 0x28b   : >> { %v6170_v53 = vpop.f32.mrb[17].mxu0  ;;  %v3964_v46 = vadd.f32 %v6219_v22, %v3640_v19  ;;  %v6222_v24 = vadd.f32 %v6221_v43, %v6220_v6  ;;  %v3630_v6 = vld [vmem:[#allocation3 + $0x70] sm:$0xff] }
 0x28c   : >> { %v6171_v21 = vadd.f32 %v6170_v53, %v6169_v38  ;;  %v6172_v3 = vpop.f32.mrb[18].mxu0  ;;  %v3647_v38 = vld [vmem:[#allocation3 + $0xf8] sm:$0xff] }
 0x28d   : >> { %v6173_v62 = vpop.f32.mrb[19].mxu0  ;;  %3996 = vst.msk [vmem:[#allocation3 + $0xc0] sm:$0xff] %vm1108_vm12, %v3964_v46  ;;  %v3965_v57 = vadd.f32 %v6222_v24, %v3641_v41  ;;  %v3631_v46 = vld [vmem:[#allocation3 + $0x78] sm:$0xff] }
 0x28e   : >> { %v3948_v29 = vadd.f32 %v6171_v21, %v3624_v42  ;;  %v6174_v44 = vadd.f32 %v6173_v62, %v6172_v3 }
 0x28f   : >> { %3997 = vst.msk [vmem:[#allocation3 + $0xc8] sm:$0xff] %vm1108_vm12, %v3965_v57  ;;  %v8618_v57 = vld [vmem:[#allocation3 + $0x10] sm:$0xff] (%p1143_p4) }
 0x290   : >> { %3980 = vst.msk [vmem:[#allocation3 + $0x40] sm:$0xff] %vm1108_vm12, %v3948_v29  ;;  %v3949_v48 = vadd.f32 %v6174_v44, %v3625_v61  ;;  %v8616_v44 = vld [vmem:[#allocation3] sm:$0xff] (%p1143_p4) }
 0x292   : >> { %3981 = vst.msk [vmem:[#allocation3 + $0x48] sm:$0xff] %vm1108_vm12, %v3949_v48  ;;  %v8620_v48 = vld [vmem:[#allocation3 + $0x8] sm:$0xff] (%p1143_p4) }
 0x293   : > { %v4039_v39 = vsel (%p1143_p4), %vm1108_vm12, %v8620_v48, 0.0 }
 0x294   : >> { %v6223_v31 = vpop.f32.mrb[20].mxu1 }
 0x295   : >> { %v6224_v2 = vpop.f32.mrb[21].mxu1 }
 0x296   : >> { %v6225_v1 = vadd.f32 %v6224_v2, %v6223_v31  ;;  %v6226_v34 = vpop.f32.mrb[22].mxu1  ;;  %v9889_v31 = vmov (%p1143_p4), 0   ;;  %v4042_v2 = vsel (%p1143_p4), %vm1108_vm12, %v8618_v57, 0.0 }
 0x297   : >> { %v6175_v23 = vpop.f32.mrb[20].mxu0  ;;  %v6227_v55 = vpop.f32.mrb[23].mxu1  ;;  %6438 = vset.pattern.permute.xlu1 (%p1143_p4), %v9889_v31  ;;  %6437 = vset.pattern.permute.xlu0 (%p1143_p4), %v9889_v31 }
 0x298   : >> { %v6176_v4 = vpop.f32.mrb[21].mxu0  ;;  %v3966_v11 = vadd.f32 %v6225_v1, %v3642_v17  ;;  %v6228_v12 = vadd.f32 %v6227_v55, %v6226_v34  ;;  %v4036_v17 = vsel (%p1143_p4), %vm1108_vm12, %v8616_v44, 0.0  ;;  %v8628_v1 = vld [vmem:[#allocation3 + $0x18] sm:$0xff] (%p1143_p4)  ;;  %4043 = vadd.xlane.f32.xlu1 (%p1143_p4), %v4042_v2 }
 0x299   : >> { %v6177_v25 = vadd.f32 %v6176_v4, %v6175_v23  ;;  %v6178_v52 = vpop.f32.mrb[22].mxu0  ;;  %4037 = vadd.xlane.f32.xlu0 (%p1143_p4), %v4036_v17  ;;  %v4045_v34 = vsel (%p1143_p4), %vm1108_vm12, %v8628_v1, 0.0  ;;  %v8634_v23 = vld [vmem:[#allocation3 + $0x20] sm:$0xff] (%p1143_p4)  ;;  %v8642_v4 = vld [vmem:[#allocation3 + $0x30] sm:$0xff] (%p1143_p4) }
 0x29a   : >> { %3998 = vst.msk [vmem:[#allocation3 + $0xd0] sm:$0xff] %vm1108_vm12, %v3966_v11  ;;  %v6179_v59 = vpop.f32.mrb[23].mxu0  ;;  %v3967_v27 = vadd.f32 %v6228_v12, %v3643_v28  ;;  %v8636_v28 = vld [vmem:[#allocation3 + $0x28] sm:$0xff] (%p1143_p4)  ;;  %v4048_v55 = vsel (%p1143_p4), %vm1108_vm12, %v8634_v23, 0.0  ;;  %v8644_v11 = vld [vmem:[#allocation3 + $0x38] sm:$0xff] (%p1143_p4)  ;;  %v4054_v12 = vsel (%p1143_p4), %vm1108_vm12, %v8642_v4, 0.0 }
 0x29b   : >> { %v3950_v26 = vadd.f32 %v6177_v25, %v3626_v63  ;;  %v6180_v9 = vadd.f32 %v6179_v59, %v6178_v52  ;;  %v4051_v63 = vsel (%p1143_p4), %vm1108_vm12, %v8636_v28, 0.0  ;;  %v8648_v25 = vld [vmem:[#allocation3 + $0x40] sm:$0xff] (%p1143_p4)  ;;  %v4057_v52 = vsel (%p1143_p4), %vm1108_vm12, %v8644_v11, 0.0 }
 0x29c   : >> { %3999 = vst.msk [vmem:[#allocation3 + $0xd8] sm:$0xff] %vm1108_vm12, %v3967_v27  ;;  %4046 = vadd.xlane.f32.xlu1 (%p1143_p4), %v4045_v34  ;;  %v4060_v59 = vsel (%p1143_p4), %vm1108_vm12, %v8648_v25, 0.0 }
 0x29d   : >> { %3982 = vst.msk [vmem:[#allocation3 + $0x50] sm:$0xff] %vm1108_vm12, %v3950_v26  ;;  %v3951_v50 = vadd.f32 %v6180_v9, %v3627_v20  ;;  %4040 = vadd.xlane.f32.xlu0 (%p1143_p4), %v4039_v39  ;;  %v8652_v20 = vld [vmem:[#allocation3 + $0x48] sm:$0xff] (%p1143_p4) }
 0x29e   : > { %v4063_v27 = vsel (%p1143_p4), %vm1108_vm12, %v8652_v20, 0.0 }
 0x29f   : >> { %3983 = vst.msk [vmem:[#allocation3 + $0x58] sm:$0xff] %vm1108_vm12, %v3951_v50 }
 0x2a0   : > { %4052 = vadd.xlane.f32.xlu1 (%p1143_p4), %v4051_v63 }
 0x2a1   : > { %4049 = vadd.xlane.f32.xlu0 (%p1143_p4), %v4048_v55 }
 0x2a4   : > { %4058 = vadd.xlane.f32.xlu1 (%p1143_p4), %v4057_v52  ;;  %v8658_v26 = vld [vmem:[#allocation3 + $0x50] sm:$0xff] (%p1143_p4) }
 0x2a5   : > { %4055 = vadd.xlane.f32.xlu0 (%p1143_p4), %v4054_v12  ;;  %v4066_v50 = vsel (%p1143_p4), %vm1108_vm12, %v8658_v26, 0.0 }
 0x2a6   : > { %v8660_v9 = vld [vmem:[#allocation3 + $0x58] sm:$0xff] (%p1143_p4) }
 0x2a8   : > { %4064 = vadd.xlane.f32.xlu1 (%p1143_p4), %v4063_v27 }
 0x2a9   : > { %4061 = vadd.xlane.f32.xlu0 (%p1143_p4), %v4060_v59 }
 0x2ad   : > { %4067 = vadd.xlane.f32.xlu0 (%p1143_p4), %v4066_v50 }
 0x2bd   : >> { %v6229_v10 = vpop.f32.mrb[24].mxu1 }
 0x2be   : >> { %v6230_v54 = vpop.f32.mrb[25].mxu1 }
 0x2bf   : >> { %v6231_v33 = vadd.f32 %v6230_v54, %v6229_v10  ;;  %v6232_v32 = vpop.f32.mrb[26].mxu1  ;;  %v4069_v10 = vsel (%p1143_p4), %vm1108_vm12, %v8660_v9, 0.0 }
 0x2c0   : >> { %v6181_v51 = vpop.f32.mrb[24].mxu0  ;;  %v6233_v58 = vpop.f32.mrb[27].mxu1  ;;  %4070 = vadd.xlane.f32.xlu1 (%p1143_p4), %v4069_v10 }
 0x2c1   : >> { %v6182_v47 = vpop.f32.mrb[25].mxu0  ;;  %v3968_v49 = vadd.f32 %v6231_v33, %v3644_v13  ;;  %v6234_v60 = vadd.f32 %v6233_v58, %v6232_v32 }
 0x2c2   : >> { %v6183_v30 = vadd.f32 %v6182_v47, %v6181_v51  ;;  %v6184_v0 = vpop.f32.mrb[26].mxu0  ;;  %v8682_v47 = vld [vmem:[#allocation3 + $0x80] sm:$0xff] (%p1143_p4) }
 0x2c3   : >> { %4000 = vst.msk [vmem:[#allocation3 + $0xe0] sm:$0xff] %vm1108_vm12, %v3968_v49  ;;  %v6185_v15 = vpop.f32.mrb[27].mxu0  ;;  %v3969_v37 = vadd.f32 %v6234_v60, %v3645_v18  ;;  %v8684_v49 = vld [vmem:[#allocation3 + $0x88] sm:$0xff] (%p1143_p4)  ;;  %v4084_v60 = vsel (%p1143_p4), %vm1108_vm12, %v8682_v47, 0.0 }
 0x2c4   : >> { %v3952_v56 = vadd.f32 %v6183_v30, %v3628_v40  ;;  %v6186_v16 = vadd.f32 %v6185_v15, %v6184_v0  ;;  %v4087_v30 = vsel (%p1143_p4), %vm1108_vm12, %v8684_v49, 0.0  ;;  %v8690_v0 = vld [vmem:[#allocation3 + $0x90] sm:$0xff] (%p1143_p4) }
 0x2c5   : >> { %4001 = vst.msk [vmem:[#allocation3 + $0xe8] sm:$0xff] %vm1108_vm12, %v3969_v37  ;;  %v4090_v15 = vsel (%p1143_p4), %vm1108_vm12, %v8690_v0, 0.0 }
 0x2c6   : >> { %3984 = vst.msk [vmem:[#allocation3 + $0x60] sm:$0xff] %vm1108_vm12, %v3952_v56  ;;  %v3953_v5 = vadd.f32 %v6186_v16, %v3629_v14  ;;  %v8692_v14 = vld [vmem:[#allocation3 + $0x98] sm:$0xff] (%p1143_p4)  ;;  %v8698_v56 = vld [vmem:[#allocation3 + $0xa0] sm:$0xff] (%p1143_p4)  ;;  %v8700_v16 = vld [vmem:[#allocation3 + $0xa8] sm:$0xff] (%p1143_p4) }
 0x2c7   : > { %v4093_v37 = vsel (%p1143_p4), %vm1108_vm12, %v8692_v14, 0.0 }
 0x2c8   : >> { %3985 = vst.msk [vmem:[#allocation3 + $0x68] sm:$0xff] %vm1108_vm12, %v3953_v5  ;;  %v4096_v5 = vsel (%p1143_p4), %vm1108_vm12, %v8698_v56, 0.0 }
 0x2cd   : > { %v8666_v13 = vld [vmem:[#allocation3 + $0x60] sm:$0xff] (%p1143_p4) }
 0x2ce   : > { %v4072_v33 = vsel (%p1143_p4), %vm1108_vm12, %v8666_v13, 0.0 }
 0x2cf   : > { %v8668_v54 = vld [vmem:[#allocation3 + $0x68] sm:$0xff] (%p1143_p4)  ;;  %4073 = vadd.xlane.f32.xlu0 (%p1143_p4), %v4072_v33 }
 0x2d0   : > { %v4075_v32 = vsel (%p1143_p4), %vm1108_vm12, %v8668_v54, 0.0 }
 0x2d1   : > { %4076 = vadd.xlane.f32.xlu1 (%p1143_p4), %v4075_v32 }
 0x2e5   : >> { %v6235_v8 = vpop.f32.mrb[28].mxu1 }
 0x2e6   : >> { %v6236_v45 = vpop.f32.mrb[29].mxu1 }
 0x2e7   : >> { %v6237_v7 = vadd.f32 %v6236_v45, %v6235_v8  ;;  %v6238_v19 = vpop.f32.mrb[30].mxu1  ;;  %v4099_v8 = vsel (%p1143_p4), %vm1108_vm12, %v8700_v16, 0.0  ;;  %v8708_v45 = vld [vmem:[#allocation3 + $0xb8] sm:$0xff] (%p1143_p4) }
 0x2e8   : >> { %v6187_v35 = vpop.f32.mrb[28].mxu0  ;;  %v6239_v22 = vpop.f32.mrb[31].mxu1 }
 0x2e9   : >> { %v6188_v42 = vpop.f32.mrb[29].mxu0  ;;  %v3970_v53 = vadd.f32 %v6237_v7, %v3646_v36  ;;  %v6240_v41 = vadd.f32 %v6239_v22, %v6238_v19  ;;  %v8706_v36 = vld [vmem:[#allocation3 + $0xb0] sm:$0xff] (%p1143_p4)  ;;  %v4105_v19 = vsel (%p1143_p4), %vm1108_vm12, %v8708_v45, 0.0 }
 0x2ea   : >> { %v6189_v43 = vadd.f32 %v6188_v42, %v6187_v35  ;;  %v6190_v21 = vpop.f32.mrb[30].mxu0  ;;  %1145 = sbr.rel (!%p1143_p4) target bundleno = 123 (0x7b), region = 104  ;;  %v4102_v7 = vsel (%p1143_p4), %vm1108_vm12, %v8706_v36, 0.0  ;;  %v8714_v35 = vld [vmem:[#allocation3 + $0xc0] sm:$0xff] (%p1143_p4)  ;;  %v8722_v42 = vld [vmem:[#allocation3 + $0xd0] sm:$0xff] (%p1143_p4) }
 0x2eb   : >> { %4002 = vst.msk [vmem:[#allocation3 + $0xf0] sm:$0xff] %vm1108_vm12, %v3970_v53  ;;  %v6191_v3 = vpop.f32.mrb[31].mxu0  ;;  %v3971_v24 = vadd.f32 %v6240_v41, %v3647_v38  ;;  %v8716_v38 = vld [vmem:[#allocation3 + $0xc8] sm:$0xff] (%p1143_p4)  ;;  %v4108_v22 = vsel (%p1143_p4), %vm1108_vm12, %v8714_v35, 0.0  ;;  %v8724_v53 = vld [vmem:[#allocation3 + $0xd8] sm:$0xff] (%p1143_p4)  ;;  %v4114_v41 = vsel (%p1143_p4), %vm1108_vm12, %v8722_v42, 0.0 }
 0x2ec   : >> { %v3954_v61 = vadd.f32 %v6189_v43, %v3630_v6  ;;  %v6192_v62 = vadd.f32 %v6191_v3, %v6190_v21  ;;  %v4111_v6 = vsel (%p1143_p4), %vm1108_vm12, %v8716_v38, 0.0  ;;  %v4117_v43 = vsel (%p1143_p4), %vm1108_vm12, %v8724_v53, 0.0  ;;  %v8730_v21 = vld [vmem:[#allocation3 + $0xe0] sm:$0xff] (%p1143_p4) }
 0x2ed   : >> { %4003 = vst.msk [vmem:[#allocation3 + $0xf8] sm:$0xff] %vm1108_vm12, %v3971_v24  ;;  %v4120_v3 = vsel (%p1143_p4), %vm1108_vm12, %v8730_v21, 0.0 }
 0x2ee   : >> { %3986 = vst.msk [vmem:[#allocation3 + $0x70] sm:$0xff] %vm1108_vm12, %v3954_v61  ;;  %v3955_v29 = vadd.f32 %v6192_v62, %v3631_v46  ;;  %v8732_v46 = vld [vmem:[#allocation3 + $0xe8] sm:$0xff] (%p1143_p4) }
 0x2ef   : > { %v4123_v24 = vsel (%p1143_p4), %vm1108_vm12, %v8732_v46, 0.0 }
 0x2f0   : >> { %3987 = vst.msk [vmem:[#allocation3 + $0x78] sm:$0xff] %vm1108_vm12, %v3955_v29 }
 0x2f2   : > { %v8738_v61 = vld [vmem:[#allocation3 + $0xf0] sm:$0xff] }
 0x2f3   : > { %v4126_v29 = vsel %vm1108_vm12, %v8738_v61, 0.0 }
 0x2f4   : > { %v8740_v62 = vld [vmem:[#allocation3 + $0xf8] sm:$0xff] }
 0x2f5   : > { %v8674_v51 = vld [vmem:[#allocation3 + $0x70] sm:$0xff]  ;;  %v4129_v31 = vsel %vm1108_vm12, %v8740_v62, 0.0 }
 0x2f6   : > { %v4078_v58 = vsel %vm1108_vm12, %v8674_v51, 0.0 }
 0x2f7   : > { %v8676_v18 = vld [vmem:[#allocation3 + $0x78] sm:$0xff]  ;;  %4079 = vadd.xlane.f32.xlu0 %v4078_v58 }
 0x2f8   : > { %v4081_v40 = vsel %vm1108_vm12, %v8676_v18, 0.0 }
 0x2f9   : > { %4082 = vadd.xlane.f32.xlu1 %v4081_v40 }
 0x2fb   : > { %4085 = vadd.xlane.f32.xlu0 %v4084_v60 }
 0x2fd   : > { %4088 = vadd.xlane.f32.xlu1 %v4087_v30 }
 0x2ff   : > { %4091 = vadd.xlane.f32.xlu0 %v4090_v15 }
 0x301   : > { %4094 = vadd.xlane.f32.xlu1 %v4093_v37 }
 0x303   : > { %4097 = vadd.xlane.f32.xlu0 %v4096_v5 }
 0x305   : > { %4100 = vadd.xlane.f32.xlu1 %v4099_v8 }
 0x307   : > { %4103 = vadd.xlane.f32.xlu0 %v4102_v7 }
 0x309   : > { %4106 = vadd.xlane.f32.xlu1 %v4105_v19 }
 0x30b   : > { %4109 = vadd.xlane.f32.xlu0 %v4108_v22 }
 0x30d   : > { %4112 = vadd.xlane.f32.xlu1 %v4111_v6 }
 0x30f   : > { %4115 = vadd.xlane.f32.xlu0 %v4114_v41 }
 0x311   : > { %4118 = vadd.xlane.f32.xlu1 %v4117_v43 }
 0x313   : > { %4121 = vadd.xlane.f32.xlu0 %v4120_v3 }
 0x315   : > { %4124 = vadd.xlane.f32.xlu1 %v4123_v24 }
 0x317   : > { %4127 = vadd.xlane.f32.xlu0 %v4126_v29 }
 0x319   : > { %4130 = vadd.xlane.f32.xlu1 %v4129_v31 }
 0x325   : > { %v4044_v2 = vpop.xlane.xlu1 %4043 }
 0x326   : > { %v4038_v17 = vpop.xlane.xlu0 %4037  ;;  %v4135_v34 = vmul.f32 0.03125, %v4044_v2 }
 0x327   : > { %v4133_v39 = vmul.f32 0.03125, %v4038_v17 }
 0x328   : > { %v8750_v63 = vsub.f32 %v8618_v57, %v4135_v34 }
 0x329   : > { %v8747_v55 = vsub.f32 %v8616_v44, %v4133_v39  ;;  %v4047_v52 = vpop.xlane.xlu1 %4046 }
 0x32a   : > { %v4041_v12 = vpop.xlane.xlu0 %4040  ;;  %v4136_v27 = vmul.f32 0.03125, %v4047_v52  ;;  %v4199_v10 = vmul.f32 %v8750_v63, %v8750_v63 }
 0x32b   : > { %v4134_v59 = vmul.f32 0.03125, %v4041_v12  ;;  %v4197_v50 = vmul.f32 %v8747_v55, %v8747_v55 }
 0x32c   : > { %v8760_v32 = vsub.f32 %v8628_v1, %v4136_v27  ;;  %v4235_v40 = vsel %vm1108_vm12, %v4199_v10, 0.0 }
 0x32d   : > { %v8757_v33 = vsub.f32 %v8620_v48, %v4134_v59  ;;  %v4229_v44 = vsel %vm1108_vm12, %v4197_v50, 0.0  ;;  %v4053_v58 = vpop.xlane.xlu1 %4052 }
 0x32e   : > { %4230 = vadd.xlane.f32.xlu0 %v4229_v44  ;;  %v4050_v57 = vpop.xlane.xlu0 %4049  ;;  %v4138_v30 = vmul.f32 0.03125, %v4053_v58  ;;  %v4200_v37 = vmul.f32 %v8760_v32, %v8760_v32 }
 0x32f   : > { %v4137_v60 = vmul.f32 0.03125, %v4050_v57  ;;  %v4198_v15 = vmul.f32 %v8757_v33, %v8757_v33 }
 0x330   : > { %v8772_v1 = vsub.f32 %v8636_v28, %v4138_v30  ;;  %v4238_v19 = vsel %vm1108_vm12, %v4200_v37, 0.0 }
 0x331   : > { %v8769_v48 = vsub.f32 %v8634_v23, %v4137_v60  ;;  %v4232_v5 = vsel %vm1108_vm12, %v4198_v15, 0.0  ;;  %v4059_v7 = vpop.xlane.xlu1 %4058 }
 0x332   : > { %4236 = vadd.xlane.f32.xlu0 %v4235_v40  ;;  %4233 = vadd.xlane.f32.xlu1 %v4232_v5  ;;  %v4056_v8 = vpop.xlane.xlu0 %4055  ;;  %v4140_v6 = vmul.f32 0.03125, %v4059_v7  ;;  %v4202_v23 = vmul.f32 %v8772_v1, %v8772_v1 }
 0x333   : > { %v4139_v22 = vmul.f32 0.03125, %v4056_v8  ;;  %v4201_v41 = vmul.f32 %v8769_v48, %v8769_v48 }
 0x334   : > { %v8784_v28 = vsub.f32 %v8644_v11, %v4140_v6  ;;  %v4244_v31 = vsel %vm1108_vm12, %v4202_v23, 0.0 }
 0x335   : > { %v8781_v43 = vsub.f32 %v8642_v4, %v4139_v22  ;;  %v4241_v3 = vsel %vm1108_vm12, %v4201_v41, 0.0  ;;  %v4065_v29 = vpop.xlane.xlu1 %4064 }
 0x336   : > { %4239 = vadd.xlane.f32.xlu1 %v4238_v19  ;;  %4242 = vadd.xlane.f32.xlu0 %v4241_v3  ;;  %v4062_v24 = vpop.xlane.xlu0 %4061  ;;  %v4142_v2 = vmul.f32 0.03125, %v4065_v29  ;;  %v4204_v4 = vmul.f32 %v8784_v28, %v8784_v28 }
 0x337   : > { %v4141_v17 = vmul.f32 0.03125, %v4062_v24  ;;  %v4203_v39 = vmul.f32 %v8781_v43, %v8781_v43 }
 0x338   : > { %v8796_v11 = vsub.f32 %v8652_v20, %v4142_v2  ;;  %v4250_v27 = vsel %vm1108_vm12, %v4204_v4, 0.0 }
 0x339   : > { %v8793_v34 = vsub.f32 %v8648_v25, %v4141_v17  ;;  %v4247_v12 = vsel %vm1108_vm12, %v4203_v39, 0.0 }
 0x33a   : > { %4245 = vadd.xlane.f32.xlu1 %v4244_v31  ;;  %4248 = vadd.xlane.f32.xlu0 %v4247_v12  ;;  %v4068_v52 = vpop.xlane.xlu0 %4067  ;;  %v4206_v25 = vmul.f32 %v8796_v11, %v8796_v11 }
 0x33b   : > { %v4143_v50 = vmul.f32 0.03125, %v4068_v52  ;;  %v4205_v44 = vmul.f32 %v8793_v34, %v8793_v34 }
 0x33c   : > { %v4256_v30 = vsel %vm1108_vm12, %v4206_v25, 0.0 }
 0x33d   : > { %v8805_v57 = vsub.f32 %v8658_v26, %v4143_v50  ;;  %v4253_v58 = vsel %vm1108_vm12, %v4205_v44, 0.0 }
 0x33e   : > { %4251 = vadd.xlane.f32.xlu1 %v4250_v27  ;;  %4254 = vadd.xlane.f32.xlu0 %v4253_v58 }
 0x33f   : > { %v4207_v5 = vmul.f32 %v8805_v57, %v8805_v57 }
 0x341   : > { %v4259_v7 = vsel %vm1108_vm12, %v4207_v5, 0.0 }
 0x342   : > { %4257 = vadd.xlane.f32.xlu1 %v4256_v30  ;;  %4260 = vadd.xlane.f32.xlu0 %v4259_v7 }
 0x34d   : > { %v4071_v59 = vpop.xlane.xlu1 %4070 }
 0x34e   : > { %v4144_v10 = vmul.f32 0.03125, %v4071_v59 }
 0x350   : > { %v8808_v20 = vsub.f32 %v8660_v9, %v4144_v10 }
 0x352   : > { %v4208_v26 = vmul.f32 %v8808_v20, %v8808_v20 }
 0x354   : > { %v4262_v6 = vsel %vm1108_vm12, %v4208_v26, 0.0 }
 0x355   : > { %4263 = vadd.xlane.f32.xlu1 %v4262_v6 }
 0x35c   : > { %v4074_v40 = vpop.xlane.xlu0 %4073 }
 0x35d   : > { %v4145_v15 = vmul.f32 0.03125, %v4074_v40 }
 0x35e   : > { %v4077_v60 = vpop.xlane.xlu1 %4076 }
 0x35f   : > { %v4146_v37 = vmul.f32 0.03125, %v4077_v60  ;;  %v8817_v8 = vsub.f32 %v8666_v13, %v4145_v15 }
 0x361   : > { %v8820_v9 = vsub.f32 %v8668_v54, %v4146_v37  ;;  %v4209_v3 = vmul.f32 %v8817_v8, %v8817_v8 }
 0x363   : > { %v4210_v13 = vmul.f32 %v8820_v9, %v8820_v9  ;;  %v4265_v29 = vsel %vm1108_vm12, %v4209_v3, 0.0  ;;  %v6439_v3 = vld [vmem:[%s9833_s6] sm:$0xff]  }
 0x364   : > { %4266 = vadd.xlane.f32.xlu0 %v4265_v29  ;;  %6279 = vmatprep.subr.bf16.mxu0 %v6439_v3 }
 0x365   : > { %v4268_v2 = vsel %vm1108_vm12, %v4210_v13, 0.0  ;;  %6280 = vmatpush3.bf16.msra.mxu0 %v6439_v3 }
 0x366   : > { %4269 = vadd.xlane.f32.xlu1 %v4268_v2 }
 0x384   : > { %v4080_v19 = vpop.xlane.xlu0 %4079 }
 0x385   : > { %v4147_v41 = vmul.f32 0.03125, %v4080_v19 }
 0x386   : > { %v4083_v22 = vpop.xlane.xlu1 %4082 }
 0x387   : > { %v4148_v23 = vmul.f32 0.03125, %v4083_v22  ;;  %v8829_v24 = vsub.f32 %v8674_v51, %v4147_v41 }
 0x388   : > { %v4086_v31 = vpop.xlane.xlu0 %4085 }
 0x389   : > { %v8832_v54 = vsub.f32 %v8676_v18, %v4148_v23  ;;  %v4149_v39 = vmul.f32 0.03125, %v4086_v31  ;;  %v4211_v12 = vmul.f32 %v8829_v24, %v8829_v24 }
 0x38a   : > { %v4089_v17 = vpop.xlane.xlu1 %4088 }
 0x38b   : > { %v4150_v4 = vmul.f32 0.03125, %v4089_v17  ;;  %v4212_v51 = vmul.f32 %v8832_v54, %v8832_v54  ;;  %v8841_v52 = vsub.f32 %v8682_v47, %v4149_v39  ;;  %v4271_v59 = vsel %vm1108_vm12, %v4211_v12, 0.0 }
 0x38c   : > { %4272 = vadd.xlane.f32.xlu0 %v4271_v59  ;;  %v4092_v27 = vpop.xlane.xlu0 %4091 }
 0x38d   : > { %v8844_v18 = vsub.f32 %v8684_v49, %v4150_v4  ;;  %v4274_v10 = vsel %vm1108_vm12, %v4212_v51, 0.0  ;;  %v4151_v44 = vmul.f32 0.03125, %v4092_v27  ;;  %v4213_v58 = vmul.f32 %v8841_v52, %v8841_v52  ;;  %v6440_v51 = vld [vmem:[%s9833_s6 + $0x8] sm:$0xff]  }
 0x38e   : > { %v4095_v50 = vpop.xlane.xlu1 %4094  ;;  %4275 = vadd.xlane.f32.xlu1 %v4274_v10  ;;  %6281 = vmatprep.subr.bf16.mxu0 %v6440_v51 }
 0x38f   : > { %v4152_v25 = vmul.f32 0.03125, %v4095_v50  ;;  %v4214_v47 = vmul.f32 %v8844_v18, %v8844_v18  ;;  %v8853_v40 = vsub.f32 %v8690_v0, %v4151_v44  ;;  %v4277_v60 = vsel %vm1108_vm12, %v4213_v58, 0.0  ;;  %6282 = vmatpush3.bf16.msra.mxu0 %v6440_v51 }
 0x390   : > { %4278 = vadd.xlane.f32.xlu0 %v4277_v60  ;;  %v4098_v30 = vpop.xlane.xlu0 %4097 }
 0x391   : > { %v8856_v49 = vsub.f32 %v8692_v14, %v4152_v25  ;;  %v4280_v37 = vsel %vm1108_vm12, %v4214_v47, 0.0  ;;  %v4153_v5 = vmul.f32 0.03125, %v4098_v30  ;;  %v4215_v7 = vmul.f32 %v8853_v40, %v8853_v40 }
 0x392   : > { %v4101_v15 = vpop.xlane.xlu1 %4100  ;;  %4281 = vadd.xlane.f32.xlu1 %v4280_v37 }
 0x393   : > { %v4154_v26 = vmul.f32 0.03125, %v4101_v15  ;;  %v4216_v0 = vmul.f32 %v8856_v49, %v8856_v49  ;;  %v8865_v19 = vsub.f32 %v8698_v56, %v4153_v5  ;;  %v4283_v22 = vsel %vm1108_vm12, %v4215_v7, 0.0 }
 0x394   : > { %4284 = vadd.xlane.f32.xlu0 %v4283_v22  ;;  %v4104_v6 = vpop.xlane.xlu0 %4103 }
 0x395   : > { %v8868_v14 = vsub.f32 %v8700_v16, %v4154_v26  ;;  %v4286_v23 = vsel %vm1108_vm12, %v4216_v0, 0.0  ;;  %v4155_v13 = vmul.f32 0.03125, %v4104_v6  ;;  %v4217_v56 = vmul.f32 %v8865_v19, %v8865_v19 }
 0x396   : > { %v4107_v41 = vpop.xlane.xlu1 %4106  ;;  %4287 = vadd.xlane.f32.xlu1 %v4286_v23 }
 0x397   : > { %v4156_v29 = vmul.f32 0.03125, %v4107_v41  ;;  %v4218_v16 = vmul.f32 %v8868_v14, %v8868_v14  ;;  %v8880_v31 = vsub.f32 %v8706_v36, %v4155_v13  ;;  %v4289_v2 = vsel %vm1108_vm12, %v4217_v56, 0.0 }
 0x398   : > { %4290 = vadd.xlane.f32.xlu0 %v4289_v2  ;;  %v4110_v39 = vpop.xlane.xlu0 %4109 }
 0x399   : > { %v8883_v17 = vsub.f32 %v8708_v45, %v4156_v29  ;;  %v4292_v12 = vsel %vm1108_vm12, %v4218_v16, 0.0  ;;  %v4157_v59 = vmul.f32 0.03125, %v4110_v39  ;;  %v4219_v36 = vmul.f32 %v8880_v31, %v8880_v31 }
 0x39a   : > { %v4113_v4 = vpop.xlane.xlu1 %4112  ;;  %4293 = vadd.xlane.f32.xlu1 %v4292_v12 }
 0x39b   : > { %v4158_v27 = vmul.f32 0.03125, %v4113_v4  ;;  %v4220_v45 = vmul.f32 %v8883_v17, %v8883_v17  ;;  %v8895_v50 = vsub.f32 %v8714_v35, %v4157_v59  ;;  %v4295_v44 = vsel %vm1108_vm12, %v4219_v36, 0.0 }
 0x39c   : > { %4296 = vadd.xlane.f32.xlu0 %v4295_v44  ;;  %v4116_v25 = vpop.xlane.xlu0 %4115 }
 0x39d   : > { %v8898_v10 = vsub.f32 %v8716_v38, %v4158_v27  ;;  %v4298_v47 = vsel %vm1108_vm12, %v4220_v45, 0.0  ;;  %v4159_v60 = vmul.f32 0.03125, %v4116_v25  ;;  %v4221_v15 = vmul.f32 %v8895_v50, %v8895_v50 }
 0x39e   : > { %v4119_v58 = vpop.xlane.xlu1 %4118  ;;  %4299 = vadd.xlane.f32.xlu1 %v4298_v47 }
 0x39f   : > { %v4160_v30 = vmul.f32 0.03125, %v4119_v58  ;;  %v4222_v35 = vmul.f32 %v8898_v10, %v8898_v10  ;;  %v8907_v38 = vsub.f32 %v8722_v42, %v4159_v60  ;;  %v4301_v5 = vsel %vm1108_vm12, %v4221_v15, 0.0 }
 0x3a0   : > { %4302 = vadd.xlane.f32.xlu0 %v4301_v5  ;;  %v4122_v26 = vpop.xlane.xlu0 %4121 }
 0x3a1   : > { %v8910_v37 = vsub.f32 %v8724_v53, %v4160_v30  ;;  %v4304_v0 = vsel %vm1108_vm12, %v4222_v35, 0.0  ;;  %v4161_v22 = vmul.f32 0.03125, %v4122_v26  ;;  %v4223_v41 = vmul.f32 %v8907_v38, %v8907_v38 }
 0x3a2   : > { %v4125_v7 = vpop.xlane.xlu1 %4124  ;;  %4305 = vadd.xlane.f32.xlu1 %v4304_v0 }
 0x3a3   : > { %v4162_v6 = vmul.f32 0.03125, %v4125_v7  ;;  %v4224_v42 = vmul.f32 %v8910_v37, %v8910_v37  ;;  %v8919_v23 = vsub.f32 %v8730_v21, %v4161_v22  ;;  %v4307_v3 = vsel %vm1108_vm12, %v4223_v41, 0.0 }
 0x3a4   : > { %4308 = vadd.xlane.f32.xlu0 %v4307_v3  ;;  %v4128_v13 = vpop.xlane.xlu0 %4127 }
 0x3a5   : > { %v8922_v53 = vsub.f32 %v8732_v46, %v4162_v6  ;;  %v4310_v56 = vsel %vm1108_vm12, %v4224_v42, 0.0  ;;  %v4163_v16 = vmul.f32 0.03125, %v4128_v13  ;;  %v4225_v39 = vmul.f32 %v8919_v23, %v8919_v23 }
 0x3a6   : > { %v4131_v29 = vpop.xlane.xlu1 %4130  ;;  %4311 = vadd.xlane.f32.xlu1 %v4310_v56 }
 0x3a7   : > { %v4164_v2 = vmul.f32 0.03125, %v4131_v29  ;;  %v4226_v21 = vmul.f32 %v8922_v53, %v8922_v53  ;;  %v8931_v4 = vsub.f32 %v8738_v61, %v4163_v16  ;;  %v4313_v12 = vsel %vm1108_vm12, %v4225_v39, 0.0 }
 0x3a8   : > { %4314 = vadd.xlane.f32.xlu0 %v4313_v12 }
 0x3a9   : > { %v8934_v46 = vsub.f32 %v8740_v62, %v4164_v2  ;;  %v4316_v51 = vsel %vm1108_vm12, %v4226_v21, 0.0  ;;  %v4227_v59 = vmul.f32 %v8931_v4, %v8931_v4 }
 0x3aa   : > { %4317 = vadd.xlane.f32.xlu1 %v4316_v51  ;;  %v8948_v51 = vld [vmem:[%s9831_s4] ss:$0 sm:$0xff] }
 0x3ab   : > { %v4228_v27 = vmul.f32 %v8934_v46, %v8934_v46  ;;  %v4319_v36 = vsel %vm1108_vm12, %v4227_v59, 0.0 }
 0x3ac   : > { %4320 = vadd.xlane.f32.xlu0 %v4319_v36 }
 0x3ad   : > { %v4322_v61 = vsel %vm1108_vm12, %v4228_v27, 0.0 }
 0x3ae   : > { %4323 = vadd.xlane.f32.xlu1 %v4322_v61 }
 0x3bb   : > { %v4231_v62 = vpop.xlane.xlu0 %4230 }
 0x3bc   : > { %v4325_v45 = vmul.f32 0.03125, %v4231_v62 }
 0x3be   : > { %v4357_v44 = vadd.f32 1e-06, %v4325_v45 }
 0x3bf   : > { %v4234_v25 = vpop.xlane.xlu1 %4233  ;;  %v4237_v58 = vpop.xlane.xlu0 %4236 }
 0x3c0   : > { %6443 = vrsqrt.f32 %v4357_v44  ;;  %v4326_v47 = vmul.f32 0.03125, %v4234_v25  ;;  %v4327_v60 = vmul.f32 0.03125, %v4237_v58 }
 0x3c2   : > { %v4358_v30 = vadd.f32 1e-06, %v4326_v47  ;;  %v4359_v15 = vadd.f32 1e-06, %v4327_v60  ;;  %v8955_v47 = vld [vmem:[%s9832_s5] ss:$0 sm:$0xff] }
 0x3c3   : > { %v4240_v35 = vpop.xlane.xlu1 %4239  ;;  %v4243_v5 = vpop.xlane.xlu0 %4242 }
 0x3c4   : > { %6445 = vrsqrt.f32 %v4358_v30  ;;  %v4328_v26 = vmul.f32 0.03125, %v4240_v35  ;;  %v4329_v7 = vmul.f32 0.03125, %v4243_v5 }
 0x3c5   : > { %6447 = vrsqrt.f32 %v4359_v15 }
 0x3c6   : > { %v4360_v0 = vadd.f32 1e-06, %v4328_v26  ;;  %v4361_v22 = vadd.f32 1e-06, %v4329_v7 }
 0x3c7   : > { %v4246_v6 = vpop.xlane.xlu1 %4245  ;;  %v4249_v41 = vpop.xlane.xlu0 %4248 }
 0x3c8   : > { %6449 = vrsqrt.f32 %v4360_v0  ;;  %v4330_v42 = vmul.f32 0.03125, %v4246_v6  ;;  %v4331_v3 = vmul.f32 0.03125, %v4249_v41 }
 0x3c9   : > { %6451 = vrsqrt.f32 %v4361_v22 }
 0x3ca   : > { %v6444_v13 = vpop.eup %6443  ;;  %v4362_v29 = vadd.f32 1e-06, %v4330_v42  ;;  %v4363_v56 = vadd.f32 1e-06, %v4331_v3 }
 0x3cb   : > { %v4252_v16 = vpop.xlane.xlu1 %4251  ;;  %v4255_v2 = vpop.xlane.xlu0 %4254  ;;  %v4421_v39 = vmul.f32 %v6444_v13, %v8747_v55 }
 0x3cc   : > { %6453 = vrsqrt.f32 %v4362_v29  ;;  %v4332_v21 = vmul.f32 0.03125, %v4252_v16  ;;  %v4333_v12 = vmul.f32 0.03125, %v4255_v2 }
 0x3cd   : > { %6455 = vrsqrt.f32 %v4363_v56  ;;  %v4460_v25 = vmul.f32 %v8948_v51, %v4421_v39 }
 0x3ce   : > { %v6446_v59 = vpop.eup %6445  ;;  %v4364_v27 = vadd.f32 1e-06, %v4332_v21  ;;  %v4365_v36 = vadd.f32 1e-06, %v4333_v12 }
 0x3cf   : > { %v6448_v61 = vpop.eup %6447  ;;  %v4258_v62 = vpop.xlane.xlu1 %4257  ;;  %v4422_v44 = vmul.f32 %v6446_v59, %v8757_v33  ;;  %v4499_v0 = vadd.f32 %v8955_v47, %v4460_v25 }
 0x3d0   : > { %v4261_v45 = vpop.xlane.xlu0 %4260  ;;  %6457 = vrsqrt.f32 %v4364_v27  ;;  %v4334_v55 = vmul.f32 0.03125, %v4258_v62  ;;  %v4423_v60 = vmul.f32 %v6448_v61, %v8750_v63 }
 0x3d1   : > { %v4335_v58 = vmul.f32 0.03125, %v4261_v45  ;;  %6459 = vrsqrt.f32 %v4365_v36  ;;  %v4461_v30 = vmul.f32 %v8948_v51, %v4422_v44 }
 0x3d2   : > { %v6450_v15 = vpop.eup %6449  ;;  %v4366_v35 = vadd.f32 1e-06, %v4334_v55  ;;  %v4462_v41 = vmul.f32 %v8948_v51, %v4423_v60 }
 0x3d3   : > { %v4367_v5 = vadd.f32 1e-06, %v4335_v58  ;;  %v6452_v26 = vpop.eup %6451  ;;  %v4500_v22 = vadd.f32 %v8955_v47, %v4461_v30  ;;  %v4424_v6 = vmul.f32 %v6450_v15, %v8760_v32 }
 0x3d4   : > { %6461 = vrsqrt.f32 %v4366_v35  ;;  %v4425_v29 = vmul.f32 %v6452_v26, %v8769_v48  ;;  %v4501_v32 = vadd.f32 %v8955_v47, %v4462_v41 }
 0x3d5   : > { %6463 = vrsqrt.f32 %v4367_v5  ;;  %v4531_v3 = vpack.c.bf16 %v4500_v22, %v4499_v0  ;;  %v4463_v13 = vmul.f32 %v8948_v51, %v4424_v6 }
 0x3d6   : > { %v6454_v56 = vpop.eup %6453  ;;  %v4464_v36 = vmul.f32 %v8948_v51, %v4425_v29 }
 0x3d7   : > { %v6456_v39 = vpop.eup %6455  ;;  %6283 = vmatprep.mubr.msk.bf16.mxu0 %vm1108_vm12, %v4531_v3  ;;  %v4502_v59 = vadd.f32 %v8955_v47, %v4463_v13  ;;  %v4426_v27 = vmul.f32 %v6454_v56, %v8772_v1 }
 0x3d8   : > { %v4427_v48 = vmul.f32 %v6456_v39, %v8781_v43  ;;  %v4503_v1 = vadd.f32 %v8955_v47, %v4464_v36 }
 0x3d9   : > { %v4532_v45 = vpack.c.bf16 %v4502_v59, %v4501_v32  ;;  %v4465_v44 = vmul.f32 %v8948_v51, %v4426_v27 }
 0x3da   : > { %v6458_v25 = vpop.eup %6457  ;;  %v4466_v43 = vmul.f32 %v8948_v51, %v4427_v48 }
 0x3db   : > { %v6460_v60 = vpop.eup %6459  ;;  %6284 = vmatmul.mubr.msk.bf16.vlgmr.msra.gmra.mrb[0].mxu0 %vm1108_vm12, %v4532_v45  ;;  %v4504_v35 = vadd.f32 %v8955_v47, %v4465_v44  ;;  %v4428_v5 = vmul.f32 %v6458_v25, %v8784_v28 }
 0x3dc   : > { %v4429_v22 = vmul.f32 %v6460_v60, %v8793_v34  ;;  %v4505_v28 = vadd.f32 %v8955_v47, %v4466_v43 }
 0x3dd   : > { %v4467_v0 = vmul.f32 %v8948_v51, %v4428_v5 }
 0x3de   : > { %v6462_v6 = vpop.eup %6461 }
 0x3df   : > { %v4506_v29 = vadd.f32 %v8955_v47, %v4467_v0  ;;  %v4430_v56 = vmul.f32 %v6462_v6, %v8796_v11 }
 0x3e2   : > { %v4264_v33 = vpop.xlane.xlu1 %4263 }
 0x3e3   : > { %v4336_v42 = vmul.f32 0.03125, %v4264_v33 }
 0x3e5   : > { %v4368_v16 = vadd.f32 1e-06, %v4336_v42 }
 0x3e7   : > { %6465 = vrsqrt.f32 %v4368_v16  ;;  %v4468_v16 = vmul.f32 %v8948_v51, %v4429_v22 }
 0x3e9   : > { %v4507_v11 = vadd.f32 %v8955_v47, %v4468_v16 }
 0x3f1   : > { %v4267_v7 = vpop.xlane.xlu0 %4266 }
 0x3f2   : > { %v4337_v63 = vmul.f32 0.03125, %v4267_v7  ;;  %v4533_v7 = vpack.c.bf16 %v4504_v35, %v4503_v1 }
 0x3f3   : > { %v4270_v21 = vpop.xlane.xlu1 %4269 }
 0x3f4   : > { %v4369_v2 = vadd.f32 1e-06, %v4337_v63  ;;  %v4338_v61 = vmul.f32 0.03125, %v4270_v21  ;;  %v6464_v63 = vpop.eup %6463  ;;  %6287 = vmatprep.mubr.msk.bf16.mxu0 %vm1108_vm12, %v4533_v7  ;;  %v4534_v21 = vpack.c.bf16 %v4506_v29, %v4505_v28 }
 0x3f5   : > { %v4431_v34 = vmul.f32 %v6464_v63, %v8805_v57  ;;  %v6466_v32 = vpop.eup %6465 }
 0x3f6   : > { %6467 = vrsqrt.f32 %v4369_v2  ;;  %v4370_v55 = vadd.f32 1e-06, %v4338_v61  ;;  %6288 = vmatmul.mubr.msk.bf16.gmra.mrb[4].mxu0 %vm1108_vm12, %v4534_v21  ;;  %v4432_v45 = vmul.f32 %v6466_v32, %v8808_v20 }
 0x3f7   : > { %v4470_v57 = vmul.f32 %v8948_v51, %v4431_v34 }
 0x3f8   : > { %6469 = vrsqrt.f32 %v4370_v55 }
 0x3f9   : > { %v4509_v20 = vadd.f32 %v8955_v47, %v4470_v57 }
 0x400   : > { %v6468_v36 = vpop.eup %6467 }
 0x401   : > { %v4433_v60 = vmul.f32 %v6468_v36, %v8817_v8 }
 0x403   : > { %v4472_v7 = vmul.f32 %v8948_v51, %v4433_v60 }
 0x419   : > { %v4273_v12 = vpop.xlane.xlu0 %4272 }
 0x41a   : > { %v4339_v62 = vmul.f32 0.03125, %v4273_v12  ;;  %v4469_v12 = vmul.f32 %v8948_v51, %v4430_v56 }
 0x41b   : > { %v4276_v30 = vpop.xlane.xlu1 %4275 }
 0x41c   : > { %v4371_v58 = vadd.f32 1e-06, %v4339_v62  ;;  %v4340_v26 = vmul.f32 0.03125, %v4276_v30  ;;  %v4508_v48 = vadd.f32 %v8955_v47, %v4469_v12  ;;  %v6470_v30 = vpop.eup %6469 }
 0x41d   : > { %v4279_v15 = vpop.xlane.xlu0 %4278 }
 0x41e   : > { %v4341_v33 = vmul.f32 0.03125, %v4279_v15  ;;  %6471 = vrsqrt.f32 %v4371_v58  ;;  %v4372_v41 = vadd.f32 1e-06, %v4340_v26  ;;  %v4535_v55 = vpack.c.bf16 %v4508_v48, %v4507_v11 }
 0x41f   : > { %v4282_v3 = vpop.xlane.xlu1 %4281  ;;  %v4471_v58 = vmul.f32 %v8948_v51, %v4432_v45 }
 0x420   : > { %v4373_v42 = vadd.f32 1e-06, %v4341_v33  ;;  %6473 = vrsqrt.f32 %v4372_v41  ;;  %v4342_v2 = vmul.f32 0.03125, %v4282_v3  ;;  %6291 = vmatprep.mubr.msk.bf16.mxu0 %vm1108_vm12, %v4535_v55  ;;  %v4434_v33 = vmul.f32 %v6470_v30, %v8820_v9 }
 0x421   : > { %v4285_v13 = vpop.xlane.xlu0 %4284  ;;  %v4510_v26 = vadd.f32 %v8955_v47, %v4471_v58  ;;  %v4511_v9 = vadd.f32 %v8955_v47, %v4472_v7 }
 0x422   : > { %v4343_v39 = vmul.f32 0.03125, %v4285_v13  ;;  %6475 = vrsqrt.f32 %v4373_v42  ;;  %v4374_v59 = vadd.f32 1e-06, %v4342_v2  ;;  %v4473_v41 = vmul.f32 %v8948_v51, %v4434_v33 }
 0x423   : > { %v4288_v61 = vpop.xlane.xlu1 %4287  ;;  %v4536_v6 = vpack.c.bf16 %v4510_v26, %v4509_v20 }
 0x424   : > { %v4375_v27 = vadd.f32 1e-06, %v4343_v39  ;;  %6477 = vrsqrt.f32 %v4374_v59  ;;  %v4344_v44 = vmul.f32 0.03125, %v4288_v61  ;;  %v4512_v56 = vadd.f32 %v8955_v47, %v4473_v41 }
 0x425   : > { %v4291_v62 = vpop.xlane.xlu0 %4290  ;;  %6292 = vmatmul.mubr.msk.bf16.gmra.mrb[8].mxu0 %vm1108_vm12, %v4536_v6 }
 0x426   : > { %v4345_v25 = vmul.f32 0.03125, %v4291_v62  ;;  %6479 = vrsqrt.f32 %v4375_v27  ;;  %v4376_v15 = vadd.f32 1e-06, %v4344_v44  ;;  %v4537_v34 = vpack.c.bf16 %v4512_v56, %v4511_v9 }
 0x427   : > { %v4294_v5 = vpop.xlane.xlu1 %4293 }
 0x428   : > { %v4377_v1 = vadd.f32 1e-06, %v4345_v25  ;;  %v6472_v35 = vpop.eup %6471  ;;  %6481 = vrsqrt.f32 %v4376_v15  ;;  %v4346_v0 = vmul.f32 0.03125, %v4294_v5  ;;  %6295 = vmatprep.mubr.msk.bf16.mxu0 %vm1108_vm12, %v4537_v34 }
 0x429   : > { %v4297_v43 = vpop.xlane.xlu0 %4296  ;;  %v4435_v8 = vmul.f32 %v6472_v35, %v8829_v24 }
 0x42a   : > { %v4347_v22 = vmul.f32 0.03125, %v4297_v43  ;;  %6483 = vrsqrt.f32 %v4377_v1  ;;  %v6474_v42 = vpop.eup %6473  ;;  %v4378_v63 = vadd.f32 1e-06, %v4346_v0 }
 0x42b   : > { %v4300_v28 = vpop.xlane.xlu1 %4299  ;;  %v4436_v16 = vmul.f32 %v6474_v42, %v8832_v54  ;;  %v4474_v24 = vmul.f32 %v8948_v51, %v4435_v8 }
 0x42c   : > { %v4379_v3 = vadd.f32 1e-06, %v4347_v22  ;;  %v6476_v13 = vpop.eup %6475  ;;  %6485 = vrsqrt.f32 %v4378_v63  ;;  %v4348_v2 = vmul.f32 0.03125, %v4300_v28 }
 0x42d   : > { %v4303_v29 = vpop.xlane.xlu0 %4302  ;;  %v4475_v21 = vmul.f32 %v8948_v51, %v4436_v16  ;;  %v4437_v12 = vmul.f32 %v6476_v13, %v8841_v52  ;;  %v4513_v54 = vadd.f32 %v8955_v47, %v4474_v24 }
 0x42e   : > { %v4349_v39 = vmul.f32 0.03125, %v4303_v29  ;;  %6487 = vrsqrt.f32 %v4379_v3  ;;  %v6478_v32 = vpop.eup %6477  ;;  %v4380_v59 = vadd.f32 1e-06, %v4348_v2 }
 0x42f   : > { %v4306_v61 = vpop.xlane.xlu1 %4305  ;;  %v4514_v11 = vadd.f32 %v8955_v47, %v4475_v21  ;;  %v4438_v48 = vmul.f32 %v6478_v32, %v8844_v18  ;;  %v4476_v45 = vmul.f32 %v8948_v51, %v4437_v12 }
 0x430   : > { %v4381_v27 = vadd.f32 1e-06, %v4349_v39  ;;  %v6480_v36 = vpop.eup %6479  ;;  %6489 = vrsqrt.f32 %v4380_v59  ;;  %v4350_v57 = vmul.f32 0.03125, %v4306_v61 }
 0x431   : > { %v4309_v62 = vpop.xlane.xlu0 %4308  ;;  %v4439_v52 = vmul.f32 %v6480_v36, %v8853_v40  ;;  %v4538_v25 = vpack.c.bf16 %v4514_v11, %v4513_v54  ;;  %v4477_v55 = vmul.f32 %v8948_v51, %v4438_v48  ;;  %v4515_v18 = vadd.f32 %v8955_v47, %v4476_v45 }
 0x432   : > { %v4351_v44 = vmul.f32 0.03125, %v4309_v62  ;;  %6491 = vrsqrt.f32 %v4381_v27  ;;  %v6482_v58 = vpop.eup %6481  ;;  %v4382_v60 = vadd.f32 1e-06, %v4350_v57 }
 0x433   : > { %v4312_v1 = vpop.xlane.xlu1 %4311  ;;  %6296 = vmatmul.mubr.msk.bf16.gmra.mrb[12].mxu0 %vm1108_vm12, %v4538_v25  ;;  %v4516_v5 = vadd.f32 %v8955_v47, %v4477_v55  ;;  %v4440_v43 = vmul.f32 %v6482_v58, %v8856_v49  ;;  %v4478_v40 = vmul.f32 %v8948_v51, %v4439_v52 }
 0x434   : > { %v4383_v30 = vadd.f32 1e-06, %v4351_v44  ;;  %v6484_v15 = vpop.eup %6483  ;;  %6493 = vrsqrt.f32 %v4382_v60  ;;  %v4352_v20 = vmul.f32 0.03125, %v4312_v1 }
 0x435   : > { %v4315_v35 = vpop.xlane.xlu0 %4314  ;;  %v4539_v33 = vpack.c.bf16 %v4516_v5, %v4515_v18  ;;  %v4479_v7 = vmul.f32 %v8948_v51, %v4440_v43  ;;  %v4441_v0 = vmul.f32 %v6484_v15, %v8865_v19  ;;  %v4517_v49 = vadd.f32 %v8955_v47, %v4478_v40 }
 0x436   : > { %v4353_v26 = vmul.f32 0.03125, %v4315_v35  ;;  %6495 = vrsqrt.f32 %v4383_v30  ;;  %v6486_v22 = vpop.eup %6485  ;;  %v4384_v8 = vadd.f32 1e-06, %v4352_v20 }
 0x437   : > { %v4318_v42 = vpop.xlane.xlu1 %4317  ;;  %6299 = vmatprep.mubr.msk.bf16.mxu0 %vm1108_vm12, %v4539_v33  ;;  %v4518_v3 = vadd.f32 %v8955_v47, %v4479_v7  ;;  %v4442_v13 = vmul.f32 %v6486_v22, %v8868_v14  ;;  %v4480_v28 = vmul.f32 %v8948_v51, %v4441_v0 }
 0x438   : > { %v4385_v6 = vadd.f32 1e-06, %v4353_v26  ;;  %v6488_v41 = vpop.eup %6487  ;;  %6497 = vrsqrt.f32 %v4384_v8  ;;  %v4354_v29 = vmul.f32 0.03125, %v4318_v42 }
 0x439   : > { %v4321_v63 = vpop.xlane.xlu0 %4320  ;;  %v4443_v19 = vmul.f32 %v6488_v41, %v8880_v31  ;;  %v4540_v56 = vpack.c.bf16 %v4518_v3, %v4517_v49  ;;  %v4481_v16 = vmul.f32 %v8948_v51, %v4442_v13  ;;  %v4519_v14 = vadd.f32 %v8955_v47, %v4480_v28 }
 0x43a   : > { %v4355_v9 = vmul.f32 0.03125, %v4321_v63  ;;  %6499 = vrsqrt.f32 %v4385_v6  ;;  %v6490_v24 = vpop.eup %6489  ;;  %v4386_v2 = vadd.f32 1e-06, %v4354_v29  ;;  %v9069_v63 = vld [vmem:[%s9834_s7] ss:$0 sm:$0xff] }
 0x43b   : > { %v4324_v21 = vpop.xlane.xlu1 %4323  ;;  %6300 = vmatmul.mubr.msk.bf16.gmra.mrb[16].mxu0 %vm1108_vm12, %v4540_v56  ;;  %v4520_v12 = vadd.f32 %v8955_v47, %v4481_v16  ;;  %v4444_v32 = vmul.f32 %v6490_v24, %v8883_v17  ;;  %v4482_v59 = vmul.f32 %v8948_v51, %v4443_v19 }
 0x43c   : > { %v4387_v39 = vadd.f32 1e-06, %v4355_v9  ;;  %v6492_v34 = vpop.eup %6491  ;;  %6501 = vrsqrt.f32 %v4386_v2  ;;  %v4356_v31 = vmul.f32 0.03125, %v4324_v21 }
 0x43d   : > { %v4445_v27 = vmul.f32 %v6492_v34, %v8895_v50  ;;  %v4541_v36 = vpack.c.bf16 %v4520_v12, %v4519_v14  ;;  %v4483_v61 = vmul.f32 %v8948_v51, %v4444_v32  ;;  %v4521_v48 = vadd.f32 %v8955_v47, %v4482_v59 }
 0x43e   : > { %6503 = vrsqrt.f32 %v4387_v39  ;;  %v6494_v62 = vpop.eup %6493  ;;  %v4388_v54 = vadd.f32 1e-06, %v4356_v31 }
 0x43f   : > { %6303 = vmatprep.mubr.msk.bf16.mxu0 %vm1108_vm12, %v4541_v36  ;;  %v4522_v45 = vadd.f32 %v8955_v47, %v4483_v61  ;;  %v4446_v17 = vmul.f32 %v6494_v62, %v8898_v10  ;;  %v4484_v57 = vmul.f32 %v8948_v51, %v4445_v27 }
 0x440   : > { %v6496_v11 = vpop.eup %6495  ;;  %6505 = vrsqrt.f32 %v4388_v54 }
 0x441   : > { %v4447_v50 = vmul.f32 %v6496_v11, %v8907_v38  ;;  %v4542_v44 = vpack.c.bf16 %v4522_v45, %v4521_v48  ;;  %v4485_v52 = vmul.f32 %v8948_v51, %v4446_v17  ;;  %v4523_v58 = vadd.f32 %v8955_v47, %v4484_v57 }
 0x442   : > { %v6498_v25 = vpop.eup %6497  ;;  %v9849_v57 = vmov -1.0  }
 0x443   : > { %6304 = vmatmul.mubr.msk.bf16.gmra.mrb[20].mxu0 %vm1108_vm12, %v4542_v44  ;;  %v4524_v60 = vadd.f32 %v8955_v47, %v4485_v52  ;;  %v4448_v30 = vmul.f32 %v6498_v25, %v8910_v37  ;;  %v4486_v10 = vmul.f32 %v8948_v51, %v4447_v50 }
 0x444   : > { %v6500_v55 = vpop.eup %6499 }
 0x445   : > { %v4449_v15 = vmul.f32 %v6500_v55, %v8919_v23  ;;  %v4543_v1 = vpack.c.bf16 %v4524_v60, %v4523_v58  ;;  %v4487_v38 = vmul.f32 %v8948_v51, %v4448_v30  ;;  %v4525_v5 = vadd.f32 %v8955_v47, %v4486_v10 }
 0x446   : > { %v6502_v35 = vpop.eup %6501 }
 0x447   : > { %6307 = vmatprep.mubr.msk.bf16.mxu0 %vm1108_vm12, %v4543_v1  ;;  %v4526_v43 = vadd.f32 %v8955_v47, %v4487_v38  ;;  %v4450_v40 = vmul.f32 %v6502_v35, %v8922_v53  ;;  %v4488_v20 = vmul.f32 %v8948_v51, %v4449_v15 }
 0x448   : > { %v6504_v18 = vpop.eup %6503 }
 0x449   : > { %v4451_v37 = vmul.f32 %v6504_v18, %v8931_v4  ;;  %v4544_v26 = vpack.c.bf16 %v4526_v43, %v4525_v5  ;;  %v4489_v23 = vmul.f32 %v8948_v51, %v4450_v40  ;;  %v4527_v7 = vadd.f32 %v8955_v47, %v4488_v20 }
 0x44a   : > { %v6506_v33 = vpop.eup %6505 }
 0x44b   : > { %6308 = vmatmul.mubr.msk.bf16.gmra.mrb[24].mxu0 %vm1108_vm12, %v4544_v26  ;;  %v4528_v0 = vadd.f32 %v8955_v47, %v4489_v23  ;;  %v4452_v22 = vmul.f32 %v6506_v33, %v8934_v46  ;;  %v4490_v8 = vmul.f32 %v8948_v51, %v4451_v37 }
 0x44d   : > { %v4545_v6 = vpack.c.bf16 %v4528_v0, %v4527_v7  ;;  %v4491_v53 = vmul.f32 %v8948_v51, %v4452_v22  ;;  %v4529_v4 = vadd.f32 %v8955_v47, %v4490_v8 }
 0x44f   : > { %6311 = vmatprep.mubr.msk.bf16.mxu0 %vm1108_vm12, %v4545_v6  ;;  %v4530_v41 = vadd.f32 %v8955_v47, %v4491_v53 }
 0x451   : > { %v4546_v42 = vpack.c.bf16 %v4530_v41, %v4529_v4 }
 0x453   : > { %6312 = vmatmul.mubr.msk.bf16.gmra.mrb[28].mxu0 %vm1108_vm12, %v4546_v42 }
 0x4ae   : > { %v6285_v46 = vpop.f32.mrb[0].mxu0 }
 0x4af   : > { %v4661_v49 = vadd.f32 %v6285_v46, %v9069_v63  ;;  %v4652_v3 = vpop.f32.mrb[1].mxu0 }
 0x4b0   : > { %v4653_v51 = vadd.f32 %v9069_v63, %v4652_v3  ;;  %v6286_v13 = vpop.f32.mrb[2].mxu0 }
 0x4b1   : > { %v4813_v28 = vmul.f32 0.70710677, %v4661_v49  ;;  %v4664_v29 = vadd.f32 %v6286_v13, %v9069_v63  ;;  %v4655_v9 = vpop.f32.mrb[3].mxu0  ;;  %v9075_v34 = vmul.f32 0.5, %v4661_v49 }
 0x4b2   : > { %v4811_v47 = vmul.f32 0.70710677, %v4653_v51  ;;  %v4656_v16 = vadd.f32 %v9069_v63, %v4655_v9  ;;  %v9077_v36 = vmul.f32 0.5, %v4653_v51 }
 0x4b3   : > { %v4909_v19 = vand.u32 2147483647, %v4813_v28  ;;  %v4814_v56 = vmul.f32 0.70710677, %v4664_v29  ;;  %vm4845_vm11 = vcmp.ge.f32.partialorder %v4813_v28, 0.0  ;;  %v9079_v48 = vmul.f32 0.5, %v4664_v29 }
 0x4b4   : > { %v4907_v24 = vand.u32 2147483647, %v4811_v47  ;;  %v4812_v59 = vmul.f32 0.70710677, %v4656_v16  ;;  %9890 = vst [vmem:[#allocation12_spill] sm:$0xff] %v9077_v36  ;;  %v9083_v50 = vsel %vm4845_vm11, 1.0, %v9849_v57 }
 0x4b5   : > { %v4941_v2 = vmul.f32 0.3275911, %v4909_v19  ;;  %v5325_v39 = vsub.f32 0.0, %v4909_v19  ;;  %v4910_v14 = vand.u32 2147483647, %v4814_v56  ;;  %vm4843_vm12 = vcmp.ge.f32.partialorder %v4811_v47, 0.0 }
 0x4b6   : > { %v5323_v21 = vsub.f32 0.0, %v4907_v24  ;;  %v4939_v32 = vmul.f32 0.3275911, %v4907_v24  ;;  %v4908_v45 = vand.u32 2147483647, %v4812_v59  ;;  %v9085_v58 = vmul.f32 0.5, %v4656_v16 }
 0x4b7   : > { %v4973_v12 = vadd.f32 1.0, %v4941_v2  ;;  %v5357_v27 = vmul.f32 %v5325_v39, %v4909_v19  ;;  %v4942_v61 = vmul.f32 0.3275911, %v4910_v14  ;;  %v5326_v62 = vsub.f32 0.0, %v4910_v14 }
 0x4b8   : > { %v5355_v11 = vmul.f32 %v5323_v21, %v4907_v24  ;;  %v4971_v55 = vadd.f32 1.0, %v4939_v32  ;;  %9891 = vst [vmem:[#allocation13_spill] sm:$0xff] %v9085_v58  ;;  %v4940_v60 = vmul.f32 0.3275911, %v4908_v45  ;;  %v5324_v30 = vsub.f32 0.0, %v4908_v45 }
 0x4b9   : > { %6507 = vrcp.f32 %v4973_v12  ;;  %v4974_v44 = vadd.f32 1.0, %v4942_v61  ;;  %v5358_v52 = vmul.f32 %v5326_v62, %v4910_v14  ;;  %v5391_v10 = vmul.f32 1.442695, %v5357_v27 }
 0x4ba   : > { %vm4846_vm15 = vcmp.ge.f32.partialorder %v4814_v56, 0.0  ;;  %v5387_v38 = vmul.f32 1.442695, %v5355_v11  ;;  %v5356_v35 = vmul.f32 %v5324_v30, %v4908_v45  ;;  %vm4844_vm1 = vcmp.ge.f32.partialorder %v4812_v59, 0.0 }
 0x4bb   : > { %6509 = vrcp.f32 %v4974_v44  ;;  %v5393_v5 = vmul.f32 1.442695, %v5358_v52  ;;  %v4972_v20 = vadd.f32 1.0, %v4940_v60  ;;  %v9092_v33 = vsel %vm4843_vm12, 1.0, %v9849_v57 }
 0x4bc   : > { %6511 = vrcp.f32 %v4971_v55  ;;  %v5389_v37 = vmul.f32 1.442695, %v5356_v35  ;;  %9892 = vst [vmem:[#allocation14_spill] sm:$0xff] %v9092_v33  ;;  %v9100_v8 = vsel %vm4846_vm15, 1.0, %v9849_v57  ;;  %v9103_v6 = vsel %vm4844_vm1, 1.0, %v9849_v57 }
 0x4bd   : > { %6513 = vpow2.f32 %v5391_v10  ;;  %9893 = vst [vmem:[#allocation15_spill] sm:$0xff] %v9103_v6 }
 0x4be   : > { %6515 = vpow2.f32 %v5387_v38 }
 0x4bf   : > { %6517 = vpow2.f32 %v5393_v5 }
 0x4c0   : > { %6519 = vrcp.f32 %v4972_v20 }
 0x4c1   : > { %6521 = vpow2.f32 %v5389_v37 }
 0x4c3   : > { %v9110_v49 = vpop.eup %6507 }
 0x4c4   : > { %v5037_v28 = vmul.f32 1.0614054, %v9110_v49 }
 0x4c5   : > { %v9117_v39 = vpop.eup %6509 }
 0x4c6   : > { %v5069_v24 = vadd.f32 -1.4531521, %v5037_v28  ;;  %v9129_v62 = vpop.eup %6511 }
 0x4c7   : > { %9894 = vst [vmem:[#allocation16_spill] sm:$0xff] %v9129_v62  ;;  %v9136_v52 = vpop.eup %6513 }
 0x4c8   : > { %v5101_v59 = vmul.f32 %v9110_v49, %v5069_v24  ;;  %v9141_v10 = vpop.eup %6515 }
 0x4c9   : > { %v6289_v31 = vpop.f32.mrb[4].mxu0  ;;  %9895 = vst [vmem:[#allocation17_spill] sm:$0xff] %v9141_v10  ;;  %v9149_v35 = vpop.eup %6517 }
 0x4ca   : > { %v4668_v54 = vpop.f32.mrb[5].mxu0  ;;  %v4677_v15 = vadd.f32 %v6289_v31, %v9069_v63  ;;  %v5038_v31 = vmul.f32 1.0614054, %v9117_v39  ;;  %v9155_v20 = vpop.eup %6519 }
 0x4cb   : > { %v6290_v17 = vpop.f32.mrb[6].mxu0  ;;  %v4669_v1 = vadd.f32 %v9069_v63, %v4668_v54  ;;  %9896 = vst [vmem:[#allocation18_spill] sm:$0xff] %v9155_v20 }
 0x4cc   : > { %v4671_v25 = vpop.f32.mrb[7].mxu0  ;;  %v4680_v18 = vadd.f32 %v6290_v17, %v9069_v63  ;;  %v4817_v43 = vmul.f32 0.70710677, %v4677_v15  ;;  %v9112_v3 = vmul.f32 0.5, %v4677_v15  ;;  %v5070_v55 = vadd.f32 -1.4531521, %v5038_v31 }
 0x4cd   : > { %v4815_v26 = vmul.f32 0.70710677, %v4669_v1  ;;  %v9108_v46 = vadd.f32 %v9069_v63, %v4671_v25  ;;  %v9119_v21 = vmul.f32 0.5, %v4669_v1  ;;  %v5133_v25 = vadd.f32 1.4214138, %v5101_v59 }
 0x4ce   : > { %v4913_v7 = vand.u32 2147483647, %v4817_v43  ;;  %v9094_v0 = vmul.f32 0.70710677, %v4680_v18  ;;  %vm4849_vm2 = vcmp.ge.f32.partialorder %v4817_v43, 0.0  ;;  %v9121_v14 = vmul.f32 0.5, %v4680_v18 }
 0x4cf   : > { %v4911_v53 = vand.u32 2147483647, %v4815_v26  ;;  %v4816_v2 = vmul.f32 0.70710677, %v9108_v46  ;;  %vm4847_vm3 = vcmp.ge.f32.partialorder %v4815_v26, 0.0  ;;  %v9132_v54 = vsel %vm4849_vm2, 1.0, %v9849_v57 }
 0x4d0   : > { %v4945_v41 = vmul.f32 0.3275911, %v4913_v7  ;;  %v5329_v42 = vsub.f32 0.0, %v4913_v7  ;;  %v4914_v13 = vand.u32 2147483647, %v9094_v0  ;;  %v9145_v15 = vsel %vm4847_vm3, 1.0, %v9849_v57 }
 0x4d1   : > { %v4943_v51 = vmul.f32 0.3275911, %v4911_v53  ;;  %v5327_v9 = vsub.f32 0.0, %v4911_v53  ;;  %v4912_v17 = vand.u32 2147483647, %v4816_v2  ;;  %vm4850_vm4 = vcmp.ge.f32.partialorder %v9094_v0, 0.0 }
 0x4d2   : > { %v4977_v29 = vadd.f32 1.0, %v4945_v41  ;;  %v5361_v47 = vmul.f32 %v5329_v42, %v4913_v7  ;;  %v4946_v56 = vmul.f32 0.3275911, %v4914_v13  ;;  %v5330_v16 = vsub.f32 0.0, %v4914_v13 }
 0x4d3   : > { %v4975_v19 = vadd.f32 1.0, %v4943_v51  ;;  %v5359_v27 = vmul.f32 %v5327_v9, %v4911_v53  ;;  %v4944_v1 = vmul.f32 0.3275911, %v4912_v17  ;;  %v5165_v18 = vmul.f32 %v9110_v49, %v5133_v25  ;;  %v9159_v53 = vpop.eup %6521 }
 0x4d4   : > { %6523 = vrcp.f32 %v4977_v29  ;;  %v4978_v12 = vadd.f32 1.0, %v4946_v56  ;;  %v5399_v11 = vmul.f32 1.442695, %v5361_v47  ;;  %v5362_v45 = vmul.f32 %v5330_v16, %v4914_v13  ;;  %9897 = vst [vmem:[#allocation19_spill] sm:$0xff] %v9159_v53 }
 0x4d5   : > { %6525 = vrcp.f32 %v4975_v19  ;;  %v5102_v5 = vmul.f32 %v9117_v39, %v5070_v55  ;;  %v5395_v43 = vmul.f32 1.442695, %v5359_v27  ;;  %vm4848_vm5 = vcmp.ge.f32.partialorder %v4816_v2, 0.0 }
 0x4d6   : > { %6527 = vrcp.f32 %v4978_v12  ;;  %v5401_v37 = vmul.f32 1.442695, %v5362_v45  ;;  %v4976_v26 = vadd.f32 1.0, %v4944_v1  ;;  %v5197_v41 = vadd.f32 -0.28449672, %v5165_v18 }
 0x4d7   : > { %6529 = vpow2.f32 %v5399_v11  ;;  %v5328_v42 = vsub.f32 0.0, %v4912_v17  ;;  %v9166_v13 = vsel %vm4850_vm4, 1.0, %v9849_v57  ;;  %v9169_v28 = vmul.f32 0.5, %v9108_v46 }
 0x4d8   : > { %6531 = vrcp.f32 %v4976_v26  ;;  %v5229_v19 = vmul.f32 %v9110_v49, %v5197_v41  ;;  %v9186_v12 = vsel %vm4848_vm5, 1.0, %v9849_v57 }
 0x4d9   : > { %6533 = vpow2.f32 %v5395_v43  ;;  %v5360_v25 = vmul.f32 %v5328_v42, %v4912_v17 }
 0x4da   : > { %6535 = vpow2.f32 %v5401_v37  ;;  %v5261_v27 = vadd.f32 0.2548296, %v5229_v19 }
 0x4db   : > { %v5397_v42 = vmul.f32 1.442695, %v5360_v25 }
 0x4dc   : > { %v5293_v37 = vmul.f32 %v9110_v49, %v5261_v27 }
 0x4de   : > { %v9174_v47 = vpop.eup %6523  ;;  %v5453_v57 = vmul.f32 %v9136_v52, %v5293_v37 }
 0x4df   : > { %v9181_v24 = vpop.eup %6525  ;;  %v5041_v46 = vmul.f32 1.0614054, %v9174_v47 }
 0x4e0   : > { %v5039_v45 = vmul.f32 1.0614054, %v9181_v24  ;;  %v9193_v43 = vpop.eup %6527  ;;  %v5485_v36 = vsub.f32 1.0, %v5453_v57 }
 0x4e1   : > { %v5073_v55 = vadd.f32 -1.4531521, %v5041_v46  ;;  %v5042_v19 = vmul.f32 1.0614054, %v9193_v43 }
 0x4e2   : > { %v5071_v26 = vadd.f32 -1.4531521, %v5039_v45 }
 0x4e3   : > { %v5074_v49 = vadd.f32 -1.4531521, %v5042_v19 }
 0x4f8   : > { %v6293_v40 = vpop.f32.mrb[8].mxu0 }
 0x4f9   : > { %v4684_v23 = vpop.f32.mrb[9].mxu0  ;;  %v4693_v60 = vadd.f32 %v6293_v40, %v9069_v63 }
 0x4fa   : > { %v9096_v22 = vpop.f32.mrb[10].mxu0  ;;  %v4685_v38 = vadd.f32 %v9069_v63, %v4684_v23  ;;  %v5134_v23 = vadd.f32 1.4214138, %v5102_v5 }
 0x4fb   : > { %v9105_v4 = vpop.f32.mrb[11].mxu0  ;;  %v9153_v40 = vmul.f32 0.70710677, %v4693_v60  ;;  %v9191_v1 = vmul.f32 0.5, %v4693_v60  ;;  %v5103_v60 = vmul.f32 %v9181_v24, %v5071_v26 }
 0x4fc   : > { %v9157_v7 = vmul.f32 0.70710677, %v4685_v38  ;;  %v5166_v56 = vmul.f32 %v9117_v39, %v5134_v23  ;;  %v5105_v23 = vmul.f32 %v9174_v47, %v5073_v55  ;;  %v6530_v55 = vpop.eup %6529 }
 0x4fd   : > { %v4917_v29 = vand.u32 2147483647, %v9153_v40  ;;  %vm4853_vm6 = vcmp.ge.f32.partialorder %v9153_v40, 0.0  ;;  %v5135_v58 = vadd.f32 1.4214138, %v5103_v60  ;;  %v9210_v26 = vpop.eup %6531 }
 0x4fe   : > { %v4915_v16 = vand.u32 2147483647, %v9157_v7  ;;  %v5198_v11 = vadd.f32 -0.28449672, %v5166_v56  ;;  %v5040_v60 = vmul.f32 1.0614054, %v9210_v26 }
 0x4ff   : > { %v4949_v59 = vmul.f32 0.3275911, %v4917_v29  ;;  %v5333_v5 = vsub.f32 0.0, %v4917_v29  ;;  %v5167_v19 = vmul.f32 %v9181_v24, %v5135_v58  ;;  %vm4851_vm7 = vcmp.ge.f32.partialorder %v9157_v7, 0.0 }
 0x500   : > { %v5230_v2 = vmul.f32 %v9117_v39, %v5198_v11  ;;  %v4947_v41 = vmul.f32 0.3275911, %v4915_v16  ;;  %v9203_v11 = vmul.f32 0.5, %v4685_v38  ;;  %v5072_v33 = vadd.f32 -1.4531521, %v5040_v60 }
 0x501   : > { %v4981_v18 = vadd.f32 1.0, %v4949_v59  ;;  %v5137_v59 = vadd.f32 1.4214138, %v5105_v23  ;;  %v5365_v27 = vmul.f32 %v5333_v5, %v4917_v29  ;;  %v9898_v23 = vmov -1.0   ;;  %v6534_v5 = vpop.eup %6533 }
 0x502   : > { %v5262_v17 = vadd.f32 0.2548296, %v5230_v2  ;;  %v4979_v56 = vadd.f32 1.0, %v4947_v41  ;;  %v5106_v41 = vmul.f32 %v9193_v43, %v5074_v49  ;;  %v9217_v38 = vsel %vm4853_vm6, 1.0, %v9898_v23 }
 0x503   : > { %6537 = vrcp.f32 %v4981_v18  ;;  %v5331_v18 = vsub.f32 0.0, %v4915_v16  ;;  %v5169_v25 = vmul.f32 %v9174_v47, %v5137_v59  ;;  %v4696_v29 = vadd.f32 %v9096_v22, %v9069_v63 }
 0x504   : > { %6539 = vrcp.f32 %v4979_v56  ;;  %v5294_v37 = vmul.f32 %v9117_v39, %v5262_v17  ;;  %v6536_v56 = vpop.eup %6535  ;;  %v5138_v49 = vadd.f32 1.4214138, %v5106_v41  ;;  %v5407_v40 = vmul.f32 1.442695, %v5365_v27 }
 0x505   : > { %v5201_v59 = vadd.f32 -0.28449672, %v5169_v25  ;;  %6541 = vpow2.f32 %v5397_v42  ;;  %v5199_v6 = vadd.f32 -0.28449672, %v5167_v19  ;;  %v5363_v22 = vmul.f32 %v5331_v18, %v4915_v16 }
 0x506   : > { %v9123_v32 = vpop.f32.mrb[12].mxu0  ;;  %v5170_v10 = vmul.f32 %v9193_v43, %v5138_v49  ;;  %v9229_v39 = vmul.f32 0.70710677, %v4696_v29  ;;  %v9233_v58 = vadd.f32 %v9069_v63, %v9105_v4  ;;  %v5454_v17 = vmul.f32 %v9149_v35, %v5294_v37 }
 0x507   : > { %v9127_v61 = vpop.f32.mrb[13].mxu0  ;;  %v5233_v53 = vmul.f32 %v9174_v47, %v5201_v59  ;;  %v5231_v25 = vmul.f32 %v9181_v24, %v5199_v6  ;;  %v5104_v42 = vmul.f32 %v9210_v26, %v5072_v33  ;;  %v9241_v57 = vsel %vm4851_vm7, 1.0, %v9898_v23 }
 0x508   : > { %v9134_v44 = vpop.f32.mrb[14].mxu0  ;;  %v5202_v41 = vadd.f32 -0.28449672, %v5170_v10  ;;  %6543 = vpow2.f32 %v5407_v40  ;;  %v9247_v4 = vmul.f32 0.5, %v4696_v29  ;;  %v5517_v35 = vmul.f32 %v5485_v36, %v9083_v50 }
 0x509   : > { %v9139_v30 = vpop.f32.mrb[15].mxu0  ;;  %v5265_v18 = vadd.f32 0.2548296, %v5233_v53  ;;  %v5263_v37 = vadd.f32 0.2548296, %v5231_v25  ;;  %v5486_v10 = vsub.f32 1.0, %v5454_v17  ;;  %v9262_v50 = vadd.f32 %v9123_v32, %v9069_v63 }
 0x50a   : > { %v5136_v6 = vadd.f32 1.4214138, %v5104_v42  ;;  %v5403_v19 = vmul.f32 1.442695, %v5363_v22  ;;  %v5234_v7 = vmul.f32 %v9193_v43, %v5202_v41  ;;  %v4918_v59 = vand.u32 2147483647, %v9229_v39 }
 0x50b   : > { %v5297_v33 = vmul.f32 %v9174_v47, %v5265_v18  ;;  %v5295_v29 = vmul.f32 %v9181_v24, %v5263_v37  ;;  %vm4854_vm8 = vcmp.ge.f32.partialorder %v9229_v39, 0.0 }
 0x50c   : > { %v5168_v36 = vmul.f32 %v9210_v26, %v5136_v6  ;;  %v5266_v22 = vadd.f32 0.2548296, %v5234_v7  ;;  %v4950_v20 = vmul.f32 0.3275911, %v4918_v59  ;;  %v5334_v62 = vsub.f32 0.0, %v4918_v59 }
 0x50d   : > { %v9245_v27 = vpop.eup %6537  ;;  %v5457_v40 = vmul.f32 %v6530_v55, %v5297_v33  ;;  %v5455_v18 = vmul.f32 %v6534_v5, %v5295_v29 }
 0x50e   : > { %v9161_v51 = vpop.f32.mrb[16].mxu0  ;;  %v5045_v60 = vmul.f32 1.0614054, %v9245_v27  ;;  %v9256_v53 = vpop.eup %6539  ;;  %v5200_v41 = vadd.f32 -0.28449672, %v5168_v36  ;;  %v5298_v6 = vmul.f32 %v9193_v43, %v5266_v22  ;;  %v4982_v7 = vadd.f32 1.0, %v4950_v20 }
 0x50f   : > { %v9172_v9 = vpop.f32.mrb[17].mxu0  ;;  %v5043_v42 = vmul.f32 1.0614054, %v9256_v53  ;;  %v6542_v24 = vpop.eup %6541  ;;  %v5489_v37 = vsub.f32 1.0, %v5457_v40  ;;  %v5487_v55 = vsub.f32 1.0, %v5455_v18  ;;  %v5549_v40 = vadd.f32 1.0, %v5517_v35 }
 0x510   : > { %v9179_v0 = vpop.f32.mrb[18].mxu0  ;;  %v5077_v25 = vadd.f32 -1.4531521, %v5045_v60  ;;  %v5232_v33 = vmul.f32 %v9210_v26, %v5200_v41  ;;  %v5458_v5 = vmul.f32 %v6536_v56, %v5298_v6  ;;  %6545 = vrcp.f32 %v4982_v7 }
 0x511   : > { %v9188_v31 = vpop.f32.mrb[19].mxu0  ;;  %v4820_v22 = vmul.f32 0.70710677, %v9233_v58  ;;  %6547 = vpow2.f32 %v5403_v19  ;;  %v9293_v19 = vmul.f32 0.5, %v9233_v58 }
 0x512   : > { %v5109_v32 = vmul.f32 %v9245_v27, %v5077_v25  ;;  %v5264_v43 = vadd.f32 0.2548296, %v5232_v33 }
 0x513   : > { %vm4852_vm9 = vcmp.ge.f32.partialorder %v4820_v22, 0.0 }
 0x514   : > { %v5141_v29 = vadd.f32 1.4214138, %v5109_v32  ;;  %v5296_v35 = vmul.f32 %v9210_v26, %v5264_v43  ;;  %v4916_v32 = vand.u32 2147483647, %v4820_v22  ;;  %v9297_v26 = vsel %vm4854_vm8, 1.0, %v9898_v23 }
 0x516   : > { %v9201_v46 = vpop.f32.mrb[20].mxu0  ;;  %v5173_v20 = vmul.f32 %v9245_v27, %v5141_v29  ;;  %v4948_v7 = vmul.f32 0.3275911, %v4916_v32 }
 0x517   : > { %v9205_v45 = vpop.f32.mrb[21].mxu0 }
 0x518   : > { %v9208_v2 = vpop.f32.mrb[22].mxu0  ;;  %v5205_v18 = vadd.f32 -0.28449672, %v5173_v20  ;;  %v4980_v29 = vadd.f32 1.0, %v4948_v7 }
 0x519   : > { %v9221_v52 = vpop.f32.mrb[23].mxu0 }
 0x51e   : > { %v9243_v16 = vpop.f32.mrb[24].mxu0 }
 0x51f   : > { %9899 = vst [vmem:[#allocation20_spill] sm:$0xff] %v9243_v16  ;;  %v9254_v49 = vpop.f32.mrb[25].mxu0 }
 0x520   : > { %9900 = vst [vmem:[#allocation21_spill] sm:$0xff] %v9254_v49  ;;  %v9264_v47 = vpop.f32.mrb[26].mxu0  ;;  %v5075_v49 = vadd.f32 -1.4531521, %v5043_v42 }
 0x521   : > { %9901 = vst [vmem:[#allocation22_spill] sm:$0xff] %v9264_v47  ;;  %v9267_v17 = vpop.f32.mrb[27].mxu0  ;;  %v5518_v47 = vmul.f32 %v5486_v10, %v9100_v8  ;;  %v6544_v8 = vpop.eup %6543  ;;  %v5521_v10 = vmul.f32 %v5489_v37, %v9132_v54  ;;  %v9290_v54 = vmul.f32 %v5549_v40, %v9075_v34  ;;  %v5456_v37 = vmul.f32 %v6542_v24, %v5296_v35 }
 0x522   : > { %9902 = vst [vmem:[#allocation23_spill] sm:$0xff] %v9267_v17  ;;  %v5107_v36 = vmul.f32 %v9256_v53, %v5075_v49  ;;  %v5366_v17 = vmul.f32 %v5334_v62, %v4918_v59  ;;  %v5519_v62 = vmul.f32 %v5487_v55, %v9145_v15  ;;  %v5490_v59 = vsub.f32 1.0, %v5458_v5  ;;  %v9308_v20 = vpop.eup %6545 }
 0x523   : > { %v5550_v49 = vadd.f32 1.0, %v5518_v47  ;;  %v5553_v33 = vadd.f32 1.0, %v5521_v10  ;;  %v5237_v15 = vmul.f32 %v9245_v27, %v5205_v18  ;;  %v5488_v5 = vsub.f32 1.0, %v5456_v37 }
 0x524   : > { %v5139_v42 = vadd.f32 1.4214138, %v5107_v36  ;;  %v5409_v6 = vmul.f32 1.442695, %v5366_v17  ;;  %v5551_v39 = vadd.f32 1.0, %v5519_v62  ;;  %v5522_v47 = vmul.f32 %v5490_v59, %v9166_v13  ;;  %v6548_v59 = vpop.eup %6547 }
 0x525   : > { %v4825_v17 = vmul.f32 0.70710677, %v9262_v50  ;;  %v9302_v34 = vmul.f32 %v5550_v49, %v9079_v48  ;;  %v5269_v24 = vadd.f32 0.2548296, %v5237_v15  ;;  %v5332_v36 = vsub.f32 0.0, %v4916_v32 }
 0x526   : > { %v9273_v60 = vpop.f32.mrb[28].mxu0  ;;  %v5171_v41 = vmul.f32 %v9256_v53, %v5139_v42  ;;  %6549 = vpow2.f32 %v5409_v6  ;;  %v4701_v40 = vadd.f32 %v9069_v63, %v9127_v61  ;;  %v9311_v48 = vmul.f32 %v5553_v33, %v9112_v3 }
 0x527   : > { %v9276_v16 = vpop.f32.mrb[29].mxu0  ;;  %v5301_v43 = vmul.f32 %v9245_v27, %v5269_v24  ;;  %v4921_v13 = vand.u32 2147483647, %v4825_v17  ;;  %v9314_v42 = vmul.f32 %v5551_v39, %v9119_v21  ;;  %v5554_v62 = vadd.f32 1.0, %v5522_v47 }
 0x528   : > { %v9279_v25 = vpop.f32.mrb[30].mxu0  ;;  %v5203_v55 = vadd.f32 -0.28449672, %v5171_v41  ;;  %9903 = vst [vmem:[#allocation24_spill] sm:$0xff] %v9311_v48  ;;  %6551 = vrcp.f32 %v4980_v29  ;;  %v5046_v61 = vmul.f32 1.0614054, %v9308_v20  ;;  %v5520_v18 = vmul.f32 %v5488_v5, %v9186_v12 }
 0x529   : > { %v9283_v56 = vpop.f32.mrb[31].mxu0  ;;  %v5461_v35 = vmul.f32 %v6544_v8, %v5301_v43  ;;  %v4953_v27 = vmul.f32 0.3275911, %v4921_v13  ;;  %v5364_v41 = vmul.f32 %v5332_v36, %v4916_v32  ;;  %v5337_v6 = vsub.f32 0.0, %v4921_v13 }
 0x52a   : > { %v5235_v58 = vmul.f32 %v9256_v53, %v5203_v55  ;;  %v4823_v37 = vmul.f32 0.70710677, %v4701_v40  ;;  %v5078_v33 = vadd.f32 -1.4531521, %v5046_v61  ;;  %v9321_v21 = vsel %vm4852_vm9, 1.0, %v9898_v23 }
 0x52b   : > { %v5493_v15 = vsub.f32 1.0, %v5461_v35  ;;  %v4985_v55 = vadd.f32 1.0, %v4953_v27  ;;  %vm4857_vm10 = vcmp.ge.f32.partialorder %v4825_v17, 0.0  ;;  %v9327_v12 = vmul.f32 0.5, %v9262_v50 }
 0x52c   : > { %v5267_v10 = vadd.f32 0.2548296, %v5235_v58  ;;  %v4919_v8 = vand.u32 2147483647, %v4823_v37  ;;  %v5110_v47 = vmul.f32 %v9308_v20, %v5078_v33  ;;  %v9330_v32 = vmul.f32 %v5554_v62, %v9121_v14 }
 0x52d   : > { %6553 = vrcp.f32 %v4985_v55  ;;  %v5552_v7 = vadd.f32 1.0, %v5520_v18  ;;  %v5369_v24 = vmul.f32 %v5337_v6, %v4921_v13  ;;  %v5525_v17 = vmul.f32 %v5493_v15, %v9217_v38 }
 0x52e   : > { %v5299_v49 = vmul.f32 %v9256_v53, %v5267_v10  ;;  %v4712_v53 = vadd.f32 %v9134_v44, %v9069_v63  ;;  %9904 = vst [vmem:[#allocation25_spill] sm:$0xff] %v9330_v32  ;;  %v4951_v22 = vmul.f32 0.3275911, %v4919_v8  ;;  %v5142_v5 = vadd.f32 1.4214138, %v5110_v47 }
 0x52f   : > { %v5405_v29 = vmul.f32 1.442695, %v5364_v41  ;;  %v9334_v44 = vsel %vm4857_vm10, 1.0, %v9898_v23  ;;  %v9336_v36 = vmul.f32 0.5, %v4701_v40  ;;  %v5335_v50 = vsub.f32 0.0, %v4919_v8 }
 0x530   : > { %v5459_v3 = vmul.f32 %v6548_v59, %v5299_v49  ;;  %v6550_v58 = vpop.eup %6549  ;;  %v4983_v43 = vadd.f32 1.0, %v4951_v22  ;;  %v4826_v10 = vmul.f32 0.70710677, %v4712_v53  ;;  %v5174_v14 = vmul.f32 %v9308_v20, %v5142_v5 }
 0x531   : > { %vm4855_vm13 = vcmp.ge.f32.partialorder %v4823_v37, 0.0  ;;  %v4704_v13 = vadd.f32 %v9069_v63, %v9139_v30  ;;  %v9345_v38 = vmul.f32 %v5552_v7, %v9169_v28  ;;  %v5415_v35 = vmul.f32 1.442695, %v5369_v24 }
 0x532   : > { %v5491_v39 = vsub.f32 1.0, %v5459_v3  ;;  %v9342_v62 = vpop.eup %6551  ;;  %6555 = vrcp.f32 %v4983_v43  ;;  %v4922_v40 = vand.u32 2147483647, %v4826_v10  ;;  %v5557_v49 = vadd.f32 1.0, %v5525_v17 }
 0x533   : > { %v5206_v61 = vadd.f32 -0.28449672, %v5174_v14  ;;  %v5044_v27 = vmul.f32 1.0614054, %v9342_v62  ;;  %6557 = vpow2.f32 %v5405_v29  ;;  %v5367_v18 = vmul.f32 %v5335_v50, %v4919_v8 }
 0x534   : > { %v5523_v59 = vmul.f32 %v5491_v39, %v9241_v57  ;;  %v9349_v57 = vsel %vm4855_vm13, 1.0, %v9898_v23  ;;  %v9351_v41 = vmul.f32 0.5, %v4712_v53  ;;  %v4954_v30 = vmul.f32 0.3275911, %v4922_v40 }
 0x535   : > { %v5238_v37 = vmul.f32 %v9308_v20, %v5206_v61  ;;  %v5076_v28 = vadd.f32 -1.4531521, %v5044_v27  ;;  %v4824_v15 = vmul.f32 0.70710677, %v4704_v13  ;;  %6559 = vpow2.f32 %v5415_v35 }
 0x536   : > { %v5555_v6 = vadd.f32 1.0, %v5523_v59  ;;  %v4986_v3 = vadd.f32 1.0, %v4954_v30  ;;  %v5338_v33 = vsub.f32 0.0, %v4922_v40  ;;  %v4725_v55 = vadd.f32 %v9161_v51, %v9069_v63 }
 0x537   : > { %v9356_v39 = vpop.eup %6553  ;;  %v9359_v47 = vmul.f32 %v5557_v49, %v9191_v1  ;;  %v5270_v8 = vadd.f32 0.2548296, %v5238_v37  ;;  %v5108_v53 = vmul.f32 %v9342_v62, %v5076_v28  ;;  %v4920_v7 = vand.u32 2147483647, %v4824_v15 }
 0x538   : > { %v5049_v24 = vmul.f32 1.0614054, %v9356_v39  ;;  %v5411_v22 = vmul.f32 1.442695, %v5367_v18  ;;  %vm4858_vm14 = vcmp.ge.f32.partialorder %v4826_v10, 0.0  ;;  %6561 = vrcp.f32 %v4986_v3 }
 0x539   : > { %9905 = vst [vmem:[#allocation26_spill] sm:$0xff] %v9359_v47  ;;  %v9364_v17 = vmul.f32 %v5555_v6, %v9203_v11  ;;  %v5302_v5 = vmul.f32 %v9308_v20, %v5270_v8  ;;  %v5140_v51 = vadd.f32 1.4214138, %v5108_v53  ;;  %v4952_v29 = vmul.f32 0.3275911, %v4920_v7 }
 0x53a   : > { %v5081_v43 = vadd.f32 -1.4531521, %v5049_v24  ;;  %v5370_v50 = vmul.f32 %v5338_v33, %v4922_v40  ;;  %v5336_v1 = vsub.f32 0.0, %v4920_v7  ;;  %v4829_v59 = vmul.f32 0.70710677, %v4725_v55 }
 0x53b   : > { %9906 = vst [vmem:[#allocation27_spill] sm:$0xff] %v9364_v17  ;;  %v5462_v14 = vmul.f32 %v6550_v58, %v5302_v5  ;;  %v5172_v35 = vmul.f32 %v9342_v62, %v5140_v51  ;;  %v9369_v49 = vsel %vm4858_vm14, 1.0, %v9898_v23  ;;  %v4984_v61 = vadd.f32 1.0, %v4952_v29 }
 0x53c   : > { %v9371_v10 = vpop.eup %6555  ;;  %v5113_v11 = vmul.f32 %v9356_v39, %v5081_v43  ;;  %6563 = vpow2.f32 %v5411_v22  ;;  %v4925_v27 = vand.u32 2147483647, %v4829_v59  ;;  %v4717_v20 = vadd.f32 %v9069_v63, %v9172_v9 }
 0x53d   : > { %v6558_v18 = vpop.eup %6557  ;;  %v5204_v40 = vadd.f32 -0.28449672, %v5172_v35  ;;  %v5047_v30 = vmul.f32 1.0614054, %v9371_v10  ;;  %vm4856_vm0 = vcmp.ge.f32.partialorder %v4824_v15, 0.0  ;;  %6565 = vrcp.f32 %v4984_v61 }
 0x53e   : > { %v5145_v58 = vadd.f32 1.4214138, %v5113_v11  ;;  %v5417_v6 = vmul.f32 1.442695, %v5370_v50  ;;  %v9377_v37 = vmul.f32 0.5, %v4704_v13  ;;  %v5368_v28 = vmul.f32 %v5336_v1, %v4920_v7 }
 0x53f   : > { %v5494_v3 = vsub.f32 1.0, %v5462_v14  ;;  %v5236_v33 = vmul.f32 %v9342_v62, %v5204_v40  ;;  %v5079_v8 = vadd.f32 -1.4531521, %v5047_v30  ;;  %v4957_v53 = vmul.f32 0.3275911, %v4925_v27  ;;  %v6560_v24 = vpop.eup %6559 }
 0x540   : > { %v5177_v22 = vmul.f32 %v9356_v39, %v5145_v58  ;;  %v9382_v9 = vsel %vm4856_vm0, 1.0, %v9898_v23  ;;  %v5341_v5 = vsub.f32 0.0, %v4925_v27  ;;  %v4728_v15 = vadd.f32 %v9179_v0, %v9069_v63 }
 0x541   : > { %v5268_v51 = vadd.f32 0.2548296, %v5236_v33  ;;  %v5111_v13 = vmul.f32 %v9371_v10, %v5079_v8  ;;  %v4989_v29 = vadd.f32 1.0, %v4957_v53  ;;  %v9387_v7 = vmul.f32 0.70710677, %v4717_v20 }
 0x542   : > { %v9389_v43 = vpop.eup %6561  ;;  %v5209_v50 = vadd.f32 -0.28449672, %v5177_v22  ;;  %6567 = vpow2.f32 %v5417_v6  ;;  %v5413_v1 = vmul.f32 1.442695, %v5368_v28  ;;  %vm4861_vm11 = vcmp.ge.f32.partialorder %v4829_v59, 0.0 }
 0x543   : > { %v5526_v14 = vmul.f32 %v5494_v3, %v9297_v26  ;;  %v5300_v35 = vmul.f32 %v9342_v62, %v5268_v51  ;;  %v5143_v61 = vadd.f32 1.4214138, %v5111_v13  ;;  %v5050_v11 = vmul.f32 1.0614054, %v9389_v43 }
 0x544   : > { %v5241_v0 = vmul.f32 %v9356_v39, %v5209_v50  ;;  %v9395_v40 = vmul.f32 0.5, %v4725_v55  ;;  %6569 = vrcp.f32 %v4989_v29  ;;  %v5373_v30 = vmul.f32 %v5341_v5, %v4925_v27 }
 0x545   : > { %v5175_v58 = vmul.f32 %v9371_v10, %v5143_v61  ;;  %v5082_v33 = vadd.f32 -1.4531521, %v5050_v11  ;;  %v4923_v6 = vand.u32 2147483647, %v9387_v7  ;;  %v4830_v28 = vmul.f32 0.70710677, %v4728_v15 }
 0x546   : > { %v6564_v8 = vpop.eup %6563  ;;  %v5460_v53 = vmul.f32 %v6558_v18, %v5300_v35  ;;  %v5273_v26 = vadd.f32 0.2548296, %v5241_v0  ;;  %v9401_v62 = vsel %vm4861_vm11, 1.0, %v9898_v23  ;;  %v9403_v3 = vmul.f32 0.5, %v4717_v20 }
 0x547   : > { %v9405_v22 = vpop.eup %6565  ;;  %v5558_v55 = vadd.f32 1.0, %v5526_v14  ;;  %v5207_v51 = vadd.f32 -0.28449672, %v5175_v58  ;;  %v5114_v27 = vmul.f32 %v9389_v43, %v5082_v33  ;;  %6571 = vpow2.f32 %v5413_v1 }
 0x548   : > { %v5305_v5 = vmul.f32 %v9356_v39, %v5273_v26  ;;  %v5048_v13 = vmul.f32 1.0614054, %v9405_v22  ;;  %v5423_v29 = vmul.f32 1.442695, %v5373_v30  ;;  %v9410_v18 = vmul.f32 0.5, %v4728_v15 }
 0x549   : > { %v5239_v59 = vmul.f32 %v9371_v10, %v5207_v51  ;;  %v5146_v50 = vadd.f32 1.4214138, %v5114_v27  ;;  %v4955_v35 = vmul.f32 0.3275911, %v4923_v6  ;;  %v4926_v20 = vand.u32 2147483647, %v4830_v28 }
 0x54a   : > { %v5492_v61 = vsub.f32 1.0, %v5460_v53  ;;  %v5465_v11 = vmul.f32 %v6560_v24, %v5305_v5  ;;  %v5080_v0 = vadd.f32 -1.4531521, %v5048_v13  ;;  %v5339_v14 = vsub.f32 0.0, %v4923_v6 }
 0x54b   : > { %v9414_v58 = vmul.f32 %v5558_v55, %v9247_v4  ;;  %v5271_v1 = vadd.f32 0.2548296, %v5239_v59  ;;  %v5178_v39 = vmul.f32 %v9389_v43, %v5146_v50  ;;  %v4958_v33 = vmul.f32 0.3275911, %v4926_v20 }
 0x54c   : > { %v6568_v26 = vpop.eup %6567  ;;  %v5497_v30 = vsub.f32 1.0, %v5465_v11  ;;  %v5112_v15 = vmul.f32 %v9405_v22, %v5080_v0  ;;  %vm4862_vm12 = vcmp.ge.f32.partialorder %v4830_v28, 0.0  ;;  %v5342_v51 = vsub.f32 0.0, %v4926_v20 }
 0x54d   : > { %9907 = vst [vmem:[#allocation28_spill] sm:$0xff] %v9414_v58  ;;  %v5303_v27 = vmul.f32 %v9371_v10, %v5271_v1  ;;  %v5210_v47 = vadd.f32 -0.28449672, %v5178_v39  ;;  %v4987_v53 = vadd.f32 1.0, %v4955_v35  ;;  %v4990_v24 = vadd.f32 1.0, %v4958_v33 }
 0x54e   : > { %v9419_v5 = vpop.eup %6569  ;;  %v5524_v4 = vmul.f32 %v5492_v61, %v9321_v21  ;;  %v5144_v55 = vadd.f32 1.4214138, %v5112_v15  ;;  %v5371_v13 = vmul.f32 %v5339_v14, %v4923_v6  ;;  %v4720_v59 = vadd.f32 %v9069_v63, %v9188_v31 }
 0x54f   : > { %v5463_v50 = vmul.f32 %v6564_v8, %v5303_v27  ;;  %v5242_v11 = vmul.f32 %v9389_v43, %v5210_v47  ;;  %v5053_v0 = vmul.f32 1.0614054, %v9419_v5  ;;  %6573 = vrcp.f32 %v4990_v24 }
 0x550   : > { %v5529_v10 = vmul.f32 %v5497_v30, %v9334_v44  ;;  %v5176_v35 = vmul.f32 %v9405_v22, %v5144_v55  ;;  %v9430_v1 = vsel %vm4862_vm12, 1.0, %v9898_v23  ;;  %v5374_v21 = vmul.f32 %v5342_v51, %v4926_v20 }
 0x551   : > { %v6572_v61 = vpop.eup %6571  ;;  %v5495_v6 = vsub.f32 1.0, %v5463_v50  ;;  %v5274_v14 = vadd.f32 0.2548296, %v5242_v11  ;;  %v5085_v39 = vadd.f32 -1.4531521, %v5053_v0  ;;  %v4741_v31 = vadd.f32 %v9201_v46, %v9069_v63 }
 0x552   : > { %v5208_v47 = vadd.f32 -0.28449672, %v5176_v35  ;;  %6575 = vpow2.f32 %v5423_v29  ;;  %v5419_v8 = vmul.f32 1.442695, %v5371_v13  ;;  %v9434_v33 = vmul.f32 0.70710677, %v4720_v59 }
 0x553   : > { %v5556_v44 = vadd.f32 1.0, %v5524_v4  ;;  %v5306_v30 = vmul.f32 %v9389_v43, %v5274_v14  ;;  %v5117_v28 = vmul.f32 %v9419_v5, %v5085_v39  ;;  %6577 = vrcp.f32 %v4987_v53 }
 0x554   : > { %v5527_v20 = vmul.f32 %v5495_v6, %v9349_v57  ;;  %v5240_v15 = vmul.f32 %v9405_v22, %v5208_v47  ;;  %v4924_v51 = vand.u32 2147483647, %v9434_v33  ;;  %v4833_v27 = vmul.f32 0.70710677, %v4741_v31 }
 0x555   : > { %v5561_v24 = vadd.f32 1.0, %v5529_v10  ;;  %v5466_v46 = vmul.f32 %v6568_v26, %v5306_v30  ;;  %v5149_v55 = vadd.f32 1.4214138, %v5117_v28  ;;  %v5425_v29 = vmul.f32 1.442695, %v5374_v21 }
 0x556   : > { %v5272_v13 = vadd.f32 0.2548296, %v5240_v15  ;;  %6579 = vpow2.f32 %v5419_v8  ;;  %v5340_v50 = vsub.f32 0.0, %v4924_v51  ;;  %v4733_v43 = vadd.f32 %v9069_v63, %v9205_v45 }
 0x557   : > { %v9444_v4 = vmul.f32 %v5556_v44, %v9293_v19  ;;  %v5498_v53 = vsub.f32 1.0, %v5466_v46  ;;  %v5181_v57 = vmul.f32 %v9419_v5, %v5149_v55  ;;  %v9447_v11 = vmul.f32 0.5, %v4720_v59 }
 0x558   : > { %v5559_v0 = vadd.f32 1.0, %v5527_v20  ;;  %v5304_v10 = vmul.f32 %v9405_v22, %v5272_v13  ;;  %v4956_v26 = vmul.f32 0.3275911, %v4924_v51  ;;  %v4929_v35 = vand.u32 2147483647, %v4833_v27 }
 0x559   : > { %9908 = vst [vmem:[#allocation29_spill] sm:$0xff] %v9444_v4  ;;  %9909 = vst [vmem:[#allocation30_spill] sm:$0xff] %v9447_v11  ;;  %v9450_v21 = vpop.eup %6573  ;;  %v9453_v6 = vmul.f32 %v5561_v24, %v9327_v12  ;;  %v5213_v14 = vadd.f32 -0.28449672, %v5181_v57  ;;  %6581 = vpow2.f32 %v5425_v29  ;;  %vm4865_vm15 = vcmp.ge.f32.partialorder %v4833_v27, 0.0 }
 0x55a   : > { %v5464_v63 = vmul.f32 %v6572_v61, %v5304_v10  ;;  %v5054_v45 = vmul.f32 1.0614054, %v9450_v21  ;;  %v5372_v19 = vmul.f32 %v5340_v50, %v4924_v51  ;;  %v4831_v39 = vmul.f32 0.70710677, %v4733_v43  ;;  %v9476_v50 = vld [vmem:[%s9834_s7] ss:$0 sm:$0xff] }
 0x55b   : > { %9910 = vst [vmem:[#allocation31_spill] sm:$0xff] %v9453_v6  ;;  %v5530_v59 = vmul.f32 %v5498_v53, %v9369_v49  ;;  %v5245_v47 = vmul.f32 %v9419_v5, %v5213_v14  ;;  %v9458_v22 = vmul.f32 0.5, %v4741_v31  ;;  %v4961_v8 = vmul.f32 0.3275911, %v4929_v35  ;;  %v9916_v6 = vld [vmem:[#allocation22_spill] sm:$0xff] }
 0x55c   : > { %v6576_v44 = vpop.eup %6575  ;;  %v9461_v30 = vmul.f32 %v5559_v0, %v9336_v36  ;;  %v5086_v12 = vadd.f32 -1.4531521, %v5054_v45  ;;  %v4988_v28 = vadd.f32 1.0, %v4956_v26  ;;  %v5345_v20 = vsub.f32 0.0, %v4929_v35 }
 0x55d   : > { %v9463_v15 = vpop.eup %6577  ;;  %v5277_v61 = vadd.f32 0.2548296, %v5245_v47  ;;  %v9467_v51 = vsel %vm4865_vm15, 1.0, %v9898_v23  ;;  %v4993_v49 = vadd.f32 1.0, %v4961_v8  ;;  %v9469_v24 = vmul.f32 0.5, %v4733_v43 }
 0x55e   : > { %9911 = vst [vmem:[#allocation32_spill] sm:$0xff] %v9461_v30  ;;  %v5496_v31 = vsub.f32 1.0, %v5464_v63  ;;  %v5118_v46 = vmul.f32 %v9450_v21, %v5086_v12  ;;  %v5421_v55 = vmul.f32 1.442695, %v5372_v19  ;;  %v4927_v29 = vand.u32 2147483647, %v4831_v39 }
 0x55f   : > { %v5562_v36 = vadd.f32 1.0, %v5530_v59  ;;  %v5309_v13 = vmul.f32 %v9419_v5, %v5277_v61  ;;  %6583 = vrcp.f32 %v4993_v49  ;;  %v4744_v27 = vadd.f32 %v9476_v50, %v9208_v2 }
 0x560   : > { %v9480_v53 = vpop.eup %6579  ;;  %v5150_v43 = vadd.f32 1.4214138, %v5118_v46  ;;  %6585 = vrcp.f32 %v4988_v28  ;;  %v5377_v57 = vmul.f32 %v5345_v20, %v4929_v35  ;;  %v4959_v0 = vmul.f32 0.3275911, %v4927_v29 }
 0x561   : > { %v5469_v10 = vmul.f32 %v6576_v44, %v5309_v13  ;;  %vm4863_vm1 = vcmp.ge.f32.partialorder %v4831_v39, 0.0  ;;  %v5343_v26 = vsub.f32 0.0, %v4927_v29  ;;  %v4834_v14 = vmul.f32 0.70710677, %v4744_v27 }
 0x562   : > { %v5528_v5 = vmul.f32 %v5496_v31, %v9382_v9  ;;  %v5182_v63 = vmul.f32 %v9450_v21, %v5150_v43  ;;  %6587 = vpow2.f32 %v5421_v55  ;;  %v4991_v45 = vadd.f32 1.0, %v4959_v0  ;;  %v9913_v55 = vld [vmem:[#allocation20_spill] sm:$0xff] }
 0x563   : > { %v6582_v19 = vpop.eup %6581  ;;  %v9485_v59 = vmul.f32 %v5562_v36, %v9351_v41  ;;  %v5501_v2 = vsub.f32 1.0, %v5469_v10  ;;  %v4930_v47 = vand.u32 2147483647, %v4834_v14  ;;  %v4736_v35 = vadd.f32 %v9476_v50, %v9221_v52  ;;  %v9914_v36 = vld [vmem:[#allocation21_spill] sm:$0xff] }
 0x564   : > { %v5214_v8 = vadd.f32 -0.28449672, %v5182_v63  ;;  %v5431_v44 = vmul.f32 1.442695, %v5377_v57  ;;  %v9490_v39 = vsel %vm4863_vm1, 1.0, %v9898_v23  ;;  %6589 = vrcp.f32 %v4991_v45 }
 0x565   : > { %9912 = vst [vmem:[#allocation33_spill] sm:$0xff] %v9485_v59  ;;  %v5533_v9 = vmul.f32 %v5501_v2, %v9401_v62  ;;  %v5375_v12 = vmul.f32 %v5343_v26, %v4927_v29  ;;  %v4962_v28 = vmul.f32 0.3275911, %v4930_v47  ;;  %v5346_v20 = vsub.f32 0.0, %v4930_v47 }
 0x566   : > { %v5560_v61 = vadd.f32 1.0, %v5528_v5  ;;  %v5246_v41 = vmul.f32 %v9450_v21, %v5214_v8  ;;  %vm4866_vm2 = vcmp.ge.f32.partialorder %v4834_v14, 0.0  ;;  %v4832_v49 = vmul.f32 0.70710677, %v4736_v35 }
 0x567   : > { %v4994_v31 = vadd.f32 1.0, %v4962_v28  ;;  %v5378_v46 = vmul.f32 %v5346_v20, %v4930_v47  ;;  %v4757_v52 = vadd.f32 %v9476_v50, %v9913_v55  ;;  %v4749_v13 = vadd.f32 %v9476_v50, %v9914_v36 }
 0x568   : > { %v5278_v43 = vadd.f32 0.2548296, %v5246_v41  ;;  %6591 = vpow2.f32 %v5431_v44  ;;  %v9498_v57 = vmul.f32 0.5, %v4744_v27  ;;  %v4928_v62 = vand.u32 2147483647, %v4832_v49 }
 0x569   : > { %v9500_v29 = vpop.eup %6583  ;;  %v5565_v0 = vadd.f32 1.0, %v5533_v9  ;;  %v5427_v10 = vmul.f32 1.442695, %v5375_v12  ;;  %v9503_v26 = vsel %vm4866_vm2, 1.0, %v9898_v23  ;;  %6593 = vrcp.f32 %v4994_v31 }
 0x56a   : > { %v9505_v14 = vpop.eup %6585  ;;  %v5310_v5 = vmul.f32 %v9450_v21, %v5278_v43  ;;  %v5057_v63 = vmul.f32 1.0614054, %v9500_v29  ;;  %vm4864_vm3 = vcmp.ge.f32.partialorder %v4832_v49, 0.0  ;;  %v4960_v45 = vmul.f32 0.3275911, %v4928_v62 }
 0x56b   : > { %v9510_v27 = vmul.f32 %v5560_v61, %v9377_v37  ;;  %v5433_v2 = vmul.f32 1.442695, %v5378_v46  ;;  %v4837_v47 = vmul.f32 0.70710677, %v4757_v52  ;;  %v4835_v8 = vmul.f32 0.70710677, %v4749_v13 }
 0x56c   : > { %v9512_v44 = vpop.eup %6587  ;;  %v5470_v9 = vmul.f32 %v6582_v19, %v5310_v5  ;;  %v5089_v12 = vadd.f32 -1.4531521, %v5057_v63  ;;  %v4992_v28 = vadd.f32 1.0, %v4960_v45  ;;  %v5344_v20 = vsub.f32 0.0, %v4928_v62 }
 0x56d   : > { %9915 = vst [vmem:[#allocation20_spill] sm:$0xff] %v9510_v27  ;;  %6595 = vpow2.f32 %v5427_v10  ;;  %v9514_v41 = vmul.f32 0.5, %v4736_v35  ;;  %v4933_v21 = vand.u32 2147483647, %v4837_v47  ;;  %v4931_v31 = vand.u32 2147483647, %v4835_v8 }
 0x56e   : > { %v9516_v55 = vpop.eup %6589  ;;  %v5502_v36 = vsub.f32 1.0, %v5470_v9  ;;  %v5121_v37 = vmul.f32 %v9500_v29, %v5089_v12  ;;  %6597 = vrcp.f32 %v4992_v28  ;;  %v9519_v61 = vmul.f32 0.5, %v4757_v52 }
 0x56f   : > { %v9522_v46 = vmul.f32 %v5565_v0, %v9395_v40  ;;  %v5055_v19 = vmul.f32 1.0614054, %v9516_v55  ;;  %v9527_v43 = vsel %vm4864_vm3, 1.0, %v9898_v23  ;;  %v4965_v35 = vmul.f32 0.3275911, %v4933_v21 }
 0x570   : > { %v5153_v10 = vadd.f32 1.4214138, %v5121_v37  ;;  %6599 = vpow2.f32 %v5433_v2  ;;  %v5376_v5 = vmul.f32 %v5344_v20, %v4928_v62  ;;  %v5349_v63 = vsub.f32 0.0, %v4933_v21 }
 0x571   : > { %v5534_v45 = vmul.f32 %v5502_v36, %v9430_v1  ;;  %v5087_v9 = vadd.f32 -1.4531521, %v5055_v19  ;;  %v4997_v12 = vadd.f32 1.0, %v4965_v35  ;;  %v4963_v52 = vmul.f32 0.3275911, %v4931_v31 }
 0x572   : > { %v6592_v28 = vpop.eup %6591  ;;  %v5185_v40 = vmul.f32 %v9500_v29, %v5153_v10  ;;  %v9531_v0 = vmul.f32 0.5, %v4749_v13  ;;  %v5347_v59 = vsub.f32 0.0, %v4931_v31  ;;  %v4760_v49 = vadd.f32 %v9476_v50, %v9916_v6 }
 0x573   : > { %v9535_v27 = vpop.eup %6593  ;;  %v5119_v2 = vmul.f32 %v9516_v55, %v5087_v9  ;;  %vm4869_vm4 = vcmp.ge.f32.partialorder %v4837_v47, 0.0  ;;  %6601 = vrcp.f32 %v4997_v12  ;;  %v4995_v62 = vadd.f32 1.0, %v4963_v52 }
 0x574   : > { %v5217_v1 = vadd.f32 -0.28449672, %v5185_v40  ;;  %v5058_v20 = vmul.f32 1.0614054, %v9535_v27  ;;  %v5429_v36 = vmul.f32 1.442695, %v5376_v5  ;;  %v5381_v37 = vmul.f32 %v5349_v63, %v4933_v21 }
 0x575   : > { %v5566_v19 = vadd.f32 1.0, %v5534_v45  ;;  %v5151_v35 = vadd.f32 1.4214138, %v5119_v2  ;;  %vm4867_vm5 = vcmp.ge.f32.partialorder %v4835_v8, 0.0  ;;  %v4838_v13 = vmul.f32 0.70710677, %v4760_v49 }
 0x576   : > { %v5249_v10 = vmul.f32 %v9500_v29, %v5217_v1  ;;  %v5090_v30 = vadd.f32 -1.4531521, %v5058_v20  ;;  %6603 = vrcp.f32 %v4995_v62  ;;  %v5379_v6 = vmul.f32 %v5347_v59, %v4931_v31  ;;  %v9917_v40 = vld [vmem:[#allocation23_spill] sm:$0xff] }
 0x577   : > { %v6596_v58 = vpop.eup %6595  ;;  %v5183_v9 = vmul.f32 %v9516_v55, %v5151_v35  ;;  %v9543_v12 = vsel %vm4869_vm4, 1.0, %v9898_v23  ;;  %v4934_v52 = vand.u32 2147483647, %v4838_v13  ;;  %v4752_v21 = vadd.f32 %v9476_v50, %v9917_v40 }
 0x578   : > { %v9547_v5 = vpop.eup %6597  ;;  %v5281_v8 = vadd.f32 0.2548296, %v5249_v10  ;;  %v5122_v63 = vmul.f32 %v9535_v27, %v5090_v30  ;;  %v5439_v45 = vmul.f32 1.442695, %v5381_v37  ;;  %v9551_v2 = vsel %vm4867_vm5, 1.0, %v9898_v23  ;;  %v9561_v30 = vld [vmem:[%s9835_s8] sm:$0xff]  }
 0x579   : > { %v5215_v59 = vadd.f32 -0.28449672, %v5183_v9  ;;  %v5056_v31 = vmul.f32 1.0614054, %v9547_v5  ;;  %6605 = vpow2.f32 %v5429_v36  ;;  %v4966_v47 = vmul.f32 0.3275911, %v4934_v52  ;;  %6275 = vmatprep.mubr.bf16.mxu1 %v9561_v30 }
 0x57a   : > { %v6600_v62 = vpop.eup %6599  ;;  %v9555_v1 = vmul.f32 %v5566_v19, %v9410_v18  ;;  %v5313_v20 = vmul.f32 %v9500_v29, %v5281_v8  ;;  %v5154_v35 = vadd.f32 1.4214138, %v5122_v63  ;;  %v5435_v40 = vmul.f32 1.442695, %v5379_v6  ;;  %9918 = vst [vmem:[#allocation21_spill] sm:$0xff] %v9561_v30 }
 0x57b   : > { %v5247_v37 = vmul.f32 %v9516_v55, %v5215_v59  ;;  %v5088_v10 = vadd.f32 -1.4531521, %v5056_v31  ;;  %v4998_v9 = vadd.f32 1.0, %v4966_v47  ;;  %v4836_v4 = vmul.f32 0.70710677, %v4752_v21 }
 0x57c   : > { %v5473_v36 = vmul.f32 %v6592_v28, %v5313_v20  ;;  %v5186_v17 = vmul.f32 %v9535_v27, %v5154_v35  ;;  %6607 = vpow2.f32 %v5439_v45  ;;  %v5350_v18 = vsub.f32 0.0, %v4934_v52 }
 0x57d   : > { %v9566_v29 = vpop.eup %6601  ;;  %v5279_v19 = vadd.f32 0.2548296, %v5247_v37  ;;  %v5120_v6 = vmul.f32 %v9547_v5, %v5088_v10  ;;  %vm4870_vm6 = vcmp.ge.f32.partialorder %v4838_v13, 0.0  ;;  %6609 = vrcp.f32 %v4998_v9 }
 0x57e   : > { %v5218_v8 = vadd.f32 -0.28449672, %v5186_v17  ;;  %v5061_v63 = vmul.f32 1.0614054, %v9566_v29  ;;  %6611 = vpow2.f32 %v5435_v40  ;;  %v9570_v59 = vmul.f32 0.5, %v4760_v49 }
 0x57f   : > { %v5505_v28 = vsub.f32 1.0, %v5473_v36  ;;  %v5311_v31 = vmul.f32 %v9516_v55, %v5279_v19  ;;  %v5152_v45 = vadd.f32 1.4214138, %v5120_v6  ;;  %v9573_v47 = vand.u32 2147483647, %v4836_v4 }
 0x580   : > { %v9575_v20 = vpop.eup %6603  ;;  %v5250_v35 = vmul.f32 %v9535_v27, %v5218_v8  ;;  %v5093_v37 = vadd.f32 -1.4531521, %v5061_v63  ;;  %v9579_v13 = vsel %vm4870_vm6, 1.0, %v9898_v23  ;;  %v5382_v17 = vmul.f32 %v5350_v18, %v4934_v52 }
 0x581   : > { %v5471_v10 = vmul.f32 %v6596_v58, %v5311_v31  ;;  %v5184_v40 = vmul.f32 %v9547_v5, %v5152_v45  ;;  %v5059_v49 = vmul.f32 1.0614054, %v9575_v20  ;;  %v4773_v55 = vadd.f32 %v9476_v50, %v9273_v60 }
 0x582   : > { %v5282_v9 = vadd.f32 0.2548296, %v5250_v35  ;;  %v5125_v36 = vmul.f32 %v9566_v29, %v5093_v37  ;;  %v9586_v19 = vmul.f32 0.5, %v4752_v21  ;;  %v4964_v6 = vmul.f32 0.3275911, %v9573_v47 }
 0x583   : > { %v6606_v8 = vpop.eup %6605  ;;  %v5537_v63 = vmul.f32 %v5505_v28, %v9467_v51  ;;  %v5503_v30 = vsub.f32 1.0, %v5471_v10  ;;  %v5216_v52 = vadd.f32 -0.28449672, %v5184_v40  ;;  %v5091_v58 = vadd.f32 -1.4531521, %v5059_v49 }
 0x584   : > { %v5314_v18 = vmul.f32 %v9535_v27, %v5282_v9  ;;  %v5157_v31 = vadd.f32 1.4214138, %v5125_v36  ;;  %v5441_v45 = vmul.f32 1.442695, %v5382_v17  ;;  %v4996_v32 = vadd.f32 1.0, %v4964_v6 }
 0x585   : > { %v5248_v60 = vmul.f32 %v9547_v5, %v5216_v52  ;;  %v5123_v35 = vmul.f32 %v9575_v20, %v5091_v58  ;;  %vm4868_vm7 = vcmp.ge.f32.partialorder %v4836_v4, 0.0  ;;  %v9593_v21 = vmul.f32 0.5, %v4773_v55 }
 0x586   : > { %v6608_v37 = vpop.eup %6607  ;;  %v5474_v48 = vmul.f32 %v6600_v62, %v5314_v18  ;;  %v5189_v11 = vmul.f32 %v9566_v29, %v5157_v31  ;;  %6613 = vrcp.f32 %v4996_v32  ;;  %v4841_v51 = vmul.f32 0.70710677, %v4773_v55 }
 0x587   : > { %v9596_v28 = vpop.eup %6609  ;;  %v5569_v10 = vadd.f32 1.0, %v5537_v63  ;;  %v5535_v27 = vmul.f32 %v5503_v30, %v9490_v39  ;;  %v5280_v17 = vadd.f32 0.2548296, %v5248_v60  ;;  %v5155_v40 = vadd.f32 1.4214138, %v5123_v35  ;;  %v5632_v39 = vld [vmem:[%s9836_s9 + $0x8] sm:$0xff] }
 0x588   : > { %v6612_v49 = vpop.eup %6611  ;;  %v5221_v9 = vadd.f32 -0.28449672, %v5189_v11  ;;  %v5062_v36 = vmul.f32 1.0614054, %v9596_v28  ;;  %6615 = vpow2.f32 %v5441_v45  ;;  %v9602_v6 = vsel %vm4868_vm7, 1.0, %v9898_v23  ;;  %v5631_v11 = vld [vmem:[%s9836_s9] sm:$0xff]  ;;  %5642 = vperm.xlu1 %6438, %v5632_v39  }
 0x589   : > { %v5506_v62 = vsub.f32 1.0, %v5474_v48  ;;  %v5312_v32 = vmul.f32 %v9547_v5, %v5280_v17  ;;  %v5187_v55 = vmul.f32 %v9575_v20, %v5155_v40  ;;  %v5348_v63 = vsub.f32 0.0, %v9573_v47  ;;  %5637 = vperm.xlu0 %6437, %v5631_v11   ;;  %v5633_v45 = vld [vmem:[%s9836_s9 + $0x10] sm:$0xff] }
 0x58a   : > { %v5253_v30 = vmul.f32 %v9566_v29, %v5221_v9  ;;  %v5094_v4 = vadd.f32 -1.4531521, %v5062_v36  ;;  %v4937_v52 = vand.u32 2147483647, %v4841_v51  ;;  %v9616_v48 = vadd.f32 %v9476_v50, %v9276_v16 }
 0x58b   : > { %v9619_v5 = vmul.f32 %v5569_v10, %v9458_v22  ;;  %v5567_v58 = vadd.f32 1.0, %v5535_v27  ;;  %v5472_v18 = vmul.f32 %v6606_v8, %v5312_v32  ;;  %v5219_v31 = vadd.f32 -0.28449672, %v5187_v55 }
 0x58c   : > { %v5285_v60 = vadd.f32 0.2548296, %v5253_v30  ;;  %v5126_v35 = vmul.f32 %v9596_v28, %v5094_v4  ;;  %vm4873_vm8 = vcmp.ge.f32.partialorder %v4841_v51, 0.0  ;;  %v4969_v17 = vmul.f32 0.3275911, %v4937_v52  ;;  %5647 = vperm.xlu1 %6438, %v5633_v45  }
 0x58d   : > { %v5538_v16 = vmul.f32 %v5506_v62, %v9503_v26  ;;  %v5251_v40 = vmul.f32 %v9575_v20, %v5219_v31  ;;  %v5380_v9 = vmul.f32 %v5348_v63, %v9573_v47  ;;  %v5353_v22 = vsub.f32 0.0, %v4937_v52  ;;  %v5634_v26 = vld [vmem:[%s9836_s9 + $0x18] sm:$0xff] }
 0x58e   : > { %v5317_v10 = vmul.f32 %v9566_v29, %v5285_v60  ;;  %v5158_v8 = vadd.f32 1.4214138, %v5126_v35  ;;  %v5001_v27 = vadd.f32 1.0, %v4969_v17  ;;  %v4839_v36 = vmul.f32 0.70710677, %v9616_v48 }
 0x58f   : > { %v9631_v32 = vmul.f32 %v5567_v58, %v9469_v24  ;;  %v5504_v55 = vsub.f32 1.0, %v5472_v18  ;;  %v5283_v51 = vadd.f32 0.2548296, %v5251_v40  ;;  %v9634_v39 = vsel %vm4873_vm8, 1.0, %v9898_v23 }
 0x590   : > { %v9639_v47 = vpop.eup %6613  ;;  %v5477_v29 = vmul.f32 %v6608_v37, %v5317_v10  ;;  %v5190_v62 = vmul.f32 %v9596_v28, %v5158_v8  ;;  %6617 = vrcp.f32 %v5001_v27  ;;  %v5385_v63 = vmul.f32 %v5353_v22, %v4937_v52  ;;  %5652 = vperm.xlu1 %6438, %v5634_v26  }
 0x591   : > { %v5570_v11 = vadd.f32 1.0, %v5538_v16  ;;  %v5315_v24 = vmul.f32 %v9575_v20, %v5283_v51  ;;  %v5060_v30 = vmul.f32 1.0614054, %v9639_v47  ;;  %v5437_v4 = vmul.f32 1.442695, %v5380_v9 }
 0x592   : > { %v6616_v58 = vpop.eup %6615  ;;  %v5509_v18 = vsub.f32 1.0, %v5477_v29  ;;  %v5222_v31 = vadd.f32 -0.28449672, %v5190_v62  ;;  %v4935_v45 = vand.u32 2147483647, %v4839_v36  ;;  %v4776_v60 = vadd.f32 %v9476_v50, %v9279_v25 }
 0x593   : > { %v5536_v37 = vmul.f32 %v5504_v55, %v9527_v43  ;;  %v5475_v35 = vmul.f32 %v6612_v49, %v5315_v24  ;;  %v5092_v17 = vadd.f32 -1.4531521, %v5060_v30  ;;  %vm4871_vm9 = vcmp.ge.f32.partialorder %v4839_v36, 0.0 }
 0x594   : > { %v5254_v52 = vmul.f32 %v9596_v28, %v5222_v31  ;;  %v5447_v16 = vmul.f32 1.442695, %v5385_v63  ;;  %v4967_v20 = vmul.f32 0.3275911, %v4935_v45  ;;  %v5351_v40 = vsub.f32 0.0, %v4935_v45 }
 0x595   : > { %vm4859_vm10 = vcmp.ge.f32.partialorder %v9387_v7, 0.0  ;;  %v5541_v9 = vmul.f32 %v5509_v18, %v9543_v12  ;;  %v5507_v22 = vsub.f32 1.0, %v5475_v35  ;;  %v5124_v10 = vmul.f32 %v9639_v47, %v5092_v17 }
 0x596   : > { %v4842_v8 = vmul.f32 0.70710677, %v4776_v60  ;;  %v5286_v25 = vadd.f32 0.2548296, %v5254_v52  ;;  %6619 = vpow2.f32 %v5437_v4  ;;  %v4999_v27 = vadd.f32 1.0, %v4967_v20 }
 0x597   : > { %v5383_v43 = vmul.f32 %v5351_v40, %v4935_v45  ;;  %v9652_v49 = vmul.f32 %v5570_v11, %v9498_v57  ;;  %v5156_v55 = vadd.f32 1.4214138, %v5124_v10  ;;  %v9656_v51 = vsel %vm4871_vm9, 1.0, %v9898_v23 }
 0x598   : > { %v4938_v26 = vand.u32 2147483647, %v4842_v8  ;;  %v5568_v29 = vadd.f32 1.0, %v5536_v37  ;;  %v5539_v12 = vmul.f32 %v5507_v22, %v9551_v2  ;;  %v5318_v62 = vmul.f32 %v9596_v28, %v5286_v25 }
 0x599   : > { %6621 = vrcp.f32 %v4999_v27  ;;  %vm4860_vm13 = vcmp.ge.f32.partialorder %v9434_v33, 0.0  ;;  %v5573_v63 = vadd.f32 1.0, %v5541_v9  ;;  %v5188_v24 = vmul.f32 %v9639_v47, %v5156_v55 }
 0x59a   : > { %6623 = vpow2.f32 %v5447_v16  ;;  %v4970_v57 = vmul.f32 0.3275911, %v4938_v26  ;;  %v9662_v11 = vpop.eup %6617  ;;  %v5478_v30 = vmul.f32 %v6616_v58, %v5318_v62  ;;  %v5443_v36 = vmul.f32 1.442695, %v5383_v43 }
 0x59b   : > { %v5354_v4 = vsub.f32 0.0, %v4938_v26  ;;  %v9666_v18 = vadd.f32 %v9476_v50, %v9283_v56  ;;  %v5220_v2 = vadd.f32 -0.28449672, %v5188_v24  ;;  %v5065_v28 = vmul.f32 1.0614054, %v9662_v11 }
 0x59c   : > { %vm4874_vm14 = vcmp.ge.f32.partialorder %v4842_v8, 0.0  ;;  %v5002_v31 = vadd.f32 1.0, %v4970_v57  ;;  %v5571_v45 = vadd.f32 1.0, %v5539_v12  ;;  %v5510_v37 = vsub.f32 1.0, %v5478_v30  ;;  %v9919_v12 = vld [vmem:[#allocation16_spill] sm:$0xff] }
 0x59d   : > { %v5386_v35 = vmul.f32 %v5354_v4, %v4938_v26  ;;  %v9670_v17 = vmul.f32 0.70710677, %v9666_v18  ;;  %v9673_v52 = vmul.f32 %v5568_v29, %v9514_v41  ;;  %v5252_v58 = vmul.f32 %v9639_v47, %v5220_v2  ;;  %v9920_v4 = vld [vmem:[#allocation18_spill] sm:$0xff] }
 0x59e   : > { %v5097_v16 = vadd.f32 -1.4531521, %v5065_v28  ;;  %6625 = vrcp.f32 %v5002_v31  ;;  %v5542_v56 = vmul.f32 %v5510_v37, %v9579_v13  ;;  %v9677_v50 = vmul.f32 0.5, %v4776_v60 }
 0x59f   : > { %v5449_v20 = vmul.f32 1.442695, %v5386_v35  ;;  %v4936_v40 = vand.u32 2147483647, %v9670_v17  ;;  %v9681_v9 = vmul.f32 %v5573_v63, %v9519_v61  ;;  %v5284_v22 = vadd.f32 0.2548296, %v5252_v58 }
 0x5a0   : > { %v5129_v10 = vmul.f32 %v9662_v11, %v5097_v16  ;;  %v9686_v41 = vsel %vm4874_vm14, 1.0, %v9898_v23  ;;  %v6620_v25 = vpop.eup %6619  ;;  %v9689_v27 = vmul.f32 %v5571_v45, %v9531_v0  ;;  %6627 = vpow2.f32 %v5443_v36 }
 0x5a1   : > { %v4968_v13 = vmul.f32 0.3275911, %v4936_v40  ;;  %v9694_v60 = vsel %vm4859_vm10, 1.0, %v9898_v23  ;;  %v5316_v61 = vmul.f32 %v9639_v47, %v5284_v22  ;;  %v5051_v55 = vmul.f32 1.0614054, %v9463_v15 }
 0x5a2   : > { %v5161_v43 = vadd.f32 1.4214138, %v5129_v10  ;;  %v5052_v8 = vmul.f32 1.0614054, %v9505_v14  ;;  %v5574_v29 = vadd.f32 1.0, %v5542_v56  ;;  %6629 = vpow2.f32 %v5449_v20 }
 0x5a3   : > { %v9699_v26 = vpop.eup %6621  ;;  %v5000_v0 = vadd.f32 1.0, %v4968_v13  ;;  %v5035_v62 = vmul.f32 1.0614054, %v9919_v12  ;;  %v5352_v57 = vsub.f32 0.0, %v4936_v40  ;;  %v5083_v30 = vadd.f32 -1.4531521, %v5051_v55 }
 0x5a4   : > { %v6624_v63 = vpop.eup %6623  ;;  %v5193_v24 = vmul.f32 %v9662_v11, %v5161_v43  ;;  %v5063_v7 = vmul.f32 1.0614054, %v9699_v26  ;;  %v9707_v47 = vsel %vm4860_vm13, 1.0, %v9898_v23  ;;  %v5084_v36 = vadd.f32 -1.4531521, %v5052_v8 }
 0x5a5   : > { %6631 = vrcp.f32 %v5000_v0  ;;  %v5036_v2 = vmul.f32 1.0614054, %v9920_v4  ;;  %v5476_v28 = vmul.f32 %v6620_v25, %v5316_v61  ;;  %v5115_v37 = vmul.f32 %v9463_v15, %v5083_v30 }
 0x5a6   : > { %v5225_v31 = vadd.f32 -0.28449672, %v5193_v24  ;;  %v5095_v45 = vadd.f32 -1.4531521, %v5063_v7  ;;  %v9712_v35 = vmul.f32 %v5574_v29, %v9570_v59  ;;  %v5116_v58 = vmul.f32 %v9505_v14, %v5084_v36 }
 0x5a7   : > { %v5067_v16 = vadd.f32 -1.4531521, %v5035_v62  ;;  %v5068_v56 = vadd.f32 -1.4531521, %v5036_v2  ;;  %v5384_v10 = vmul.f32 %v5352_v57, %v4936_v40  ;;  %v5147_v13 = vadd.f32 1.4214138, %v5115_v37 }
 0x5a8   : > { %v9715_v20 = vpop.eup %6625  ;;  %v5257_v33 = vmul.f32 %v9662_v11, %v5225_v31  ;;  %v5127_v22 = vmul.f32 %v9699_v26, %v5095_v45  ;;  %v5148_v61 = vadd.f32 1.4214138, %v5116_v58  ;;  %v5508_v55 = vsub.f32 1.0, %v5476_v28 }
 0x5a9   : > { %v5066_v25 = vmul.f32 1.0614054, %v9715_v20  ;;  %v5099_v43 = vmul.f32 %v9919_v12, %v5067_v16  ;;  %v5100_v59 = vmul.f32 %v9920_v4, %v5068_v56  ;;  %v5179_v0 = vmul.f32 %v9463_v15, %v5147_v13 }
 0x5aa   : > { %v5289_v8 = vadd.f32 0.2548296, %v5257_v33  ;;  %v5159_v29 = vadd.f32 1.4214138, %v5127_v22  ;;  %v9723_v62 = vpop.eup %6627  ;;  %v5180_v7 = vmul.f32 %v9505_v14, %v5148_v61  ;;  %v5445_v2 = vmul.f32 1.442695, %v5384_v10 }
 0x5ab   : > { %v5098_v24 = vadd.f32 -1.4531521, %v5066_v25  ;;  %v5131_v30 = vadd.f32 1.4214138, %v5099_v43  ;;  %v5132_v40 = vadd.f32 1.4214138, %v5100_v59  ;;  %v5540_v56 = vmul.f32 %v5508_v55, %v9602_v6 }
 0x5ac   : > { %v5321_v57 = vmul.f32 %v9662_v11, %v5289_v8  ;;  %v5191_v36 = vmul.f32 %v9699_v26, %v5159_v29  ;;  %v5211_v31 = vadd.f32 -0.28449672, %v5179_v0  ;;  %v6630_v45 = vpop.eup %6629  ;;  %v5212_v37 = vadd.f32 -0.28449672, %v5180_v7 }
 0x5ad   : > { %v5130_v28 = vmul.f32 %v9715_v20, %v5098_v24  ;;  %v5163_v58 = vmul.f32 %v9919_v12, %v5131_v30  ;;  %v5164_v16 = vmul.f32 %v9920_v4, %v5132_v40  ;;  %v5624_v11 = vpack.c.bf16 %v9555_v1, %v9522_v46  ;;  %v9938_v46 = vld [vmem:[#allocation21_spill] sm:$0xff]  ;;  %v5720_v1 = vld [vmem:[%s6849_s23] sm:$0xff] }
 0x5ae   : > { %v5223_v33 = vadd.f32 -0.28449672, %v5191_v36  ;;  %v5243_v22 = vmul.f32 %v9463_v15, %v5211_v31  ;;  %v5244_v25 = vmul.f32 %v9505_v14, %v5212_v37  ;;  %v5481_v59 = vmul.f32 %v6624_v63, %v5321_v57 }
 0x5af   : > { %v9735_v13 = vpop.eup %6631  ;;  %v5162_v10 = vadd.f32 1.4214138, %v5130_v28  ;;  %v5195_v61 = vadd.f32 -0.28449672, %v5163_v58  ;;  %v5196_v43 = vadd.f32 -0.28449672, %v5164_v16  ;;  %6633 = vpow2.f32 %v5445_v2 }
 0x5b0   : > { %v5255_v8 = vmul.f32 %v9699_v26, %v5223_v33  ;;  %v5064_v29 = vmul.f32 1.0614054, %v9735_v13  ;;  %v5275_v0 = vadd.f32 0.2548296, %v5243_v22  ;;  %v5276_v55 = vadd.f32 0.2548296, %v5244_v25 }
 0x5b1   : > { %v5194_v6 = vmul.f32 %v9715_v20, %v5162_v10  ;;  %v5227_v24 = vmul.f32 %v9919_v12, %v5195_v61  ;;  %v5228_v7 = vmul.f32 %v9920_v4, %v5196_v43  ;;  %v5572_v30 = vadd.f32 1.0, %v5540_v56  ;;  %v9921_v2 = vld [vmem:[#allocation17_spill] sm:$0xff] }
 0x5b2   : > { %v5287_v40 = vadd.f32 0.2548296, %v5255_v8  ;;  %v5096_v36 = vadd.f32 -1.4531521, %v5064_v29  ;;  %v5307_v31 = vmul.f32 %v9463_v15, %v5275_v0  ;;  %v5308_v63 = vmul.f32 %v9505_v14, %v5276_v55 }
 0x5b3   : > { %v5226_v28 = vadd.f32 -0.28449672, %v5194_v6  ;;  %v5259_v57 = vadd.f32 0.2548296, %v5227_v24  ;;  %v5260_v37 = vadd.f32 0.2548296, %v5228_v7  ;;  %v9752_v15 = vmul.f32 %v5572_v30, %v9586_v19 }
 0x5b4   : > { %v5513_v58 = vsub.f32 1.0, %v5481_v59  ;;  %v5128_v16 = vmul.f32 %v9735_v13, %v5096_v36  ;;  %v5467_v33 = vmul.f32 %v9480_v53, %v5307_v31  ;;  %v5468_v10 = vmul.f32 %v9512_v44, %v5308_v63  ;;  %v9922_v53 = vld [vmem:[#allocation19_spill] sm:$0xff] }
 0x5b5   : > { %v5258_v22 = vmul.f32 %v9715_v20, %v5226_v28  ;;  %v5291_v56 = vmul.f32 %v9919_v12, %v5259_v57  ;;  %v5292_v25 = vmul.f32 %v9920_v4, %v5260_v37  ;;  %v5319_v14 = vmul.f32 %v9699_v26, %v5287_v40  ;;  %v9923_v28 = vld [vmem:[#allocation14_spill] sm:$0xff]  ;;  %v9924_v63 = vld [vmem:[#allocation15_spill] sm:$0xff] }
 0x5b6   : > { %v5160_v61 = vadd.f32 1.4214138, %v5128_v16  ;;  %v5499_v43 = vsub.f32 1.0, %v5467_v33  ;;  %v5500_v8 = vsub.f32 1.0, %v5468_v10  ;;  %v5545_v6 = vmul.f32 %v5513_v58, %v9634_v39  ;;  %v9925_v37 = vld [vmem:[#allocation30_spill] sm:$0xff]  ;;  %v9926_v10 = vld [vmem:[#allocation24_spill] sm:$0xff] }
 0x5b7   : > { %v5290_v59 = vadd.f32 0.2548296, %v5258_v22  ;;  %v5451_v29 = vmul.f32 %v9921_v2, %v5291_v56  ;;  %v5452_v0 = vmul.f32 %v9922_v53, %v5292_v25  ;;  %v5616_v19 = vpack.c.bf16 %v9302_v34, %v9290_v54  ;;  %v9927_v56 = vld [vmem:[#allocation25_spill] sm:$0xff]  ;;  %v9930_v2 = vld [vmem:[#allocation27_spill] sm:$0xff] }
 0x5b8   : > { %v5192_v44 = vmul.f32 %v9735_v13, %v5160_v61  ;;  %v5531_v12 = vmul.f32 %v5499_v43, %v9694_v60  ;;  %v5532_v26 = vmul.f32 %v5500_v8, %v9707_v47  ;;  %v5479_v7 = vmul.f32 %v9723_v62, %v5319_v14  ;;  %v9928_v61 = vld [vmem:[#allocation12_spill] sm:$0xff] }
 0x5b9   : > { %v5322_v4 = vmul.f32 %v9715_v20, %v5290_v59  ;;  %v5483_v55 = vsub.f32 1.0, %v5451_v29  ;;  %v5484_v24 = vsub.f32 1.0, %v5452_v0  ;;  %v5625_v39 = vpack.c.bf16 %v9673_v52, %v9631_v32  ;;  %v6634_v32 = vpop.eup %6633  ;;  %v9931_v29 = vld [vmem:[#allocation29_spill] sm:$0xff] }
 0x5ba   : > { %v5224_v30 = vadd.f32 -0.28449672, %v5192_v44  ;;  %v5563_v40 = vadd.f32 1.0, %v5531_v12  ;;  %v5564_v31 = vadd.f32 1.0, %v5532_v26  ;;  %v5577_v54 = vadd.f32 1.0, %v5545_v6  ;;  %v9933_v6 = vld [vmem:[#allocation28_spill] sm:$0xff] }
 0x5bb   : > { %v5482_v36 = vmul.f32 %v6630_v45, %v5322_v4  ;;  %v5515_v60 = vmul.f32 %v5483_v55, %v9923_v28  ;;  %v5516_v57 = vmul.f32 %v5484_v24, %v9924_v63  ;;  %v5617_v20 = vpack.c.bf16 %v9345_v38, %v9314_v42  ;;  %v9929_v42 = vld [vmem:[#allocation13_spill] sm:$0xff]  ;;  %v9934_v12 = vld [vmem:[#allocation32_spill] sm:$0xff]  ;;  %v5723_v63 = vld [vmem:[%s6849_s23 + $0x18] sm:$0xff] }
 0x5bc   : > { %v5256_v34 = vmul.f32 %v9735_v13, %v5224_v30  ;;  %v5595_v47 = vmul.f32 %v5563_v40, %v9403_v3  ;;  %v5596_v58 = vmul.f32 %v5564_v31, %v9925_v37  ;;  %v5511_v52 = vsub.f32 1.0, %v5479_v7  ;;  %v9935_v4 = vld [vmem:[#allocation20_spill] sm:$0xff]  ;;  %v9937_v55 = vld [vmem:[#allocation33_spill] sm:$0xff] }
 0x5bd   : > { %v5514_v62 = vsub.f32 1.0, %v5482_v36  ;;  %v5547_v16 = vadd.f32 1.0, %v5515_v60  ;;  %v5548_v33 = vadd.f32 1.0, %v5516_v57  ;;  %v5626_v22 = vpack.c.bf16 %v9652_v49, %v9619_v5 }
 0x5be   : > { %v5288_v45 = vadd.f32 0.2548296, %v5256_v34  ;;  %v5618_v25 = vpack.c.bf16 %v9927_v56, %v9926_v10  ;;  %v5623_v3 = vpack.c.bf16 %v5596_v58, %v5595_v47  ;;  %v5627_v8 = vpack.c.bf16 %v9752_v15, %v9689_v27  ;;  %v9936_v15 = vld [vmem:[#allocation31_spill] sm:$0xff] }
 0x5bf   : > { %v5546_v14 = vmul.f32 %v5514_v62, %v9686_v41  ;;  %v5579_v43 = vmul.f32 %v5547_v16, %v9928_v61  ;;  %v5580_v38 = vmul.f32 %v5548_v33, %v9929_v42  ;;  %v5619_v53 = vpack.c.bf16 %v9931_v29, %v9930_v2  ;;  %v9932_v41 = vld [vmem:[#allocation26_spill] sm:$0xff]  ;;  %v5724_v10 = vld [vmem:[%s6849_s23 + $0x20] sm:$0xff] }
 0x5c0   : > { %v5320_v59 = vmul.f32 %v9735_v13, %v5288_v45  ;;  %v5628_v5 = vpack.c.bf16 %v9712_v35, %v9681_v9  ;;  %6259 = vmatprep.subr.bf16.mxu1 %v5623_v3  ;;  %v5620_v44 = vpack.c.bf16 %v9933_v6, %v9932_v41  ;;  %v5621_v26 = vpack.c.bf16 %v9935_v4, %v9934_v12  ;;  %v5726_v3 = vld [vmem:[%s6849_s23 + $0x30] sm:$0xff] }
 0x5c1   : > { %v5578_v49 = vadd.f32 1.0, %v5546_v14  ;;  %v5615_v0 = vpack.c.bf16 %v5580_v38, %v5579_v43  ;;  %v5543_v13 = vmul.f32 %v5511_v52, %v9656_v51  ;;  %vm4872_vm0 = vcmp.ge.f32.partialorder %v9670_v17, 0.0  ;;  %v5727_v43 = vld [vmem:[%s6849_s23 + $0x38] sm:$0xff] }
 0x5c2   : > { %v5480_v27 = vmul.f32 %v6634_v32, %v5320_v59  ;;  %v5622_v24 = vpack.c.bf16 %v9937_v55, %v9936_v15  ;;  %v5609_v7 = vmul.f32 %v5577_v54, %v9593_v21  ;;  %v4904_v30 = vsel %vm4872_vm0, 1.0, %v9898_v23  ;;  %v6442_v23 = vld [vmem:[%s9835_s8 + $0x8] sm:$0xff]  }
 0x5c3   : > { %v5610_v9 = vmul.f32 %v5578_v49, %v9677_v50  ;;  %6260 = vmatpush3.bf16.xpose.msra.mxu1 %v5615_v0  ;;  %v5575_v51 = vadd.f32 1.0, %v5543_v13  ;;  %v4807_v17 = vmul.f32 0.5, %v9616_v48  ;;  %v4808_v31 = vmul.f32 0.5, %v9666_v18  ;;  %v5721_v48 = vld [vmem:[%s6849_s23 + $0x8] sm:$0xff] }
 0x5c4   : > { %v5512_v35 = vsub.f32 1.0, %v5480_v27  ;;  %6261 = vmatprep.subr.bf16.mxu1 %v5624_v11  ;;  %v5729_v54 = vmul.f32 2.0, %v5721_v48  ;;  %v5731_v58 = vmul.f32 2.0, %v5723_v63  ;;  %v5732_v61 = vmul.f32 2.0, %v5724_v10 }
 0x5c5   : > { %v5630_v40 = vpack.c.bf16 %v5610_v9, %v5609_v7  ;;  %v5607_v60 = vmul.f32 %v5575_v51, %v4807_v17  ;;  %v5734_v2 = vmul.f32 2.0, %v5726_v3  ;;  %v5735_v49 = vmul.f32 2.0, %v5727_v43 }
 0x5c6   : > { %v5544_v36 = vmul.f32 %v5512_v35, %v4904_v30 }
 0x5c8   : > { %v5576_v28 = vadd.f32 1.0, %v5544_v36 }
 0x5ca   : > { %v5608_v21 = vmul.f32 %v5576_v28, %v4808_v31 }
 0x5cb   : > { %6262 = vmatpush3.bf16.xpose.msra.mxu1 %v5616_v19  ;;  %v5722_v19 = vld [vmem:[%s6849_s23 + $0x10] sm:$0xff] }
 0x5cc   : > { %6263 = vmatprep.subr.bf16.mxu1 %v5625_v39  ;;  %v5629_v50 = vpack.c.bf16 %v5608_v21, %v5607_v60  ;;  %v5728_v39 = vmul.f32 2.0, %v5720_v1 }
 0x5d3   : > { %6264 = vmatpush3.bf16.xpose.msra.mxu1 %v5617_v20  ;;  %v5730_v20 = vmul.f32 2.0, %v5722_v19 }
 0x5d4   : > { %6265 = vmatprep.subr.bf16.mxu1 %v5626_v22 }
 0x5db   : > { %6266 = vmatpush3.bf16.xpose.msra.mxu1 %v5618_v25  ;;  %v5725_v25 = vld [vmem:[%s6849_s23 + $0x28] sm:$0xff] }
 0x5dc   : > { %6267 = vmatprep.subr.bf16.mxu1 %v5627_v8  ;;  %v5733_v38 = vmul.f32 2.0, %v5725_v25 }
 0x5e3   : > { %6268 = vmatpush3.bf16.xpose.msra.mxu1 %v5619_v53 }
 0x5e4   : > { %6269 = vmatprep.subr.bf16.mxu1 %v5628_v5 }
 0x5eb   : > { %6270 = vmatpush3.bf16.xpose.msra.mxu1 %v5620_v44 }
 0x5ec   : > { %6271 = vmatprep.subr.bf16.mxu1 %v5629_v50 }
 0x5f3   : > { %6272 = vmatpush3.bf16.xpose.msra.mxu1 %v5621_v26 }
 0x5f4   : > { %6273 = vmatprep.subr.bf16.mxu1 %v5630_v40 }
 0x5fb   : > { %6274 = vmatpush3.bf16.xpose.msra.mxu1 %v5622_v24 }
 0x602   : > { %6276 = vmatmul.mubr.bf16.vlgmr.msra.gmra.mrb[0].mxu1 %v9938_v46 }
 0x603   : > { %6277 = vmatprep.mubr.bf16.mxu1 %v6442_v23 }
 0x607   : > { %v5643_v18 = vpop.permute.xlu1 %5642 }
 0x608   : > { %v5638_v11 = vpop.permute.xlu0 %5637 }
 0x60a   : > { %6278 = vmatmul.mubr.bf16.gmra.mrb[4].mxu1 %v6442_v23 }
 0x60b   : > { %v5648_v52 = vpop.permute.xlu1 %5647 }
 0x60f   : > { %v5653_v29 = vpop.permute.xlu1 %5652 }
 0x6d5   : > { %v5701_v57 = vpop.f32.mrb[0].mxu1 }
 0x6d6   : > { %v5702_v34 = vadd.f32 %v5701_v57, %v5638_v11  ;;  %v5703_v47 = vpop.f32.mrb[1].mxu1 }
 0x6d7   : > { %v5704_v62 = vadd.f32 %v5703_v47, %v5638_v11  ;;  %v5705_v37 = vpop.f32.mrb[2].mxu1 }
 0x6d8   : > { %v5736_v16 = vadd.f32 %v5728_v39, %v5702_v34  ;;  %v5706_v33 = vadd.f32 %v5705_v37, %v5643_v18  ;;  %v5707_v32 = vpop.f32.mrb[3].mxu1 }
 0x6d9   : > { %v5737_v45 = vadd.f32 %v5729_v54, %v5704_v62  ;;  %v5708_v22 = vadd.f32 %v5707_v32, %v5643_v18 }
 0x6da   : > { %5744 = vst [vmem:[%s6854_s26] sm:$0xff] %v5736_v16  ;;  %v5738_v56 = vadd.f32 %v5730_v20, %v5706_v33 }
 0x6db   : > { %5745 = vst [vmem:[%s6854_s26 + $0x8] sm:$0xff] %v5737_v45  ;;  %v5739_v14 = vadd.f32 %v5731_v58, %v5708_v22 }
 0x6dc   : > { %5746 = vst [vmem:[%s6854_s26 + $0x10] sm:$0xff] %v5738_v56 }
 0x6dd   : > { %5747 = vst [vmem:[%s6854_s26 + $0x18] sm:$0xff] %v5739_v14  ;;  %v5711_v42 = vpop.f32.mrb[4].mxu1 }
 0x6de   : > { %v5712_v59 = vadd.f32 %v5711_v42, %v5648_v52  ;;  %v5713_v8 = vpop.f32.mrb[5].mxu1 }
 0x6df   : > { %v5714_v53 = vadd.f32 %v5713_v8, %v5648_v52  ;;  %v5715_v5 = vpop.f32.mrb[6].mxu1 }
 0x6e0   : > { %v5740_v0 = vadd.f32 %v5732_v61, %v5712_v59  ;;  %v5716_v41 = vadd.f32 %v5715_v5, %v5653_v29  ;;  %v5717_v6 = vpop.f32.mrb[7].mxu1 }
 0x6e1   : > { %v5741_v44 = vadd.f32 %v5733_v38, %v5714_v53  ;;  %v5718_v12 = vadd.f32 %v5717_v6, %v5653_v29 }
 0x6e2   : > { %5748 = vst [vmem:[%s6854_s26 + $0x20] sm:$0xff] %v5740_v0  ;;  %v5742_v4 = vadd.f32 %v5734_v2, %v5716_v41 }
 0x6e3   : > { %5749 = vst [vmem:[%s6854_s26 + $0x28] sm:$0xff] %v5741_v44  ;;  %v5743_v26 = vadd.f32 %v5735_v49, %v5718_v12 }
 0x6e4   : > { %5750 = vst [vmem:[%s6854_s26 + $0x30] sm:$0xff] %v5742_v4 }
 0x6e5   : > { %5751 = vst [vmem:[%s6854_s26 + $0x38] sm:$0xff] %v5743_v26 }
 0x6e6 PF: > { %s20_s13 = sadd.s32 1, %s6646_s13  }
 0x6e7   : > { %p17_p5 = scmp.ge.s32.totalorder %s20_s13, 4  }
 0x6e9   :  { %19 = sbr.rel (!%p17_p5) target bundleno = 1 (0x1), region = 115 }

</bundles_post_ra>
